<compile_context>
chip_gen: v5e
topology: v5e:2x2
jax: 0.10.0
libtpu: 0.0.40
codegen_flags: <defaults>
</compile_context>

<pallas_src>
import numpy as np
import jax
import jax.numpy as jnp
from jax import lax
from jax.experimental import pallas as pl
from jax.experimental.pallas import tpu as pltpu

# ---- model hyper-parameters (Res2Net_weight defaults, scale=1) ----
EPSILON = 0.2
HIDDEN_PLANES = 16
BATCH_SIZE = 5                       # folded into channel groups in the torch module
INPLANES = 3
CIN = INPLANES * BATCH_SIZE          # 15
CW = HIDDEN_PLANES * BATCH_SIZE      # 80  (width * scale, scale=1)
COUT = CIN                           # planes * batch_size = 15
K = 3
DIL = 2
PAD = (K - 1) // 2 * DIL             # 2
BN_EPS = 1e-5

H = W = 16                           # small spatial test size
HW = H * W                           # 256

CIN_IN = 16                          # block-1 input channels padded 15 -> 16
CWP = 128                            # lane-dense padded hidden width (80 -> 128)
COUT_PAD = 128                       # lane-dense padded output width (15 -> 128)
NTAP = 3                             # dx taps stacked side-by-side in the conv2 scratch
BUFW = NTAP * CWP                    # 384 scratch columns (3 x 128 lane-dense blocks)

ROW0 = 40                            # top halo rows (multiple of 8, >= 2*W + DIL = 34)
BUF_ROWS = 336                       # ROW0 + HW + 40 bottom halo rows
ZROWS = 48                           # halo rows zeroed once at kernel start (top & bottom)

# halo / alignment invariants for the flat conv2 scratch (re-derive if H/W change)
assert (W & (W - 1)) == 0            # kernel uses `& (W-1)` for the column index
assert ROW0 % 8 == 0 and ROW0 >= 2 * W
assert ZROWS % 8 == 0 and ZROWS >= ROW0 + DIL
assert (BUF_ROWS - ZROWS) % 8 == 0 and BUF_ROWS - ZROWS <= ROW0 - DIL + HW
assert BUF_ROWS >= ROW0 + 2 * W + HW


# ----------------------------- Pallas kernel --------------------------------
def _bottle2neck(x_in, w1, w3, blk, w2_ref, bn_ref, bn_base, buf_ref, keep_m2, keep_p2):
    """One Bottle2neck block on channels-last, spatially-flattened (HW, 128) activations."""

    def bn_row(r):                                   # (1, 128) scale/shift row
        return bn_ref[pl.ds(bn_base + r, 1), :]

    # conv1 (1x1 grouped -> block-diagonal dense matmul) + bn1 + relu, lane-dense
    h1 = jnp.dot(x_in, w1, preferred_element_type=jnp.float32)
    h1 = jnp.maximum(h1 * bn_row(0) + bn_row(1), 0.0)

    # Three shifted copies of h1, one per horizontal tap offset dx in (-DIL, 0, +DIL):
    # the copy for dx lives in its own 128-wide column block at row offset ROW0 - dx, so
    # every conv2 tap read below is a single sublane-aligned (HW, 384) slice.  Horizontal
    # zero padding is baked in by masking the +-DIL copies at store time; vertical zero
    # padding comes from the halo rows zeroed once per call.
    buf_ref[pl.ds(ROW0 + DIL, HW), pl.ds(0 * CWP, CWP)] = jnp.where(keep_m2, h1, 0.0)
    buf_ref[pl.ds(ROW0, HW), pl.ds(1 * CWP, CWP)] = h1
    buf_ref[pl.ds(ROW0 - DIL, HW), pl.ds(2 * CWP, CWP)] = jnp.where(keep_p2, h1, 0.0)

    # dilated 3x3 grouped conv as 3 aligned, K-stacked matmuls (one per vertical offset)
    acc = None
    for d, dy in enumerate((-DIL, 0, DIL)):
        tap = buf_ref[pl.ds(ROW0 + dy * W, HW), :]                 # (HW, 384), aligned
        contrib = jnp.dot(tap, w2_ref[blk * K + d], preferred_element_type=jnp.float32)
        acc = contrib if acc is None else acc + contrib

    # bn2 + relu (conv2 bias pre-folded into the bn2 shift on the host)
    h2 = jnp.maximum(acc * bn_row(2) + bn_row(3), 0.0)

    # conv3 (1x1 grouped) + bn3 (epsilon folded in); lanes >= 15 stay exactly zero
    out = jnp.dot(h2, w3, preferred_element_type=jnp.float32)
    return out * bn_row(4) + bn_row(5)


def res2net_kernel(x_ref, w1b1_ref, wm_ref, w2_ref, bn_ref, o_ref, buf_ref):
    # zero only the halo rows, once; the interiors are fully overwritten by every block.
    buf_ref[pl.ds(0, ZROWS), :] = jnp.zeros((ZROWS, BUFW), jnp.float32)
    buf_ref[pl.ds(BUF_ROWS - ZROWS, ZROWS), :] = jnp.zeros((ZROWS, BUFW), jnp.float32)

    # horizontal-edge keep masks as a function of a copy's own row index (built once,
    # in-kernel, instead of two extra DMA'd operands)
    xcol = lax.broadcasted_iota(jnp.int32, (HW, CWP), 0) & (W - 1)
    keep_m2 = xcol < (W - DIL)        # applied to the dx = -DIL copy
    keep_p2 = xcol >= DIL             # applied to the dx = +DIL copy

    y1 = _bottle2neck(x_ref[...], w1b1_ref[...], wm_ref[0], 0,
                      w2_ref, bn_ref, 0, buf_ref, keep_m2, keep_p2)
    y2 = _bottle2neck(y1, wm_ref[1], wm_ref[2], 1,
                      w2_ref, bn_ref, 8, buf_ref, keep_m2, keep_p2)
    o_ref[...] = y2


def res2net_weight_pallas(x_nchw, kp):
    # NCHW -> channels-last flattened, padded 15 -> 16 channels (cheap XLA glue)
    x_flat = jnp.transpose(x_nchw[0], (1, 2, 0)).reshape(HW, CIN)
    x_in = jnp.zeros((HW, CIN_IN), jnp.float32).at[:, :CIN].set(x_flat)

    args = (x_in, kp['w1b1'], kp['wm'], kp['w2s'], kp['bn'])

    flops = (2 * HW * CIN_IN * CWP            # block-1 conv1
             + 2 * HW * CWP * CWP             # block-2 conv1
             + 2 * 2 * HW * K * BUFW * CWP    # conv2, both blocks (3 K-stacked matmuls)
             + 2 * 2 * HW * CWP * COUT_PAD)   # conv3, both blocks
    bytes_accessed = sum(int(np.prod(a.shape)) * a.dtype.itemsize for a in args) \
        + HW * COUT_PAD * 4

    vmem = pl.BlockSpec(memory_space=pltpu.MemorySpace.VMEM)
    y = pl.pallas_call(
        res2net_kernel,
        out_shape=jax.ShapeDtypeStruct((HW, COUT_PAD), jnp.float32),
        in_specs=[vmem] * len(args),
        out_specs=vmem,
        scratch_shapes=[pltpu.VMEM((BUF_ROWS, BUFW), jnp.float32)],
        cost_estimate=pl.CostEstimate(flops=flops, transcendentals=0,
                                      bytes_accessed=bytes_accessed),
    )(*args)

    return jnp.transpose(y[:, :COUT].reshape(H, W, COUT), (2, 0, 1))[None]


res2net_weight_pallas_jit = jax.jit(res2net_weight_pallas)


# ------------------------ parameter initialization --------------------------
def init_bn(key, c):
    k1, k2, k3, k4 = jax.random.split(key, 4)
    return dict(
        gamma=1.0 + 0.1 * jax.random.normal(k1, (c,), jnp.float32),
        beta=0.1 * jax.random.normal(k2, (c,), jnp.float32),
        mean=0.1 * jax.random.normal(k3, (c,), jnp.float32),
        var=jax.random.uniform(k4, (c,), jnp.float32, 0.5, 1.5),
    )


def init_block(key):
    k = jax.random.split(key, 7)
    return dict(
        w1=0.3 * jax.random.normal(k[0], (CW, INPLANES, 1, 1), jnp.float32),
        bn1=init_bn(k[1], CW),
        w2=0.1 * jax.random.normal(k[2], (CW, HIDDEN_PLANES, K, K), jnp.float32),
        b2=0.1 * jax.random.normal(k[3], (CW,), jnp.float32),
        bn2=init_bn(k[4], CW),
        w3=0.3 * jax.random.normal(k[5], (COUT, HIDDEN_PLANES, 1, 1), jnp.float32),
        bn3=init_bn(k[6], COUT),
    )


def to_kernel_params(p1, p2, epsilon):
    """Torch-layout grouped-conv / BN params -> packed, lane-dense kernel tensors (host)."""
    G = BATCH_SIZE

    def bn_fold(bn):
        scale = np.asarray(bn['gamma']) / np.sqrt(np.asarray(bn['var']) + BN_EPS)
        shift = np.asarray(bn['beta']) - np.asarray(bn['mean']) * scale
        return scale.astype(np.float32), shift.astype(np.float32)

    def dense_1x1(w, rows_pad, cols_pad):
        # (Cout, Cin_g, 1, 1) grouped -> zero-padded dense block-diagonal (rows_pad, cols_pad)
        w = np.asarray(w)
        cout, cin_g = w.shape[0], w.shape[1]
        co_g = cout // G
        d = np.zeros((rows_pad, cols_pad), np.float32)
        for g in range(G):
            d[g * cin_g:(g + 1) * cin_g, g * co_g:(g + 1) * co_g] = \
                w[g * co_g:(g + 1) * co_g, :, 0, 0].T
        return d

    def dense_w2_stack(w):
        # (Cout, Cin_g, K, K) grouped -> (K, 384, 128): for each vertical offset ky, the
        # three horizontal taps stacked along K (one per 128-wide scratch column block),
        # each block-diagonal and zero-padded to lane-dense widths.
        w = np.asarray(w)
        cout, cin_g = w.shape[0], w.shape[1]
        co_g = cout // G
        st = np.zeros((K, BUFW, CWP), np.float32)
        for ky in range(K):                    # dy = (ky - 1) * DIL
            for kx in range(K):                # dx = (kx - 1) * DIL -> column block kx
                base = kx * CWP
                for g in range(G):
                    st[ky, base + g * cin_g: base + (g + 1) * cin_g,
                       g * co_g:(g + 1) * co_g] = w[g * co_g:(g + 1) * co_g, :, ky, kx].T
        return st

    def bn_rows(p):
        s1, t1 = bn_fold(p['bn1'])
        s2, t2 = bn_fold(p['bn2'])
        s3, t3 = bn_fold(p['bn3'])
        # fold conv2 bias into bn2 shift: (acc + b2)*s2 + t2 = acc*s2 + (b2*s2 + t2)
        t2 = np.asarray(p['b2']) * s2 + t2
        rows = np.zeros((8, CWP), np.float32)
        rows[0, :CW] = s1
        rows[1, :CW] = t1
        rows[2, :CW] = s2
        rows[3, :CW] = t2
        rows[4, :COUT] = epsilon * s3          # fold "* epsilon" into bn3 affine
        rows[5, :COUT] = epsilon * t3
        return rows

    w1b1 = dense_1x1(p1['w1'], CIN_IN, CWP)    # (16, 128)
    w1b2 = dense_1x1(p2['w1'], CWP, CWP)       # (128, 128), rows >= 15 zero
    w3b1 = dense_1x1(p1['w3'], CWP, COUT_PAD)  # (128, 128), cols >= 15 zero
    w3b2 = dense_1x1(p2['w3'], CWP, COUT_PAD)

    return dict(
        w1b1=jnp.asarray(w1b1),
        wm=jnp.asarray(np.stack([w3b1, w1b2, w3b2])),                       # (3, 128, 128)
        w2s=jnp.asarray(np.concatenate([dense_w2_stack(p1['w2']),
                                        dense_w2_stack(p2['w2'])], 0)),     # (6, 384, 128)
        bn=jnp.asarray(np.concatenate([bn_rows(p1), bn_rows(p2)], 0)))      # (16, 128)


# ------------------------------ JAX reference --------------------------------
def conv_nchw(x, w, stride=1, padding=0, dilation=1, groups=1, bias=None):
    y = lax.conv_general_dilated(
        x, w, window_strides=(stride, stride),
        padding=[(padding, padding), (padding, padding)],
        rhs_dilation=(dilation, dilation),
        dimension_numbers=('NCHW', 'OIHW', 'NCHW'),
        feature_group_count=groups,
        precision=lax.Precision.HIGHEST)
    if bias is not None:
        y = y + bias[None, :, None, None]
    return y


def bn_nchw(x, bn):
    scale = bn['gamma'] / jnp.sqrt(bn['var'] + BN_EPS)
    shift = bn['beta'] - bn['mean'] * scale
    return x * scale[None, :, None, None] + shift[None, :, None, None]


def ref_block(x, p, epsilon):
    y = jnp.maximum(bn_nchw(conv_nchw(x, p['w1'], groups=BATCH_SIZE), p['bn1']), 0.0)
    # scale == 1: the torch view/transpose/flatten reshuffle is the identity
    y = jnp.maximum(bn_nchw(conv_nchw(y, p['w2'], padding=PAD, dilation=DIL,
                                      groups=BATCH_SIZE, bias=p['b2']), p['bn2']), 0.0)
    y = bn_nchw(conv_nchw(y, p['w3'], groups=BATCH_SIZE), p['bn3'])
    return y * epsilon


def ref_forward(x, p1, p2, epsilon):
    return ref_block(ref_block(x, p1, epsilon), p2, epsilon)


# ---------------------------------- main -------------------------------------
if __name__ == "__main__":
    key = jax.random.PRNGKey(0)
    kx, k1, k2 = jax.random.split(key, 3)
    x = jax.random.normal(kx, (1, CIN, H, W), jnp.float32)   # NCHW, N=1, C=15

    p1 = init_block(k1)
    p2 = init_block(k2)
    kp = to_kernel_params(p1, p2, EPSILON)

    out = res2net_weight_pallas_jit(x, kp)
    out = jax.block_until_ready(out)

    ref = ref_forward(x, p1, p2, EPSILON)
    np.testing.assert_allclose(np.asarray(out), np.asarray(ref), rtol=2e-3, atol=2e-3)

    print("KERNEL_OK")
</pallas_src>

<mosaic_0001>
module attributes {stable_mosaic.version = 11 : i64} {
  func.func @res2net_kernel(%arg0: memref<256x16xf32, #tpu.memory_space<vmem>>, %arg1: memref<16x128xf32, #tpu.memory_space<vmem>>, %arg2: memref<3x128x128xf32, #tpu.memory_space<vmem>>, %arg3: memref<6x384x128xf32, #tpu.memory_space<vmem>>, %arg4: memref<16x128xf32, #tpu.memory_space<vmem>>, %arg5: memref<256x128xf32, #tpu.memory_space<vmem>>, %arg6: memref<336x384xf32, #tpu.memory_space<vmem>>) attributes {dimension_semantics = [], scalar_prefetch = 0 : i64, scratch_operands = 1 : i64, tpu.core_type = #tpu.core_type<tc>} {
    %cst = arith.constant 0.000000e+00 : f32
    %0 = vector.broadcast %cst : f32 to vector<48x384xf32>
    %c0 = arith.constant 0 : index
    %c0_0 = arith.constant 0 : index
    %1 = vector.load %arg6[%c0, %c0_0] : memref<336x384xf32, #tpu.memory_space<vmem>>, vector<48x384xf32>
    tpu.vector_store %arg6[%c0, %c0_0], %0 {strides = array<i32>} : memref<336x384xf32, #tpu.memory_space<vmem>>, vector<48x384xf32>,
    %cst_1 = arith.constant 0.000000e+00 : f32
    %2 = vector.broadcast %cst_1 : f32 to vector<48x384xf32>
    %c288 = arith.constant 288 : index
    %c0_2 = arith.constant 0 : index
    %3 = vector.load %arg6[%c288, %c0_2] : memref<336x384xf32, #tpu.memory_space<vmem>>, vector<48x384xf32>
    tpu.vector_store %arg6[%c288, %c0_2], %2 {strides = array<i32>} : memref<336x384xf32, #tpu.memory_space<vmem>>, vector<48x384xf32>,
    %4 = tpu.iota {dimensions = array<i32: 0>} : vector<256x128xi32>
    %c15_i32 = arith.constant 15 : i32
    %5 = vector.broadcast %c15_i32 : i32 to vector<256x128xi32>
    %6 = arith.andi %4, %5 : vector<256x128xi32>
    %c14_i32 = arith.constant 14 : i32
    %7 = vector.broadcast %c14_i32 : i32 to vector<256x128xi32>
    %8 = arith.cmpi slt, %6, %7 : vector<256x128xi32>
    %c2_i32 = arith.constant 2 : i32
    %9 = vector.broadcast %c2_i32 : i32 to vector<256x128xi32>
    %10 = arith.cmpi sge, %6, %9 : vector<256x128xi32>
    %c0_3 = arith.constant 0 : index
    %c0_4 = arith.constant 0 : index
    %11 = vector.load %arg0[%c0_3, %c0_4] : memref<256x16xf32, #tpu.memory_space<vmem>>, vector<256x16xf32>
    %c0_5 = arith.constant 0 : index
    %c0_6 = arith.constant 0 : index
    %12 = vector.load %arg1[%c0_5, %c0_6] : memref<16x128xf32, #tpu.memory_space<vmem>>, vector<16x128xf32>
    %c0_7 = arith.constant 0 : index
    %c0_8 = arith.constant 0 : index
    %c0_9 = arith.constant 0 : index
    %13 = vector.load %arg2[%c0_7, %c0_8, %c0_9] : memref<3x128x128xf32, #tpu.memory_space<vmem>>, vector<1x128x128xf32>
    %14 = vector.shape_cast %13 : vector<1x128x128xf32> to vector<128x128xf32>
    %cst_10 = arith.constant dense<0.000000e+00> : vector<256x128xf32>
    %15 = tpu.matmul %11, %12, %cst_10 {dimension_numbers = #tpu.dot_dimension_numbers<[1], [0], [0], [1], [0, 0, 1, 1], [], []>} : vector<256x16xf32>, vector<16x128xf32>, vector<256x128xf32> -> vector<256x128xf32>
    %c0_11 = arith.constant 0 : index
    %c0_12 = arith.constant 0 : index
    %16 = vector.load %arg4[%c0_11, %c0_12] : memref<16x128xf32, #tpu.memory_space<vmem>>, vector<1x128xf32>
    %17 = vector.broadcast %16 : vector<1x128xf32> to vector<256x128xf32>
    %18 = arith.mulf %15, %17 : vector<256x128xf32>
    %c1 = arith.constant 1 : index
    %c0_13 = arith.constant 0 : index
    %19 = vector.load %arg4[%c1, %c0_13] : memref<16x128xf32, #tpu.memory_space<vmem>>, vector<1x128xf32>
    %20 = vector.broadcast %19 : vector<1x128xf32> to vector<256x128xf32>
    %21 = arith.addf %18, %20 : vector<256x128xf32>
    %cst_14 = arith.constant 0.000000e+00 : f32
    %22 = vector.broadcast %cst_14 : f32 to vector<256x128xf32>
    %23 = arith.maximumf %21, %22 : vector<256x128xf32>
    %cst_15 = arith.constant 0.000000e+00 : f32
    %24 = vector.broadcast %cst_15 : f32 to vector<256x128xf32>
    %25 = arith.select %8, %23, %24 : vector<256x128xi1>, vector<256x128xf32>
    %c42 = arith.constant 42 : index
    %c0_16 = arith.constant 0 : index
    %26 = vector.load %arg6[%c42, %c0_16] : memref<336x384xf32, #tpu.memory_space<vmem>>, vector<256x128xf32>
    tpu.vector_store %arg6[%c42, %c0_16], %25 {strides = array<i32>} : memref<336x384xf32, #tpu.memory_space<vmem>>, vector<256x128xf32>,
    %c40 = arith.constant 40 : index
    %c128 = arith.constant 128 : index
    %27 = vector.load %arg6[%c40, %c128] : memref<336x384xf32, #tpu.memory_space<vmem>>, vector<256x128xf32>
    tpu.vector_store %arg6[%c40, %c128], %23 {strides = array<i32>} : memref<336x384xf32, #tpu.memory_space<vmem>>, vector<256x128xf32>,
    %cst_17 = arith.constant 0.000000e+00 : f32
    %28 = vector.broadcast %cst_17 : f32 to vector<256x128xf32>
    %29 = arith.select %10, %23, %28 : vector<256x128xi1>, vector<256x128xf32>
    %c38 = arith.constant 38 : index
    %c256 = arith.constant 256 : index
    %30 = vector.load %arg6[%c38, %c256] : memref<336x384xf32, #tpu.memory_space<vmem>>, vector<256x128xf32>
    tpu.vector_store %arg6[%c38, %c256], %29 {strides = array<i32>} : memref<336x384xf32, #tpu.memory_space<vmem>>, vector<256x128xf32>,
    %c8 = arith.constant 8 : index
    %c0_18 = arith.constant 0 : index
    %31 = vector.load %arg6[%c8, %c0_18] : memref<336x384xf32, #tpu.memory_space<vmem>>, vector<256x384xf32>
    %c0_19 = arith.constant 0 : index
    %c0_20 = arith.constant 0 : index
    %c0_21 = arith.constant 0 : index
    %32 = vector.load %arg3[%c0_19, %c0_20, %c0_21] : memref<6x384x128xf32, #tpu.memory_space<vmem>>, vector<1x384x128xf32>
    %33 = vector.shape_cast %32 : vector<1x384x128xf32> to vector<384x128xf32>
    %cst_22 = arith.constant dense<0.000000e+00> : vector<256x128xf32>
    %34 = tpu.matmul %31, %33, %cst_22 {dimension_numbers = #tpu.dot_dimension_numbers<[1], [0], [0], [1], [0, 0, 1, 1], [], []>} : vector<256x384xf32>, vector<384x128xf32>, vector<256x128xf32> -> vector<256x128xf32>
    %c40_23 = arith.constant 40 : index
    %c0_24 = arith.constant 0 : index
    %35 = vector.load %arg6[%c40_23, %c0_24] : memref<336x384xf32, #tpu.memory_space<vmem>>, vector<256x384xf32>
    %c1_25 = arith.constant 1 : index
    %c0_26 = arith.constant 0 : index
    %c0_27 = arith.constant 0 : index
    %36 = vector.load %arg3[%c1_25, %c0_26, %c0_27] : memref<6x384x128xf32, #tpu.memory_space<vmem>>, vector<1x384x128xf32>
    %37 = vector.shape_cast %36 : vector<1x384x128xf32> to vector<384x128xf32>
    %cst_28 = arith.constant dense<0.000000e+00> : vector<256x128xf32>
    %38 = tpu.matmul %35, %37, %cst_28 {dimension_numbers = #tpu.dot_dimension_numbers<[1], [0], [0], [1], [0, 0, 1, 1], [], []>} : vector<256x384xf32>, vector<384x128xf32>, vector<256x128xf32> -> vector<256x128xf32>
    %39 = arith.addf %34, %38 : vector<256x128xf32>
    %c72 = arith.constant 72 : index
    %c0_29 = arith.constant 0 : index
    %40 = vector.load %arg6[%c72, %c0_29] : memref<336x384xf32, #tpu.memory_space<vmem>>, vector<256x384xf32>
    %c2 = arith.constant 2 : index
    %c0_30 = arith.constant 0 : index
    %c0_31 = arith.constant 0 : index
    %41 = vector.load %arg3[%c2, %c0_30, %c0_31] : memref<6x384x128xf32, #tpu.memory_space<vmem>>, vector<1x384x128xf32>
    %42 = vector.shape_cast %41 : vector<1x384x128xf32> to vector<384x128xf32>
    %cst_32 = arith.constant dense<0.000000e+00> : vector<256x128xf32>
    %43 = tpu.matmul %40, %42, %cst_32 {dimension_numbers = #tpu.dot_dimension_numbers<[1], [0], [0], [1], [0, 0, 1, 1], [], []>} : vector<256x384xf32>, vector<384x128xf32>, vector<256x128xf32> -> vector<256x128xf32>
    %44 = arith.addf %39, %43 : vector<256x128xf32>
    %c2_33 = arith.constant 2 : index
    %c0_34 = arith.constant 0 : index
    %45 = vector.load %arg4[%c2_33, %c0_34] : memref<16x128xf32, #tpu.memory_space<vmem>>, vector<1x128xf32>
    %46 = vector.broadcast %45 : vector<1x128xf32> to vector<256x128xf32>
    %47 = arith.mulf %44, %46 : vector<256x128xf32>
    %c3 = arith.constant 3 : index
    %c0_35 = arith.constant 0 : index
    %48 = vector.load %arg4[%c3, %c0_35] : memref<16x128xf32, #tpu.memory_space<vmem>>, vector<1x128xf32>
    %49 = vector.broadcast %48 : vector<1x128xf32> to vector<256x128xf32>
    %50 = arith.addf %47, %49 : vector<256x128xf32>
    %cst_36 = arith.constant 0.000000e+00 : f32
    %51 = vector.broadcast %cst_36 : f32 to vector<256x128xf32>
    %52 = arith.maximumf %50, %51 : vector<256x128xf32>
    %cst_37 = arith.constant dense<0.000000e+00> : vector<256x128xf32>
    %53 = tpu.matmul %52, %14, %cst_37 {dimension_numbers = #tpu.dot_dimension_numbers<[1], [0], [0], [1], [0, 0, 1, 1], [], []>} : vector<256x128xf32>, vector<128x128xf32>, vector<256x128xf32> -> vector<256x128xf32>
    %c4 = arith.constant 4 : index
    %c0_38 = arith.constant 0 : index
    %54 = vector.load %arg4[%c4, %c0_38] : memref<16x128xf32, #tpu.memory_space<vmem>>, vector<1x128xf32>
    %55 = vector.broadcast %54 : vector<1x128xf32> to vector<256x128xf32>
    %56 = arith.mulf %53, %55 : vector<256x128xf32>
    %c5 = arith.constant 5 : index
    %c0_39 = arith.constant 0 : index
    %57 = vector.load %arg4[%c5, %c0_39] : memref<16x128xf32, #tpu.memory_space<vmem>>, vector<1x128xf32>
    %58 = vector.broadcast %57 : vector<1x128xf32> to vector<256x128xf32>
    %59 = arith.addf %56, %58 : vector<256x128xf32>
    %c1_40 = arith.constant 1 : index
    %c0_41 = arith.constant 0 : index
    %c0_42 = arith.constant 0 : index
    %60 = vector.load %arg2[%c1_40, %c0_41, %c0_42] : memref<3x128x128xf32, #tpu.memory_space<vmem>>, vector<1x128x128xf32>
    %61 = vector.shape_cast %60 : vector<1x128x128xf32> to vector<128x128xf32>
    %c2_43 = arith.constant 2 : index
    %c0_44 = arith.constant 0 : index
    %c0_45 = arith.constant 0 : index
    %62 = vector.load %arg2[%c2_43, %c0_44, %c0_45] : memref<3x128x128xf32, #tpu.memory_space<vmem>>, vector<1x128x128xf32>
    %63 = vector.shape_cast %62 : vector<1x128x128xf32> to vector<128x128xf32>
    %cst_46 = arith.constant dense<0.000000e+00> : vector<256x128xf32>
    %64 = tpu.matmul %59, %61, %cst_46 {dimension_numbers = #tpu.dot_dimension_numbers<[1], [0], [0], [1], [0, 0, 1, 1], [], []>} : vector<256x128xf32>, vector<128x128xf32>, vector<256x128xf32> -> vector<256x128xf32>
    %c8_47 = arith.constant 8 : index
    %c0_48 = arith.constant 0 : index
    %65 = vector.load %arg4[%c8_47, %c0_48] : memref<16x128xf32, #tpu.memory_space<vmem>>, vector<1x128xf32>
    %66 = vector.broadcast %65 : vector<1x128xf32> to vector<256x128xf32>
    %67 = arith.mulf %64, %66 : vector<256x128xf32>
    %c9 = arith.constant 9 : index
    %c0_49 = arith.constant 0 : index
    %68 = vector.load %arg4[%c9, %c0_49] : memref<16x128xf32, #tpu.memory_space<vmem>>, vector<1x128xf32>
    %69 = vector.broadcast %68 : vector<1x128xf32> to vector<256x128xf32>
    %70 = arith.addf %67, %69 : vector<256x128xf32>
    %cst_50 = arith.constant 0.000000e+00 : f32
    %71 = vector.broadcast %cst_50 : f32 to vector<256x128xf32>
    %72 = arith.maximumf %70, %71 : vector<256x128xf32>
    %cst_51 = arith.constant 0.000000e+00 : f32
    %73 = vector.broadcast %cst_51 : f32 to vector<256x128xf32>
    %74 = arith.select %8, %72, %73 : vector<256x128xi1>, vector<256x128xf32>
    %c42_52 = arith.constant 42 : index
    %c0_53 = arith.constant 0 : index
    %75 = vector.load %arg6[%c42_52, %c0_53] : memref<336x384xf32, #tpu.memory_space<vmem>>, vector<256x128xf32>
    tpu.vector_store %arg6[%c42_52, %c0_53], %74 {strides = array<i32>} : memref<336x384xf32, #tpu.memory_space<vmem>>, vector<256x128xf32>,
    %c40_54 = arith.constant 40 : index
    %c128_55 = arith.constant 128 : index
    %76 = vector.load %arg6[%c40_54, %c128_55] : memref<336x384xf32, #tpu.memory_space<vmem>>, vector<256x128xf32>
    tpu.vector_store %arg6[%c40_54, %c128_55], %72 {strides = array<i32>} : memref<336x384xf32, #tpu.memory_space<vmem>>, vector<256x128xf32>,
    %cst_56 = arith.constant 0.000000e+00 : f32
    %77 = vector.broadcast %cst_56 : f32 to vector<256x128xf32>
    %78 = arith.select %10, %72, %77 : vector<256x128xi1>, vector<256x128xf32>
    %c38_57 = arith.constant 38 : index
    %c256_58 = arith.constant 256 : index
    %79 = vector.load %arg6[%c38_57, %c256_58] : memref<336x384xf32, #tpu.memory_space<vmem>>, vector<256x128xf32>
    tpu.vector_store %arg6[%c38_57, %c256_58], %78 {strides = array<i32>} : memref<336x384xf32, #tpu.memory_space<vmem>>, vector<256x128xf32>,
    %c8_59 = arith.constant 8 : index
    %c0_60 = arith.constant 0 : index
    %80 = vector.load %arg6[%c8_59, %c0_60] : memref<336x384xf32, #tpu.memory_space<vmem>>, vector<256x384xf32>
    %c3_61 = arith.constant 3 : index
    %c0_62 = arith.constant 0 : index
    %c0_63 = arith.constant 0 : index
    %81 = vector.load %arg3[%c3_61, %c0_62, %c0_63] : memref<6x384x128xf32, #tpu.memory_space<vmem>>, vector<1x384x128xf32>
    %82 = vector.shape_cast %81 : vector<1x384x128xf32> to vector<384x128xf32>
    %cst_64 = arith.constant dense<0.000000e+00> : vector<256x128xf32>
    %83 = tpu.matmul %80, %82, %cst_64 {dimension_numbers = #tpu.dot_dimension_numbers<[1], [0], [0], [1], [0, 0, 1, 1], [], []>} : vector<256x384xf32>, vector<384x128xf32>, vector<256x128xf32> -> vector<256x128xf32>
    %c40_65 = arith.constant 40 : index
    %c0_66 = arith.constant 0 : index
    %84 = vector.load %arg6[%c40_65, %c0_66] : memref<336x384xf32, #tpu.memory_space<vmem>>, vector<256x384xf32>
    %c4_67 = arith.constant 4 : index
    %c0_68 = arith.constant 0 : index
    %c0_69 = arith.constant 0 : index
    %85 = vector.load %arg3[%c4_67, %c0_68, %c0_69] : memref<6x384x128xf32, #tpu.memory_space<vmem>>, vector<1x384x128xf32>
    %86 = vector.shape_cast %85 : vector<1x384x128xf32> to vector<384x128xf32>
    %cst_70 = arith.constant dense<0.000000e+00> : vector<256x128xf32>
    %87 = tpu.matmul %84, %86, %cst_70 {dimension_numbers = #tpu.dot_dimension_numbers<[1], [0], [0], [1], [0, 0, 1, 1], [], []>} : vector<256x384xf32>, vector<384x128xf32>, vector<256x128xf32> -> vector<256x128xf32>
    %88 = arith.addf %83, %87 : vector<256x128xf32>
    %c72_71 = arith.constant 72 : index
    %c0_72 = arith.constant 0 : index
    %89 = vector.load %arg6[%c72_71, %c0_72] : memref<336x384xf32, #tpu.memory_space<vmem>>, vector<256x384xf32>
    %c5_73 = arith.constant 5 : index
    %c0_74 = arith.constant 0 : index
    %c0_75 = arith.constant 0 : index
    %90 = vector.load %arg3[%c5_73, %c0_74, %c0_75] : memref<6x384x128xf32, #tpu.memory_space<vmem>>, vector<1x384x128xf32>
    %91 = vector.shape_cast %90 : vector<1x384x128xf32> to vector<384x128xf32>
    %cst_76 = arith.constant dense<0.000000e+00> : vector<256x128xf32>
    %92 = tpu.matmul %89, %91, %cst_76 {dimension_numbers = #tpu.dot_dimension_numbers<[1], [0], [0], [1], [0, 0, 1, 1], [], []>} : vector<256x384xf32>, vector<384x128xf32>, vector<256x128xf32> -> vector<256x128xf32>
    %93 = arith.addf %88, %92 : vector<256x128xf32>
    %c10 = arith.constant 10 : index
    %c0_77 = arith.constant 0 : index
    %94 = vector.load %arg4[%c10, %c0_77] : memref<16x128xf32, #tpu.memory_space<vmem>>, vector<1x128xf32>
    %95 = vector.broadcast %94 : vector<1x128xf32> to vector<256x128xf32>
    %96 = arith.mulf %93, %95 : vector<256x128xf32>
    %c11 = arith.constant 11 : index
    %c0_78 = arith.constant 0 : index
    %97 = vector.load %arg4[%c11, %c0_78] : memref<16x128xf32, #tpu.memory_space<vmem>>, vector<1x128xf32>
    %98 = vector.broadcast %97 : vector<1x128xf32> to vector<256x128xf32>
    %99 = arith.addf %96, %98 : vector<256x128xf32>
    %cst_79 = arith.constant 0.000000e+00 : f32
    %100 = vector.broadcast %cst_79 : f32 to vector<256x128xf32>
    %101 = arith.maximumf %99, %100 : vector<256x128xf32>
    %cst_80 = arith.constant dense<0.000000e+00> : vector<256x128xf32>
    %102 = tpu.matmul %101, %63, %cst_80 {dimension_numbers = #tpu.dot_dimension_numbers<[1], [0], [0], [1], [0, 0, 1, 1], [], []>} : vector<256x128xf32>, vector<128x128xf32>, vector<256x128xf32> -> vector<256x128xf32>
    %c12 = arith.constant 12 : index
    %c0_81 = arith.constant 0 : index
    %103 = vector.load %arg4[%c12, %c0_81] : memref<16x128xf32, #tpu.memory_space<vmem>>, vector<1x128xf32>
    %104 = vector.broadcast %103 : vector<1x128xf32> to vector<256x128xf32>
    %105 = arith.mulf %102, %104 : vector<256x128xf32>
    %c13 = arith.constant 13 : index
    %c0_82 = arith.constant 0 : index
    %106 = vector.load %arg4[%c13, %c0_82] : memref<16x128xf32, #tpu.memory_space<vmem>>, vector<1x128xf32>
    %107 = vector.broadcast %106 : vector<1x128xf32> to vector<256x128xf32>
    %108 = arith.addf %105, %107 : vector<256x128xf32>
    %c0_83 = arith.constant 0 : index
    %c0_84 = arith.constant 0 : index
    %109 = vector.load %arg5[%c0_83, %c0_84] : memref<256x128xf32, #tpu.memory_space<vmem>>, vector<256x128xf32>
    tpu.vector_store %arg5[%c0_83, %c0_84], %108 {strides = array<i32>} : memref<256x128xf32, #tpu.memory_space<vmem>>, vector<256x128xf32>,
    return
  }
}

</mosaic_0001>

<bundles_post_ra>
// kernel: res2net_weight_pallas.1
= control target key start
LH: loop header
LB: loop body
LE: loop exit
PB: predicated region body
PF: predicated region fallthrough
CT: control target
= control target key end

     0   :  { %10 = vsyncpa [#allocation4], 0  ;;  %s8280_s0 = inlined_call_operand.vmem [shape: f32[256,16], index: 0, kind: input, shape index: {}]   ;;  %s8281_s1 = inlined_call_operand.hbm [shape: f32[16,128], index: 1, kind: input, shape index: {}]   ;;  %s8282_s2 = inlined_call_operand.hbm [shape: f32[3,128,128], index: 2, kind: input, shape index: {}]   ;;  %s8283_s3 = inlined_call_operand.hbm [shape: f32[6,384,128], index: 3, kind: input, shape index: {}]   ;;  %s8284_s4 = inlined_call_operand.hbm [shape: f32[16,128], index: 4, kind: input, shape index: {}]   ;;  %s8285_s5 = inlined_call_operand.vmem [shape: f32[256,128], index: 5, kind: output, shape index: {}]  }
   0x1   :  { %11 = vsyncpa [#allocation6], 0 }
   0x2   :  { %12 = vsyncpa [#allocation9], 0  ;;  %s32_s20 = sshll.u32 %s8282_s2, 4  ;;  %s5375_s21 = smov [#allocation5]   ;;  %s33_s20 = int_to_ptr.hbm [resolvable:$true] %s32_s20 }
   0x3   :  { %s34_s22 = sshll.u32 %s5375_s21, 4  ;;  %s19_s25 = sshll.u32 %s8281_s1, 4  ;;  %s35_s22 = int_to_ptr.vmem [resolvable:$true] %s34_s22  ;;  %s20_s25 = int_to_ptr.hbm [resolvable:$true] %s19_s25 }
   0x4   :  { %s5376_s26 = smov 128   ;;  %s5377_s27 = smov 8  }
   0x5   :  { %40 = dma.hbm_to_vmem [thread:$0]  %s33_s20, 6144, %s35_s22, [#allocation6], %s5376_s26, %s5376_s26, %s5377_s27  }
   0x6   :  { %s5378_s28 = smov [#allocation3]   ;;  %s45_s7 = sshll.u32 %s8283_s3, 4  ;;  %s46_s7 = int_to_ptr.hbm [resolvable:$true] %s45_s7 }
   0x7   :  { %s21_s29 = sshll.u32 %s5378_s28, 4  ;;  %s58_s9 = sshll.u32 %s8284_s4, 4  ;;  %s22_s29 = int_to_ptr.vmem [resolvable:$true] %s21_s29  ;;  %s59_s9 = int_to_ptr.hbm [resolvable:$true] %s58_s9 }
   0x8   :  { %27 = dma.hbm_to_vmem [thread:$0]  %s20_s25, 256, %s22_s29, [#allocation4], %s5376_s26, %s5376_s26, %s5377_s27  }
   0x9   :  { %s5379_s10 = smov [#allocation7]   ;;  %s5380_s1 = smov [#allocation8]  }
   0xa   :  { %s47_s11 = sshll.u32 %s5379_s10, 4  ;;  %s60_s12 = sshll.u32 %s5380_s1, 4  ;;  %s48_s11 = int_to_ptr.vmem [resolvable:$true] %s47_s11  ;;  %s61_s12 = int_to_ptr.vmem [resolvable:$true] %s60_s12 }
   0xb   :  { %53 = dma.hbm_to_vmem [thread:$0]  %s46_s7, 36864, %s48_s11, [#allocation6], %s5376_s26, %s5376_s26, %s5377_s27  }
   0xc   :  { %66 = dma.hbm_to_vmem [thread:$0]  %s59_s9, 256, %s61_s12, [#allocation9], %s5376_s26, %s5376_s26, %s5377_s27  }
   0xd   :  { %5369 = dma.done.wait [#allocation4], 256  }
   0xe   :  { %5370 = vsyncadd [#allocation4], 4294967040 }
   0xf   :  { %5371 = dma.done.wait [#allocation6], 43008  }
  0x10   :  { %5372 = vsyncadd [#allocation6], 4294924288 }
  0x11   :  { %5373 = dma.done.wait [#allocation9], 256  }
  0x12   :  { %5374 = vsyncadd [#allocation9], 4294967040  ;;  %v5381_v0 = vmov 0.0   ;;  %v281_v1 = vld [vmem:[#allocation3 + $0x8] sm:$0xff]  ;;  %v280_v2 = vld [vmem:[#allocation3] sm:$0xff]  ;;  %vm298_vm0 = vcmask 130048  }
  0x13   :  { %83 = vst [vmem:[#allocation2 + $0x278] sm:$0xff] %v5381_v0  ;;  %409 = vmatpush.msra.mxu0 %v281_v1  ;;  %v248_v3 = vld [vmem:[%s8280_s0] sm:$0xff]  ;;  %5125 = vmatpush.msra.mxu3 %v281_v1  ;;  %v266_v4 = vld [vmem:[%s8280_s0 + $0x90] sm:$0xff]  ;;  %v249_v5 = vld [vmem:[%s8280_s0 + $0x8] sm:$0xff]  ;;  %vm8287_vm3 = vcmask 1045504   ;;  %vm8289_vm5 = vcmask 1041408  }
  0x14   :  { %v267_v6 = vld [vmem:[%s8280_s0 + $0x98] sm:$0xff]  ;;  %97 = vst [vmem:[#allocation2 + $0x3d8] sm:$0xff] %v5381_v0  ;;  %v250_v7 = vld [vmem:[%s8280_s0 + $0x10] sm:$0xff]  ;;  %v268_v8 = vld [vmem:[%s8280_s0 + $0xa0] sm:$0xff] }
  0x15   :  { %410 = vmatpush.msra.mxu0 %v280_v2  ;;  %5126 = vmatpush.msra.mxu3 %v280_v2  ;;  %98 = vst [vmem:[#allocation2 + $0x60] sm:$0xff] %v5381_v0  ;;  %v251_v9 = vld [vmem:[%s8280_s0 + $0x18] sm:$0xff]  ;;  %v269_v10 = vld [vmem:[%s8280_s0 + $0xa8] sm:$0xff]  ;;  %v252_v11 = vld [vmem:[%s8280_s0 + $0x20] sm:$0xff] }
  0x16   :  { %5093 = vmatmul.msk.f32.vlgmr.msra.gmra.mxu0 %vm298_vm0, %v248_v3  ;;  %5111 = vmatmul.msk.f32.vlgmr.msra.gmra.mxu3 %vm298_vm0, %v266_v4  ;;  %103 = vst [vmem:[#allocation2 + $0x80] sm:$0xff] %v5381_v0  ;;  %v270_v12 = vld [vmem:[%s8280_s0 + $0xb0] sm:$0xff]  ;;  %v253_v13 = vld [vmem:[%s8280_s0 + $0x28] sm:$0xff]  ;;  %v271_v14 = vld [vmem:[%s8280_s0 + $0xb8] sm:$0xff] }
  0x17   :  { %104 = vst [vmem:[#allocation2 + $0x228] sm:$0xff] %v5381_v0  ;;  %v254_v15 = vld [vmem:[%s8280_s0 + $0x30] sm:$0xff]  ;;  %v272_v16 = vld [vmem:[%s8280_s0 + $0xc0] sm:$0xff]  ;;  %v255_v17 = vld [vmem:[%s8280_s0 + $0x38] sm:$0xff] }
  0x18   :  { %v273_v18 = vld [vmem:[%s8280_s0 + $0xc8] sm:$0xff]  ;;  %v256_v19 = vld [vmem:[%s8280_s0 + $0x40] sm:$0xff]  ;;  %v274_v20 = vld [vmem:[%s8280_s0 + $0xd0] sm:$0xff] }
  0x19   :  { %v257_v21 = vld [vmem:[%s8280_s0 + $0x48] sm:$0xff]  ;;  %v275_v22 = vld [vmem:[%s8280_s0 + $0xd8] sm:$0xff]  ;;  %v258_v24 = vld [vmem:[%s8280_s0 + $0x50] sm:$0xff] }
  0x1a   :  { %v1200_v23 = vld [vmem:[#allocation7 + $0x1f8] sm:$0xff]  ;;  %v276_v25 = vld [vmem:[%s8280_s0 + $0xe0] sm:$0xff]  ;;  %v1199_v27 = vld [vmem:[#allocation7 + $0x1f0] sm:$0xff] }
  0x1b   :  { %1233 = vmatpush.msra.mxu1 %v1200_v23  ;;  %5127 = vmatpush.msra.mxu2 %v1200_v23  ;;  %v1232_v26 = vld [vmem:[#allocation7 + $0x2f8] sm:$0xff]  ;;  %v1198_v29 = vld [vmem:[#allocation7 + $0x1e8] sm:$0xff]  ;;  %v1138_v30 = vld [vmem:[#allocation7 + $0x70] sm:$0xff] }
  0x1c   :  { %v1139_v28 = vld [vmem:[#allocation7 + $0x78] sm:$0xff]  ;;  %v1197_v31 = vld [vmem:[#allocation7 + $0x1e0] sm:$0xff]  ;;  %v1137_v32 = vld [vmem:[#allocation7 + $0x68] sm:$0xff]  ;;  %1459 = vmatpush.msrb.mxu3 %v1232_v26 }
  0x1d   :  { %1234 = vmatpush.msra.mxu1 %v1199_v27  ;;  %1572 = vmatpush.msrb.mxu0 %v1139_v28  ;;  %v1231_v33 = vld [vmem:[#allocation7 + $0x2f0] sm:$0xff]  ;;  %v1230_v34 = vld [vmem:[#allocation7 + $0x2e8] sm:$0xff]  ;;  %v1196_v35 = vld [vmem:[#allocation7 + $0x1d8] sm:$0xff] }
  0x1e   :  { %5094 = vmatmul.msk.f32.gmra.mxu0 %vm298_vm0, %v249_v5  ;;  %5112 = vmatmul.msk.f32.gmra.mxu3 %vm298_vm0, %v267_v6  ;;  %v1136_v36 = vld [vmem:[#allocation7 + $0x60] sm:$0xff]  ;;  %v259_v37 = vld [vmem:[%s8280_s0 + $0x58] sm:$0xff]  ;;  %v277_v39 = vld [vmem:[%s8280_s0 + $0xe8] sm:$0xff] }
  0x1f   :  { %5128 = vmatpush.msra.mxu2 %v1199_v27  ;;  %1235 = vmatpush.msra.mxu1 %v1198_v29  ;;  %v1229_v38 = vld [vmem:[#allocation7 + $0x2e0] sm:$0xff]  ;;  %v1195_v40 = vld [vmem:[#allocation7 + $0x1d0] sm:$0xff]  ;;  %v1135_v41 = vld [vmem:[#allocation7 + $0x58] sm:$0xff]  ;;  %v8341_v27 = vmov 0 }
  0x20   :  { %1573 = vmatpush.msrb.mxu0 %v1138_v30  ;;  %1460 = vmatpush.msrb.mxu3 %v1231_v33  ;;  %v1194_v42 = vld [vmem:[#allocation7 + $0x1c8] sm:$0xff]  ;;  %v1134_v43 = vld [vmem:[#allocation7 + $0x50] sm:$0xff]  ;;  %v1228_v44 = vld [vmem:[#allocation7 + $0x2d8] sm:$0xff] }
  0x21   :  { %5129 = vmatpush.msra.mxu2 %v1198_v29  ;;  %1236 = vmatpush.msra.mxu1 %v1197_v31  ;;  %v1227_v45 = vld [vmem:[#allocation7 + $0x2d0] sm:$0xff]  ;;  %v1193_v46 = vld [vmem:[#allocation7 + $0x1c0] sm:$0xff]  ;;  %v1133_v47 = vld [vmem:[#allocation7 + $0x48] sm:$0xff] }
  0x22   :  { %1574 = vmatpush.msrb.mxu0 %v1137_v32  ;;  %1461 = vmatpush.msrb.mxu3 %v1230_v34  ;;  %v260_v48 = vld [vmem:[%s8280_s0 + $0x60] sm:$0xff]  ;;  %v1226_v49 = vld [vmem:[#allocation7 + $0x2c8] sm:$0xff]  ;;  %v1192_v50 = vld [vmem:[#allocation7 + $0x1b8] sm:$0xff] }
  0x23   :  { %5130 = vmatpush.msra.mxu2 %v1197_v31  ;;  %1237 = vmatpush.msra.mxu1 %v1196_v35  ;;  %v1132_v51 = vld [vmem:[#allocation7 + $0x40] sm:$0xff]  ;;  %v1191_v53 = vld [vmem:[#allocation7 + $0x1b0] sm:$0xff]  ;;  %v1131_v54 = vld [vmem:[#allocation7 + $0x38] sm:$0xff] }
  0x24   :  { %1575 = vmatpush.msrb.mxu0 %v1136_v36  ;;  %1462 = vmatpush.msrb.mxu3 %v1229_v38  ;;  %v1225_v52 = vld [vmem:[#allocation7 + $0x2c0] sm:$0xff]  ;;  %v278_v55 = vld [vmem:[%s8280_s0 + $0xf0] sm:$0xff]  ;;  %v1190_v56 = vld [vmem:[#allocation7 + $0x1a8] sm:$0xff] }
  0x25   :  { %1238 = vmatpush.msra.mxu1 %v1195_v40  ;;  %5131 = vmatpush.msra.mxu2 %v1196_v35  ;;  %v1130_v57 = vld [vmem:[#allocation7 + $0x30] sm:$0xff]  ;;  %v1224_v58 = vld [vmem:[#allocation7 + $0x2b8] sm:$0xff]  ;;  %v1189_v59 = vld [vmem:[#allocation7 + $0x1a0] sm:$0xff] }
  0x26   :  { %5095 = vmatmul.msk.f32.gmra.mxu0 %vm298_vm0, %v250_v7  ;;  %5113 = vmatmul.msk.f32.gmra.mxu3 %vm298_vm0, %v268_v8  ;;  %v1129_v60 = vld [vmem:[#allocation7 + $0x28] sm:$0xff]  ;;  %v1223_v62 = vld [vmem:[#allocation7 + $0x2b0] sm:$0xff]  ;;  %v1188_v63 = vld [vmem:[#allocation7 + $0x198] sm:$0xff] }
  0x27   :  { %1576 = vmatpush.msrb.mxu0 %v1135_v41  ;;  %1239 = vmatpush.msra.mxu1 %v1194_v42  ;;  %v261_v61 = vld [vmem:[%s8280_s0 + $0x68] sm:$0xff]  ;;  %v1128_v1 = vld [vmem:[#allocation7 + $0x20] sm:$0xff]  ;;  %v1187_v3 = vld [vmem:[#allocation7 + $0x190] sm:$0xff]  ;;  %v8344_v41 = vmov 0 }
  0x28   :  { %1463 = vmatpush.msrb.mxu3 %v1228_v44  ;;  %5132 = vmatpush.msra.mxu2 %v1195_v40  ;;  %v1222_v2 = vld [vmem:[#allocation7 + $0x2a8] sm:$0xff]  ;;  %v1127_v4 = vld [vmem:[#allocation7 + $0x18] sm:$0xff]  ;;  %v1221_v5 = vld [vmem:[#allocation7 + $0x2a0] sm:$0xff] }
  0x29   :  { %1577 = vmatpush.msrb.mxu0 %v1134_v43  ;;  %1240 = vmatpush.msra.mxu1 %v1193_v46  ;;  %v1186_v6 = vld [vmem:[#allocation7 + $0x188] sm:$0xff]  ;;  %v1126_v7 = vld [vmem:[#allocation7 + $0x10] sm:$0xff]  ;;  %v279_v8 = vld [vmem:[%s8280_s0 + $0xf8] sm:$0xff] }
  0x2a   :  { %1464 = vmatpush.msrb.mxu3 %v1227_v45  ;;  %5133 = vmatpush.msra.mxu2 %v1194_v42  ;;  %v265_v35 = vld [vmem:[%s8280_s0 + $0x88] sm:$0xff] }
  0x2b   :  { %1578 = vmatpush.msrb.mxu0 %v1133_v47  ;;  %1241 = vmatpush.msra.mxu1 %v1192_v50 }
  0x2c   :  { %1465 = vmatpush.msrb.mxu3 %v1226_v49  ;;  %5134 = vmatpush.msra.mxu2 %v1193_v46 }
  0x2d   :  { %1579 = vmatpush.msrb.mxu0 %v1132_v51  ;;  %1242 = vmatpush.msra.mxu1 %v1191_v53 }
  0x2e   :  { %5096 = vmatmul.msk.f32.gmra.mxu0 %vm298_vm0, %v251_v9  ;;  %5114 = vmatmul.msk.f32.gmra.mxu3 %vm298_vm0, %v269_v10  ;;  %v1185_v9 = vld [vmem:[#allocation7 + $0x180] sm:$0xff]  ;;  %v1125_v10 = vld [vmem:[#allocation7 + $0x8] sm:$0xff] }
  0x2f   :  { %1580 = vmatpush.msrb.mxu0 %v1131_v54  ;;  %1466 = vmatpush.msrb.mxu3 %v1225_v52  ;;  %v8347_v54 = vmov 0 }
  0x30   :  { %1243 = vmatpush.msra.mxu1 %v1190_v56  ;;  %5135 = vmatpush.msra.mxu2 %v1192_v50 }
  0x31   :  { %1581 = vmatpush.msrb.mxu0 %v1130_v57  ;;  %1467 = vmatpush.msrb.mxu3 %v1224_v58 }
  0x32   :  { %1244 = vmatpush.msra.mxu1 %v1189_v59  ;;  %5136 = vmatpush.msra.mxu2 %v1191_v53 }
  0x33   :  { %1582 = vmatpush.msrb.mxu0 %v1129_v60  ;;  %1468 = vmatpush.msrb.mxu3 %v1223_v62 }
  0x34   :  { %1245 = vmatpush.msra.mxu1 %v1188_v63  ;;  %5137 = vmatpush.msra.mxu2 %v1190_v56 }
  0x35   :  { %1583 = vmatpush.msrb.mxu0 %v1128_v1  ;;  %1469 = vmatpush.msrb.mxu3 %v1222_v2 }
  0x36   :  { %5097 = vmatmul.msk.f32.gmra.mxu0 %vm298_vm0, %v252_v11  ;;  %5115 = vmatmul.msk.f32.gmra.mxu3 %vm298_vm0, %v270_v12  ;;  %v1220_v11 = vld [vmem:[#allocation7 + $0x298] sm:$0xff]  ;;  %v262_v12 = vld [vmem:[%s8280_s0 + $0x70] sm:$0xff] }
  0x37   :  { %1246 = vmatpush.msra.mxu1 %v1187_v3  ;;  %1584 = vmatpush.msrb.mxu0 %v1127_v4 }
  0x38   :  { %1470 = vmatpush.msrb.mxu3 %v1221_v5  ;;  %5138 = vmatpush.msra.mxu2 %v1189_v59  ;;  %v8350_v5 = vmov 0 }
  0x39   :  { %1247 = vmatpush.msra.mxu1 %v1186_v6  ;;  %1585 = vmatpush.msrb.mxu0 %v1126_v7 }
  0x3a   :  { %5139 = vmatpush.msra.mxu2 %v1188_v63  ;;  %1471 = vmatpush.msrb.mxu3 %v1220_v11 }
  0x3b   :  { %1248 = vmatpush.msra.mxu1 %v1185_v9  ;;  %1586 = vmatpush.msrb.mxu0 %v1125_v10  ;;  %v8353_v10 = vmov 0 }
  0x3c   :  { %5140 = vmatpush.msra.mxu2 %v1187_v3 }
  0x3e   :  { %5098 = vmatmul.msk.f32.gmra.mxu0 %vm298_vm0, %v253_v13  ;;  %5116 = vmatmul.msk.f32.gmra.mxu3 %vm298_vm0, %v271_v14  ;;  %v1124_v13 = vld [vmem:[#allocation7] sm:$0xff]  ;;  %v1219_v14 = vld [vmem:[#allocation7 + $0x290] sm:$0xff] }
  0x3f   :  { %1587 = vmatpush.msrb.mxu0 %v1124_v13  ;;  %1472 = vmatpush.msrb.mxu3 %v1219_v14 }
  0x40   :  { %5141 = vmatpush.msra.mxu2 %v1186_v6 }
  0x42   :  { %5142 = vmatpush.msra.mxu2 %v1185_v9 }
  0x46   :  { %5099 = vmatmul.msk.f32.gmra.mxu0 %vm298_vm0, %v254_v15  ;;  %5117 = vmatmul.msk.f32.gmra.mxu3 %vm298_vm0, %v272_v16  ;;  %v1218_v15 = vld [vmem:[#allocation7 + $0x288] sm:$0xff]  ;;  %v1217_v16 = vld [vmem:[#allocation7 + $0x280] sm:$0xff] }
  0x47   :  { %1473 = vmatpush.msrb.mxu3 %v1218_v15 }
  0x49   :  { %1474 = vmatpush.msrb.mxu3 %v1217_v16 }
  0x4e   :  { %5100 = vmatmul.msk.f32.gmra.mxu0 %vm298_vm0, %v255_v17  ;;  %5118 = vmatmul.msk.f32.gmra.mxu3 %vm298_vm0, %v273_v18  ;;  %v263_v17 = vld [vmem:[%s8280_s0 + $0x78] sm:$0xff]  ;;  %v119_v18 = vlaneseq }
  0x56   :  { %5101 = vmatmul.msk.f32.gmra.mxu0 %vm298_vm0, %v256_v19  ;;  %5119 = vmatmul.msk.f32.gmra.mxu3 %vm298_vm0, %v274_v20  ;;  %v5549_v19 = vshrl.u32 %v119_v18, 7  ;;  %v5551_v20 = vld [vmem:[#allocation8] ss:$0 sm:$0xff]  ;;  %v8356_v18 = vmov 0 }
  0x58   :  { %v121_v29 = vadd.s32 8, %v5549_v19  ;;  %v138_v51 = vadd.s32 144, %v5549_v19  ;;  %v139_v7 = vadd.s32 152, %v5549_v19  ;;  %v124_v11 = vadd.s32 32, %v5549_v19 }
  0x5a   :  { %v170_v58 = vand.u32 15, %v138_v51  ;;  %v171_v14 = vand.u32 15, %v139_v7 }
  0x5c   :  { %vm5617_vm6 = vcmp.ge.s32.totalorder %v170_v58, 2  ;;  %vm5636_vm8 = vcmp.lt.s32.totalorder %v171_v14, 14 }
  0x5d   :  { %v8351_v5 = vsel %vm5617_vm6, 4294967295, %v8350_v5  ;;  %v8357_v18 = vsel %vm5636_vm8, 4294967295, %v8356_v18 }
  0x5e   :  { %5102 = vmatmul.msk.f32.gmra.mxu0 %vm298_vm0, %v257_v21  ;;  %5120 = vmatmul.msk.f32.gmra.mxu3 %vm298_vm0, %v275_v22  ;;  %v5553_v21 = vld [vmem:[#allocation8 + $0x1] ss:$0 sm:$0xff]  ;;  %v152_v22 = vand.u32 15, %v5549_v19  ;;  %8352 = vst [vmem:[#allocation16_spill] sm:$0xff] %v8351_v5 }
  0x5f   :  { %8358 = vst [vmem:[#allocation18_spill] sm:$0xff] %v8357_v18 }
  0x60   :  { %vm5562_vm1 = vcmp.ge.s32.totalorder %v152_v22, 2 }
  0x61   :  { %v8342_v27 = vsel %vm5562_vm1, 4294967295, %v8341_v27 }
  0x62   :  { %8343 = vst [vmem:[#allocation13_spill] sm:$0xff] %v8342_v27 }
  0x66   :  { %5103 = vmatmul.msk.f32.gmra.mxu0 %vm298_vm0, %v258_v24  ;;  %5121 = vmatmul.msk.f32.gmra.mxu3 %vm298_vm0, %v276_v25  ;;  %v264_v24 = vld [vmem:[%s8280_s0 + $0x80] sm:$0xff] }
  0x6e   :  { %5104 = vmatmul.msk.f32.gmra.mxu0 %vm298_vm0, %v259_v37  ;;  %5122 = vmatmul.msk.f32.gmra.mxu3 %vm298_vm0, %v277_v39  ;;  %v153_v37 = vand.u32 15, %v121_v29  ;;  %v122_v39 = vadd.s32 16, %v5549_v19 }
  0x70   :  { %vm5576_vm2 = vcmp.lt.s32.totalorder %v153_v37, 14  ;;  %v154_v44 = vand.u32 15, %v122_v39  ;;  %v140_v37 = vadd.s32 160, %v5549_v19 }
  0x71   :  { %v8345_v41 = vsel %vm5576_vm2, 4294967295, %v8344_v41 }
  0x72   :  { %8346 = vst [vmem:[#allocation14_spill] sm:$0xff] %v8345_v41  ;;  %vm5594_vm4 = vcmp.ge.s32.totalorder %v154_v44, 2  ;;  %v1204_v41 = vld [vmem:[#allocation7 + $0x218] sm:$0xff] }
  0x73   :  { %v8348_v54 = vsel %vm5594_vm4, 4294967295, %v8347_v54 }
  0x74   :  { %8349 = vst [vmem:[#allocation15_spill] sm:$0xff] %v8348_v54 }
  0x76   :  { %5105 = vmatmul.msk.f32.gmra.mxu0 %vm298_vm0, %v260_v48  ;;  %5123 = vmatmul.msk.f32.gmra.mxu3 %vm298_vm0, %v278_v55  ;;  %v123_v55 = vadd.s32 24, %v5549_v19 }
  0x78   :  { %v155_v1 = vand.u32 15, %v123_v55 }
  0x7a   :  { %vm5627_vm7 = vcmp.lt.s32.totalorder %v155_v1, 14 }
  0x7b   :  { %v8354_v10 = vsel %vm5627_vm7, 4294967295, %v8353_v10 }
  0x7c   :  { %8355 = vst [vmem:[#allocation17_spill] sm:$0xff] %v8354_v10 }
  0x7e   :  { %5106 = vmatmul.msk.f32.gmra.mxu0 %vm298_vm0, %v261_v61  ;;  %5124 = vmatmul.msk.f32.gmra.mxu3 %vm298_vm0, %v279_v8 }
  0x86   :  { %5107 = vmatmul.msk.f32.gmra.mxu0 %vm298_vm0, %v262_v12 }
  0x8e   :  { %5108 = vmatmul.msk.f32.gmra.mxu0 %vm298_vm0, %v263_v17 }
  0x93   :  { %v412_v23 = vpop.f32.mrf.mxu0 }
  0x94   :  { %v510_v25 = vmul.f32 %v5551_v20, %v412_v23 }
  0x96   :  { %v544_v26 = vadd.f32 %v5553_v21, %v510_v25  ;;  %5109 = vmatmul.msk.f32.gmra.mxu0 %vm298_vm0, %v264_v24  ;;  %v156_v25 = vand.u32 15, %v124_v11  ;;  %v8365_v11 = vmov 0 }
  0x98   :  { %v576_v28 = vmax.f32 %v544_v26, 0.0  ;;  %vm5664_vm9 = vcmp.ge.s32.totalorder %v156_v25, 2 }
  0x99   :  { %v466_v30 = vpop.f32.mrf.mxu3 }
  0x9a   :  { %v673_v31 = vrot.slane %v576_v28, 6  ;;  %802 = vst [vmem:[#allocation2 + $0x308] sm:$0xff] %v576_v28  ;;  %v834_v32 = vsel %vm5562_vm1, %v576_v28, 0.0  ;;  %v528_v52 = vmul.f32 %v5551_v20, %v466_v30 }
  0x9b   :  { %v899_v33 = vrot.slane %v834_v32, 2  ;;  %v415_v34 = vpop.f32.mrf.mxu0 }
  0x9c   :  { %769 = vst [vmem:[#allocation2 + $0x60] sm:$0xfc] %v673_v31  ;;  %v511_v36 = vmul.f32 %v5551_v20, %v415_v34  ;;  %v562_v57 = vadd.f32 %v5553_v21, %v528_v52  ;;  %v8362_v52 = vmov 0 }
  0x9d   :  { %995 = vst [vmem:[#allocation2 + $0x3d8] sm:$0xc0] %v899_v33 }
  0x9e   :  { %v545_v38 = vadd.f32 %v5553_v21, %v511_v36  ;;  %5110 = vmatmul.msk.f32.gmra.mxu0 %vm298_vm0, %v265_v35  ;;  %v5606_v61 = vmax.f32 %v562_v57, 0.0 }
  0xa0   :  { %v577_v40 = vmax.f32 %v545_v38, 0.0  ;;  %820 = vst [vmem:[#allocation2 + $0x330] sm:$0xff] %v5606_v61  ;;  %v852_v13 = vsel %vm5617_vm6, %v5606_v61, 0.0  ;;  %vm8420_vm6 = vcmask 1045504  }
  0xa1   :  { %v469_v42 = vpop.f32.mrf.mxu3  ;;  %v5645_v28 = vrot.slane %v852_v13, 2 }
  0xa2   :  { %803 = vst [vmem:[#allocation2 + $0x8] sm:$0xff] %v577_v40  ;;  %v900_v43 = vrot.slane %v577_v40, 2  ;;  %v609_v47 = vsel %vm5576_vm2, %v577_v40, 0.0  ;;  %v529_v8 = vmul.f32 %v5551_v20, %v469_v42  ;;  %v8359_v40 = vmov 0 }
  0xa3   :  { %v418_v45 = vpop.f32.mrf.mxu0  ;;  %v5580_v46 = vld [vmem:[#allocation2 + $0x60] sm:$0xff]  ;;  %v674_v53 = vrot.slane %v609_v47, 6  ;;  %v8360_v40 = vsel %vm5664_vm9, 4294967295, %v8359_v40  ;;  %v125_v42 = vadd.s32 40, %v5549_v19 }
  0xa4   :  { %v5585_v48 = vsel %vm8287_vm3, %v899_v33, %v900_v43  ;;  %v512_v49 = vmul.f32 %v5551_v20, %v418_v45  ;;  %1249 = vmatmul.f32.vlgmr.msra.gmra.mxu1 %v5580_v46  ;;  %v563_v15 = vadd.f32 %v5553_v21, %v529_v8  ;;  %v8293_v33 = vrot.slane %v5606_v61, 6  ;;  %8361 = vst [vmem:[#allocation19_spill] sm:$0xff] %v8360_v40  ;;  %v1205_v40 = vld [vmem:[#allocation7 + $0x220] sm:$0xff] }
  0xa5   :  { %1475 = vmatmul.f32.vlgmr.msrb.gmra.mxu3 %v5585_v48  ;;  %v5609_v62 = vsel %vm8289_vm5, %v673_v31, %v674_v53  ;;  %v172_v45 = vand.u32 15, %v140_v37  ;;  %v157_v57 = vand.u32 15, %v125_v42  ;;  %v141_v8 = vadd.s32 168, %v5549_v19 }
  0xa6   :  { %v546_v50 = vadd.f32 %v5553_v21, %v512_v49  ;;  %1588 = vmatmul.f32.vlgmr.msrb.gmra.mxu0 %v5381_v0  ;;  %v595_v22 = vmax.f32 %v563_v15, 0.0 }
  0xa7   :  { %vm5679_vm10 = vcmp.ge.s32.totalorder %v172_v45, 2  ;;  %vm5705_vm11 = vcmp.lt.s32.totalorder %v157_v57, 14  ;;  %v173_v14 = vand.u32 15, %v141_v8  ;;  %v142_v45 = vadd.s32 176, %v5549_v19 }
  0xa8   :  { %v5599_v56 = vmax.f32 %v546_v50, 0.0  ;;  %v627_v31 = vsel %vm5636_vm8, %v595_v22, 0.0  ;;  %821 = vst [vmem:[#allocation2 + $0x2f8] sm:$0xff] %v595_v22  ;;  %v936_v32 = vrot.slane %v595_v22, 2  ;;  %v8363_v52 = vsel %vm5679_vm10, 4294967295, %v8362_v52 }
  0xa9   :  { %v472_v59 = vpop.f32.mrf.mxu3  ;;  %v710_v34 = vrot.slane %v627_v31, 6  ;;  %8364 = vst [vmem:[#allocation20_spill] sm:$0xff] %v8363_v52  ;;  %v8366_v11 = vsel %vm5705_vm11, 4294967295, %v8365_v11  ;;  %vm5718_vm12 = vcmp.lt.s32.totalorder %v173_v14, 14  ;;  %vm8413_vm8 = vcmask 1041408  }
  0xaa   :  { %804 = vst [vmem:[#allocation2 + $0x338] sm:$0xff] %v5599_v56  ;;  %v836_v60 = vsel %vm5594_vm4, %v5599_v56, 0.0  ;;  %v676_v9 = vrot.slane %v5599_v56, 6  ;;  %v5660_v36 = vsel %vm8287_vm3, %v5645_v28, %v936_v32  ;;  %v530_v38 = vmul.f32 %v5551_v20, %v472_v59 }
  0xab   :  { %v902_v63 = vrot.slane %v836_v60, 2  ;;  %v421_v2 = vpop.f32.mrf.mxu0  ;;  %1014 = vst [vmem:[#allocation2 + $0x320] sm:$0xff] %v5660_v36 }
  0xac   :  { %v513_v3 = vmul.f32 %v5551_v20, %v421_v2  ;;  %1252 = vmatmul.f32.gmra.mxu1 %v5609_v62  ;;  %v5641_v23 = vsel %vm8289_vm5, %v674_v53, %v676_v9  ;;  %v564_v47 = vadd.f32 %v5553_v21, %v530_v38  ;;  %8367 = vst [vmem:[#allocation21_spill] sm:$0xff] %v8366_v11 }
  0xad   :  { %v5615_v4 = vsel %vm8287_vm3, %v900_v43, %v902_v63  ;;  %v5672_v43 = vsel %vm8289_vm5, %v8293_v33, %v710_v34  ;;  %v8399_v33 = vmov 0 }
  0xae   :  { %v547_v6 = vadd.f32 %v5553_v21, %v513_v3  ;;  %1591 = vmatmul.f32.gmra.mxu0 %v5381_v0  ;;  %1478 = vmatmul.f32.gmra.mxu3 %v5615_v4  ;;  %788 = vst [vmem:[#allocation2 + $0x178] sm:$0xff] %v5672_v43  ;;  %v596_v53 = vmax.f32 %v564_v47, 0.0  ;;  %v8371_v47 = vmov 0 }
  0xb0   :  { %v579_v12 = vmax.f32 %v547_v6, 0.0  ;;  %822 = vst [vmem:[#allocation2 + $0x2b8] sm:$0xff] %v596_v53  ;;  %v854_v1 = vsel %vm5679_vm10, %v596_v53, 0.0  ;;  %vm8405_vm10 = vcmask 1045504  }
  0xb1   :  { %v475_v16 = vpop.f32.mrf.mxu3  ;;  %v938_v3 = vrot.slane %v854_v1, 2 }
  0xb2   :  { %805 = vst [vmem:[#allocation2 + $0x3b8] sm:$0xff] %v579_v12  ;;  %v904_v17 = vrot.slane %v579_v12, 2  ;;  %v611_v24 = vsel %vm5627_vm7, %v579_v12, 0.0  ;;  %v126_v12 = vadd.s32 48, %v5549_v19 }
  0xb3   :  { %v424_v26 = vpop.f32.mrf.mxu0  ;;  %v678_v39 = vrot.slane %v611_v24, 6  ;;  %v5712_v13 = vsel %vm8287_vm3, %v936_v32, %v938_v3  ;;  %v8368_v24 = vmov 0 }
  0xb4   :  { %v5648_v29 = vsel %vm8287_vm3, %v902_v63, %v904_v17  ;;  %v514_v30 = vmul.f32 %v5551_v20, %v424_v26  ;;  %1255 = vmatmul.f32.gmra.mxu1 %v5641_v23  ;;  %v712_v63 = vrot.slane %v596_v53, 6  ;;  %1015 = vst [vmem:[#allocation2 + $0x1a0] sm:$0xff] %v5712_v13  ;;  %v8369_v24 = vsel %vm5718_vm12, 4294967295, %v8368_v24 }
  0xb5   :  { %v5684_v55 = vsel %vm8289_vm5, %v676_v9, %v678_v39  ;;  %v531_v9 = vmul.f32 %v5551_v20, %v475_v16  ;;  %8370 = vst [vmem:[#allocation22_spill] sm:$0xff] %v8369_v24  ;;  %v5181_v10 = vld [vmem:[#allocation2 + $0x178] sm:$0xff] }
  0xb6   :  { %v548_v35 = vadd.f32 %v5553_v21, %v514_v30  ;;  %1594 = vmatmul.f32.gmra.mxu0 %v5381_v0  ;;  %1481 = vmatmul.f32.gmra.mxu3 %v5648_v29  ;;  %v5701_v7 = vsel %vm8289_vm5, %v710_v34, %v712_v63  ;;  %v158_v30 = vand.u32 15, %v126_v12 }
  0xb7   :  { %789 = vst [vmem:[#allocation2 + $0x170] sm:$0xff] %v5701_v7  ;;  %v565_v15 = vadd.f32 %v5553_v21, %v531_v9 }
  0xb8   :  { %v580_v44 = vmax.f32 %v548_v35, 0.0  ;;  %vm5737_vm13 = vcmp.ge.s32.totalorder %v158_v30, 2 }
  0xb9   :  { %v478_v49 = vpop.f32.mrf.mxu3  ;;  %v597_v25 = vmax.f32 %v565_v15, 0.0  ;;  %v8372_v47 = vsel %vm5737_vm13, 4294967295, %v8371_v47 }
  0xba   :  { %v680_v50 = vrot.slane %v580_v44, 6  ;;  %806 = vst [vmem:[#allocation2 + $0x388] sm:$0xff] %v580_v44  ;;  %v838_v51 = vsel %vm5664_vm9, %v580_v44, 0.0  ;;  %v532_v53 = vmul.f32 %v5551_v20, %v478_v49 }
  0xbb   :  { %v906_v56 = vrot.slane %v838_v51, 2  ;;  %v427_v58 = vpop.f32.mrf.mxu0  ;;  %v629_v35 = vsel %vm5718_vm12, %v597_v25, 0.0  ;;  %823 = vst [vmem:[#allocation2 + $0x210] sm:$0xff] %v597_v25  ;;  %v940_v37 = vrot.slane %v597_v25, 2  ;;  %vm8398_vm12 = vcmask 1041408  }
  0xbc   :  { %v5687_v59 = vsel %vm8289_vm5, %v678_v39, %v680_v50  ;;  %v515_v60 = vmul.f32 %v5551_v20, %v427_v58  ;;  %1258 = vmatmul.f32.gmra.mxu1 %v5684_v55  ;;  %v714_v39 = vrot.slane %v629_v35, 6  ;;  %8373 = vst [vmem:[#allocation23_spill] sm:$0xff] %v8372_v47  ;;  %v566_v57 = vadd.f32 %v5553_v21, %v532_v53 }
  0xbd   :  { %773 = vst [vmem:[#allocation2 + $0x20] sm:$0xff] %v5687_v59  ;;  %v5695_v2 = vsel %vm8287_vm3, %v904_v17, %v906_v56  ;;  %v5734_v44 = vsel %vm8287_vm3, %v938_v3, %v940_v37  ;;  %v8374_v3 = vmov 0 }
  0xbe   :  { %v549_v6 = vadd.f32 %v5553_v21, %v515_v60  ;;  %1597 = vmatmul.f32.gmra.mxu0 %v5381_v0  ;;  %1484 = vmatmul.f32.gmra.mxu3 %v5695_v2  ;;  %v5743_v51 = vsel %vm8289_vm5, %v712_v63, %v714_v39  ;;  %1016 = vst [vmem:[#allocation2 + $0x190] sm:$0xff] %v5734_v44  ;;  %v598_v49 = vmax.f32 %v566_v57, 0.0  ;;  %v5182_v27 = vld [vmem:[#allocation2 + $0x170] sm:$0xff] }
  0xbf   :  { %790 = vst [vmem:[#allocation2 + $0x58] sm:$0xff] %v5743_v51 }
  0xc0   :  { %v581_v0 = vmax.f32 %v549_v6, 0.0  ;;  %v716_v14 = vrot.slane %v598_v49, 6  ;;  %824 = vst [vmem:[#allocation2 + $0x380] sm:$0xff] %v598_v49 }
  0xc1   :  { %v481_v17 = vpop.f32.mrf.mxu3  ;;  %v6260_v54 = vld [vmem:[#allocation2 + $0x388] sm:$0xff] }
  0xc2   :  { %v613_v16 = vsel %vm5705_vm11, %v581_v0, 0.0  ;;  %807 = vst [vmem:[#allocation2 + $0xe8] sm:$0xff] %v581_v0  ;;  %v908_v22 = vrot.slane %v581_v0, 2  ;;  %v533_v30 = vmul.f32 %v5551_v20, %v481_v17 }
  0xc3   :  { %v682_v26 = vrot.slane %v613_v16, 6  ;;  %v430_v31 = vpop.f32.mrf.mxu0 }
  0xc4   :  { %v909_v32 = vsel %vm8287_vm3, %v906_v56, %v908_v22  ;;  %v516_v34 = vmul.f32 %v5551_v20, %v430_v31  ;;  %1261 = vmatmul.f32.gmra.mxu1 %v5687_v59  ;;  %v174_v56 = vand.u32 15, %v142_v45  ;;  %v8377_v31 = vmov 0 }
  0xc5   :  { %v5728_v38 = vsel %vm8289_vm5, %v680_v50, %v682_v26  ;;  %1000 = vst [vmem:[#allocation2 + $0x1f8] sm:$0xff] %v909_v32  ;;  %v127_v50 = vadd.s32 56, %v5549_v19 }
  0xc6   :  { %774 = vst [vmem:[#allocation2 + $0x2d8] sm:$0xff] %v5728_v38  ;;  %v550_v42 = vadd.f32 %v5553_v21, %v516_v34  ;;  %1600 = vmatmul.f32.gmra.mxu0 %v5580_v46  ;;  %1487 = vmatmul.f32.gmra.mxu3 %v909_v32  ;;  %vm5751_vm14 = vcmp.ge.s32.totalorder %v174_v56, 2  ;;  %v5774_v32 = vsel %vm8289_vm5, %v714_v39, %v716_v14  ;;  %v8380_v39 = vmov 0 }
  0xc7   :  { %v8375_v3 = vsel %vm5751_vm14, 4294967295, %v8374_v3  ;;  %v159_v6 = vand.u32 15, %v127_v50  ;;  %v856_v15 = vsel %vm5751_vm14, %v598_v49, 0.0  ;;  %791 = vst [vmem:[#allocation2 + $0x198] sm:$0xff] %v5774_v32  ;;  %vm8389_vm14 = vcmask 1045504  }
  0xc8   :  { %v582_v46 = vmax.f32 %v550_v42, 0.0  ;;  %8376 = vst [vmem:[#allocation24_spill] sm:$0xff] %v8375_v3  ;;  %v942_v25 = vrot.slane %v856_v15, 2  ;;  %v567_v42 = vadd.f32 %v5553_v21, %v533_v30  ;;  %v144_v15 = vadd.s32 192, %v5549_v19  ;;  %v1151_v3 = vld [vmem:[#allocation7 + $0xd8] sm:$0xff] }
  0xc9   :  { %v484_v58 = vpop.f32.mrf.mxu3  ;;  %vm5768_vm15 = vcmp.lt.s32.totalorder %v159_v6, 14 }
  0xca   :  { %v684_v60 = vrot.slane %v582_v46, 6  ;;  %808 = vst [vmem:[#allocation2 + $0x158] sm:$0xff] %v582_v46  ;;  %v840_v1 = vsel %vm5737_vm13, %v582_v46, 0.0  ;;  %v8378_v31 = vsel %vm5768_vm15, 4294967295, %v8377_v31  ;;  %v599_v53 = vmax.f32 %v567_v42, 0.0 }
  0xcb   :  { %v910_v63 = vrot.slane %v840_v1, 2  ;;  %v433_v8 = vpop.f32.mrf.mxu0  ;;  %8379 = vst [vmem:[#allocation25_spill] sm:$0xff] %v8378_v31  ;;  %v534_v30 = vmul.f32 %v5551_v20, %v484_v58 }
  0xcc   :  { %v5756_v9 = vsel %vm8289_vm5, %v682_v26, %v684_v60  ;;  %v517_v12 = vmul.f32 %v5551_v20, %v433_v8  ;;  %1264 = vmatmul.f32.gmra.mxu1 %v5728_v38  ;;  %v143_v26 = vadd.s32 184, %v5549_v19  ;;  %825 = vst [vmem:[#allocation2 + $0x2a8] sm:$0xff] %v599_v53  ;;  %v944_v8 = vrot.slane %v599_v53, 2 }
  0xcd   :  { %775 = vst [vmem:[#allocation2] sm:$0xff] %v5756_v9  ;;  %v911_v0 = vsel %vm8287_vm3, %v908_v22, %v910_v63  ;;  %v128_v22 = vadd.s32 64, %v5549_v19 }
  0xce   :  { %1001 = vst [vmem:[#allocation2 + $0x140] sm:$0xff] %v911_v0  ;;  %v551_v16 = vadd.f32 %v5553_v21, %v517_v12  ;;  %1603 = vmatmul.f32.gmra.mxu0 %v5609_v62  ;;  %1490 = vmatmul.f32.gmra.mxu3 %v911_v0  ;;  %v5778_v62 = vsel %vm8287_vm3, %v940_v37, %v942_v25  ;;  %v175_v35 = vand.u32 15, %v143_v26 }
  0xcf   :  { %1017 = vst [vmem:[#allocation2 + $0x90] sm:$0xff] %v5778_v62  ;;  %v160_v56 = vand.u32 15, %v128_v22  ;;  %v568_v22 = vadd.f32 %v5553_v21, %v534_v30 }
  0xd0   :  { %v583_v34 = vmax.f32 %v551_v16, 0.0  ;;  %vm5784_vm0 = vcmp.lt.s32.totalorder %v175_v35, 14  ;;  %v8383_v16 = vmov 0 }
  0xd1   :  { %v487_v17 = vpop.f32.mrf.mxu3  ;;  %v8381_v39 = vsel %vm5784_vm0, 4294967295, %v8380_v39  ;;  %v631_v6 = vsel %vm5784_vm0, %v599_v53, 0.0  ;;  %vm5803_vm0 = vcmp.ge.s32.totalorder %v160_v56, 2  ;;  %v600_v56 = vmax.f32 %v568_v22, 0.0 }
  0xd2   :  { %v615_v45 = vsel %vm5768_vm15, %v583_v34, 0.0  ;;  %809 = vst [vmem:[#allocation2 + $0xa8] sm:$0xff] %v583_v34  ;;  %v912_v50 = vrot.slane %v583_v34, 2  ;;  %v718_v12 = vrot.slane %v631_v6, 6  ;;  %v8384_v16 = vsel %vm5803_vm0, 4294967295, %v8383_v16 }
  0xd3   :  { %8382 = vst [vmem:[#allocation26_spill] sm:$0xff] %v8381_v39  ;;  %v686_v46 = vrot.slane %v615_v45, 6  ;;  %v436_v37 = vpop.f32.mrf.mxu0  ;;  %v720_v6 = vrot.slane %v600_v56, 6  ;;  %v535_v30 = vmul.f32 %v5551_v20, %v487_v17 }
  0xd4   :  { %v913_v57 = vsel %vm8287_vm3, %v910_v63, %v912_v50  ;;  %v518_v1 = vmul.f32 %v5551_v20, %v436_v37  ;;  %1267 = vmatmul.f32.gmra.mxu1 %v5756_v9  ;;  %v5800_v63 = vsel %vm8287_vm3, %v942_v25, %v944_v8  ;;  %8385 = vst [vmem:[#allocation27_spill] sm:$0xff] %v8384_v16  ;;  %v176_v25 = vand.u32 15, %v144_v15 }
  0xd5   :  { %v5794_v49 = vsel %vm8289_vm5, %v684_v60, %v686_v46  ;;  %1002 = vst [vmem:[#allocation2 + $0x2c0] sm:$0xff] %v913_v57  ;;  %v129_v60 = vadd.s32 72, %v5549_v19  ;;  %v5809_v26 = vsel %vm8289_vm5, %v716_v14, %v718_v12  ;;  %v8386_v14 = vmov 0 }
  0xd6   :  { %776 = vst [vmem:[#allocation2 + $0x378] sm:$0xff] %v5794_v49  ;;  %v552_v0 = vadd.f32 %v5553_v21, %v518_v1  ;;  %1606 = vmatmul.f32.gmra.mxu0 %v5641_v23  ;;  %1493 = vmatmul.f32.gmra.mxu3 %v913_v57  ;;  %vm5819_vm3 = vcmp.ge.s32.totalorder %v176_v25, 2  ;;  %v569_v17 = vadd.f32 %v5553_v21, %v535_v30 }
  0xd7   :  { %1018 = vst [vmem:[#allocation2 + $0x360] sm:$0xff] %v5800_v63  ;;  %v8387_v14 = vsel %vm5819_vm3, 4294967295, %v8386_v14  ;;  %v161_v53 = vand.u32 15, %v129_v60  ;;  %v145_v60 = vadd.s32 200, %v5549_v19 }
  0xd8   :  { %v584_v23 = vmax.f32 %v552_v0, 0.0  ;;  %792 = vst [vmem:[#allocation2 + $0x288] sm:$0xff] %v5809_v26  ;;  %v858_v0 = vsel %vm5819_vm3, %v600_v56, 0.0  ;;  %vm8394_vm3 = vcmask 1045504  }
  0xd9   :  { %v5815_v34 = vpop.f32.mrf.mxu3  ;;  %8388 = vst [vmem:[#allocation28_spill] sm:$0xff] %v8387_v14 }
  0xda   :  { %v688_v35 = vrot.slane %v584_v23, 6  ;;  %810 = vst [vmem:[#allocation2 + $0x260] sm:$0xff] %v584_v23  ;;  %v842_v42 = vsel %vm5803_vm0, %v584_v23, 0.0  ;;  %v8390_v23 = vmov 0 }
  0xdb   :  { %v914_v45 = vrot.slane %v842_v42, 2  ;;  %v439_v58 = vpop.f32.mrf.mxu0  ;;  %826 = vst [vmem:[#allocation2 + $0x3c0] sm:$0xff] %v600_v56  ;;  %v177_v42 = vand.u32 15, %v145_v60  ;;  %v8395_v56 = vmov 0 }
  0xdc   :  { %v5824_v37 = vsel %vm8289_vm5, %v686_v46, %v688_v35  ;;  %v519_v57 = vmul.f32 %v5551_v20, %v439_v58  ;;  %1270 = vmatmul.f32.gmra.mxu1 %v5794_v49  ;;  %v946_v46 = vrot.slane %v858_v0, 2  ;;  %vm5836_vm5 = vcmp.lt.s32.totalorder %v161_v53, 14 }
  0xdd   :  { %777 = vst [vmem:[#allocation2 + $0x2a0] sm:$0xff] %v5824_v37  ;;  %v915_v1 = vsel %vm8389_vm14, %v912_v50, %v914_v45  ;;  %v8391_v23 = vsel %vm5836_vm5, 4294967295, %v8390_v23  ;;  %v130_v50 = vadd.s32 80, %v5549_v19  ;;  %vm8393_vm14 = vcmask 1041408  }
  0xde   :  { %1003 = vst [vmem:[#allocation2 + $0x240] sm:$0xff] %v915_v1  ;;  %v553_v15 = vadd.f32 %v5553_v21, %v519_v57  ;;  %1609 = vmatmul.f32.gmra.mxu0 %v5684_v55  ;;  %1496 = vmatmul.f32.gmra.mxu3 %v915_v1  ;;  %v5842_v25 = vsel %vm8393_vm14, %v718_v12, %v720_v6  ;;  %vm5859_vm14 = vcmp.lt.s32.totalorder %v177_v42, 14  ;;  %v1155_v42 = vld [vmem:[#allocation7 + $0xf8] sm:$0xff] }
  0xdf   :  { %8392 = vst [vmem:[#allocation29_spill] sm:$0xff] %v8391_v23  ;;  %v5848_v55 = vsel %vm8394_vm3, %v944_v8, %v946_v46  ;;  %v8396_v56 = vsel %vm5859_vm14, 4294967295, %v8395_v56  ;;  %v5863_v8 = vmax.f32 %v569_v17, 0.0  ;;  %v162_v1 = vand.u32 15, %v130_v50  ;;  %1685 = vmatpush.msrb.mxu1 %v1155_v42 }
  0xe0   :  { %v5844_v22 = vmax.f32 %v553_v15, 0.0  ;;  %793 = vst [vmem:[#allocation2 + $0x78] sm:$0xff] %v5842_v25 }
  0xe1   :  { %1019 = vst [vmem:[#allocation2 + $0x3b0] sm:$0xff] %v5848_v55  ;;  %v5852_v53 = vpop.f32.mrf.mxu3  ;;  %v633_v30 = vsel %vm5859_vm14, %v5863_v8, 0.0  ;;  %vm5883_vm14 = vcmp.ge.s32.totalorder %v162_v1, 2  ;;  %v1153_v1 = vld [vmem:[#allocation7 + $0xe8] sm:$0xff] }
  0xe2   :  { %v617_v12 = vsel %vm5836_vm5, %v5844_v22, 0.0  ;;  %811 = vst [vmem:[#allocation2 + $0x110] sm:$0xff] %v5844_v22  ;;  %v916_v58 = vrot.slane %v5844_v22, 2  ;;  %v948_v22 = vrot.slane %v5863_v8, 2  ;;  %v722_v50 = vrot.slane %v633_v30, 6 }
  0xe3   :  { %8397 = vst [vmem:[#allocation30_spill] sm:$0xff] %v8396_v56  ;;  %v690_v57 = vrot.slane %v617_v12, 6  ;;  %v442_v0 = vpop.f32.mrf.mxu0  ;;  %v8400_v33 = vsel %vm5883_vm14, 4294967295, %v8399_v33 }
  0xe4   :  { %v917_v15 = vsel %vm8394_vm3, %v914_v45, %v916_v58  ;;  %v520_v60 = vmul.f32 %v5551_v20, %v442_v0  ;;  %1273 = vmatmul.f32.gmra.mxu1 %v5824_v37  ;;  %827 = vst [vmem:[#allocation2 + $0x30] sm:$0xff] %v5863_v8  ;;  %v5880_v12 = vsel %vm8394_vm3, %v946_v46, %v948_v22  ;;  %v146_v0 = vadd.s32 208, %v5549_v19  ;;  %v1154_v8 = vld [vmem:[#allocation7 + $0xf0] sm:$0xff] }
  0xe5   :  { %v5874_v17 = vsel %vm8398_vm12, %v688_v35, %v690_v57  ;;  %1004 = vst [vmem:[#allocation2 + $0x180] sm:$0xff] %v917_v15  ;;  %v131_v35 = vadd.s32 88, %v5549_v19  ;;  %v5889_v30 = vsel %vm8398_vm12, %v720_v6, %v722_v50  ;;  %1686 = vmatpush.msrb.mxu1 %v1154_v8  ;;  %v1152_v8 = vld [vmem:[#allocation7 + $0xe0] sm:$0xff] }
  0xe6   :  { %778 = vst [vmem:[#allocation2 + $0x2d0] sm:$0xff] %v5874_v17  ;;  %v554_v45 = vadd.f32 %v5553_v21, %v520_v60  ;;  %1612 = vmatmul.f32.gmra.mxu0 %v5687_v59  ;;  %1499 = vmatmul.f32.gmra.mxu3 %v917_v15  ;;  %v536_v59 = vmul.f32 %v5551_v20, %v5815_v34  ;;  %v178_v15 = vand.u32 15, %v146_v0 }
  0xe7   :  { %8401 = vst [vmem:[#allocation31_spill] sm:$0xff] %v8400_v33  ;;  %1687 = vmatpush.msrb.mxu1 %v1153_v1  ;;  %v163_v56 = vand.u32 15, %v131_v35  ;;  %v8421_v33 = vmov 0 }
  0xe8   :  { %1020 = vst [vmem:[#allocation2 + $0x1b8] sm:$0xff] %v5880_v12  ;;  %v5894_v46 = vmax.f32 %v554_v45, 0.0  ;;  %v570_v60 = vadd.f32 %v5553_v21, %v536_v59  ;;  %vm5905_vm3 = vcmp.ge.s32.totalorder %v178_v15, 2  ;;  %v8402_v45 = vmov 0 }
  0xe9   :  { %794 = vst [vmem:[#allocation2 + $0xc0] sm:$0xff] %v5889_v30  ;;  %v5898_v42 = vpop.f32.mrf.mxu3  ;;  %v8403_v45 = vsel %vm5905_vm3, 4294967295, %v8402_v45  ;;  %1688 = vmatpush.msrb.mxu1 %v1152_v8  ;;  %v8406_v8 = vmov 0 }
  0xea   :  { %v692_v6 = vrot.slane %v5894_v46, 6  ;;  %812 = vst [vmem:[#allocation2 + $0x1f0] sm:$0xff] %v5894_v46  ;;  %v844_v34 = vsel %vm5883_vm14, %v5894_v46, 0.0  ;;  %v5909_v59 = vmax.f32 %v570_v60, 0.0  ;;  %v147_v60 = vadd.s32 216, %v5549_v19 }
  0xeb   :  { %8404 = vst [vmem:[#allocation32_spill] sm:$0xff] %v8403_v45  ;;  %v918_v0 = vrot.slane %v844_v34, 2  ;;  %v445_v14 = vpop.f32.mrf.mxu0  ;;  %1689 = vmatpush.msrb.mxu1 %v1151_v3  ;;  %v537_v34 = vmul.f32 %v5551_v20, %v5852_v53  ;;  %v132_v45 = vadd.s32 96, %v5549_v19 }
  0xec   :  { %v5912_v1 = vsel %vm8398_vm12, %v690_v57, %v692_v6  ;;  %v521_v39 = vmul.f32 %v5551_v20, %v445_v14  ;;  %1276 = vmatmul.f32.gmra.mxu1 %v5874_v17  ;;  %v724_v15 = vrot.slane %v5909_v59, 6  ;;  %v860_v35 = vsel %vm5905_vm3, %v5909_v59, 0.0  ;;  %828 = vst [vmem:[#allocation2 + $0x348] sm:$0xff] %v5909_v59 }
  0xed   :  { %779 = vst [vmem:[#allocation2 + $0x1a8] sm:$0xff] %v5912_v1  ;;  %v919_v46 = vsel %vm8405_vm10, %v916_v58, %v918_v0  ;;  %v950_v14 = vrot.slane %v860_v35, 2  ;;  %v1150_v58 = vld [vmem:[#allocation7 + $0xd0] sm:$0xff]  ;;  %vm5927_vm10 = vcmp.lt.s32.totalorder %v163_v56, 14  ;;  %vm8409_vm3 = vcmask 1045504  }
  0xee   :  { %1005 = vst [vmem:[#allocation2 + $0x150] sm:$0xff] %v919_v46  ;;  %v555_v57 = vadd.f32 %v5553_v21, %v521_v39  ;;  %1615 = vmatmul.f32.gmra.mxu0 %v5728_v38  ;;  %1502 = vmatmul.f32.gmra.mxu3 %v919_v46  ;;  %v8407_v8 = vsel %vm5927_vm10, 4294967295, %v8406_v8  ;;  %v5933_v3 = vsel %vm8398_vm12, %v722_v50, %v724_v15  ;;  %v179_v53 = vand.u32 15, %v147_v60  ;;  %v1149_v46 = vld [vmem:[#allocation7 + $0xc8] sm:$0xff] }
  0xef   :  { %8408 = vst [vmem:[#allocation33_spill] sm:$0xff] %v8407_v8  ;;  %1690 = vmatpush.msrb.mxu1 %v1150_v58  ;;  %v5940_v39 = vsel %vm8409_vm3, %v948_v22, %v950_v14  ;;  %v571_v56 = vadd.f32 %v5553_v21, %v537_v34  ;;  %v8410_v35 = vmov 0  ;;  %v164_v34 = vand.u32 15, %v132_v45  ;;  %v1143_v8 = vld [vmem:[#allocation7 + $0x98] sm:$0xff] }
  0xf0   :  { %v5936_v38 = vmax.f32 %v555_v57, 0.0  ;;  %795 = vst [vmem:[#allocation2 + $0x230] sm:$0xff] %v5933_v3  ;;  %vm5949_vm12 = vcmp.lt.s32.totalorder %v179_v53, 14  ;;  %v1148_v57 = vld [vmem:[#allocation7 + $0xc0] sm:$0xff] }
  0xf1   :  { %1021 = vst [vmem:[#allocation2 + $0xf0] sm:$0xff] %v5940_v39  ;;  %1691 = vmatpush.msrb.mxu1 %v1149_v46  ;;  %v8411_v35 = vsel %vm5949_vm12, 4294967295, %v8410_v35  ;;  %v5953_v22 = vmax.f32 %v571_v56, 0.0  ;;  %v499_v46 = vpop.f32.mrf.mxu3  ;;  %v1147_v56 = vld [vmem:[#allocation7 + $0xb8] sm:$0xff] }
  0xf2   :  { %v619_v50 = vsel %vm5927_vm10, %v5936_v38, 0.0  ;;  %813 = vst [vmem:[#allocation2 + $0x310] sm:$0xff] %v5936_v38  ;;  %v920_v59 = vrot.slane %v5936_v38, 2 }
  0xf3   :  { %8412 = vst [vmem:[#allocation34_spill] sm:$0xff] %v8411_v35  ;;  %v694_v60 = vrot.slane %v619_v50, 6  ;;  %v448_v58 = vpop.f32.mrf.mxu0  ;;  %1692 = vmatpush.msrb.mxu1 %v1148_v57  ;;  %v635_v38 = vsel %vm5949_vm12, %v5953_v22, 0.0  ;;  %v952_v53 = vrot.slane %v5953_v22, 2  ;;  %vm5973_vm12 = vcmp.ge.s32.totalorder %v164_v34, 2 }
  0xf4   :  { %v921_v24 = vsel %vm8409_vm3, %v918_v0, %v920_v59  ;;  %v522_v52 = vmul.f32 %v5551_v20, %v448_v58  ;;  %1279 = vmatmul.f32.gmra.mxu1 %v5912_v1  ;;  %829 = vst [vmem:[#allocation2 + $0x1c8] sm:$0xff] %v5953_v22  ;;  %v726_v50 = vrot.slane %v635_v38, 6  ;;  %v148_v58 = vadd.s32 224, %v5549_v19  ;;  %v1146_v22 = vld [vmem:[#allocation7 + $0xb0] sm:$0xff] }
  0xf5   :  { %v5964_v45 = vsel %vm8413_vm8, %v692_v6, %v694_v60  ;;  %1006 = vst [vmem:[#allocation2 + $0x70] sm:$0xff] %v921_v24  ;;  %1693 = vmatpush.msrb.mxu1 %v1147_v56  ;;  %v5970_v57 = vsel %vm8409_vm3, %v950_v14, %v952_v53  ;;  %v8414_v35 = vmov 0  ;;  %v133_v6 = vadd.s32 104, %v5549_v19 }
  0xf6   :  { %780 = vst [vmem:[#allocation2 + $0xc8] sm:$0xff] %v5964_v45  ;;  %v556_v0 = vadd.f32 %v5553_v21, %v522_v52  ;;  %1618 = vmatmul.f32.gmra.mxu0 %v5756_v9  ;;  %1505 = vmatmul.f32.gmra.mxu3 %v921_v24  ;;  %v8415_v35 = vsel %vm5973_vm12, 4294967295, %v8414_v35  ;;  %v5979_v38 = vsel %vm8413_vm8, %v724_v15, %v726_v50  ;;  %v180_v9 = vand.u32 15, %v148_v58 }
  0xf7   :  { %8416 = vst [vmem:[#allocation35_spill] sm:$0xff] %v8415_v35  ;;  %v538_v52 = vmul.f32 %v5551_v20, %v5898_v42  ;;  %1694 = vmatpush.msrb.mxu1 %v1146_v22  ;;  %v8417_v56 = vmov 0  ;;  %v1145_v42 = vld [vmem:[#allocation7 + $0xa8] sm:$0xff]  ;;  %v165_v22 = vand.u32 15, %v133_v6  ;;  %v1144_v35 = vld [vmem:[#allocation7 + $0xa0] sm:$0xff] }
  0xf8   :  { %1022 = vst [vmem:[#allocation2 + $0x248] sm:$0xff] %v5970_v57  ;;  %v5984_v24 = vmax.f32 %v556_v0, 0.0  ;;  %vm5993_vm3 = vcmp.ge.s32.totalorder %v180_v9, 2  ;;  %v134_v9 = vadd.s32 112, %v5549_v19 }
  0xf9   :  { %796 = vst [vmem:[#allocation2 + $0x280] sm:$0xff] %v5979_v38  ;;  %v572_v14 = vadd.f32 %v5553_v21, %v538_v52  ;;  %v8418_v56 = vsel %vm5993_vm3, 4294967295, %v8417_v56  ;;  %1695 = vmatpush.msrb.mxu1 %v1145_v42  ;;  %v149_v42 = vadd.s32 232, %v5549_v19 }
  0xfa   :  { %v696_v34 = vrot.slane %v5984_v24, 6  ;;  %814 = vst [vmem:[#allocation2 + $0x328] sm:$0xff] %v5984_v24  ;;  %v846_v15 = vsel %vm5973_vm12, %v5984_v24, 0.0  ;;  %vm8439_vm12 = vcmask 1041408  }
  0xfb   :  { %8419 = vst [vmem:[#allocation36_spill] sm:$0xff] %v8418_v56  ;;  %v922_v0 = vrot.slane %v846_v15, 2  ;;  %v451_v18 = vpop.f32.mrf.mxu0  ;;  %v5997_v5 = vmax.f32 %v572_v14, 0.0  ;;  %1696 = vmatpush.msrb.mxu1 %v1144_v35 }
  0xfc   :  { %v6000_v58 = vsel %vm8413_vm8, %v694_v60, %v696_v34  ;;  %v523_v52 = vmul.f32 %v5551_v20, %v451_v18  ;;  %1282 = vmatmul.f32.gmra.mxu1 %v5964_v45  ;;  %v502_v60 = vpop.f32.mrf.mxu3 }
  0xfd   :  { %781 = vst [vmem:[#allocation2 + $0xf8] sm:$0xff] %v6000_v58  ;;  %v923_v24 = vsel %vm8420_vm6, %v920_v59, %v922_v0  ;;  %v728_v6 = vrot.slane %v5997_v5, 6  ;;  %v862_v14 = vsel %vm5993_vm3, %v5997_v5, 0.0  ;;  %v539_v59 = vmul.f32 %v5551_v20, %v499_v46  ;;  %1697 = vmatpush.msrb.mxu1 %v1143_v8 }
  0xfe   :  { %1007 = vst [vmem:[#allocation2 + $0x128] sm:$0xff] %v923_v24  ;;  %v557_v18 = vadd.f32 %v5553_v21, %v523_v52  ;;  %1621 = vmatmul.f32.gmra.mxu0 %v5794_v49  ;;  %1508 = vmatmul.f32.gmra.mxu3 %v923_v24  ;;  %v954_v15 = vrot.slane %v862_v14, 2  ;;  %vm6015_vm6 = vcmp.lt.s32.totalorder %v165_v22, 14  ;;  %vm8424_vm3 = vcmask 1045504   ;;  %v1142_v22 = vld [vmem:[#allocation7 + $0x90] sm:$0xff]  ;;  %v1141_v14 = vld [vmem:[#allocation7 + $0x88] sm:$0xff] }
  0xff   :  { %v8422_v33 = vsel %vm6015_vm6, 4294967295, %v8421_v33  ;;  %v6020_v56 = vsel %vm8413_vm8, %v726_v50, %v728_v6  ;;  %830 = vst [vmem:[#allocation2 + $0x2f0] sm:$0xff] %v5997_v5  ;;  %v181_v52 = vand.u32 15, %v149_v42  ;;  %v573_v46 = vadd.f32 %v5553_v21, %v539_v59  ;;  %1698 = vmatpush.msrb.mxu1 %v1142_v22 }
 0x100   :  { %8423 = vst [vmem:[#allocation37_spill] sm:$0xff] %v8422_v33  ;;  %v6023_v35 = vmax.f32 %v557_v18, 0.0  ;;  %v6027_v49 = vsel %vm8424_vm3, %v952_v53, %v954_v15  ;;  %v166_v24 = vand.u32 15, %v134_v9  ;;  %v8425_v50 = vmov 0 }
 0x101   :  { %797 = vst [vmem:[#allocation2 + $0x300] sm:$0xff] %v6020_v56  ;;  %vm6036_vm8 = vcmp.lt.s32.totalorder %v181_v52, 14  ;;  %v6040_v53 = vmax.f32 %v573_v46, 0.0  ;;  %1699 = vmatpush.msrb.mxu1 %v1141_v14  ;;  %v1140_v46 = vld [vmem:[#allocation7 + $0x80] sm:$0xff] }
 0x102   :  { %1023 = vst [vmem:[#allocation2 + $0x200] sm:$0xff] %v6027_v49  ;;  %v621_v5 = vsel %vm6015_vm6, %v6023_v35, 0.0  ;;  %v924_v8 = vrot.slane %v6023_v35, 2  ;;  %v8426_v50 = vsel %vm6036_vm8, 4294967295, %v8425_v50  ;;  %vm8428_vm6 = vcmask 1041408  }
 0x103   :  { %815 = vst [vmem:[#allocation2 + $0x1d0] sm:$0xff] %v6023_v35  ;;  %v698_v18 = vrot.slane %v621_v5, 6  ;;  %v454_v9 = vpop.f32.mrf.mxu0  ;;  %v637_v22 = vsel %vm6036_vm8, %v6040_v53, 0.0  ;;  %v956_v52 = vrot.slane %v6040_v53, 2  ;;  %1700 = vmatpush.msrb.mxu1 %v1140_v46  ;;  %vm8432_vm8 = vcmask 1045504   ;;  %v1216_v46 = vld [vmem:[#allocation7 + $0x278] sm:$0xff] }
 0x104   :  { %8427 = vst [vmem:[#allocation38_spill] sm:$0xff] %v8426_v50  ;;  %v925_v42 = vsel %vm8424_vm3, %v922_v0, %v924_v8  ;;  %v524_v59 = vmul.f32 %v5551_v20, %v454_v9  ;;  %1285 = vmatmul.f32.gmra.mxu1 %v6000_v58  ;;  %v730_v5 = vrot.slane %v637_v22, 6  ;;  %vm6054_vm3 = vcmp.ge.s32.totalorder %v166_v24, 2  ;;  %v505_v50 = vpop.f32.mrf.mxu3  ;;  %1346 = vmatpush.msrb.mxu2 %v1216_v46 }
 0x105   :  { %831 = vst [vmem:[#allocation2 + $0x2e8] sm:$0xff] %v6040_v53  ;;  %v6051_v33 = vsel %vm8428_vm6, %v696_v34, %v698_v18  ;;  %v8429_v0 = vmov 0  ;;  %v135_v9 = vadd.s32 120, %v5549_v19  ;;  %v6062_v53 = vsel %vm8432_vm8, %v954_v15, %v956_v52 }
 0x106   :  { %1008 = vst [vmem:[#allocation2 + $0x10] sm:$0xff] %v925_v42  ;;  %v8430_v0 = vsel %vm6054_vm3, 4294967295, %v8429_v0  ;;  %v558_v14 = vadd.f32 %v5553_v21, %v524_v59  ;;  %1624 = vmatmul.f32.gmra.mxu0 %v5824_v37  ;;  %1511 = vmatmul.f32.gmra.mxu3 %v925_v42  ;;  %v6065_v34 = vsel %vm8428_vm6, %v728_v6, %v730_v5  ;;  %v150_v24 = vadd.s32 240, %v5549_v19 }
 0x107   :  { %782 = vst [vmem:[#allocation2 + $0x118] sm:$0xff] %v6051_v33  ;;  %v540_v22 = vmul.f32 %v5551_v20, %v502_v60  ;;  %v151_v59 = vadd.s32 248, %v5549_v19  ;;  %v541_v15 = vmul.f32 %v5551_v20, %v505_v50  ;;  %v167_v31 = vand.u32 15, %v135_v9 }
 0x108   :  { %8431 = vst [vmem:[#allocation39_spill] sm:$0xff] %v8430_v0  ;;  %v6071_v37 = vmax.f32 %v558_v14, 0.0  ;;  %v182_v42 = vand.u32 15, %v150_v24  ;;  %v8433_v46 = vmov 0  ;;  %v8436_v24 = vmov 0 }
 0x109   :  { %1024 = vst [vmem:[#allocation2 + $0x188] sm:$0xff] %v6062_v53  ;;  %v574_v6 = vadd.f32 %v5553_v21, %v540_v22  ;;  %v183_v23 = vand.u32 15, %v151_v59  ;;  %v575_v14 = vadd.f32 %v5553_v21, %v541_v15  ;;  %v1215_v22 = vld [vmem:[#allocation7 + $0x270] sm:$0xff] }
 0x10a   :  { %798 = vst [vmem:[#allocation2 + $0xb8] sm:$0xff] %v6065_v34  ;;  %v700_v16 = vrot.slane %v6071_v37, 6  ;;  %v848_v60 = vsel %vm6054_vm3, %v6071_v37, 0.0  ;;  %vm6082_vm8 = vcmp.ge.s32.totalorder %v182_v42, 2  ;;  %1347 = vmatpush.msrb.mxu2 %v1215_v22  ;;  %vm8440_vm3 = vcmask 1045504  }
 0x10b   :  { %816 = vst [vmem:[#allocation2 + $0x268] sm:$0xff] %v6071_v37  ;;  %v926_v47 = vrot.slane %v848_v60, 2  ;;  %v457_v11 = vpop.f32.mrf.mxu0  ;;  %v8434_v46 = vsel %vm6082_vm8, 4294967295, %v8433_v46  ;;  %v606_v50 = vmax.f32 %v574_v6, 0.0  ;;  %vm6086_vm6 = vcmp.lt.s32.totalorder %v183_v23, 14 }
 0x10c   :  { %8435 = vst [vmem:[#allocation40_spill] sm:$0xff] %v8434_v46  ;;  %v8437_v24 = vsel %vm6086_vm6, 4294967295, %v8436_v24  ;;  %v6091_v59 = vsel %vm8439_vm12, %v698_v18, %v700_v16  ;;  %v525_v0 = vmul.f32 %v5551_v20, %v457_v11  ;;  %1288 = vmatmul.f32.gmra.mxu1 %v6051_v33  ;;  %v607_v9 = vmax.f32 %v575_v14, 0.0 }
 0x10d   :  { %8438 = vst [vmem:[#allocation41_spill] sm:$0xff] %v8437_v24  ;;  %v927_v15 = vsel %vm8440_vm3, %v924_v8, %v926_v47  ;;  %v732_v42 = vrot.slane %v606_v50, 6  ;;  %v864_v23 = vsel %vm6082_vm8, %v606_v50, 0.0  ;;  %vm6103_vm12 = vcmp.lt.s32.totalorder %v167_v31, 14 }
 0x10e   :  { %783 = vst [vmem:[#allocation2 + $0x250] sm:$0xff] %v6091_v59  ;;  %v559_v6 = vadd.f32 %v5553_v21, %v525_v0  ;;  %1627 = vmatmul.f32.gmra.mxu0 %v5874_v17  ;;  %1514 = vmatmul.f32.gmra.mxu3 %v927_v15  ;;  %v958_v18 = vrot.slane %v864_v23, 2  ;;  %v639_v20 = vsel %vm6086_vm6, %v607_v9, 0.0  ;;  %v8441_v11 = vmov 0 }
 0x10f   :  { %1009 = vst [vmem:[#allocation2 + $0x38] sm:$0xff] %v927_v15  ;;  %v8442_v11 = vsel %vm6103_vm12, 4294967295, %v8441_v11  ;;  %v136_v8 = vadd.s32 128, %v5549_v19  ;;  %vm8444_vm3 = vcmask 1041408   ;;  %v734_v14 = vrot.slane %v639_v20, 6 }
 0x110   :  { %8443 = vst [vmem:[#allocation42_spill] sm:$0xff] %v8442_v11  ;;  %v6109_v60 = vsel %vm8444_vm3, %v730_v5, %v732_v42  ;;  %v6111_v22 = vmax.f32 %v559_v6, 0.0  ;;  %vm8445_vm8 = vcmask 1045504   ;;  %vm8446_vm6 = vmmov %vm8444_vm3  ;;  %v960_v17 = vrot.slane %v607_v9, 2  ;;  %v5178_v20 = vld [vmem:[#allocation8] ss:$0 sm:$0xff] }
 0x111   :  { %832 = vst [vmem:[#allocation2 + $0xe0] sm:$0xff] %v606_v50  ;;  %v6115_v21 = vsel %vm8445_vm8, %v956_v52, %v958_v18  ;;  %v6119_v31 = vsel %vm8446_vm6, %v732_v42, %v734_v14  ;;  %v168_v15 = vand.u32 15, %v136_v8  ;;  %v1214_v52 = vld [vmem:[#allocation7 + $0x268] sm:$0xff]  ;;  %vm8447_vm6 = vmmov %vm8444_vm3  ;;  %v5179_v8 = vld [vmem:[#allocation8 + $0x1] ss:$0 sm:$0xff] }
 0x112   :  { %799 = vst [vmem:[#allocation2 + $0x98] sm:$0xff] %v6109_v60  ;;  %v623_v5 = vsel %vm6103_vm12, %v6111_v22, 0.0  ;;  %v928_v0 = vrot.slane %v6111_v22, 2  ;;  %1348 = vmatpush.msrb.mxu2 %v1214_v52  ;;  %vm8448_vm3 = vmmov %vm8445_vm8  ;;  %vm8456_vm12 = vcmask 1041408   ;;  %v6249_v11 = vld [vmem:[#allocation2 + $0x3b8] sm:$0xff] }
 0x113   :  { %1025 = vst [vmem:[#allocation2 + $0xa0] sm:$0xff] %v6115_v21  ;;  %v702_v50 = vrot.slane %v623_v5, 6  ;;  %v460_v23 = vpop.f32.mrf.mxu0  ;;  %v6133_v46 = vsel %vm8448_vm3, %v958_v18, %v960_v17 }
 0x114   :  { %817 = vst [vmem:[#allocation2 + $0x2c8] sm:$0xff] %v6111_v22  ;;  %v929_v6 = vsel %vm8445_vm8, %v926_v47, %v928_v0  ;;  %v526_v42 = vmul.f32 %v5178_v20, %v460_v23  ;;  %1291 = vmatmul.f32.gmra.mxu1 %v6091_v59  ;;  %vm6137_vm8 = vcmp.ge.s32.totalorder %v168_v15, 2  ;;  %v8449_v47 = vmov 0 }
 0x115   :  { %800 = vst [vmem:[#allocation2 + $0x148] sm:$0xff] %v6119_v31  ;;  %v6130_v24 = vsel %vm8447_vm6, %v700_v16, %v702_v50  ;;  %v8450_v47 = vsel %vm6137_vm8, 4294967295, %v8449_v47 }
 0x116   :  { %801 = vst [vmem:[#allocation2 + $0x228] sm:$0x3] %v734_v14  ;;  %v560_v5 = vadd.f32 %v5179_v8, %v526_v42  ;;  %1630 = vmatmul.f32.gmra.mxu0 %v5912_v1  ;;  %1517 = vmatmul.f32.gmra.mxu3 %v929_v6  ;;  %v137_v14 = vadd.s32 136, %v5549_v19 }
 0x117   :  { %1010 = vst [vmem:[#allocation2 + $0x108] sm:$0xff] %v929_v6  ;;  %v1213_v6 = vld [vmem:[#allocation7 + $0x260] sm:$0xff] }
 0x118   :  { %784 = vst [vmem:[#allocation2 + $0x318] sm:$0xff] %v6130_v24  ;;  %v6142_v16 = vmax.f32 %v560_v5, 0.0  ;;  %v169_v23 = vand.u32 15, %v137_v14  ;;  %1349 = vmatpush.msrb.mxu2 %v1213_v6  ;;  %v8452_v5 = vmov 0  ;;  %v5180_v6 = vld [vmem:[#allocation2 + $0x278] sm:$0xff] }
 0x119   :  { %8451 = vst [vmem:[#allocation43_spill] sm:$0xff] %v8450_v47 }
 0x11a   :  { %833 = vst [vmem:[#allocation2 + $0x160] sm:$0xff] %v607_v9  ;;  %v704_v18 = vrot.slane %v6142_v16, 6  ;;  %v850_v1 = vsel %vm6137_vm8, %v6142_v16, 0.0  ;;  %vm6158_vm8 = vcmp.lt.s32.totalorder %v169_v23, 14 }
 0x11b   :  { %1026 = vst [vmem:[#allocation2 + $0x1b0] sm:$0xff] %v6133_v46  ;;  %v930_v15 = vrot.slane %v850_v1, 2  ;;  %v463_v52 = vpop.f32.mrf.mxu0  ;;  %v8453_v5 = vsel %vm6158_vm8, 4294967295, %v8452_v5 }
 0x11c   :  { %1027 = vst [vmem:[#allocation2 + $0x80] sm:$0x3f] %v960_v17  ;;  %v6151_v19 = vsel %vm8447_vm6, %v702_v50, %v704_v18  ;;  %v527_v9 = vmul.f32 %v5178_v20, %v463_v52  ;;  %1294 = vmatmul.f32.gmra.mxu1 %v6130_v24  ;;  %vm8455_vm6 = vmmov %vm8448_vm3 }
 0x11d   :  { %818 = vst [vmem:[#allocation2 + $0x68] sm:$0xff] %v6142_v16  ;;  %v931_v17 = vsel %vm8448_vm3, %v928_v0, %v930_v15  ;;  %1297 = vmatmul.f32.vlgmr.msra.gmra.mxu2 %v6151_v19 }
 0x11e   :  { %785 = vst [vmem:[#allocation2 + $0x3c8] sm:$0xff] %v6151_v19  ;;  %v561_v42 = vadd.f32 %v5179_v8, %v527_v9  ;;  %1633 = vmatmul.f32.gmra.mxu0 %v5964_v45  ;;  %1520 = vmatmul.f32.gmra.mxu3 %v931_v17  ;;  %v1212_v8 = vld [vmem:[#allocation7 + $0x258] sm:$0xff] }
 0x11f   :  { %1011 = vst [vmem:[#allocation2 + $0xd0] sm:$0xff] %v931_v17  ;;  %1350 = vmatpush.msrb.mxu2 %v1212_v8  ;;  %v8457_v17 = vrot.slane %v5606_v61, 6 }
 0x120   :  { %8454 = vst [vmem:[#allocation44_spill] sm:$0xff] %v8453_v5  ;;  %v6162_v50 = vmax.f32 %v561_v42, 0.0  ;;  %v1206_v5 = vld [vmem:[#allocation7 + $0x228] sm:$0xff] }
 0x121   :  { %v6164_v20 = vpop.f32.mrf.mxu1 }
 0x122   :  { %v625_v14 = vsel %vm6158_vm8, %v6162_v50, 0.0  ;;  %v932_v0 = vrot.slane %v6162_v50, 2  ;;  %vm8458_vm8 = vmmov %vm8456_vm12 }
 0x123   :  { %v706_v1 = vrot.slane %v625_v14, 6  ;;  %v6170_v52 = vpop.f32.mrf.mxu0 }
 0x124   :  { %v933_v45 = vsel %vm8455_vm6, %v930_v15, %v932_v0  ;;  %v935_v23 = vsel %vm8448_vm3, %v932_v0, %v5645_v28  ;;  %1701 = vmatmul.f32.vlgmr.msrb.gmra.mxu1 %v5180_v6 }
 0x125   :  { %v6176_v9 = vsel %vm8456_vm12, %v704_v18, %v706_v1  ;;  %v709_v42 = vsel %vm8458_vm8, %v706_v1, %v8457_v17  ;;  %1012 = vst [vmem:[#allocation2 + $0x398] sm:$0xff] %v933_v45  ;;  %v1211_v18 = vld [vmem:[#allocation7 + $0x250] sm:$0xff]  ;;  %v1210_v1 = vld [vmem:[#allocation7 + $0x248] sm:$0xff]  ;;  %vm8702_vm12 = vmmov %vm8458_vm8 }
 0x126   :  { %787 = vst [vmem:[#allocation2 + $0x370] sm:$0xff] %v709_v42  ;;  %1636 = vmatmul.f32.gmra.mxu0 %v6000_v58  ;;  %1300 = vmatmul.f32.gmra.mxu2 %v6176_v9  ;;  %v6214_v17 = vld [vmem:[#allocation2 + $0x308] sm:$0xff] }
 0x127   :  { %1013 = vst [vmem:[#allocation2 + $0x1c0] sm:$0xff] %v935_v23  ;;  %1523 = vmatmul.f32.gmra.mxu3 %v933_v45  ;;  %1351 = vmatpush.msrb.mxu2 %v1211_v18  ;;  %v1208_v18 = vld [vmem:[#allocation7 + $0x238] sm:$0xff] }
 0x128   :  { %v6183_v15 = vpop.f32.mrf.mxu3 }
 0x129   :  { %v6185_v28 = vpop.f32.mrf.mxu1  ;;  %1352 = vmatpush.msrb.mxu2 %v1210_v1  ;;  %v1207_v1 = vld [vmem:[#allocation7 + $0x230] sm:$0xff] }
 0x12b   :  { %v6187_v14 = vpop.f32.mrf.mxu0 }
 0x12c   :  { %1704 = vmatmul.f32.gmra.mxu1 %v5180_v6 }
 0x12e   :  { %1639 = vmatmul.f32.gmra.mxu0 %v6051_v33  ;;  %1303 = vmatmul.f32.gmra.mxu2 %v709_v42 }
 0x12f   :  { %1526 = vmatmul.f32.gmra.mxu3 %v935_v23  ;;  %v1209_v23 = vld [vmem:[#allocation7 + $0x240] sm:$0xff] }
 0x130   :  { %1353 = vmatpush.msrb.mxu2 %v1209_v23 }
 0x131   :  { %v6190_v61 = vpop.f32.mrf.mxu1  ;;  %v6192_v58 = vpop.f32.mrf.mxu3 }
 0x132   :  { %1354 = vmatpush.msrb.mxu2 %v1208_v18  ;;  %v6238_v18 = vld [vmem:[#allocation2 + $0x338] sm:$0xff] }
 0x133   :  { %v6194_v0 = vpop.f32.mrf.mxu0 }
 0x134   :  { %1707 = vmatmul.f32.gmra.mxu1 %v5180_v6  ;;  %1355 = vmatpush.msrb.mxu2 %v1207_v1 }
 0x136   :  { %1642 = vmatmul.f32.gmra.mxu0 %v6091_v59  ;;  %1306 = vmatmul.f32.gmra.mxu2 %v5672_v43 }
 0x137   :  { %1529 = vmatmul.f32.gmra.mxu3 %v5660_v36  ;;  %1356 = vmatpush.msrb.mxu2 %v1206_v5 }
 0x139   :  { %v6199_v8 = vpop.f32.mrf.mxu1  ;;  %v6201_v33 = vpop.f32.mrf.mxu3  ;;  %1357 = vmatpush.msrb.mxu2 %v1205_v40  ;;  %v2038_v40 = vld [vmem:[#allocation7 + $0x3f0] sm:$0xff] }
 0x13b   :  { %v6203_v45 = vpop.f32.mrf.mxu0  ;;  %1358 = vmatpush.msrb.mxu2 %v1204_v41  ;;  %v6271_v41 = vld [vmem:[#allocation2 + $0xe8] sm:$0xff] }
 0x13c   :  { %1710 = vmatmul.f32.gmra.mxu1 %v5180_v6  ;;  %v6226_v6 = vld [vmem:[#allocation2 + $0x8] sm:$0xff] }
 0x13e   :  { %1645 = vmatmul.f32.gmra.mxu0 %v6130_v24  ;;  %1309 = vmatmul.f32.gmra.mxu2 %v5701_v7 }
 0x13f   :  { %1532 = vmatmul.f32.gmra.mxu3 %v5712_v13 }
 0x141   :  { %v6208_v59 = vpop.f32.mrf.mxu1  ;;  %v6210_v43 = vpop.f32.mrf.mxu3 }
 0x143   :  { %v6212_v36 = vpop.f32.mrf.mxu0 }
 0x144   :  { %1713 = vmatmul.f32.gmra.mxu1 %v6214_v17 }
 0x146   :  { %1648 = vmatmul.f32.gmra.mxu0 %v6151_v19  ;;  %1312 = vmatmul.f32.gmra.mxu2 %v5743_v51 }
 0x147   :  { %1535 = vmatmul.f32.gmra.mxu3 %v5734_v44 }
 0x149   :  { %v6220_v7 = vpop.f32.mrf.mxu1  ;;  %v6222_v13 = vpop.f32.mrf.mxu3 }
 0x14b   :  { %v6224_v24 = vpop.f32.mrf.mxu0 }
 0x14c   :  { %1716 = vmatmul.f32.gmra.mxu1 %v6226_v6 }
 0x14e   :  { %1651 = vmatmul.f32.gmra.mxu0 %v6176_v9  ;;  %1315 = vmatmul.f32.gmra.mxu2 %v5774_v32 }
 0x14f   :  { %1538 = vmatmul.f32.gmra.mxu3 %v5778_v62 }
 0x151   :  { %v6232_v19 = vpop.f32.mrf.mxu1  ;;  %v6234_v44 = vpop.f32.mrf.mxu3 }
 0x153   :  { %v6236_v23 = vpop.f32.mrf.mxu0 }
 0x154   :  { %8459 = vst [vmem:[#allocation45_spill] sm:$0xff] %v6236_v23  ;;  %1719 = vmatmul.f32.gmra.mxu1 %v6238_v18  ;;  %v1203_v23 = vld [vmem:[#allocation7 + $0x210] sm:$0xff] }
 0x155   :  { %1359 = vmatpush.msrb.mxu2 %v1203_v23  ;;  %v2018_v23 = vld [vmem:[#allocation7 + $0x350] sm:$0xff] }
 0x156   :  { %1654 = vmatmul.f32.gmra.mxu0 %v709_v42  ;;  %1318 = vmatmul.f32.gmra.mxu2 %v5809_v26 }
 0x157   :  { %1541 = vmatmul.f32.gmra.mxu3 %v5800_v63 }
 0x159   :  { %v6243_v1 = vpop.f32.mrf.mxu1  ;;  %v6245_v62 = vpop.f32.mrf.mxu3 }
 0x15a   :  { %8460 = vst [vmem:[#allocation46_spill] sm:$0xff] %v6243_v1  ;;  %v1202_v1 = vld [vmem:[#allocation7 + $0x208] sm:$0xff] }
 0x15b   :  { %v6247_v47 = vpop.f32.mrf.mxu0  ;;  %1360 = vmatpush.msrb.mxu2 %v1202_v1  ;;  %v2015_v1 = vld [vmem:[#allocation7 + $0x338] sm:$0xff] }
 0x15c   :  { %8461 = vst [vmem:[#allocation47_spill] sm:$0xff] %v6247_v47  ;;  %1722 = vmatmul.f32.gmra.mxu1 %v6249_v11 }
 0x15e   :  { %1657 = vmatmul.f32.gmra.mxu0 %v5181_v10  ;;  %1321 = vmatmul.f32.gmra.mxu2 %v5842_v25  ;;  %v2039_v10 = vld [vmem:[#allocation7 + $0x3f8] sm:$0xff] }
 0x15f   :  { %1544 = vmatmul.f32.gmra.mxu3 %v5848_v55  ;;  %2169 = vmatpush.msra.mxu0 %v2039_v10  ;;  %v2023_v55 = vld [vmem:[#allocation7 + $0x378] sm:$0xff]  ;;  %v2021_v10 = vld [vmem:[#allocation7 + $0x368] sm:$0xff] }
 0x160   :  { %2056 = vmatpush.msra.mxu3 %v2023_v55  ;;  %v2020_v55 = vld [vmem:[#allocation7 + $0x360] sm:$0xff] }
 0x161   :  { %v6254_v5 = vpop.f32.mrf.mxu1  ;;  %v6256_v63 = vpop.f32.mrf.mxu3  ;;  %2170 = vmatpush.msra.mxu0 %v2038_v40  ;;  %v2035_v40 = vld [vmem:[#allocation7 + $0x3d8] sm:$0xff] }
 0x162   :  { %8462 = vst [vmem:[#allocation48_spill] sm:$0xff] %v6254_v5 }
 0x163   :  { %8463 = vst [vmem:[#allocation49_spill] sm:$0xff] %v6256_v63  ;;  %v6258_v42 = vpop.f32.mrf.mxu0 }
 0x164   :  { %8464 = vst [vmem:[#allocation50_spill] sm:$0xff] %v6258_v42  ;;  %1725 = vmatmul.f32.gmra.mxu1 %v6260_v54  ;;  %v2022_v42 = vld [vmem:[#allocation7 + $0x370] sm:$0xff] }
 0x165   :  { %2057 = vmatpush.msra.mxu3 %v2022_v42 }
 0x166   :  { %1660 = vmatmul.f32.gmra.mxu0 %v5182_v27  ;;  %1324 = vmatmul.f32.gmra.mxu2 %v5889_v30  ;;  %v2037_v27 = vld [vmem:[#allocation7 + $0x3e8] sm:$0xff] }
 0x167   :  { %1547 = vmatmul.f32.gmra.mxu3 %v5880_v12  ;;  %2171 = vmatpush.msra.mxu0 %v2037_v27  ;;  %v2036_v12 = vld [vmem:[#allocation7 + $0x3e0] sm:$0xff] }
 0x168   :  { %2058 = vmatpush.msra.mxu3 %v2021_v10  ;;  %v2033_v10 = vld [vmem:[#allocation7 + $0x3c8] sm:$0xff] }
 0x169   :  { %v6265_v47 = vpop.f32.mrf.mxu1  ;;  %v6267_v5 = vpop.f32.mrf.mxu3  ;;  %2172 = vmatpush.msra.mxu0 %v2036_v12  ;;  %v2017_v12 = vld [vmem:[#allocation7 + $0x348] sm:$0xff] }
 0x16a   :  { %8465 = vst [vmem:[#allocation51_spill] sm:$0xff] %v6265_v47  ;;  %2059 = vmatpush.msra.mxu3 %v2020_v55  ;;  %v2019_v47 = vld [vmem:[#allocation7 + $0x358] sm:$0xff]  ;;  %v2030_v55 = vld [vmem:[#allocation7 + $0x3b0] sm:$0xff] }
 0x16b   :  { %8466 = vst [vmem:[#allocation52_spill] sm:$0xff] %v6267_v5  ;;  %v6269_v63 = vpop.f32.mrf.mxu0  ;;  %2173 = vmatpush.msra.mxu0 %v2035_v40  ;;  %v2016_v40 = vld [vmem:[#allocation7 + $0x340] sm:$0xff] }
 0x16c   :  { %8467 = vst [vmem:[#allocation53_spill] sm:$0xff] %v6269_v63  ;;  %1728 = vmatmul.f32.gmra.mxu1 %v6271_v41  ;;  %v2034_v63 = vld [vmem:[#allocation7 + $0x3d0] sm:$0xff]  ;;  %2060 = vmatpush.msra.mxu3 %v2019_v47  ;;  %v2031_v47 = vld [vmem:[#allocation7 + $0x3b8] sm:$0xff] }
 0x16d   :  { %2174 = vmatpush.msra.mxu0 %v2034_v63 }
 0x16e   :  { %1663 = vmatmul.f32.gmra.mxu0 %v5743_v51  ;;  %1327 = vmatmul.f32.gmra.mxu2 %v5933_v3  ;;  %v6283_v51 = vld [vmem:[#allocation2 + $0x158] sm:$0xff] }
 0x16f   :  { %1550 = vmatmul.f32.gmra.mxu3 %v5940_v39  ;;  %v2032_v39 = vld [vmem:[#allocation7 + $0x3c0] sm:$0xff]  ;;  %2175 = vmatpush.msra.mxu0 %v2033_v10  ;;  %v6295_v10 = vld [vmem:[#allocation2 + $0xa8] sm:$0xff] }
 0x170   :  { %2061 = vmatpush.msra.mxu3 %v2018_v23 }
 0x171   :  { %v6277_v42 = vpop.f32.mrf.mxu1  ;;  %v6279_v5 = vpop.f32.mrf.mxu3  ;;  %2176 = vmatpush.msra.mxu0 %v2032_v39  ;;  %v2014_v39 = vld [vmem:[#allocation7 + $0x330] sm:$0xff] }
 0x172   :  { %8468 = vst [vmem:[#allocation54_spill] sm:$0xff] %v6277_v42  ;;  %2062 = vmatpush.msra.mxu3 %v2017_v12  ;;  %v1201_v42 = vld [vmem:[#allocation7 + $0x200] sm:$0xff]  ;;  %v2027_v12 = vld [vmem:[#allocation7 + $0x398] sm:$0xff] }
 0x173   :  { %v6281_v27 = vpop.f32.mrf.mxu0  ;;  %2177 = vmatpush.msra.mxu0 %v2031_v47  ;;  %1361 = vmatpush.msrb.mxu2 %v1201_v42  ;;  %v2013_v47 = vld [vmem:[#allocation7 + $0x328] sm:$0xff]  ;;  %v2012_v42 = vld [vmem:[#allocation7 + $0x320] sm:$0xff] }
 0x174   :  { %8469 = vst [vmem:[#allocation55_spill] sm:$0xff] %v6281_v27  ;;  %1731 = vmatmul.f32.gmra.mxu1 %v6283_v51  ;;  %2063 = vmatpush.msra.mxu3 %v2016_v40  ;;  %v2026_v40 = vld [vmem:[#allocation7 + $0x390] sm:$0xff] }
 0x175   :  { %2178 = vmatpush.msra.mxu0 %v2030_v55 }
 0x176   :  { %1666 = vmatmul.f32.gmra.mxu0 %v5774_v32  ;;  %1330 = vmatmul.f32.gmra.mxu2 %v5979_v38  ;;  %v2029_v32 = vld [vmem:[#allocation7 + $0x3a8] sm:$0xff] }
 0x177   :  { %1553 = vmatmul.f32.gmra.mxu3 %v5970_v57  ;;  %v2028_v57 = vld [vmem:[#allocation7 + $0x3a0] sm:$0xff]  ;;  %2179 = vmatpush.msra.mxu0 %v2029_v32 }
 0x178   :  { %2064 = vmatpush.msra.mxu3 %v2015_v1  ;;  %v6307_v32 = vld [vmem:[#allocation2 + $0x260] sm:$0xff] }
 0x179   :  { %v6289_v63 = vpop.f32.mrf.mxu1  ;;  %v6291_v27 = vpop.f32.mrf.mxu3  ;;  %2180 = vmatpush.msra.mxu0 %v2028_v57  ;;  %v2011_v57 = vld [vmem:[#allocation7 + $0x318] sm:$0xff] }
 0x17a   :  { %8470 = vst [vmem:[#allocation56_spill] sm:$0xff] %v6289_v63  ;;  %2065 = vmatpush.msra.mxu3 %v2014_v39  ;;  %v2010_v39 = vld [vmem:[#allocation7 + $0x310] sm:$0xff] }
 0x17b   :  { %8471 = vst [vmem:[#allocation57_spill] sm:$0xff] %v6291_v27  ;;  %v6293_v23 = vpop.f32.mrf.mxu0  ;;  %2181 = vmatpush.msra.mxu0 %v2027_v12  ;;  %v1158_v63 = vld [vmem:[#allocation7 + $0x110] sm:$0xff]  ;;  %v1157_v27 = vld [vmem:[#allocation7 + $0x108] sm:$0xff] }
 0x17c   :  { %8472 = vst [vmem:[#allocation58_spill] sm:$0xff] %v6293_v23  ;;  %1734 = vmatmul.f32.gmra.mxu1 %v6295_v10  ;;  %2066 = vmatpush.msra.mxu3 %v2013_v47 }
 0x17d   :  { %2182 = vmatpush.msra.mxu0 %v2026_v40  ;;  %v2009_v40 = vld [vmem:[#allocation7 + $0x308] sm:$0xff] }
 0x17e   :  { %1669 = vmatmul.f32.gmra.mxu0 %v5809_v26  ;;  %1333 = vmatmul.f32.gmra.mxu2 %v6020_v56  ;;  %v2025_v26 = vld [vmem:[#allocation7 + $0x388] sm:$0xff]  ;;  %v2024_v56 = vld [vmem:[#allocation7 + $0x380] sm:$0xff] }
 0x17f   :  { %1556 = vmatmul.f32.gmra.mxu3 %v6027_v49  ;;  %v1171_v49 = vld [vmem:[#allocation7 + $0x178] sm:$0xff]  ;;  %2183 = vmatpush.msra.mxu0 %v2025_v26  ;;  %v6319_v26 = vld [vmem:[#allocation2 + $0x110] sm:$0xff] }
 0x180   :  { %2067 = vmatpush.msra.mxu3 %v2012_v42  ;;  %1798 = vmatpush.msra.mxu2 %v1171_v49  ;;  %v6331_v49 = vld [vmem:[#allocation2 + $0x1f0] sm:$0xff] }
 0x181   :  { %v6301_v55 = vpop.f32.mrf.mxu1  ;;  %v6303_v23 = vpop.f32.mrf.mxu3  ;;  %2184 = vmatpush.msra.mxu0 %v2024_v56 }
 0x182   :  { %8473 = vst [vmem:[#allocation59_spill] sm:$0xff] %v6301_v55  ;;  %2068 = vmatpush.msra.mxu3 %v2011_v57  ;;  %v1170_v57 = vld [vmem:[#allocation7 + $0x170] sm:$0xff]  ;;  %v1160_v55 = vld [vmem:[#allocation7 + $0x120] sm:$0xff] }
 0x183   :  { %8474 = vst [vmem:[#allocation60_spill] sm:$0xff] %v6303_v23  ;;  %v6305_v1 = vpop.f32.mrf.mxu0  ;;  %1799 = vmatpush.msra.mxu2 %v1170_v57  ;;  %v6356_v57 = vld [vmem:[#allocation2 + $0x328] sm:$0xff] }
 0x184   :  { %8475 = vst [vmem:[#allocation61_spill] sm:$0xff] %v6305_v1  ;;  %1737 = vmatmul.f32.gmra.mxu1 %v6307_v32  ;;  %2069 = vmatpush.msra.mxu3 %v2010_v39  ;;  %v6343_v39 = vld [vmem:[#allocation2 + $0x310] sm:$0xff] }
 0x186   :  { %1672 = vmatmul.f32.gmra.mxu0 %v5842_v25  ;;  %1336 = vmatmul.f32.gmra.mxu2 %v6065_v34  ;;  %v2008_v25 = vld [vmem:[#allocation7 + $0x300] sm:$0xff] }
 0x187   :  { %1559 = vmatmul.f32.gmra.mxu3 %v6062_v53 }
 0x188   :  { %2070 = vmatpush.msra.mxu3 %v2009_v40  ;;  %v1183_v40 = vld [vmem:[#allocation2 + $0x80] sm:$0xff] }
 0x189   :  { %v6313_v12 = vpop.f32.mrf.mxu1  ;;  %v6315_v47 = vpop.f32.mrf.mxu3 }
 0x18a   :  { %8476 = vst [vmem:[#allocation62_spill] sm:$0xff] %v6313_v12  ;;  %2071 = vmatpush.msra.mxu3 %v2008_v25 }
 0x18b   :  { %8477 = vst [vmem:[#allocation63_spill] sm:$0xff] %v6315_v47  ;;  %v6317_v42 = vpop.f32.mrf.mxu0 }
 0x18c   :  { %8478 = vst [vmem:[#allocation64_spill] sm:$0xff] %v6317_v42  ;;  %1740 = vmatmul.f32.gmra.mxu1 %v6319_v26  ;;  %v2052_v42 = vld [vmem:[#allocation7 + $0x460] sm:$0xff] }
 0x18e   :  { %1675 = vmatmul.f32.gmra.mxu0 %v5889_v30  ;;  %1339 = vmatmul.f32.gmra.mxu2 %v6109_v60 }
 0x18f   :  { %1562 = vmatmul.f32.gmra.mxu3 %v6115_v21 }
 0x191   :  { %v6325_v53 = vpop.f32.mrf.mxu1  ;;  %v6327_v34 = vpop.f32.mrf.mxu3 }
 0x192   :  { %8479 = vst [vmem:[#allocation65_spill] sm:$0xff] %v6325_v53 }
 0x193   :  { %8480 = vst [vmem:[#allocation66_spill] sm:$0xff] %v6327_v34  ;;  %v6329_v56 = vpop.f32.mrf.mxu0  ;;  %v6473_v34 = vld [vmem:[#allocation2 + $0x380] sm:$0xff] }
 0x194   :  { %8481 = vst [vmem:[#allocation67_spill] sm:$0xff] %v6329_v56  ;;  %1743 = vmatmul.f32.gmra.mxu1 %v6331_v49 }
 0x196   :  { %1678 = vmatmul.f32.gmra.mxu0 %v5933_v3  ;;  %1342 = vmatmul.f32.gmra.mxu2 %v6119_v31 }
 0x197   :  { %1565 = vmatmul.f32.gmra.mxu3 %v6133_v46 }
 0x199   :  { %v6337_v30 = vpop.f32.mrf.mxu1  ;;  %v6339_v60 = vpop.f32.mrf.mxu3 }
 0x19a   :  { %8482 = vst [vmem:[#allocation68_spill] sm:$0xff] %v6337_v30  ;;  %v2054_v30 = vld [vmem:[#allocation7 + $0x470] sm:$0xff] }
 0x19b   :  { %8483 = vst [vmem:[#allocation69_spill] sm:$0xff] %v6339_v60  ;;  %v6341_v21 = vpop.f32.mrf.mxu0 }
 0x19c   :  { %8484 = vst [vmem:[#allocation70_spill] sm:$0xff] %v6341_v21  ;;  %1746 = vmatmul.f32.gmra.mxu1 %v6343_v39  ;;  %v1169_v21 = vld [vmem:[#allocation7 + $0x168] sm:$0xff] }
 0x19d   :  { %1800 = vmatpush.msra.mxu2 %v1169_v21  ;;  %v1914_v21 = vld [vmem:[#allocation2 + $0x2d8] sm:$0xff] }
 0x19e   :  { %1681 = vmatmul.f32.gmra.mxu0 %v5979_v38  ;;  %1362 = vmatmul.f32.vlgmr.msrb.gmra.mxu2 %v6214_v17  ;;  %v1911_v38 = vld [vmem:[#allocation2 + $0x20] sm:$0xff] }
 0x19f   :  { %1568 = vmatmul.f32.gmra.mxu3 %v1183_v40 }
 0x1a0   :  { %v6348_v3 = vpop.f32.mrf.mxu2 }
 0x1a1   :  { %8485 = vst [vmem:[#allocation71_spill] sm:$0xff] %v6348_v3  ;;  %v6350_v31 = vpop.f32.mrf.mxu1  ;;  %v6352_v46 = vpop.f32.mrf.mxu3 }
 0x1a2   :  { %8486 = vst [vmem:[#allocation72_spill] sm:$0xff] %v6352_v46 }
 0x1a3   :  { %v6354_v25 = vpop.f32.mrf.mxu0 }
 0x1a4   :  { %8487 = vst [vmem:[#allocation73_spill] sm:$0xff] %v6354_v25  ;;  %1749 = vmatmul.f32.gmra.mxu1 %v6356_v57 }
 0x1a6   :  { %2185 = vmatmul.f32.vlgmr.msra.gmra.mxu0 %v6260_v54  ;;  %1365 = vmatmul.f32.gmra.mxu2 %v6226_v6 }
 0x1a7   :  { %2072 = vmatmul.f32.vlgmr.msra.gmra.mxu3 %v1911_v38 }
 0x1a9   :  { %v6361_v17 = vpop.f32.mrf.mxu1  ;;  %v6363_v40 = vpop.f32.mrf.mxu2 }
 0x1aa   :  { %8488 = vst [vmem:[#allocation74_spill] sm:$0xff] %v6363_v40  ;;  %v6365_v3 = vpop.f32.mrf.mxu3  ;;  %v1168_v40 = vld [vmem:[#allocation7 + $0x160] sm:$0xff] }
 0x1ab   :  { %8489 = vst [vmem:[#allocation75_spill] sm:$0xff] %v6365_v3  ;;  %v6367_v46 = vpop.f32.mrf.mxu0  ;;  %1801 = vmatpush.msra.mxu2 %v1168_v40  ;;  %v1920_v40 = vld [vmem:[#allocation2 + $0x378] sm:$0xff] }
 0x1ac   :  { %8490 = vst [vmem:[#allocation76_spill] sm:$0xff] %v6367_v46  ;;  %1752 = vmatmul.f32.gmra.mxu1 %v6023_v35  ;;  %v1917_v35 = vld [vmem:[#allocation2] sm:$0xff] }
 0x1ae   :  { %2188 = vmatmul.f32.gmra.mxu0 %v6271_v41  ;;  %1368 = vmatmul.f32.gmra.mxu2 %v6238_v18 }
 0x1af   :  { %2075 = vmatmul.f32.gmra.mxu3 %v1914_v21 }
 0x1b1   :  { %v6372_v25 = vpop.f32.mrf.mxu1  ;;  %v6374_v6 = vpop.f32.mrf.mxu2 }
 0x1b2   :  { %8491 = vst [vmem:[#allocation77_spill] sm:$0xff] %v6374_v6  ;;  %v6376_v38 = vpop.f32.mrf.mxu3 }
 0x1b3   :  { %8492 = vst [vmem:[#allocation78_spill] sm:$0xff] %v6376_v38  ;;  %v6378_v56 = vpop.f32.mrf.mxu0 }
 0x1b4   :  { %8493 = vst [vmem:[#allocation79_spill] sm:$0xff] %v6378_v56  ;;  %1755 = vmatmul.f32.gmra.mxu1 %v6071_v37 }
 0x1b6   :  { %2191 = vmatmul.f32.gmra.mxu0 %v6283_v51  ;;  %1371 = vmatmul.f32.gmra.mxu2 %v6249_v11 }
 0x1b7   :  { %2078 = vmatmul.f32.gmra.mxu3 %v1917_v35 }
 0x1b9   :  { %v6383_v18 = vpop.f32.mrf.mxu1  ;;  %v6385_v21 = vpop.f32.mrf.mxu2 }
 0x1ba   :  { %8494 = vst [vmem:[#allocation80_spill] sm:$0xff] %v6385_v21  ;;  %v6387_v46 = vpop.f32.mrf.mxu3  ;;  %v1167_v21 = vld [vmem:[#allocation7 + $0x158] sm:$0xff] }
 0x1bb   :  { %8495 = vst [vmem:[#allocation81_spill] sm:$0xff] %v6387_v46  ;;  %v6389_v6 = vpop.f32.mrf.mxu0  ;;  %1802 = vmatpush.msra.mxu2 %v1167_v21  ;;  %v1926_v21 = vld [vmem:[#allocation2 + $0x2d0] sm:$0xff] }
 0x1bc   :  { %8496 = vst [vmem:[#allocation82_spill] sm:$0xff] %v6389_v6  ;;  %1758 = vmatmul.f32.gmra.mxu1 %v6111_v22  ;;  %v1923_v6 = vld [vmem:[#allocation2 + $0x2a0] sm:$0xff] }
 0x1be   :  { %2194 = vmatmul.f32.gmra.mxu0 %v6295_v10  ;;  %1374 = vmatmul.f32.gmra.mxu2 %v6260_v54 }
 0x1bf   :  { %2081 = vmatmul.f32.gmra.mxu3 %v1920_v40 }
 0x1c1   :  { %v6394_v56 = vpop.f32.mrf.mxu1  ;;  %v6396_v11 = vpop.f32.mrf.mxu2 }
 0x1c2   :  { %8497 = vst [vmem:[#allocation83_spill] sm:$0xff] %v6396_v11  ;;  %v6398_v35 = vpop.f32.mrf.mxu3 }
 0x1c3   :  { %8498 = vst [vmem:[#allocation84_spill] sm:$0xff] %v6398_v35  ;;  %v6400_v38 = vpop.f32.mrf.mxu0 }
 0x1c4   :  { %8499 = vst [vmem:[#allocation85_spill] sm:$0xff] %v6400_v38  ;;  %1761 = vmatmul.f32.gmra.mxu1 %v6142_v16 }
 0x1c6   :  { %2197 = vmatmul.f32.gmra.mxu0 %v6307_v32  ;;  %1377 = vmatmul.f32.gmra.mxu2 %v6271_v41 }
 0x1c7   :  { %2084 = vmatmul.f32.gmra.mxu3 %v1923_v6 }
 0x1c9   :  { %v6405_v54 = vpop.f32.mrf.mxu1  ;;  %v6407_v40 = vpop.f32.mrf.mxu2 }
 0x1ca   :  { %8500 = vst [vmem:[#allocation86_spill] sm:$0xff] %v6407_v40  ;;  %v6409_v46 = vpop.f32.mrf.mxu3  ;;  %v6424_v40 = vld [vmem:[#allocation2 + $0x330] sm:$0xff] }
 0x1cb   :  { %8501 = vst [vmem:[#allocation87_spill] sm:$0xff] %v6409_v46  ;;  %v6411_v11 = vpop.f32.mrf.mxu0 }
 0x1cc   :  { %8502 = vst [vmem:[#allocation88_spill] sm:$0xff] %v6411_v11  ;;  %1764 = vmatmul.f32.gmra.mxu1 %v6162_v50  ;;  %v1166_v11 = vld [vmem:[#allocation7 + $0x150] sm:$0xff] }
 0x1cd   :  { %1803 = vmatpush.msra.mxu2 %v1166_v11  ;;  %v1932_v11 = vld [vmem:[#allocation2 + $0xc8] sm:$0xff] }
 0x1ce   :  { %2200 = vmatmul.f32.gmra.mxu0 %v6319_v26  ;;  %1380 = vmatmul.f32.gmra.mxu2 %v6283_v51  ;;  %v1929_v51 = vld [vmem:[#allocation2 + $0x1a8] sm:$0xff] }
 0x1cf   :  { %2087 = vmatmul.f32.gmra.mxu3 %v1926_v21 }
 0x1d1   :  { %v6416_v38 = vpop.f32.mrf.mxu2  ;;  %v6418_v41 = vpop.f32.mrf.mxu1 }
 0x1d2   :  { %8503 = vst [vmem:[#allocation89_spill] sm:$0xff] %v6416_v38  ;;  %v6420_v6 = vpop.f32.mrf.mxu3 }
 0x1d3   :  { %8504 = vst [vmem:[#allocation90_spill] sm:$0xff] %v6420_v6  ;;  %v6422_v35 = vpop.f32.mrf.mxu0  ;;  %v6435_v6 = vld [vmem:[#allocation2 + $0x2f8] sm:$0xff] }
 0x1d4   :  { %8505 = vst [vmem:[#allocation91_spill] sm:$0xff] %v6422_v35  ;;  %1767 = vmatmul.f32.gmra.mxu1 %v6424_v40 }
 0x1d6   :  { %2203 = vmatmul.f32.gmra.mxu0 %v6331_v49  ;;  %1383 = vmatmul.f32.gmra.mxu2 %v6295_v10 }
 0x1d7   :  { %2090 = vmatmul.f32.gmra.mxu3 %v1929_v51 }
 0x1d9   :  { %v6429_v21 = vpop.f32.mrf.mxu2  ;;  %v6437_v35 = vpop.f32.mrf.mxu1 }
 0x1da   :  { %8506 = vst [vmem:[#allocation92_spill] sm:$0xff] %v6429_v21  ;;  %v6431_v38 = vpop.f32.mrf.mxu3 }
 0x1db   :  { %8507 = vst [vmem:[#allocation93_spill] sm:$0xff] %v6431_v38  ;;  %v6433_v46 = vpop.f32.mrf.mxu0  ;;  %v6448_v38 = vld [vmem:[#allocation2 + $0x2b8] sm:$0xff] }
 0x1dc   :  { %8508 = vst [vmem:[#allocation94_spill] sm:$0xff] %v6433_v46  ;;  %1770 = vmatmul.f32.gmra.mxu1 %v6435_v6  ;;  %v1165_v46 = vld [vmem:[#allocation7 + $0x148] sm:$0xff] }
 0x1dd   :  { %1804 = vmatpush.msra.mxu2 %v1165_v46  ;;  %v6461_v46 = vld [vmem:[#allocation2 + $0x210] sm:$0xff] }
 0x1de   :  { %2206 = vmatmul.f32.gmra.mxu0 %v6343_v39  ;;  %1386 = vmatmul.f32.gmra.mxu2 %v6307_v32  ;;  %v1935_v32 = vld [vmem:[#allocation2 + $0xf8] sm:$0xff] }
 0x1df   :  { %2093 = vmatmul.f32.gmra.mxu3 %v1932_v11  ;;  %v2055_v11 = vld [vmem:[#allocation7 + $0x478] sm:$0xff] }
 0x1e0   :  { %2282 = vmatpush.msra.mxu1 %v2055_v11  ;;  %v2051_v11 = vld [vmem:[#allocation7 + $0x458] sm:$0xff] }
 0x1e1   :  { %v6442_v10 = vpop.f32.mrf.mxu2  ;;  %v6451_v3 = vpop.f32.mrf.mxu1 }
 0x1e2   :  { %8509 = vst [vmem:[#allocation95_spill] sm:$0xff] %v6442_v10  ;;  %v6444_v51 = vpop.f32.mrf.mxu3  ;;  %2283 = vmatpush.msra.mxu1 %v2054_v30 }
 0x1e3   :  { %8510 = vst [vmem:[#allocation96_spill] sm:$0xff] %v6444_v51  ;;  %v6446_v21 = vpop.f32.mrf.mxu0  ;;  %v2053_v51 = vld [vmem:[#allocation7 + $0x468] sm:$0xff] }
 0x1e4   :  { %8511 = vst [vmem:[#allocation97_spill] sm:$0xff] %v6446_v21  ;;  %1773 = vmatmul.f32.gmra.mxu1 %v6448_v38 }
 0x1e5   :  { %8512 = vst [vmem:[#allocation98_spill] sm:$0xff] %v6451_v3  ;;  %2284 = vmatpush.msra.mxu1 %v2053_v51  ;;  %v2049_v51 = vld [vmem:[#allocation7 + $0x448] sm:$0xff]  ;;  %v1946_v3 = vld [vmem:[#allocation2 + $0xd0] sm:$0xff] }
 0x1e6   :  { %2209 = vmatmul.f32.gmra.mxu0 %v6356_v57  ;;  %1389 = vmatmul.f32.gmra.mxu2 %v6319_v26  ;;  %v1939_v26 = vld [vmem:[#allocation2 + $0x1d0] sm:$0xff] }
 0x1e7   :  { %2096 = vmatmul.f32.gmra.mxu3 %v1935_v32  ;;  %2285 = vmatpush.msra.mxu1 %v2052_v42  ;;  %v1938_v32 = vld [vmem:[#allocation2 + $0x118] sm:$0xff]  ;;  %v2048_v42 = vld [vmem:[#allocation7 + $0x440] sm:$0xff] }
 0x1e9   :  { %v6455_v10 = vpop.f32.mrf.mxu2  ;;  %2286 = vmatpush.msra.mxu1 %v2051_v11  ;;  %v6465_v30 = vpop.f32.mrf.mxu1  ;;  %v2046_v11 = vld [vmem:[#allocation7 + $0x430] sm:$0xff] }
 0x1ea   :  { %8513 = vst [vmem:[#allocation99_spill] sm:$0xff] %v6455_v10  ;;  %v6457_v21 = vpop.f32.mrf.mxu3  ;;  %v2050_v10 = vld [vmem:[#allocation7 + $0x450] sm:$0xff] }
 0x1eb   :  { %8514 = vst [vmem:[#allocation100_spill] sm:$0xff] %v6457_v21  ;;  %v6459_v60 = vpop.f32.mrf.mxu0  ;;  %2287 = vmatpush.msra.mxu1 %v2050_v10  ;;  %v2047_v10 = vld [vmem:[#allocation7 + $0x438] sm:$0xff] }
 0x1ec   :  { %8515 = vst [vmem:[#allocation101_spill] sm:$0xff] %v6459_v60  ;;  %1776 = vmatmul.f32.gmra.mxu1 %v6461_v46 }
 0x1ed   :  { %8516 = vst [vmem:[#allocation102_spill] sm:$0xff] %v6465_v30  ;;  %2288 = vmatpush.msra.mxu1 %v2049_v51 }
 0x1ee   :  { %2212 = vmatmul.f32.gmra.mxu0 %v1939_v26  ;;  %1392 = vmatmul.f32.gmra.mxu2 %v6331_v49  ;;  %v1164_v49 = vld [vmem:[#allocation7 + $0x140] sm:$0xff]  ;;  %v1942_v26 = vld [vmem:[#allocation2 + $0x268] sm:$0xff] }
 0x1ef   :  { %2099 = vmatmul.f32.gmra.mxu3 %v1938_v32  ;;  %2289 = vmatpush.msra.mxu1 %v2048_v42  ;;  %v1941_v32 = vld [vmem:[#allocation2 + $0x250] sm:$0xff]  ;;  %v6485_v42 = vld [vmem:[#allocation2 + $0x2a8] sm:$0xff] }
 0x1f0   :  { %1805 = vmatpush.msra.mxu2 %v1164_v49  ;;  %v2044_v49 = vld [vmem:[#allocation7 + $0x420] sm:$0xff] }
 0x1f1   :  { %v6467_v21 = vpop.f32.mrf.mxu2  ;;  %2290 = vmatpush.msra.mxu1 %v2047_v10  ;;  %v2042_v10 = vld [vmem:[#allocation7 + $0x410] sm:$0xff] }
 0x1f2   :  { %8517 = vst [vmem:[#allocation103_spill] sm:$0xff] %v6467_v21  ;;  %v6469_v60 = vpop.f32.mrf.mxu3 }
 0x1f3   :  { %8518 = vst [vmem:[#allocation104_spill] sm:$0xff] %v6469_v60  ;;  %v6471_v53 = vpop.f32.mrf.mxu0  ;;  %2291 = vmatpush.msra.mxu1 %v2046_v11  ;;  %v2045_v60 = vld [vmem:[#allocation7 + $0x428] sm:$0xff] }
 0x1f4   :  { %8519 = vst [vmem:[#allocation105_spill] sm:$0xff] %v6471_v53  ;;  %1779 = vmatmul.f32.gmra.mxu1 %v6473_v34  ;;  %v6479_v53 = vpop.f32.mrf.mxu1 }
 0x1f5   :  { %8521 = vst [vmem:[#allocation107_spill] sm:$0xff] %v6479_v53  ;;  %2292 = vmatpush.msra.mxu1 %v2045_v60 }
 0x1f6   :  { %2215 = vmatmul.f32.gmra.mxu0 %v1942_v26  ;;  %1395 = vmatmul.f32.gmra.mxu2 %v6343_v39  ;;  %v1945_v39 = vld [vmem:[#allocation2 + $0x2c8] sm:$0xff]  ;;  %v1944_v26 = vld [vmem:[#allocation2 + $0x318] sm:$0xff] }
 0x1f7   :  { %2102 = vmatmul.f32.gmra.mxu3 %v1941_v32  ;;  %2293 = vmatpush.msra.mxu1 %v2044_v49  ;;  %v2043_v32 = vld [vmem:[#allocation7 + $0x418] sm:$0xff]  ;;  %v2040_v49 = vld [vmem:[#allocation7 + $0x400] sm:$0xff] }
 0x1f9   :  { %v6477_v21 = vpop.f32.mrf.mxu2  ;;  %2294 = vmatpush.msra.mxu1 %v2043_v32  ;;  %v1947_v32 = vld [vmem:[#allocation2 + $0x3c8] sm:$0xff] }
 0x1fa   :  { %8520 = vst [vmem:[#allocation106_spill] sm:$0xff] %v6477_v21  ;;  %v6481_v51 = vpop.f32.mrf.mxu3  ;;  %v2041_v21 = vld [vmem:[#allocation7 + $0x408] sm:$0xff] }
 0x1fb   :  { %8522 = vst [vmem:[#allocation108_spill] sm:$0xff] %v6481_v51  ;;  %v6483_v1 = vpop.f32.mrf.mxu0  ;;  %2295 = vmatpush.msra.mxu1 %v2042_v10  ;;  %v6495_v51 = vld [vmem:[#allocation2 + $0x3c0] sm:$0xff] }
 0x1fc   :  { %8523 = vst [vmem:[#allocation109_spill] sm:$0xff] %v6483_v1  ;;  %1782 = vmatmul.f32.gmra.mxu1 %v6485_v42  ;;  %v6497_v12 = vpop.f32.mrf.mxu1 }
 0x1fd   :  { %2296 = vmatpush.msra.mxu1 %v2041_v21  ;;  %8527 = vst [vmem:[#allocation113_spill] sm:$0xff] %v6497_v12  ;;  %v6506_v21 = vld [vmem:[#allocation2 + $0x30] sm:$0xff] }
 0x1fe   :  { %2218 = vmatmul.f32.gmra.mxu0 %v1945_v39  ;;  %1398 = vmatmul.f32.gmra.mxu2 %v6356_v57  ;;  %v1163_v39 = vld [vmem:[#allocation7 + $0x138] sm:$0xff]  ;;  %v1948_v57 = vld [vmem:[#allocation2 + $0x68] sm:$0xff] }
 0x1ff   :  { %2105 = vmatmul.f32.gmra.mxu3 %v1944_v26  ;;  %1806 = vmatpush.msra.mxu2 %v1163_v39  ;;  %v5183_v26 = vld [vmem:[#allocation2 + $0x1d0] sm:$0xff] }
 0x200   :  { %2297 = vmatpush.msra.mxu1 %v2040_v49 }
 0x201   :  { %v6489_v11 = vpop.f32.mrf.mxu2 }
 0x202   :  { %8524 = vst [vmem:[#allocation110_spill] sm:$0xff] %v6489_v11  ;;  %v6491_v1 = vpop.f32.mrf.mxu3 }
 0x203   :  { %8525 = vst [vmem:[#allocation111_spill] sm:$0xff] %v6491_v1  ;;  %v6493_v60 = vpop.f32.mrf.mxu0 }
 0x204   :  { %8526 = vst [vmem:[#allocation112_spill] sm:$0xff] %v6493_v60  ;;  %1785 = vmatmul.f32.gmra.mxu1 %v6495_v51  ;;  %v6509_v1 = vpop.f32.mrf.mxu1 }
 0x205   :  { %8531 = vst [vmem:[#allocation117_spill] sm:$0xff] %v6509_v1  ;;  %v1916_v1 = vld [vmem:[#allocation2 + $0x140] sm:$0xff] }
 0x206   :  { %2221 = vmatmul.f32.gmra.mxu0 %v1948_v57  ;;  %1401 = vmatmul.f32.gmra.mxu2 %v5183_v26  ;;  %v6520_v26 = vld [vmem:[#allocation2 + $0x348] sm:$0xff] }
 0x207   :  { %2108 = vmatmul.f32.gmra.mxu3 %v1947_v32  ;;  %v1162_v32 = vld [vmem:[#allocation7 + $0x130] sm:$0xff] }
 0x208   :  { %1807 = vmatpush.msra.mxu2 %v1162_v32  ;;  %v1956_v32 = vld [vmem:[#allocation2 + $0x178] sm:$0xff] }
 0x209   :  { %v6500_v10 = vpop.f32.mrf.mxu2 }
 0x20a   :  { %8528 = vst [vmem:[#allocation114_spill] sm:$0xff] %v6500_v10  ;;  %v6502_v60 = vpop.f32.mrf.mxu3 }
 0x20b   :  { %8529 = vst [vmem:[#allocation115_spill] sm:$0xff] %v6502_v60  ;;  %v6504_v11 = vpop.f32.mrf.mxu0  ;;  %v1161_v60 = vld [vmem:[#allocation7 + $0x128] sm:$0xff] }
 0x20c   :  { %8530 = vst [vmem:[#allocation116_spill] sm:$0xff] %v6504_v11  ;;  %1788 = vmatmul.f32.gmra.mxu1 %v6506_v21  ;;  %v1953_v11 = vld [vmem:[#allocation2 + $0x370] sm:$0xff]  ;;  %1808 = vmatpush.msra.mxu2 %v1161_v60  ;;  %v1962_v60 = vld [vmem:[#allocation2 + $0x58] sm:$0xff] }
 0x20e   :  { %2224 = vmatmul.f32.gmra.mxu0 %v6162_v50  ;;  %1404 = vmatmul.f32.gmra.mxu2 %v6071_v37  ;;  %v6525_v37 = vpop.f32.mrf.mxu1 }
 0x20f   :  { %2111 = vmatmul.f32.gmra.mxu3 %v6176_v9  ;;  %8535 = vst [vmem:[#allocation121_spill] sm:$0xff] %v6525_v37  ;;  %1809 = vmatpush.msra.mxu2 %v1160_v55  ;;  %v1968_v55 = vld [vmem:[#allocation2 + $0x288] sm:$0xff] }
 0x211   :  { %v6514_v49 = vpop.f32.mrf.mxu2 }
 0x212   :  { %8532 = vst [vmem:[#allocation118_spill] sm:$0xff] %v6514_v49  ;;  %v6516_v39 = vpop.f32.mrf.mxu3 }
 0x213   :  { %8533 = vst [vmem:[#allocation119_spill] sm:$0xff] %v6516_v39  ;;  %v6518_v57 = vpop.f32.mrf.mxu0 }
 0x214   :  { %8534 = vst [vmem:[#allocation120_spill] sm:$0xff] %v6518_v57  ;;  %1791 = vmatmul.f32.gmra.mxu1 %v6520_v26  ;;  %v6533_v57 = vld [vmem:[#allocation2 + $0x1c8] sm:$0xff] }
 0x216   :  { %2227 = vmatmul.f32.gmra.mxu0 %v6424_v40  ;;  %1407 = vmatmul.f32.gmra.mxu2 %v6111_v22 }
 0x217   :  { %2114 = vmatmul.f32.gmra.mxu3 %v1953_v11  ;;  %v6540_v11 = vpop.f32.mrf.mxu1 }
 0x218   :  { %8539 = vst [vmem:[#allocation125_spill] sm:$0xff] %v6540_v11 }
 0x219   :  { %v6527_v9 = vpop.f32.mrf.mxu2 }
 0x21a   :  { %8536 = vst [vmem:[#allocation122_spill] sm:$0xff] %v6527_v9  ;;  %v6529_v49 = vpop.f32.mrf.mxu3 }
 0x21b   :  { %8537 = vst [vmem:[#allocation123_spill] sm:$0xff] %v6529_v49  ;;  %v6531_v39 = vpop.f32.mrf.mxu0  ;;  %v1913_v49 = vld [vmem:[#allocation2 + $0x1f8] sm:$0xff] }
 0x21c   :  { %8538 = vst [vmem:[#allocation124_spill] sm:$0xff] %v6531_v39  ;;  %1794 = vmatmul.f32.gmra.mxu1 %v6533_v57  ;;  %v1959_v39 = vld [vmem:[#allocation2 + $0x170] sm:$0xff] }
 0x21e   :  { %2230 = vmatmul.f32.gmra.mxu0 %v6435_v6  ;;  %1410 = vmatmul.f32.gmra.mxu2 %v6142_v16 }
 0x21f   :  { %2117 = vmatmul.f32.gmra.mxu3 %v1956_v32  ;;  %v6550_v11 = vpop.f32.mrf.mxu1 }
 0x220   :  { %8541 = vst [vmem:[#allocation127_spill] sm:$0xff] %v6550_v11  ;;  %v1922_v11 = vld [vmem:[#allocation2 + $0x240] sm:$0xff] }
 0x221   :  { %v6538_v22 = vpop.f32.mrf.mxu2 }
 0x222   :  { %v6542_v10 = vpop.f32.mrf.mxu3 }
 0x223   :  { %8540 = vst [vmem:[#allocation126_spill] sm:$0xff] %v6542_v10  ;;  %v2186_v9 = vpop.f32.mrf.mxu0  ;;  %v1919_v10 = vld [vmem:[#allocation2 + $0x2c0] sm:$0xff] }
 0x224   :  { %2298 = vmatmul.f32.vlgmr.msra.gmra.mxu1 %v1913_v49 }
 0x226   :  { %2233 = vmatmul.f32.gmra.mxu0 %v6448_v38  ;;  %1413 = vmatmul.f32.gmra.mxu2 %v6162_v50 }
 0x227   :  { %2120 = vmatmul.f32.gmra.mxu3 %v1959_v39 }
 0x229   :  { %v6546_v16 = vpop.f32.mrf.mxu2 }
 0x22a   :  { %v2073_v32 = vpop.f32.mrf.mxu3 }
 0x22b   :  { %v2189_v37 = vpop.f32.mrf.mxu0  ;;  %v6548_v12 = vadd.f32 %v2186_v9, %v2073_v32  ;;  %v6558_v9 = vpop.f32.mrf.mxu1 }
 0x22c   :  { %2301 = vmatmul.f32.gmra.mxu1 %v1916_v1  ;;  %8542 = vst [vmem:[#allocation128_spill] sm:$0xff] %v6558_v9  ;;  %v1965_v1 = vld [vmem:[#allocation2 + $0x198] sm:$0xff] }
 0x22d   :  { %v1159_v9 = vld [vmem:[#allocation7 + $0x118] sm:$0xff] }
 0x22e   :  { %2236 = vmatmul.f32.gmra.mxu0 %v6461_v46  ;;  %1416 = vmatmul.f32.gmra.mxu2 %v6424_v40 }
 0x22f   :  { %2123 = vmatmul.f32.gmra.mxu3 %v1962_v60  ;;  %1810 = vmatpush.msra.mxu2 %v1159_v9  ;;  %v1974_v9 = vld [vmem:[#allocation2 + $0xc0] sm:$0xff] }
 0x231   :  { %v6554_v49 = vpop.f32.mrf.mxu2  ;;  %1811 = vmatpush.msra.mxu2 %v1158_v63  ;;  %v1980_v63 = vld [vmem:[#allocation2 + $0x280] sm:$0xff] }
 0x232   :  { %v2076_v50 = vpop.f32.mrf.mxu3 }
 0x233   :  { %v2192_v39 = vpop.f32.mrf.mxu0  ;;  %v6556_v47 = vadd.f32 %v2189_v37, %v2076_v50  ;;  %v1925_v50 = vld [vmem:[#allocation2 + $0x180] sm:$0xff]  ;;  %1812 = vmatpush.msra.mxu2 %v1157_v27 }
 0x234   :  { %2304 = vmatmul.f32.gmra.mxu1 %v1919_v10  ;;  %v6568_v10 = vpop.f32.mrf.mxu1 }
 0x235   :  { %8543 = vst [vmem:[#allocation129_spill] sm:$0xff] %v6568_v10 }
 0x236   :  { %2239 = vmatmul.f32.gmra.mxu0 %v6473_v34  ;;  %1419 = vmatmul.f32.gmra.mxu2 %v6435_v6 }
 0x237   :  { %2126 = vmatmul.f32.gmra.mxu3 %v1965_v1 }
 0x239   :  { %v6562_v40 = vpop.f32.mrf.mxu2 }
 0x23a   :  { %v2079_v32 = vpop.f32.mrf.mxu3 }
 0x23b   :  { %v2195_v60 = vpop.f32.mrf.mxu0  ;;  %v6564_v53 = vadd.f32 %v2192_v39, %v2079_v32 }
 0x23c   :  { %2307 = vmatmul.f32.gmra.mxu1 %v1922_v11  ;;  %v1971_v11 = vld [vmem:[#allocation2 + $0x78] sm:$0xff]  ;;  %v6578_v39 = vpop.f32.mrf.mxu1 }
 0x23d   :  { %8544 = vst [vmem:[#allocation130_spill] sm:$0xff] %v6578_v39 }
 0x23e   :  { %2242 = vmatmul.f32.gmra.mxu0 %v6485_v42  ;;  %1422 = vmatmul.f32.gmra.mxu2 %v6448_v38 }
 0x23f   :  { %2129 = vmatmul.f32.gmra.mxu3 %v1968_v55  ;;  %v1928_v55 = vld [vmem:[#allocation2 + $0x150] sm:$0xff] }
 0x241   :  { %v6570_v37 = vpop.f32.mrf.mxu2 }
 0x242   :  { %v2082_v6 = vpop.f32.mrf.mxu3 }
 0x243   :  { %v6572_v1 = vadd.f32 %v2195_v60, %v2082_v6  ;;  %v2198_v23 = vpop.f32.mrf.mxu0 }
 0x244   :  { %2310 = vmatmul.f32.gmra.mxu1 %v1925_v50  ;;  %v1931_v50 = vld [vmem:[#allocation2 + $0x70] sm:$0xff]  ;;  %v6588_v39 = vpop.f32.mrf.mxu1 }
 0x245   :  { %8545 = vst [vmem:[#allocation131_spill] sm:$0xff] %v6588_v39 }
 0x246   :  { %2245 = vmatmul.f32.gmra.mxu0 %v6495_v51  ;;  %1425 = vmatmul.f32.gmra.mxu2 %v6461_v46 }
 0x247   :  { %2132 = vmatmul.f32.gmra.mxu3 %v1971_v11 }
 0x249   :  { %v6576_v38 = vpop.f32.mrf.mxu2 }
 0x24a   :  { %v2085_v32 = vpop.f32.mrf.mxu3 }
 0x24b   :  { %v6580_v10 = vadd.f32 %v2198_v23, %v2085_v32  ;;  %v2201_v60 = vpop.f32.mrf.mxu0  ;;  %v1977_v23 = vld [vmem:[#allocation2 + $0x230] sm:$0xff] }
 0x24c   :  { %2313 = vmatmul.f32.gmra.mxu1 %v1928_v55 }
 0x24e   :  { %2248 = vmatmul.f32.gmra.mxu0 %v6506_v21  ;;  %1428 = vmatmul.f32.gmra.mxu2 %v6473_v34 }
 0x24f   :  { %2135 = vmatmul.f32.gmra.mxu3 %v1974_v9  ;;  %v1934_v9 = vld [vmem:[#allocation2 + $0x128] sm:$0xff] }
 0x251   :  { %v6584_v6 = vpop.f32.mrf.mxu2 }
 0x252   :  { %v2088_v46 = vpop.f32.mrf.mxu3 }
 0x253   :  { %v6586_v11 = vadd.f32 %v2201_v60, %v2088_v46  ;;  %v2204_v34 = vpop.f32.mrf.mxu0  ;;  %v6596_v60 = vpop.f32.mrf.mxu1 }
 0x254   :  { %2316 = vmatmul.f32.gmra.mxu1 %v1931_v50  ;;  %8546 = vst [vmem:[#allocation132_spill] sm:$0xff] %v6596_v60  ;;  %v1987_v60 = vld [vmem:[#allocation2 + $0x2e8] sm:$0xff] }
 0x256   :  { %2251 = vmatmul.f32.gmra.mxu0 %v6520_v26  ;;  %1431 = vmatmul.f32.gmra.mxu2 %v6485_v42 }
 0x257   :  { %2138 = vmatmul.f32.gmra.mxu3 %v1977_v23  ;;  %v1937_v23 = vld [vmem:[#allocation2 + $0x10] sm:$0xff] }
 0x259   :  { %v6592_v32 = vpop.f32.mrf.mxu2 }
 0x25a   :  { %v2091_v55 = vpop.f32.mrf.mxu3 }
 0x25b   :  { %v6594_v30 = vadd.f32 %v2204_v34, %v2091_v55  ;;  %v2207_v42 = vpop.f32.mrf.mxu0  ;;  %v1984_v34 = vld [vmem:[#allocation2 + $0x2f0] sm:$0xff]  ;;  %v1983_v55 = vld [vmem:[#allocation2 + $0x300] sm:$0xff] }
 0x25c   :  { %2319 = vmatmul.f32.gmra.mxu1 %v1934_v9  ;;  %v6605_v9 = vpop.f32.mrf.mxu1 }
 0x25d   :  { %8547 = vst [vmem:[#allocation133_spill] sm:$0xff] %v6605_v9  ;;  %v1989_v9 = vld [vmem:[#allocation2 + $0x98] sm:$0xff] }
 0x25e   :  { %2254 = vmatmul.f32.gmra.mxu0 %v6533_v57  ;;  %1434 = vmatmul.f32.gmra.mxu2 %v6495_v51 }
 0x25f   :  { %2141 = vmatmul.f32.gmra.mxu3 %v1980_v63  ;;  %v1940_v63 = vld [vmem:[#allocation2 + $0x38] sm:$0xff] }
 0x261   :  { %v6600_v46 = vpop.f32.mrf.mxu2 }
 0x262   :  { %v2094_v50 = vpop.f32.mrf.mxu3 }
 0x263   :  { %v6602_v39 = vadd.f32 %v2207_v42, %v2094_v50  ;;  %v1986_v42 = vld [vmem:[#allocation2 + $0xb8] sm:$0xff] }
 0x264   :  { %2322 = vmatmul.f32.gmra.mxu1 %v1937_v23  ;;  %v6612_v27 = vpop.f32.mrf.mxu1  ;;  %v1943_v23 = vld [vmem:[#allocation2 + $0x108] sm:$0xff] }
 0x265   :  { %8549 = vst [vmem:[#allocation135_spill] sm:$0xff] %v6612_v27  ;;  %v1992_v27 = vld [vmem:[#allocation2 + $0x148] sm:$0xff] }
 0x266   :  { %2257 = vmatmul.f32.gmra.mxu0 %v1984_v34  ;;  %1437 = vmatmul.f32.gmra.mxu2 %v6506_v21  ;;  %v1156_v21 = vld [vmem:[#allocation7 + $0x100] sm:$0xff] }
 0x267   :  { %2144 = vmatmul.f32.gmra.mxu3 %v1983_v55  ;;  %1813 = vmatpush.msra.mxu2 %v1156_v21  ;;  %v1990_v55 = vld [vmem:[#allocation2 + $0xe0] sm:$0xff]  ;;  %v297_v21 = vld [vmem:[#allocation5 + $0x78] sm:$0xff] }
 0x269   :  { %v6607_v51 = vpop.f32.mrf.mxu2  ;;  %2527 = vmatpush.msrb.mxu2 %v297_v21  ;;  %v296_v21 = vld [vmem:[#allocation5 + $0x70] sm:$0xff] }
 0x26b   :  { %2528 = vmatpush.msrb.mxu2 %v296_v21  ;;  %v1961_v21 = vld [vmem:[#allocation2 + $0x190] sm:$0xff] }
 0x26c   :  { %2325 = vmatmul.f32.gmra.mxu1 %v1940_v63 }
 0x26e   :  { %2260 = vmatmul.f32.gmra.mxu0 %v1987_v60  ;;  %1440 = vmatmul.f32.gmra.mxu2 %v6520_v26  ;;  %v6617_v26 = vpop.f32.mrf.mxu1 }
 0x26f   :  { %2147 = vmatmul.f32.gmra.mxu3 %v1986_v42  ;;  %8551 = vst [vmem:[#allocation137_spill] sm:$0xff] %v6617_v26  ;;  %v1993_v42 = vld [vmem:[#allocation2 + $0x160] sm:$0xff] }
 0x271   :  { %v6610_v50 = vpop.f32.mrf.mxu2 }
 0x272   :  { %8548 = vst [vmem:[#allocation134_spill] sm:$0xff] %v6610_v50 }
 0x274   :  { %2328 = vmatmul.f32.gmra.mxu1 %v1943_v23  ;;  %v1949_v23 = vld [vmem:[#allocation2 + $0x398] sm:$0xff] }
 0x276   :  { %2263 = vmatmul.f32.gmra.mxu0 %v1990_v55  ;;  %1443 = vmatmul.f32.gmra.mxu2 %v6533_v57  ;;  %v6621_v57 = vpop.f32.mrf.mxu1 }
 0x277   :  { %2150 = vmatmul.f32.gmra.mxu3 %v1989_v9  ;;  %8552 = vst [vmem:[#allocation138_spill] sm:$0xff] %v6621_v57  ;;  %v1995_v9 = vld [vmem:[#allocation2 + $0x228] sm:$0xff] }
 0x279   :  { %v6615_v63 = vpop.f32.mrf.mxu2 }
 0x27a   :  { %8550 = vst [vmem:[#allocation136_spill] sm:$0xff] %v6615_v63  ;;  %v6623_v63 = vld [vmem:[#allocation2 + $0x278] sm:$0xff] }
 0x27c   :  { %2331 = vmatmul.f32.gmra.mxu1 %v1946_v3 }
 0x27e   :  { %2266 = vmatmul.f32.gmra.mxu0 %v1993_v42  ;;  %1446 = vmatmul.f32.gmra.mxu2 %v1984_v34  ;;  %v1952_v34 = vld [vmem:[#allocation2 + $0x1c0] sm:$0xff] }
 0x27f   :  { %2153 = vmatmul.f32.gmra.mxu3 %v1992_v27  ;;  %v6630_v27 = vpop.f32.mrf.mxu1 }
 0x280   :  { %8554 = vst [vmem:[#allocation140_spill] sm:$0xff] %v6630_v27  ;;  %v295_v27 = vld [vmem:[#allocation5 + $0x68] sm:$0xff] }
 0x281   :  { %v6619_v50 = vpop.f32.mrf.mxu2  ;;  %2529 = vmatpush.msrb.mxu2 %v295_v27 }
 0x284   :  { %2334 = vmatmul.f32.gmra.mxu1 %v1949_v23 }
 0x286   :  { %1449 = vmatmul.f32.gmra.mxu2 %v1987_v60  ;;  %2269 = vmatmul.f32.gmra.mxu0 %v6623_v63  ;;  %v1955_v60 = vld [vmem:[#allocation2 + $0x320] sm:$0xff] }
 0x287   :  { %2156 = vmatmul.f32.gmra.mxu3 %v1995_v9 }
 0x289   :  { %v6626_v3 = vpop.f32.mrf.mxu2 }
 0x28a   :  { %8553 = vst [vmem:[#allocation139_spill] sm:$0xff] %v6626_v3  ;;  %v2723_v3 = vld [vmem:[#allocation5 + $0xf0] sm:$0xff] }
 0x28c   :  { %2337 = vmatmul.f32.gmra.mxu1 %v1952_v34  ;;  %v1958_v34 = vld [vmem:[#allocation2 + $0x1a0] sm:$0xff] }
 0x28e   :  { %1452 = vmatmul.f32.gmra.mxu2 %v1990_v55  ;;  %2272 = vmatmul.f32.gmra.mxu0 %v6623_v63  ;;  %v6638_v55 = vpop.f32.mrf.mxu1 }
 0x28f   :  { %2159 = vmatmul.f32.gmra.mxu3 %v6623_v63  ;;  %8557 = vst [vmem:[#allocation143_spill] sm:$0xff] %v6638_v55  ;;  %v1964_v55 = vld [vmem:[#allocation2 + $0x90] sm:$0xff] }
 0x291   :  { %v6632_v23 = vpop.f32.mrf.mxu2 }
 0x292   :  { %8555 = vst [vmem:[#allocation141_spill] sm:$0xff] %v6632_v23  ;;  %v1039_v23 = vld [vmem:[#allocation2 + $0x3d8] sm:$0xff] }
 0x294   :  { %2340 = vmatmul.f32.gmra.mxu1 %v1955_v60 }
 0x296   :  { %1455 = vmatmul.f32.gmra.mxu2 %v1993_v42  ;;  %2275 = vmatmul.f32.gmra.mxu0 %v6623_v63  ;;  %v6645_v42 = vpop.f32.mrf.mxu1 }
 0x297   :  { %2162 = vmatmul.f32.gmra.mxu3 %v6623_v63  ;;  %8559 = vst [vmem:[#allocation145_spill] sm:$0xff] %v6645_v42  ;;  %v1970_v42 = vld [vmem:[#allocation2 + $0x3b0] sm:$0xff] }
 0x299   :  { %v6636_v9 = vpop.f32.mrf.mxu2 }
 0x29a   :  { %8556 = vst [vmem:[#allocation142_spill] sm:$0xff] %v6636_v9  ;;  %v1967_v9 = vld [vmem:[#allocation2 + $0x360] sm:$0xff] }
 0x29c   :  { %2343 = vmatmul.f32.gmra.mxu1 %v1958_v34 }
 0x29e   :  { %1814 = vmatmul.f32.vlgmr.msra.gmra.mxu2 %v6623_v63  ;;  %2278 = vmatmul.f32.gmra.mxu0 %v6623_v63  ;;  %v6650_v34 = vpop.f32.mrf.mxu1 }
 0x29f   :  { %2165 = vmatmul.f32.gmra.mxu3 %v6623_v63  ;;  %8561 = vst [vmem:[#allocation147_spill] sm:$0xff] %v6650_v34 }
 0x2a1   :  { %v6643_v60 = vpop.f32.mrf.mxu2 }
 0x2a2   :  { %8558 = vst [vmem:[#allocation144_spill] sm:$0xff] %v6643_v60  ;;  %v294_v60 = vld [vmem:[#allocation5 + $0x60] sm:$0xff] }
 0x2a3   :  { %2530 = vmatpush.msrb.mxu2 %v294_v60 }
 0x2a4   :  { %2346 = vmatmul.f32.gmra.mxu1 %v1961_v21 }
 0x2a6   :  { %1817 = vmatmul.f32.gmra.mxu2 %v6623_v63  ;;  %v6655_v21 = vpop.f32.mrf.mxu1 }
 0x2a7   :  { %8563 = vst [vmem:[#allocation149_spill] sm:$0xff] %v6655_v21  ;;  %v292_v21 = vld [vmem:[#allocation5 + $0x50] sm:$0xff] }
 0x2a9   :  { %v6648_v57 = vpop.f32.mrf.mxu2 }
 0x2aa   :  { %8560 = vst [vmem:[#allocation146_spill] sm:$0xff] %v6648_v57  ;;  %v1973_v57 = vld [vmem:[#allocation2 + $0x1b8] sm:$0xff] }
 0x2ac   :  { %2349 = vmatmul.f32.gmra.mxu1 %v1964_v55 }
 0x2ae   :  { %1820 = vmatmul.f32.gmra.mxu2 %v6623_v63  ;;  %v6662_v34 = vpop.f32.mrf.mxu1 }
 0x2af   :  { %8566 = vst [vmem:[#allocation152_spill] sm:$0xff] %v6662_v34 }
 0x2b1   :  { %v6653_v26 = vpop.f32.mrf.mxu2 }
 0x2b2   :  { %8562 = vst [vmem:[#allocation148_spill] sm:$0xff] %v6653_v26  ;;  %v293_v26 = vld [vmem:[#allocation5 + $0x58] sm:$0xff] }
 0x2b3   :  { %2531 = vmatpush.msrb.mxu2 %v293_v26 }
 0x2b4   :  { %2352 = vmatmul.f32.gmra.mxu1 %v1967_v9 }
 0x2b5   :  { %2532 = vmatpush.msrb.mxu2 %v292_v21 }
 0x2b6   :  { %1823 = vmatmul.f32.gmra.mxu2 %v1039_v23  ;;  %v1976_v23 = vld [vmem:[#allocation2 + $0xf0] sm:$0xff]  ;;  %v6667_v60 = vpop.f32.mrf.mxu1 }
 0x2b7   :  { %8568 = vst [vmem:[#allocation154_spill] sm:$0xff] %v6667_v60 }
 0x2b9   :  { %v6657_v27 = vpop.f32.mrf.mxu2 }
 0x2ba   :  { %8564 = vst [vmem:[#allocation150_spill] sm:$0xff] %v6657_v27  ;;  %v5189_v27 = vld [vmem:[#allocation2 + $0x180] sm:$0xff] }
 0x2bc   :  { %2355 = vmatmul.f32.gmra.mxu1 %v1970_v42 }
 0x2be   :  { %1826 = vmatmul.f32.gmra.mxu2 %v5585_v48  ;;  %v1979_v48 = vld [vmem:[#allocation2 + $0x248] sm:$0xff]  ;;  %v6672_v34 = vpop.f32.mrf.mxu1 }
 0x2c1   :  { %v6660_v55 = vpop.f32.mrf.mxu2 }
 0x2c2   :  { %8565 = vst [vmem:[#allocation151_spill] sm:$0xff] %v6660_v55  ;;  %v1991_v55 = vld [vmem:[#allocation2 + $0x1b0] sm:$0xff] }
 0x2c4   :  { %2358 = vmatmul.f32.gmra.mxu1 %v1973_v57  ;;  %v5185_v57 = vld [vmem:[#allocation2 + $0x1f8] sm:$0xff] }
 0x2c6   :  { %1829 = vmatmul.f32.gmra.mxu2 %v5615_v4  ;;  %v1982_v4 = vld [vmem:[#allocation2 + $0x200] sm:$0xff]  ;;  %v6677_v60 = vpop.f32.mrf.mxu1 }
 0x2c9   :  { %v6665_v9 = vpop.f32.mrf.mxu2 }
 0x2ca   :  { %8567 = vst [vmem:[#allocation153_spill] sm:$0xff] %v6665_v9 }
 0x2cc   :  { %2361 = vmatmul.f32.gmra.mxu1 %v1976_v23 }
 0x2ce   :  { %1832 = vmatmul.f32.gmra.mxu2 %v5648_v29  ;;  %v1985_v29 = vld [vmem:[#allocation2 + $0x188] sm:$0xff]  ;;  %v6683_v9 = vpop.f32.mrf.mxu1 }
 0x2d1   :  { %v6670_v42 = vpop.f32.mrf.mxu2 }
 0x2d2   :  { %8569 = vst [vmem:[#allocation155_spill] sm:$0xff] %v6670_v42  ;;  %v291_v42 = vld [vmem:[#allocation5 + $0x48] sm:$0xff] }
 0x2d3   :  { %2533 = vmatpush.msrb.mxu2 %v291_v42 }
 0x2d4   :  { %2364 = vmatmul.f32.gmra.mxu1 %v1979_v48  ;;  %v5186_v48 = vld [vmem:[#allocation2 + $0x140] sm:$0xff] }
 0x2d6   :  { %1835 = vmatmul.f32.gmra.mxu2 %v5695_v2  ;;  %v1988_v2 = vld [vmem:[#allocation2 + $0xa0] sm:$0xff] }
 0x2d9   :  { %v6675_v26 = vpop.f32.mrf.mxu2 }
 0x2da   :  { %8570 = vst [vmem:[#allocation156_spill] sm:$0xff] %v6675_v26  ;;  %v5187_v26 = vld [vmem:[#allocation2 + $0x2c0] sm:$0xff] }
 0x2dc   :  { %2367 = vmatmul.f32.gmra.mxu1 %v1982_v4 }
 0x2de   :  { %1838 = vmatmul.f32.gmra.mxu2 %v5185_v57  ;;  %v290_v57 = vld [vmem:[#allocation5 + $0x40] sm:$0xff] }
 0x2df   :  { %2534 = vmatpush.msrb.mxu2 %v290_v57  ;;  %v5190_v57 = vld [vmem:[#allocation2 + $0x150] sm:$0xff] }
 0x2e1   :  { %v6679_v23 = vpop.f32.mrf.mxu2 }
 0x2e2   :  { %8571 = vst [vmem:[#allocation157_spill] sm:$0xff] %v6679_v23  ;;  %v6687_v23 = vpop.f32.mrf.mxu1 }
 0x2e4   :  { %2370 = vmatmul.f32.gmra.mxu1 %v1985_v29  ;;  %v5188_v29 = vld [vmem:[#allocation2 + $0x240] sm:$0xff] }
 0x2e6   :  { %1841 = vmatmul.f32.gmra.mxu2 %v5186_v48  ;;  %v1994_v48 = vld [vmem:[#allocation2 + $0x80] sm:$0xff] }
 0x2e9   :  { %v6681_v21 = vpop.f32.mrf.mxu2 }
 0x2ea   :  { %8572 = vst [vmem:[#allocation158_spill] sm:$0xff] %v6681_v21  ;;  %v6691_v21 = vpop.f32.mrf.mxu1 }
 0x2ec   :  { %2373 = vmatmul.f32.gmra.mxu1 %v1988_v2 }
 0x2ee   :  { %1844 = vmatmul.f32.gmra.mxu2 %v5187_v26  ;;  %v289_v26 = vld [vmem:[#allocation5 + $0x38] sm:$0xff] }
 0x2ef   :  { %2535 = vmatpush.msrb.mxu2 %v289_v26  ;;  %v1364_v26 = vadd.f32 %v6538_v22, %v6164_v20  ;;  %v5193_v20 = vld [vmem:[#allocation2 + $0x10] sm:$0xff] }
 0x2f1   :  { %v6685_v4 = vpop.f32.mrf.mxu2 }
 0x2f2   :  { %8573 = vst [vmem:[#allocation159_spill] sm:$0xff] %v6685_v4  ;;  %v6696_v4 = vpop.f32.mrf.mxu1 }
 0x2f4   :  { %2376 = vmatmul.f32.gmra.mxu1 %v1991_v55 }
 0x2f6   :  { %1847 = vmatmul.f32.gmra.mxu2 %v5188_v29  ;;  %v2724_v29 = vld [vmem:[#allocation5 + $0xf8] sm:$0xff] }
 0x2f7   :  { %2742 = vmatpush.msrb.mxu3 %v2724_v29 }
 0x2f9   :  { %v6689_v42 = vpop.f32.mrf.mxu2  ;;  %2743 = vmatpush.msrb.mxu3 %v2723_v3 }
 0x2fa   :  { %8574 = vst [vmem:[#allocation160_spill] sm:$0xff] %v6689_v42 }
 0x2fc   :  { %2379 = vmatmul.f32.gmra.mxu1 %v1994_v48  ;;  %v5191_v48 = vld [vmem:[#allocation2 + $0x70] sm:$0xff] }
 0x2fe   :  { %1850 = vmatmul.f32.gmra.mxu2 %v5189_v27  ;;  %v6703_v27 = vpop.f32.mrf.mxu1 }
 0x301   :  { %v6693_v2 = vpop.f32.mrf.mxu2 }
 0x302   :  { %8575 = vst [vmem:[#allocation161_spill] sm:$0xff] %v6693_v2  ;;  %v288_v2 = vld [vmem:[#allocation5 + $0x30] sm:$0xff] }
 0x303   :  { %2536 = vmatpush.msrb.mxu2 %v288_v2 }
 0x304   :  { %2382 = vmatmul.f32.gmra.mxu1 %v6623_v63 }
 0x306   :  { %1853 = vmatmul.f32.gmra.mxu2 %v5190_v57  ;;  %v5192_v57 = vld [vmem:[#allocation2 + $0x128] sm:$0xff] }
 0x309   :  { %v6698_v55 = vpop.f32.mrf.mxu2 }
 0x30a   :  { %8576 = vst [vmem:[#allocation162_spill] sm:$0xff] %v6698_v55  ;;  %v1477_v55 = vadd.f32 %v6183_v15, %v1364_v26  ;;  %v2300_v26 = vadd.f32 %v6672_v34, %v6548_v12  ;;  %v2303_v12 = vadd.f32 %v6677_v60, %v6556_v47  ;;  %v2306_v47 = vadd.f32 %v6683_v9, %v6564_v53 }
 0x30b   :  { %v2309_v53 = vadd.f32 %v6687_v23, %v6572_v1  ;;  %v2312_v1 = vadd.f32 %v6691_v21, %v6580_v10  ;;  %v2315_v10 = vadd.f32 %v6696_v4, %v6586_v11  ;;  %v2318_v11 = vadd.f32 %v6703_v27, %v6594_v30 }
 0x30c   :  { %2385 = vmatmul.f32.gmra.mxu1 %v6623_v63  ;;  %v1590_v2 = vadd.f32 %v6170_v52, %v1477_v55 }
 0x30e   :  { %1856 = vmatmul.f32.gmra.mxu2 %v5191_v48  ;;  %v1367_v48 = vadd.f32 %v6546_v16, %v6185_v28  ;;  %v1370_v28 = vadd.f32 %v6554_v49, %v6190_v61  ;;  %v1373_v61 = vadd.f32 %v6562_v40, %v6199_v8  ;;  %v1376_v8 = vadd.f32 %v6570_v37, %v6208_v59 }
 0x30f   :  { %v1379_v59 = vadd.f32 %v6576_v38, %v6220_v7  ;;  %v1382_v7 = vadd.f32 %v6584_v6, %v6232_v19 }
 0x310   :  { %v1480_v22 = vadd.f32 %v6192_v58, %v1367_v48  ;;  %v1483_v58 = vadd.f32 %v6201_v33, %v1370_v28  ;;  %v2722_v48 = vld [vmem:[#allocation5 + $0xe8] sm:$0xff]  ;;  %v1486_v33 = vadd.f32 %v6210_v43, %v1373_v61  ;;  %v1489_v43 = vadd.f32 %v6222_v13, %v1376_v8  ;;  %v285_v28 = vld [vmem:[#allocation5 + $0x18] sm:$0xff]  ;;  %v284_v61 = vld [vmem:[#allocation5 + $0x10] sm:$0xff] }
 0x311   :  { %v6701_v42 = vpop.f32.mrf.mxu2  ;;  %2744 = vmatpush.msrb.mxu3 %v2722_v48  ;;  %v1492_v13 = vadd.f32 %v6234_v44, %v1379_v59  ;;  %v1495_v44 = vadd.f32 %v6245_v62, %v1382_v7  ;;  %v2719_v8 = vld [vmem:[#allocation5 + $0xd0] sm:$0xff] }
 0x312   :  { %8577 = vst [vmem:[#allocation163_spill] sm:$0xff] %v6701_v42  ;;  %v6713_v42 = vpop.f32.mrf.mxu1  ;;  %v1593_v52 = vadd.f32 %v6187_v14, %v1480_v22  ;;  %v1596_v14 = vadd.f32 %v6194_v0, %v1483_v58  ;;  %v1599_v0 = vadd.f32 %v6203_v45, %v1486_v33  ;;  %v5196_v22 = vld [vmem:[#allocation2 + $0xd0] sm:$0xff]  ;;  %v1602_v45 = vadd.f32 %v6212_v36, %v1489_v43  ;;  %v2720_v58 = vld [vmem:[#allocation5 + $0xd8] sm:$0xff]  ;;  %v8583_v33 = vld [vmem:[#allocation47_spill] sm:$0xff] }
 0x313   :  { %v1605_v36 = vadd.f32 %v6224_v24, %v1492_v13  ;;  %v2321_v30 = vadd.f32 %v6713_v42, %v6602_v39  ;;  %v8586_v43 = vld [vmem:[#allocation50_spill] sm:$0xff]  ;;  %v283_v39 = vld [vmem:[#allocation5 + $0x8] sm:$0xff]  ;;  %v8590_v13 = vld [vmem:[#allocation53_spill] sm:$0xff] }
 0x314   :  { %2388 = vmatmul.f32.gmra.mxu1 %v6623_v63  ;;  %v8588_v42 = vld [vmem:[#allocation54_spill] sm:$0xff] }
 0x316   :  { %1859 = vmatmul.f32.gmra.mxu2 %v5192_v57  ;;  %v1703_v57 = vadd.f32 %v6350_v31, %v1590_v2  ;;  %v1706_v31 = vadd.f32 %v6361_v17, %v1593_v52  ;;  %v1709_v17 = vadd.f32 %v6372_v25, %v1596_v14  ;;  %v1712_v25 = vadd.f32 %v6383_v18, %v1599_v0  ;;  %v5198_v52 = vld [vmem:[#allocation2 + $0x1c0] sm:$0xff]  ;;  %v8582_v14 = vld [vmem:[#allocation48_spill] sm:$0xff] }
 0x317   :  { %v1715_v18 = vadd.f32 %v6394_v56, %v1602_v45  ;;  %v1718_v56 = vadd.f32 %v6405_v54, %v1605_v36  ;;  %v8585_v0 = vld [vmem:[#allocation51_spill] sm:$0xff]  ;;  %v8589_v45 = vld [vmem:[#allocation134_spill] sm:$0xff] }
 0x319   :  { %v6709_v29 = vpop.f32.mrf.mxu2 }
 0x31a   :  { %8578 = vst [vmem:[#allocation164_spill] sm:$0xff] %v6709_v29  ;;  %v287_v29 = vld [vmem:[#allocation5 + $0x28] sm:$0xff] }
 0x31b   :  { %2537 = vmatpush.msrb.mxu2 %v287_v29  ;;  %v5195_v29 = vld [vmem:[#allocation2 + $0x108] sm:$0xff] }
 0x31c   :  { %2391 = vmatmul.f32.gmra.mxu1 %v6623_v63  ;;  %v5194_v63 = vld [vmem:[#allocation2 + $0x38] sm:$0xff] }
 0x31e   :  { %1862 = vmatmul.f32.gmra.mxu2 %v5193_v20  ;;  %v286_v20 = vld [vmem:[#allocation5 + $0x20] sm:$0xff] }
 0x31f   :  { %2538 = vmatpush.msrb.mxu2 %v286_v20 }
 0x321   :  { %v1815_v15 = vpop.f32.mrf.mxu2  ;;  %2539 = vmatpush.msrb.mxu2 %v285_v28  ;;  %v8592_v28 = vld [vmem:[#allocation102_spill] sm:$0xff] }
 0x322   :  { %v1816_v3 = vadd.f32 %v1815_v15, %v1703_v57  ;;  %v2721_v15 = vld [vmem:[#allocation5 + $0xe0] sm:$0xff] }
 0x323   :  { %2745 = vmatpush.msrb.mxu3 %v2721_v15  ;;  %2540 = vmatpush.msrb.mxu2 %v284_v61  ;;  %v2717_v61 = vld [vmem:[#allocation5 + $0xc0] sm:$0xff] }
 0x324   :  { %v6723_v16 = vadd.f32 %v2300_v26, %v1816_v3  ;;  %v5197_v26 = vld [vmem:[#allocation2 + $0x398] sm:$0xff] }
 0x325   :  { %2746 = vmatpush.msrb.mxu3 %v2720_v58  ;;  %2541 = vmatpush.msrb.mxu2 %v283_v39  ;;  %v282_v58 = vld [vmem:[#allocation5] sm:$0xff] }
 0x326   :  { %1865 = vmatmul.f32.gmra.mxu2 %v5194_v63 }
 0x327   :  { %2747 = vmatpush.msrb.mxu3 %v2719_v8  ;;  %2542 = vmatpush.msrb.mxu2 %v282_v58  ;;  %v5205_v8 = vld [vmem:[#allocation2 + $0x1b8] sm:$0xff] }
 0x329   :  { %v1818_v55 = vpop.f32.mrf.mxu2 }
 0x32a   :  { %v1819_v34 = vadd.f32 %v1818_v55, %v1706_v31  ;;  %v8579_v31 = vld [vmem:[#allocation46_spill] sm:$0xff]  ;;  %v8580_v55 = vld [vmem:[#allocation45_spill] sm:$0xff] }
 0x32b   :  { %v1385_v19 = vadd.f32 %v6592_v32, %v8579_v31  ;;  %v1608_v24 = vadd.f32 %v8580_v55, %v1495_v44  ;;  %v1388_v32 = vadd.f32 %v6600_v46, %v8582_v14  ;;  %v1391_v46 = vadd.f32 %v6607_v51, %v8585_v0  ;;  %v8594_v44 = vld [vmem:[#allocation136_spill] sm:$0xff]  ;;  %v8597_v55 = vld [vmem:[#allocation107_spill] sm:$0xff] }
 0x32c   :  { %v6732_v49 = vadd.f32 %v2303_v12, %v1819_v34  ;;  %v5199_v12 = vld [vmem:[#allocation2 + $0x320] sm:$0xff]  ;;  %v8581_v34 = vld [vmem:[#allocation49_spill] sm:$0xff]  ;;  %v8596_v31 = vld [vmem:[#allocation60_spill] sm:$0xff] }
 0x32d   :  { %v1498_v62 = vadd.f32 %v8581_v34, %v1385_v19  ;;  %v1721_v54 = vadd.f32 %v6418_v41, %v1608_v24  ;;  %v8600_v14 = vld [vmem:[#allocation63_spill] sm:$0xff] }
 0x32e   :  { %1868 = vmatmul.f32.gmra.mxu2 %v5195_v29 }
 0x331   :  { %v1821_v2 = vpop.f32.mrf.mxu2 }
 0x332   :  { %v1822_v60 = vadd.f32 %v1821_v2, %v1709_v17  ;;  %v1611_v17 = vadd.f32 %v8583_v33, %v1498_v62  ;;  %v5200_v2 = vld [vmem:[#allocation2 + $0x1a0] sm:$0xff]  ;;  %v8601_v33 = vld [vmem:[#allocation113_spill] sm:$0xff] }
 0x333   :  { %v8598_v62 = vld [vmem:[#allocation59_spill] sm:$0xff] }
 0x334   :  { %v6741_v40 = vadd.f32 %v2306_v47, %v1822_v60  ;;  %v8584_v47 = vld [vmem:[#allocation52_spill] sm:$0xff]  ;;  %v1724_v41 = vadd.f32 %v6437_v35, %v1611_v17 }
 0x335   :  { %v1501_v60 = vadd.f32 %v8584_v47, %v1388_v32 }
 0x336   :  { %1871 = vmatmul.f32.gmra.mxu2 %v5196_v22 }
 0x339   :  { %v1824_v57 = vpop.f32.mrf.mxu2 }
 0x33a   :  { %v1825_v9 = vadd.f32 %v1824_v57, %v1712_v25  ;;  %v1614_v25 = vadd.f32 %v8586_v43, %v1501_v60  ;;  %v5201_v57 = vld [vmem:[#allocation2 + $0x190] sm:$0xff]  ;;  %v8602_v60 = vld [vmem:[#allocation62_spill] sm:$0xff] }
 0x33c   :  { %v6750_v37 = vadd.f32 %v2309_v53, %v1825_v9  ;;  %v1504_v53 = vadd.f32 %v6279_v5, %v1391_v46  ;;  %v8587_v9 = vld [vmem:[#allocation98_spill] sm:$0xff]  ;;  %v8606_v46 = vld [vmem:[#allocation117_spill] sm:$0xff] }
 0x33d   :  { %v1727_v35 = vadd.f32 %v8587_v9, %v1614_v25  ;;  %v8608_v9 = vld [vmem:[#allocation141_spill] sm:$0xff] }
 0x33e   :  { %1874 = vmatmul.f32.gmra.mxu2 %v5197_v26  ;;  %v1394_v26 = vadd.f32 %v8589_v45, %v8588_v42  ;;  %v1617_v51 = vadd.f32 %v8590_v13, %v1504_v53  ;;  %v8607_v53 = vld [vmem:[#allocation65_spill] sm:$0xff]  ;;  %v2716_v45 = vld [vmem:[#allocation5 + $0xb8] sm:$0xff] }
 0x33f   :  { %v5206_v42 = vld [vmem:[#allocation2 + $0xf0] sm:$0xff] }
 0x340   :  { %v1730_v5 = vadd.f32 %v8592_v28, %v1617_v51  ;;  %v8611_v51 = vld [vmem:[#allocation121_spill] sm:$0xff]  ;;  %v8613_v28 = vld [vmem:[#allocation142_spill] sm:$0xff] }
 0x341   :  { %v1827_v3 = vpop.f32.mrf.mxu2 }
 0x342   :  { %v1828_v23 = vadd.f32 %v1827_v3, %v1715_v18  ;;  %v5202_v18 = vld [vmem:[#allocation2 + $0x90] sm:$0xff]  ;;  %v2718_v3 = vld [vmem:[#allocation5 + $0xc8] sm:$0xff] }
 0x343   :  { %2748 = vmatpush.msrb.mxu3 %v2718_v3 }
 0x344   :  { %v6759_v38 = vadd.f32 %v2312_v1, %v1828_v23  ;;  %v8591_v1 = vld [vmem:[#allocation57_spill] sm:$0xff] }
 0x345   :  { %v1507_v23 = vadd.f32 %v8591_v1, %v1394_v26  ;;  %2749 = vmatpush.msrb.mxu3 %v2717_v61  ;;  %v8610_v26 = vld [vmem:[#allocation69_spill] sm:$0xff] }
 0x346   :  { %1877 = vmatmul.f32.gmra.mxu2 %v5198_v52  ;;  %v8593_v52 = vld [vmem:[#allocation56_spill] sm:$0xff]  ;;  %v2715_v61 = vld [vmem:[#allocation5 + $0xb0] sm:$0xff] }
 0x347   :  { %2750 = vmatpush.msrb.mxu3 %v2716_v45 }
 0x349   :  { %v1830_v63 = vpop.f32.mrf.mxu2  ;;  %2751 = vmatpush.msrb.mxu3 %v2715_v61  ;;  %v8634_v61 = vld [vmem:[#allocation79_spill] sm:$0xff] }
 0x34a   :  { %v1831_v21 = vadd.f32 %v1830_v63, %v1718_v56  ;;  %v1397_v56 = vadd.f32 %v8594_v44, %v8593_v52  ;;  %v8595_v63 = vld [vmem:[#allocation55_spill] sm:$0xff]  ;;  %v5207_v44 = vld [vmem:[#allocation2 + $0x248] sm:$0xff] }
 0x34c   :  { %v6768_v6 = vadd.f32 %v2315_v10, %v1831_v21  ;;  %v1620_v10 = vadd.f32 %v8595_v63, %v1507_v23  ;;  %v5203_v21 = vld [vmem:[#allocation2 + $0x360] sm:$0xff]  ;;  %v1510_v19 = vadd.f32 %v8596_v31, %v1397_v56  ;;  %v8612_v23 = vld [vmem:[#allocation68_spill] sm:$0xff] }
 0x34d   :  { %v8615_v56 = vld [vmem:[#allocation72_spill] sm:$0xff] }
 0x34e   :  { %1880 = vmatmul.f32.gmra.mxu2 %v5199_v12  ;;  %v1733_v24 = vadd.f32 %v8597_v55, %v1620_v10  ;;  %v6832_v10 = vld [vmem:[#allocation8 + $0x2] ss:$0 sm:$0xff] }
 0x34f   :  { %v8617_v55 = vld [vmem:[#allocation71_spill] sm:$0xff] }
 0x351   :  { %v1833_v48 = vpop.f32.mrf.mxu2 }
 0x352   :  { %v1834_v4 = vadd.f32 %v1833_v48, %v1721_v54  ;;  %v1400_v54 = vadd.f32 %v6619_v50, %v8598_v62  ;;  %v8599_v48 = vld [vmem:[#allocation58_spill] sm:$0xff]  ;;  %v2429_v62 = vmul.f32 %v6832_v10, %v6723_v16  ;;  %v6851_v16 = vpop.f32.mrf.mxu0 }
 0x353   :  { %v8605_v50 = vld [vmem:[#allocation66_spill] sm:$0xff] }
 0x354   :  { %v6777_v29 = vadd.f32 %v2318_v11, %v1834_v4  ;;  %v1623_v11 = vadd.f32 %v8599_v48, %v1510_v19  ;;  %v5204_v4 = vld [vmem:[#allocation2 + $0x3b0] sm:$0xff]  ;;  %v1513_v32 = vadd.f32 %v8600_v14, %v1400_v54  ;;  %v6841_v54 = vld [vmem:[#allocation8 + $0x3] ss:$0 sm:$0xff]  ;;  %v8619_v48 = vld [vmem:[#allocation70_spill] sm:$0xff]  ;;  %v6844_v14 = vpop.f32.mrf.mxu3 }
 0x356   :  { %1883 = vmatmul.f32.gmra.mxu2 %v5200_v2  ;;  %v1736_v17 = vadd.f32 %v8601_v33, %v1623_v11 }
 0x359   :  { %v1836_v20 = vpop.f32.mrf.mxu2 }
 0x35a   :  { %v1837_v27 = vadd.f32 %v1836_v20, %v1724_v41  ;;  %v8603_v41 = vld [vmem:[#allocation139_spill] sm:$0xff] }
 0x35b   :  { %v1403_v20 = vadd.f32 %v8603_v41, %v8602_v60 }
 0x35c   :  { %v6786_v22 = vadd.f32 %v2321_v30, %v1837_v27  ;;  %v8604_v30 = vld [vmem:[#allocation61_spill] sm:$0xff] }
 0x35d   :  { %v1626_v27 = vadd.f32 %v8604_v30, %v1513_v32  ;;  %v1516_v0 = vadd.f32 %v8605_v50, %v1403_v20  ;;  %v8620_v32 = vld [vmem:[#allocation75_spill] sm:$0xff]  ;;  %v8622_v30 = vld [vmem:[#allocation74_spill] sm:$0xff] }
 0x35e   :  { %1886 = vmatmul.f32.gmra.mxu2 %v5201_v57 }
 0x35f   :  { %v1739_v43 = vadd.f32 %v8606_v46, %v1626_v27  ;;  %v8623_v27 = vld [vmem:[#allocation146_spill] sm:$0xff]  ;;  %v8624_v46 = vld [vmem:[#allocation73_spill] sm:$0xff] }
 0x361   :  { %v1839_v15 = vpop.f32.mrf.mxu2 }
 0x362   :  { %v6791_v59 = vadd.f32 %v1839_v15, %v1727_v35  ;;  %v1406_v35 = vadd.f32 %v8608_v9, %v8607_v53  ;;  %v8609_v15 = vld [vmem:[#allocation64_spill] sm:$0xff]  ;;  %v3546_v53 = vld [vmem:[#allocation7 + $0x678] sm:$0xff] }
 0x363   :  { %v1629_v39 = vadd.f32 %v8609_v15, %v1516_v0  ;;  %v2430_v0 = vmul.f32 %v6832_v10, %v6732_v49  ;;  %3579 = vmatpush.msrb.mxu0 %v3546_v53  ;;  %v8625_v9 = vld [vmem:[#allocation78_spill] sm:$0xff]  ;;  %v8626_v15 = vld [vmem:[#allocation128_spill] sm:$0xff]  ;;  %v2433_v53 = vmul.f32 %v6832_v10, %v6759_v38 }
 0x364   :  { %v1519_v13 = vadd.f32 %v8610_v26, %v1406_v35  ;;  %v6863_v26 = vpop.f32.mrf.mxu3  ;;  %v8628_v49 = vld [vmem:[#allocation148_spill] sm:$0xff] }
 0x366   :  { %1889 = vmatmul.f32.gmra.mxu2 %v5202_v18  ;;  %v1742_v18 = vadd.f32 %v8611_v51, %v1629_v39  ;;  %v8627_v51 = vld [vmem:[#allocation77_spill] sm:$0xff] }
 0x369   :  { %v1842_v7 = vpop.f32.mrf.mxu2 }
 0x36a   :  { %v6798_v36 = vadd.f32 %v1842_v7, %v1730_v5  ;;  %v1409_v5 = vadd.f32 %v8613_v28, %v8612_v23  ;;  %v8614_v7 = vld [vmem:[#allocation67_spill] sm:$0xff]  ;;  %v8629_v28 = vld [vmem:[#allocation76_spill] sm:$0xff] }
 0x36b   :  { %v1632_v52 = vadd.f32 %v8614_v7, %v1519_v13  ;;  %v6872_v7 = vpop.f32.mrf.mxu0 }
 0x36c   :  { %v1522_v63 = vadd.f32 %v8615_v56, %v1409_v5  ;;  %v8630_v56 = vld [vmem:[#allocation81_spill] sm:$0xff] }
 0x36e   :  { %1892 = vmatmul.f32.gmra.mxu2 %v5203_v21  ;;  %v8616_v21 = vld [vmem:[#allocation125_spill] sm:$0xff]  ;;  %v1635_v11 = vadd.f32 %v8619_v48, %v1522_v63 }
 0x36f   :  { %v1745_v58 = vadd.f32 %v8616_v21, %v1632_v52  ;;  %v2714_v52 = vld [vmem:[#allocation5 + $0xa8] sm:$0xff]  ;;  %v8631_v21 = vld [vmem:[#allocation129_spill] sm:$0xff] }
 0x370   :  { %2752 = vmatpush.msrb.mxu3 %v2714_v52  ;;  %v8642_v52 = vld [vmem:[#allocation86_spill] sm:$0xff] }
 0x371   :  { %v1845_v12 = vpop.f32.mrf.mxu2 }
 0x372   :  { %v6805_v34 = vadd.f32 %v1845_v12, %v1733_v24  ;;  %v8618_v24 = vld [vmem:[#allocation144_spill] sm:$0xff] }
 0x373   :  { %v1412_v12 = vadd.f32 %v8618_v24, %v8617_v55 }
 0x375   :  { %v1525_v33 = vadd.f32 %v8620_v32, %v1412_v12  ;;  %v8632_v12 = vld [vmem:[#allocation80_spill] sm:$0xff] }
 0x376   :  { %1895 = vmatmul.f32.gmra.mxu2 %v5204_v4  ;;  %v5208_v4 = vld [vmem:[#allocation2 + $0x200] sm:$0xff] }
 0x379   :  { %v1848_v2 = vpop.f32.mrf.mxu2 }
 0x37a   :  { %v6812_v47 = vadd.f32 %v1848_v2, %v1736_v17  ;;  %v2463_v17 = vadd.f32 %v6841_v54, %v2429_v62  ;;  %v8621_v2 = vld [vmem:[#allocation127_spill] sm:$0xff]  ;;  %v8633_v62 = vld [vmem:[#allocation150_spill] sm:$0xff] }
 0x37b   :  { %v1748_v60 = vadd.f32 %v8621_v2, %v1635_v11  ;;  %v1421_v48 = vadd.f32 %v8633_v62, %v8632_v12  ;;  %v2432_v11 = vmul.f32 %v6832_v10, %v6750_v37  ;;  %v8635_v2 = vld [vmem:[#allocation84_spill] sm:$0xff]  ;;  %v8637_v37 = vld [vmem:[#allocation83_spill] sm:$0xff] }
 0x37c   :  { %v2495_v50 = vmax.f32 %v2463_v17, 0.0  ;;  %v6888_v17 = vpop.f32.mrf.mxu0  ;;  %v3544_v12 = vld [vmem:[#allocation7 + $0x668] sm:$0xff] }
 0x37e   :  { %1898 = vmatmul.f32.gmra.mxu2 %v5205_v8  ;;  %v1415_v8 = vadd.f32 %v8623_v27, %v8622_v30  ;;  %v2466_v27 = vadd.f32 %v6841_v54, %v2432_v11 }
 0x380   :  { %v1528_v35 = vadd.f32 %v8625_v9, %v1415_v8  ;;  %v2498_v9 = vmax.f32 %v2466_v27, 0.0  ;;  %v2435_v27 = vmul.f32 %v6832_v10, %v6777_v29  ;;  %v2211_v29 = vadd.f32 %v6851_v16, %v6844_v14 }
 0x381   :  { %v1851_v25 = vpop.f32.mrf.mxu2 }
 0x382   :  { %v6819_v57 = vadd.f32 %v1851_v25, %v1739_v43  ;;  %v1638_v43 = vadd.f32 %v8624_v46, %v1525_v33  ;;  %v6858_v25 = vpop.f32.mrf.mxu1  ;;  %v1641_v5 = vadd.f32 %v8629_v28, %v1528_v35  ;;  %v3545_v33 = vld [vmem:[#allocation7 + $0x670] sm:$0xff]  ;;  %v8638_v46 = vld [vmem:[#allocation151_spill] sm:$0xff]  ;;  %v8639_v35 = vld [vmem:[#allocation82_spill] sm:$0xff] }
 0x383   :  { %3580 = vmatpush.msrb.mxu0 %v3545_v33 }
 0x384   :  { %v1751_v39 = vadd.f32 %v8626_v15, %v1638_v43  ;;  %v1424_v43 = vadd.f32 %v8638_v46, %v8637_v37  ;;  %v8649_v37 = vld [vmem:[#allocation88_spill] sm:$0xff] }
 0x385   :  { %3581 = vmatpush.msrb.mxu0 %v3544_v12  ;;  %v3543_v12 = vld [vmem:[#allocation7 + $0x660] sm:$0xff] }
 0x386   :  { %1901 = vmatmul.f32.gmra.mxu2 %v5206_v42  ;;  %v2464_v42 = vadd.f32 %v6841_v54, %v2430_v0 }
 0x387   :  { %3582 = vmatpush.msrb.mxu0 %v3543_v12 }
 0x388   :  { %v2496_v23 = vmax.f32 %v2464_v42, 0.0  ;;  %v2713_v42 = vld [vmem:[#allocation5 + $0xa0] sm:$0xff] }
 0x389   :  { %v1854_v3 = vpop.f32.mrf.mxu2  ;;  %2753 = vmatpush.msrb.mxu3 %v2713_v42 }
 0x38a   :  { %v6826_v1 = vadd.f32 %v1854_v3, %v1742_v18  ;;  %v1418_v18 = vadd.f32 %v8628_v49, %v8627_v51  ;;  %v2431_v3 = vmul.f32 %v6832_v10, %v6741_v40  ;;  %v6881_v40 = vpop.f32.mrf.mxu3  ;;  %v8641_v49 = vld [vmem:[#allocation131_spill] sm:$0xff] }
 0x38c   :  { %v1531_v63 = vadd.f32 %v8630_v56, %v1418_v18  ;;  %v8643_v56 = vld [vmem:[#allocation153_spill] sm:$0xff] }
 0x38e   :  { %1904 = vmatmul.f32.gmra.mxu2 %v5207_v44  ;;  %v6874_v44 = vpop.f32.mrf.mxu1  ;;  %v1644_v32 = vadd.f32 %v8634_v61, %v1531_v63  ;;  %v1427_v63 = vadd.f32 %v8643_v56, %v8642_v52  ;;  %v2436_v56 = vmul.f32 %v6832_v10, %v6786_v22 }
 0x390   :  { %v2470_v22 = vadd.f32 %v6841_v54, %v2436_v56  ;;  %v8663_v56 = vld [vmem:[#allocation158_spill] sm:$0xff] }
 0x391   :  { %v1857_v31 = vpop.f32.mrf.mxu2 }
 0x392   :  { %v6835_v19 = vadd.f32 %v1857_v31, %v1745_v58  ;;  %v1754_v58 = vadd.f32 %v8631_v21, %v1641_v5  ;;  %v2465_v31 = vadd.f32 %v6841_v54, %v2431_v3  ;;  %v2467_v3 = vadd.f32 %v6841_v54, %v2433_v53  ;;  %v2712_v53 = vld [vmem:[#allocation5 + $0x98] sm:$0xff] }
 0x393   :  { %v2434_v21 = vmul.f32 %v6832_v10, %v6768_v6  ;;  %v8647_v6 = vld [vmem:[#allocation89_spill] sm:$0xff]  ;;  %2754 = vmatpush.msrb.mxu3 %v2712_v53 }
 0x396   :  { %1907 = vmatmul.f32.gmra.mxu2 %v5208_v4  ;;  %v2497_v4 = vmax.f32 %v2465_v31, 0.0  ;;  %v6893_v8 = vpop.f32.mrf.mxu1  ;;  %v8644_v31 = vld [vmem:[#allocation85_spill] sm:$0xff] }
 0x399   :  { %v1860_v41 = vpop.f32.mrf.mxu2 }
 0x39a   :  { %v6849_v20 = vadd.f32 %v1860_v41, %v1748_v60  ;;  %v1534_v60 = vadd.f32 %v8635_v2, %v1421_v48  ;;  %v8636_v41 = vld [vmem:[#allocation130_spill] sm:$0xff] }
 0x39b   :  { %v1757_v30 = vadd.f32 %v8636_v41, %v1644_v32  ;;  %v8645_v48 = vld [vmem:[#allocation90_spill] sm:$0xff]  ;;  %v2468_v32 = vadd.f32 %v6841_v54, %v2434_v21  ;;  %v8648_v41 = vld [vmem:[#allocation155_spill] sm:$0xff] }
 0x39c   :  { %v1647_v15 = vadd.f32 %v8639_v35, %v1534_v60  ;;  %v1540_v11 = vadd.f32 %v8645_v48, %v1427_v63  ;;  %v8654_v21 = vld [vmem:[#allocation91_spill] sm:$0xff] }
 0x39e   :  { %2543 = vmatmul.f32.vlgmr.msrb.gmra.mxu2 %v2495_v50  ;;  %v1760_v18 = vadd.f32 %v8641_v49, %v1647_v15  ;;  %v6911_v38 = vpop.f32.mrf.mxu1  ;;  %v1653_v46 = vadd.f32 %v8649_v37, %v1540_v11  ;;  %v8651_v15 = vld [vmem:[#allocation133_spill] sm:$0xff]  ;;  %v8655_v11 = vld [vmem:[#allocation96_spill] sm:$0xff]  ;;  %v2502_v37 = vmax.f32 %v2470_v22, 0.0 }
 0x3a0   :  { %v1766_v42 = vadd.f32 %v8651_v15, %v1653_v46  ;;  %v8659_v46 = vld [vmem:[#allocation94_spill] sm:$0xff]  ;;  %v8660_v15 = vld [vmem:[#allocation100_spill] sm:$0xff] }
 0x3a1   :  { %v1863_v45 = vpop.f32.mrf.mxu2 }
 0x3a2   :  { %v6865_v13 = vadd.f32 %v1863_v45, %v1751_v39  ;;  %v6902_v39 = vpop.f32.mrf.mxu3  ;;  %v8640_v45 = vld [vmem:[#allocation87_spill] sm:$0xff] }
 0x3a3   :  { %v1537_v51 = vadd.f32 %v8640_v45, %v1424_v43  ;;  %v2469_v45 = vadd.f32 %v6841_v54, %v2435_v27 }
 0x3a5   :  { %v2501_v63 = vmax.f32 %v2469_v45, 0.0 }
 0x3a6   :  { %2546 = vmatmul.f32.gmra.mxu2 %v2496_v23  ;;  %v6907_v23 = vpop.f32.mrf.mxu0  ;;  %v6932_v43 = vpop.f32.mrf.mxu1 }
 0x3a9   :  { %v1866_v55 = vpop.f32.mrf.mxu2 }
 0x3aa   :  { %v6879_v24 = vadd.f32 %v1866_v55, %v1754_v58  ;;  %v2499_v58 = vmax.f32 %v2467_v3, 0.0  ;;  %v1650_v55 = vadd.f32 %v8644_v31, %v1537_v51  ;;  %v6918_v62 = vpop.f32.mrf.mxu3  ;;  %v8652_v3 = vld [vmem:[#allocation92_spill] sm:$0xff] }
 0x3ae   :  { %2549 = vmatmul.f32.gmra.mxu2 %v2497_v4  ;;  %v8646_v4 = vld [vmem:[#allocation132_spill] sm:$0xff]  ;;  %v6925_v60 = vpop.f32.mrf.mxu0  ;;  %v6951_v48 = vpop.f32.mrf.mxu1 }
 0x3af   :  { %v1763_v61 = vadd.f32 %v8646_v4, %v1650_v55  ;;  %v2324_v55 = vadd.f32 %v6858_v25, %v2211_v29  ;;  %v8656_v4 = vld [vmem:[#allocation135_spill] sm:$0xff] }
 0x3b1   :  { %v1869_v50 = vpop.f32.mrf.mxu2  ;;  %v2403_v16 = vadd.f32 %v2324_v55, %v6791_v59  ;;  %v8664_v55 = vld [vmem:[#allocation97_spill] sm:$0xff] }
 0x3b2   :  { %v6895_v0 = vadd.f32 %v1869_v50, %v1757_v30  ;;  %v1430_v30 = vadd.f32 %v8648_v41, %v8647_v6  ;;  %v2500_v50 = vmax.f32 %v2468_v32, 0.0  ;;  %v6937_v49 = vpop.f32.mrf.mxu3  ;;  %v2214_v6 = vadd.f32 %v6872_v7, %v6863_v26  ;;  %v8657_v41 = vld [vmem:[#allocation95_spill] sm:$0xff]  ;;  %v8661_v7 = vld [vmem:[#allocation137_spill] sm:$0xff] }
 0x3b4   :  { %v2327_v53 = vadd.f32 %v6874_v44, %v2214_v6  ;;  %v2217_v44 = vadd.f32 %v6888_v17, %v6881_v40  ;;  %v8666_v40 = vld [vmem:[#allocation138_spill] sm:$0xff] }
 0x3b6   :  { %2552 = vmatmul.f32.gmra.mxu2 %v2498_v9  ;;  %v8650_v9 = vld [vmem:[#allocation93_spill] sm:$0xff]  ;;  %v6948_v31 = vpop.f32.mrf.mxu0  ;;  %v2404_v26 = vadd.f32 %v2327_v53, %v6798_v36  ;;  %v6974_v29 = vpop.f32.mrf.mxu1 }
 0x3b7   :  { %v1543_v35 = vadd.f32 %v8650_v9, %v1430_v30  ;;  %v8658_v30 = vld [vmem:[#allocation157_spill] sm:$0xff] }
 0x3b8   :  { %v1436_v27 = vadd.f32 %v8658_v30, %v8657_v41  ;;  %v2711_v9 = vld [vmem:[#allocation5 + $0x90] sm:$0xff]  ;;  %v2220_v30 = vadd.f32 %v6907_v23, %v6902_v39  ;;  %v8671_v23 = vld [vmem:[#allocation140_spill] sm:$0xff] }
 0x3b9   :  { %v1872_v28 = vpop.f32.mrf.mxu2  ;;  %2755 = vmatpush.msrb.mxu3 %v2711_v9 }
 0x3ba   :  { %v6909_v5 = vadd.f32 %v1872_v28, %v1760_v18  ;;  %v8653_v28 = vld [vmem:[#allocation156_spill] sm:$0xff]  ;;  %v6961_v25 = vpop.f32.mrf.mxu3  ;;  %v2333_v9 = vadd.f32 %v6911_v38, %v2220_v30 }
 0x3bb   :  { %v1433_v52 = vadd.f32 %v8653_v28, %v8652_v3 }
 0x3bc   :  { %v2406_v39 = vadd.f32 %v2333_v9, %v6812_v47 }
 0x3bd   :  { %v1546_v14 = vadd.f32 %v8655_v11, %v1433_v52  ;;  %v8662_v52 = vld [vmem:[#allocation99_spill] sm:$0xff]  ;;  %v2330_v11 = vadd.f32 %v6893_v8, %v2217_v44 }
 0x3be   :  { %2555 = vmatmul.f32.gmra.mxu2 %v2499_v58  ;;  %v1656_v58 = vadd.f32 %v8654_v21, %v1543_v35  ;;  %v6968_v35 = vpop.f32.mrf.mxu0  ;;  %v2438_v21 = vmul.f32 %v6832_v10, %v2404_v26  ;;  %v6997_v8 = vpop.f32.mrf.mxu1  ;;  %v8670_v26 = vld [vmem:[#allocation108_spill] sm:$0xff] }
 0x3bf   :  { %v1659_v59 = vadd.f32 %v8659_v46, %v1546_v14  ;;  %v3542_v14 = vld [vmem:[#allocation7 + $0x658] sm:$0xff] }
 0x3c0   :  { %3583 = vmatpush.msrb.mxu0 %v3542_v14  ;;  %v2472_v22 = vadd.f32 %v6841_v54, %v2438_v21 }
 0x3c1   :  { %v1875_v33 = vpop.f32.mrf.mxu2  ;;  %v1772_v45 = vadd.f32 %v8661_v7, %v1659_v59  ;;  %v8669_v59 = vld [vmem:[#allocation101_spill] sm:$0xff] }
 0x3c2   :  { %v6923_v2 = vadd.f32 %v1875_v33, %v1763_v61  ;;  %v1769_v61 = vadd.f32 %v8656_v4, %v1656_v58  ;;  %v6984_v12 = vpop.f32.mrf.mxu3 }
 0x3c6   :  { %2558 = vmatmul.f32.gmra.mxu2 %v2500_v50  ;;  %v2437_v50 = vmul.f32 %v6832_v10, %v2403_v16  ;;  %v8665_v16 = vld [vmem:[#allocation104_spill] sm:$0xff] }
 0x3c9   :  { %v1878_v51 = vpop.f32.mrf.mxu2 }
 0x3ca   :  { %v6939_v18 = vadd.f32 %v1878_v51, %v1766_v42  ;;  %v1549_v42 = vadd.f32 %v8660_v15, %v1436_v27  ;;  %v2471_v51 = vadd.f32 %v6841_v54, %v2437_v50  ;;  %v8667_v27 = vld [vmem:[#allocation103_spill] sm:$0xff]  ;;  %v2710_v15 = vld [vmem:[#allocation5 + $0x88] sm:$0xff] }
 0x3cb   :  { %v8668_v50 = vld [vmem:[#allocation159_spill] sm:$0xff]  ;;  %2756 = vmatpush.msrb.mxu3 %v2710_v15 }
 0x3cc   :  { %v2503_v58 = vmax.f32 %v2471_v51, 0.0  ;;  %v1662_v36 = vadd.f32 %v8664_v55, %v1549_v42  ;;  %v7004_v42 = vpop.f32.mrf.mxu3  ;;  %v2709_v15 = vld [vmem:[#allocation5 + $0x80] sm:$0xff] }
 0x3cd   :  { %2757 = vmatpush.msrb.mxu3 %v2709_v15 }
 0x3ce   :  { %2561 = vmatmul.f32.gmra.mxu2 %v2501_v63  ;;  %v1439_v63 = vadd.f32 %v8663_v56, %v8662_v52  ;;  %v1775_v17 = vadd.f32 %v8666_v40, %v1662_v36  ;;  %v2223_v52 = vadd.f32 %v6925_v60, %v6918_v62  ;;  %v8672_v56 = vld [vmem:[#allocation106_spill] sm:$0xff]  ;;  %v8674_v36 = vld [vmem:[#allocation105_spill] sm:$0xff]  ;;  %v8676_v60 = vld [vmem:[#allocation143_spill] sm:$0xff] }
 0x3d0   :  { %v1552_v4 = vadd.f32 %v8665_v16, %v1439_v63  ;;  %v8673_v63 = vld [vmem:[#allocation160_spill] sm:$0xff]  ;;  %v2336_v14 = vadd.f32 %v6932_v43, %v2223_v52  ;;  %v3541_v16 = vld [vmem:[#allocation7 + $0x650] sm:$0xff]  ;;  %v8677_v43 = vld [vmem:[#allocation110_spill] sm:$0xff]  ;;  %v2229_v52 = vadd.f32 %v6968_v35, %v6961_v25 }
 0x3d1   :  { %v1881_v32 = vpop.f32.mrf.mxu2  ;;  %v1445_v21 = vadd.f32 %v8673_v63, %v8672_v56  ;;  %3584 = vmatpush.msrb.mxu0 %v3541_v16  ;;  %v8682_v56 = vld [vmem:[#allocation114_spill] sm:$0xff]  ;;  %v8686_v35 = vld [vmem:[#allocation147_spill] sm:$0xff] }
 0x3d2   :  { %v6957_v33 = vadd.f32 %v1881_v32, %v1769_v61  ;;  %v2405_v61 = vadd.f32 %v2330_v11, %v6805_v34  ;;  %v6991_v32 = vpop.f32.mrf.mxu0  ;;  %v2504_v34 = vmax.f32 %v2472_v22, 0.0  ;;  %v1665_v53 = vadd.f32 %v8669_v59, %v1552_v4  ;;  %v7020_v11 = vpop.f32.mrf.mxu1  ;;  %v8675_v4 = vld [vmem:[#allocation111_spill] sm:$0xff]  ;;  %v8679_v59 = vld [vmem:[#allocation109_spill] sm:$0xff]  ;;  %v8683_v63 = vld [vmem:[#allocation162_spill] sm:$0xff] }
 0x3d3   :  { %v2407_v62 = vadd.f32 %v2336_v14, %v6819_v57  ;;  %v3540_v14 = vld [vmem:[#allocation7 + $0x648] sm:$0xff] }
 0x3d4   :  { %v2439_v46 = vmul.f32 %v6832_v10, %v2405_v61  ;;  %v1558_v61 = vadd.f32 %v8675_v4, %v1445_v21  ;;  %v1451_v21 = vadd.f32 %v8683_v63, %v8682_v56  ;;  %3585 = vmatpush.msrb.mxu0 %v3540_v14  ;;  %v8685_v4 = vld [vmem:[#allocation119_spill] sm:$0xff]  ;;  %v8693_v56 = vld [vmem:[#allocation164_spill] sm:$0xff] }
 0x3d6   :  { %2564 = vmatmul.f32.gmra.mxu2 %v2502_v37  ;;  %v1442_v37 = vadd.f32 %v8668_v50, %v8667_v27  ;;  %v2473_v51 = vadd.f32 %v6841_v54, %v2439_v46  ;;  %v2226_v27 = vadd.f32 %v6948_v31, %v6937_v49  ;;  %v8678_v50 = vld [vmem:[#allocation161_spill] sm:$0xff]  ;;  %v2441_v46 = vmul.f32 %v6832_v10, %v2407_v62 }
 0x3d7   :  { %v1671_v57 = vadd.f32 %v8679_v59, %v1558_v61  ;;  %v8681_v31 = vld [vmem:[#allocation145_spill] sm:$0xff]  ;;  %v1564_v61 = vadd.f32 %v8685_v4, %v1451_v21 }
 0x3d8   :  { %v1555_v7 = vadd.f32 %v8670_v26, %v1442_v37  ;;  %v2505_v55 = vmax.f32 %v2473_v51, 0.0  ;;  %v1448_v37 = vadd.f32 %v8678_v50, %v8677_v43  ;;  %v2339_v9 = vadd.f32 %v6951_v48, %v2226_v27  ;;  %v8688_v43 = vld [vmem:[#allocation163_spill] sm:$0xff] }
 0x3d9   :  { %v1884_v3 = vpop.f32.mrf.mxu2  ;;  %v2232_v27 = vadd.f32 %v6991_v32, %v6984_v12 }
 0x3da   :  { %v6976_v28 = vadd.f32 %v1884_v3, %v1772_v45  ;;  %v1778_v45 = vadd.f32 %v8671_v23, %v1665_v53  ;;  %v7014_v38 = vpop.f32.mrf.mxu0  ;;  %v1668_v47 = vadd.f32 %v8674_v36, %v1555_v7  ;;  %v7040_v26 = vpop.f32.mrf.mxu1  ;;  %v8680_v7 = vld [vmem:[#allocation115_spill] sm:$0xff]  ;;  %v2408_v49 = vadd.f32 %v2339_v9, %v6826_v1  ;;  %v8684_v36 = vld [vmem:[#allocation112_spill] sm:$0xff] }
 0x3db   :  { %v1784_v23 = vadd.f32 %v8681_v31, %v1671_v57  ;;  %v2345_v57 = vadd.f32 %v6997_v8, %v2232_v27  ;;  %v8690_v9 = vld [vmem:[#allocation123_spill] sm:$0xff]  ;;  %v8697_v27 = vld [vmem:[#allocation124_spill] sm:$0xff] }
 0x3dc   :  { %v1781_v40 = vadd.f32 %v8676_v60, %v1668_v47  ;;  %v2342_v47 = vadd.f32 %v6974_v29, %v2229_v52  ;;  %v8687_v29 = vld [vmem:[#allocation118_spill] sm:$0xff] }
 0x3dd   :  { %v1454_v50 = vadd.f32 %v8688_v43, %v8687_v29  ;;  %v8692_v52 = vld [vmem:[#allocation122_spill] sm:$0xff] }
 0x3de   :  { %2567 = vmatmul.f32.gmra.mxu2 %v2503_v58  ;;  %v2440_v58 = vmul.f32 %v6832_v10, %v2406_v39  ;;  %v1561_v39 = vadd.f32 %v8680_v7, %v1448_v37  ;;  %v2409_v25 = vadd.f32 %v2342_v47, %v6835_v19  ;;  %v2410_v7 = vadd.f32 %v2345_v57, %v6849_v20  ;;  %v8695_v47 = vld [vmem:[#allocation126_spill] sm:$0xff] }
 0x3df   :  { %v1567_v15 = vadd.f32 %v8690_v9, %v1454_v50  ;;  %v1457_v8 = vadd.f32 %v8693_v56, %v8692_v52 }
 0x3e0   :  { %v1674_v1 = vadd.f32 %v8684_v36, %v1561_v39  ;;  %v2443_v37 = vmul.f32 %v6832_v10, %v2409_v25  ;;  %v8691_v39 = vld [vmem:[#allocation149_spill] sm:$0xff]  ;;  %v2444_v63 = vmul.f32 %v6832_v10, %v2410_v7  ;;  %v3538_v7 = vld [vmem:[#allocation7 + $0x638] sm:$0xff] }
 0x3e1   :  { %v1887_v6 = vpop.f32.mrf.mxu2  ;;  %v1570_v14 = vadd.f32 %v8695_v47, %v1457_v8 }
 0x3e2   :  { %v6993_v41 = vadd.f32 %v1887_v6, %v1775_v17  ;;  %v2474_v17 = vadd.f32 %v6841_v54, %v2440_v58  ;;  %v7027_v6 = vpop.f32.mrf.mxu3  ;;  %v7037_v53 = vpop.f32.mrf.mxu0  ;;  %v2442_v58 = vmul.f32 %v6832_v10, %v2408_v49  ;;  %v1787_v62 = vadd.f32 %v8686_v35, %v1674_v1 }
 0x3e3   :  { %v2477_v12 = vadd.f32 %v6841_v54, %v2443_v37  ;;  %v1683_v29 = vadd.f32 %v8697_v27, %v1570_v14  ;;  %v8698_v37 = vld [vmem:[#allocation154_spill] sm:$0xff] }
 0x3e4   :  { %v2476_v60 = vadd.f32 %v6841_v54, %v2442_v58  ;;  %v8694_v58 = vld [vmem:[#allocation120_spill] sm:$0xff] }
 0x3e5   :  { %v2509_v21 = vmax.f32 %v2477_v12, 0.0  ;;  %v1680_v20 = vadd.f32 %v8694_v58, %v1567_v15 }
 0x3e6   :  { %2570 = vmatmul.f32.gmra.mxu2 %v2504_v34  ;;  %v2506_v34 = vmax.f32 %v2474_v17, 0.0 }
 0x3e9   :  { %v1890_v3 = vpop.f32.mrf.mxu2 }
 0x3ea   :  { %v7010_v44 = vadd.f32 %v1890_v3, %v1778_v45  ;;  %v2475_v45 = vadd.f32 %v6841_v54, %v2441_v46  ;;  %v7050_v48 = vpop.f32.mrf.mxu3  ;;  %v2240_v16 = vpop.f32.mrf.mxu0  ;;  %v2508_v46 = vmax.f32 %v2476_v60, 0.0  ;;  %v2238_v60 = vadd.f32 %v7037_v53, %v7027_v6 }
 0x3eb   :  { %v2241_v6 = vadd.f32 %v2240_v16, %v7050_v48 }
 0x3ec   :  { %v2351_v50 = vadd.f32 %v7040_v26, %v2238_v60 }
 0x3ee   :  { %2573 = vmatmul.f32.gmra.mxu2 %v2505_v55  ;;  %v2507_v55 = vmax.f32 %v2475_v45, 0.0  ;;  %v2235_v45 = vadd.f32 %v7014_v38, %v7004_v42  ;;  %v8696_v42 = vld [vmem:[#allocation152_spill] sm:$0xff] }
 0x3ef   :  { %v1793_v38 = vadd.f32 %v8696_v42, %v1680_v20  ;;  %v3537_v42 = vld [vmem:[#allocation7 + $0x630] sm:$0xff] }
 0x3f0   :  { %v2348_v36 = vadd.f32 %v7020_v11, %v2235_v45 }
 0x3f1   :  { %v1893_v22 = vpop.f32.mrf.mxu2 }
 0x3f2   :  { %v7029_v30 = vadd.f32 %v1893_v22, %v1781_v40  ;;  %v2353_v40 = vpop.f32.mrf.mxu1  ;;  %v2130_v19 = vpop.f32.mrf.mxu3  ;;  %v2411_v4 = vadd.f32 %v2348_v36, %v6865_v13  ;;  %v2412_v13 = vadd.f32 %v2351_v50, %v6879_v24  ;;  %v3562_v50 = vld [vmem:[#allocation7 + $0x6f8] sm:$0xff] }
 0x3f3   :  { %v2243_v32 = vpop.f32.mrf.mxu0  ;;  %v2354_v26 = vadd.f32 %v2353_v40, %v2241_v6  ;;  %3692 = vmatpush.msrb.mxu1 %v3562_v50 }
 0x3f4   :  { %v2446_v53 = vmul.f32 %v6832_v10, %v2412_v13  ;;  %v2244_v16 = vadd.f32 %v2243_v32, %v2130_v19 }
 0x3f5   :  { %v2413_v12 = vadd.f32 %v2354_v26, %v6895_v0 }
 0x3f6   :  { %2576 = vmatmul.f32.gmra.mxu2 %v2506_v34  ;;  %v8689_v34 = vld [vmem:[#allocation116_spill] sm:$0xff]  ;;  %v2480_v45 = vadd.f32 %v6841_v54, %v2446_v53 }
 0x3f7   :  { %v1677_v59 = vadd.f32 %v8689_v34, %v1564_v61  ;;  %v2478_v61 = vadd.f32 %v6841_v54, %v2444_v63  ;;  %v2447_v8 = vmul.f32 %v6832_v10, %v2413_v12 }
 0x3f8   :  { %v2512_v40 = vmax.f32 %v2480_v45, 0.0 }
 0x3f9   :  { %v1896_v51 = vpop.f32.mrf.mxu2  ;;  %v1790_v49 = vadd.f32 %v8691_v39, %v1677_v59  ;;  %v2510_v11 = vmax.f32 %v2478_v61, 0.0  ;;  %v2481_v20 = vadd.f32 %v6841_v54, %v2447_v8 }
 0x3fa   :  { %v7046_v3 = vadd.f32 %v1896_v51, %v1784_v23  ;;  %v2356_v51 = vpop.f32.mrf.mxu1  ;;  %v2133_v1 = vpop.f32.mrf.mxu3 }
 0x3fe   :  { %2579 = vmatmul.f32.gmra.mxu2 %v2507_v55  ;;  %v3539_v55 = vld [vmem:[#allocation7 + $0x640] sm:$0xff] }
 0x3ff   :  { %3586 = vmatpush.msrb.mxu0 %v3539_v55 }
 0x401   :  { %v1899_v17 = vpop.f32.mrf.mxu2  ;;  %3587 = vmatpush.msrb.mxu0 %v3538_v7  ;;  %v3536_v7 = vld [vmem:[#allocation7 + $0x628] sm:$0xff] }
 0x402   :  { %v7061_v22 = vadd.f32 %v1899_v17, %v1787_v62  ;;  %v2246_v62 = vpop.f32.mrf.mxu0  ;;  %v2445_v17 = vmul.f32 %v6832_v10, %v2411_v4  ;;  %v2359_v43 = vpop.f32.mrf.mxu1  ;;  %v2513_v4 = vmax.f32 %v2481_v20, 0.0 }
 0x403   :  { %v2136_v57 = vpop.f32.mrf.mxu3  ;;  %v2247_v14 = vadd.f32 %v2246_v62, %v2133_v1  ;;  %3588 = vmatpush.msrb.mxu0 %v3537_v42 }
 0x404   :  { %v2479_v34 = vadd.f32 %v6841_v54, %v2445_v17 }
 0x405   :  { %3589 = vmatpush.msrb.mxu0 %v3536_v7 }
 0x406   :  { %2582 = vmatmul.f32.gmra.mxu2 %v2508_v46  ;;  %v1796_v46 = vadd.f32 %v8698_v37, %v1683_v29  ;;  %v2511_v15 = vmax.f32 %v2479_v34, 0.0 }
 0x409   :  { %v1902_v31 = vpop.f32.mrf.mxu2 }
 0x40a   :  { %v7074_v23 = vadd.f32 %v1902_v31, %v1790_v49  ;;  %v2249_v39 = vpop.f32.mrf.mxu0  ;;  %v7101_v49 = vld [vmem:[#allocation8 + $0x4] ss:$0 sm:$0xff]  ;;  %v2362_v24 = vpop.f32.mrf.mxu1  ;;  %v7104_v31 = vld [vmem:[#allocation8 + $0x5] ss:$0 sm:$0xff] }
 0x40b   :  { %v2139_v56 = vpop.f32.mrf.mxu3  ;;  %v2250_v62 = vadd.f32 %v2249_v39, %v2136_v57 }
 0x40e   :  { %2585 = vmatmul.f32.gmra.mxu2 %v2509_v21  ;;  %v2357_v21 = vadd.f32 %v2356_v51, %v2244_v16 }
 0x410   :  { %v2414_v0 = vadd.f32 %v2357_v21, %v6909_v5 }
 0x411   :  { %v1905_v25 = vpop.f32.mrf.mxu2 }
 0x412   :  { %v7087_v35 = vadd.f32 %v1905_v25, %v1793_v38  ;;  %v2252_v58 = vpop.f32.mrf.mxu0  ;;  %v2365_v55 = vpop.f32.mrf.mxu1  ;;  %v2448_v19 = vmul.f32 %v6832_v10, %v2414_v0  ;;  %v2360_v38 = vadd.f32 %v2359_v43, %v2247_v14  ;;  %v2363_v43 = vadd.f32 %v2362_v24, %v2250_v62 }
 0x413   :  { %v2142_v51 = vpop.f32.mrf.mxu3  ;;  %v2253_v57 = vadd.f32 %v2252_v58, %v2139_v56 }
 0x414   :  { %v2415_v5 = vadd.f32 %v2360_v38, %v6923_v2  ;;  %v2482_v61 = vadd.f32 %v6841_v54, %v2448_v19  ;;  %v2416_v2 = vadd.f32 %v2363_v43, %v6939_v18 }
 0x415   :  { %v2366_v26 = vadd.f32 %v2365_v55, %v2253_v57 }
 0x416   :  { %2588 = vmatmul.f32.gmra.mxu2 %v2510_v11  ;;  %v2449_v11 = vmul.f32 %v6832_v10, %v2415_v5  ;;  %v2514_v29 = vmax.f32 %v2482_v61, 0.0  ;;  %v2450_v6 = vmul.f32 %v6832_v10, %v2416_v2 }
 0x417   :  { %v2417_v18 = vadd.f32 %v2366_v26, %v6957_v33 }
 0x418   :  { %v2483_v37 = vadd.f32 %v6841_v54, %v2449_v11  ;;  %v2484_v24 = vadd.f32 %v6841_v54, %v2450_v6  ;;  %v3560_v11 = vld [vmem:[#allocation7 + $0x6e8] sm:$0xff]  ;;  %v3534_v6 = vld [vmem:[#allocation7 + $0x618] sm:$0xff] }
 0x419   :  { %v1908_v59 = vpop.f32.mrf.mxu2  ;;  %v2451_v16 = vmul.f32 %v6832_v10, %v2417_v18 }
 0x41a   :  { %v7097_v9 = vadd.f32 %v1908_v59, %v1796_v46  ;;  %v2255_v25 = vpop.f32.mrf.mxu0  ;;  %v2368_v1 = vpop.f32.mrf.mxu1  ;;  %v2516_v8 = vmax.f32 %v2484_v24, 0.0 }
 0x41b   :  { %v2145_v13 = vpop.f32.mrf.mxu3  ;;  %v2485_v0 = vadd.f32 %v6841_v54, %v2451_v16 }
 0x41e   :  { %2591 = vmatmul.f32.gmra.mxu2 %v2511_v15  ;;  %v2515_v15 = vmax.f32 %v2483_v37, 0.0 }
 0x421   :  { %v2544_v52 = vpop.f32.mrf.mxu2 }
 0x422   :  { %v2642_v48 = vmul.f32 %v7101_v49, %v2544_v52  ;;  %v2258_v59 = vpop.f32.mrf.mxu0  ;;  %v2371_v39 = vpop.f32.mrf.mxu1 }
 0x423   :  { %v2148_v45 = vpop.f32.mrf.mxu3 }
 0x424   :  { %v2676_v63 = vadd.f32 %v7104_v31, %v2642_v48  ;;  %v2256_v48 = vadd.f32 %v2255_v25, %v2142_v51 }
 0x426   :  { %2594 = vmatmul.f32.gmra.mxu2 %v2512_v40  ;;  %2758 = vmatmul.f32.vlgmr.msrb.gmra.mxu3 %v2676_v63  ;;  %v3561_v63 = vld [vmem:[#allocation7 + $0x6f0] sm:$0xff]  ;;  %v2369_v21 = vadd.f32 %v2368_v1, %v2256_v48  ;;  %v3559_v48 = vld [vmem:[#allocation7 + $0x6e0] sm:$0xff] }
 0x427   :  { %3693 = vmatpush.msrb.mxu1 %v3561_v63 }
 0x428   :  { %v2418_v33 = vadd.f32 %v2369_v21, %v6976_v28 }
 0x429   :  { %v2547_v36 = vpop.f32.mrf.mxu2  ;;  %3694 = vmatpush.msrb.mxu1 %v3560_v11 }
 0x42a   :  { %v2643_v47 = vmul.f32 %v7101_v49, %v2547_v36  ;;  %v2261_v40 = vpop.f32.mrf.mxu0  ;;  %v2374_v58 = vpop.f32.mrf.mxu1  ;;  %v2259_v36 = vadd.f32 %v2258_v59, %v2145_v13  ;;  %v2452_v14 = vmul.f32 %v6832_v10, %v2418_v33 }
 0x42b   :  { %3695 = vmatpush.msrb.mxu1 %v3559_v48  ;;  %v3553_v48 = vld [vmem:[#allocation7 + $0x6b0] sm:$0xff] }
 0x42c   :  { %v2677_v32 = vadd.f32 %v7104_v31, %v2643_v47  ;;  %v2151_v47 = vpop.f32.mrf.mxu3  ;;  %v2372_v42 = vadd.f32 %v2371_v39, %v2259_v36  ;;  %v2486_v38 = vadd.f32 %v6841_v54, %v2452_v14  ;;  %v3533_v36 = vld [vmem:[#allocation7 + $0x610] sm:$0xff] }
 0x42e   :  { %2597 = vmatmul.f32.gmra.mxu2 %v2513_v4  ;;  %2761 = vmatmul.f32.gmra.mxu3 %v2677_v32  ;;  %v2517_v32 = vmax.f32 %v2485_v0, 0.0  ;;  %v3535_v4 = vld [vmem:[#allocation7 + $0x620] sm:$0xff]  ;;  %v2419_v28 = vadd.f32 %v2372_v42, %v6993_v41  ;;  %v2518_v62 = vmax.f32 %v2486_v38, 0.0 }
 0x42f   :  { %3590 = vmatpush.msrb.mxu0 %v3535_v4 }
 0x431   :  { %v2550_v60 = vpop.f32.mrf.mxu2  ;;  %3591 = vmatpush.msrb.mxu0 %v3534_v6 }
 0x432   :  { %v2644_v17 = vmul.f32 %v7101_v49, %v2550_v60  ;;  %v2264_v51 = vpop.f32.mrf.mxu0  ;;  %v2377_v5 = vpop.f32.mrf.mxu1  ;;  %v2262_v60 = vadd.f32 %v2261_v40, %v2148_v45 }
 0x433   :  { %3592 = vmatpush.msrb.mxu0 %v3533_v36 }
 0x434   :  { %v2678_v27 = vadd.f32 %v7104_v31, %v2644_v17  ;;  %v2453_v17 = vmul.f32 %v6832_v10, %v2419_v28 }
 0x436   :  { %2600 = vmatmul.f32.gmra.mxu2 %v2514_v29  ;;  %2764 = vmatmul.f32.gmra.mxu3 %v2678_v27  ;;  %v2154_v27 = vpop.f32.mrf.mxu3  ;;  %v2375_v29 = vadd.f32 %v2374_v58, %v2262_v60  ;;  %v2487_v50 = vadd.f32 %v6841_v54, %v2453_v17  ;;  %v3558_v60 = vld [vmem:[#allocation7 + $0x6d8] sm:$0xff] }
 0x437   :  { %3696 = vmatpush.msrb.mxu1 %v3558_v60  ;;  %v3566_v60 = vld [vmem:[#allocation7 + $0x718] sm:$0xff] }
 0x438   :  { %v2420_v41 = vadd.f32 %v2375_v29, %v7010_v44  ;;  %v2519_v57 = vmax.f32 %v2487_v50, 0.0 }
 0x439   :  { %v2553_v46 = vpop.f32.mrf.mxu2 }
 0x43a   :  { %v2645_v34 = vmul.f32 %v7101_v49, %v2553_v46  ;;  %v2267_v43 = vpop.f32.mrf.mxu0  ;;  %v2380_v37 = vpop.f32.mrf.mxu1  ;;  %v2265_v46 = vadd.f32 %v2264_v51, %v2151_v47 }
 0x43b   :  { %v2268_v24 = vadd.f32 %v2267_v43, %v2154_v27 }
 0x43c   :  { %v2679_v53 = vadd.f32 %v7104_v31, %v2645_v34  ;;  %v2454_v34 = vmul.f32 %v6832_v10, %v2420_v41 }
 0x43e   :  { %2603 = vmatmul.f32.gmra.mxu2 %v2515_v15  ;;  %2767 = vmatmul.f32.gmra.mxu3 %v2679_v53  ;;  %v2378_v53 = vadd.f32 %v2377_v5, %v2265_v46  ;;  %v2157_v15 = vpop.f32.mrf.mxu3  ;;  %v2488_v7 = vadd.f32 %v6841_v54, %v2454_v34  ;;  %v3578_v34 = vld [vmem:[#allocation7 + $0x778] sm:$0xff] }
 0x43f   :  { %3805 = vmatpush.msra.mxu2 %v3578_v34 }
 0x440   :  { %v2421_v44 = vadd.f32 %v2378_v53, %v7029_v30 }
 0x441   :  { %v2556_v12 = vpop.f32.mrf.mxu2 }
 0x442   :  { %v2646_v52 = vmul.f32 %v7101_v49, %v2556_v12  ;;  %v2270_v39 = vpop.f32.mrf.mxu0  ;;  %v2455_v12 = vmul.f32 %v6832_v10, %v2421_v44  ;;  %v2383_v16 = vpop.f32.mrf.mxu1 }
 0x443   :  { %v2271_v33 = vadd.f32 %v2270_v39, %v2157_v15  ;;  %v3555_v15 = vld [vmem:[#allocation7 + $0x6c0] sm:$0xff]  ;;  %v3576_v39 = vld [vmem:[#allocation7 + $0x768] sm:$0xff] }
 0x444   :  { %v2680_v56 = vadd.f32 %v7104_v31, %v2646_v52  ;;  %v2520_v52 = vmax.f32 %v2488_v7, 0.0  ;;  %v2489_v63 = vadd.f32 %v6841_v54, %v2455_v12 }
 0x445   :  { %v2384_v14 = vadd.f32 %v2383_v16, %v2271_v33  ;;  %v3574_v16 = vld [vmem:[#allocation7 + $0x758] sm:$0xff] }
 0x446   :  { %2606 = vmatmul.f32.gmra.mxu2 %v2516_v8  ;;  %2770 = vmatmul.f32.gmra.mxu3 %v2680_v56  ;;  %v2381_v56 = vadd.f32 %v2380_v37, %v2268_v24  ;;  %v2160_v8 = vpop.f32.mrf.mxu3  ;;  %v3575_v24 = vld [vmem:[#allocation7 + $0x760] sm:$0xff]  ;;  %v3550_v33 = vld [vmem:[#allocation7 + $0x698] sm:$0xff] }
 0x448   :  { %v2422_v30 = vadd.f32 %v2381_v56, %v7046_v3  ;;  %v2423_v3 = vadd.f32 %v2384_v14, %v7061_v22  ;;  %v3552_v56 = vld [vmem:[#allocation7 + $0x6a8] sm:$0xff]  ;;  %v3549_v14 = vld [vmem:[#allocation7 + $0x690] sm:$0xff] }
 0x449   :  { %v2559_v20 = vpop.f32.mrf.mxu2 }
 0x44a   :  { %v2647_v55 = vmul.f32 %v7101_v49, %v2559_v20  ;;  %v2273_v40 = vpop.f32.mrf.mxu0  ;;  %v2456_v0 = vmul.f32 %v6832_v10, %v2422_v30  ;;  %v2386_v47 = vpop.f32.mrf.mxu1  ;;  %v2457_v38 = vmul.f32 %v6832_v10, %v2423_v3  ;;  %v3573_v30 = vld [vmem:[#allocation7 + $0x750] sm:$0xff] }
 0x44b   :  { %v3569_v3 = vld [vmem:[#allocation7 + $0x730] sm:$0xff] }
 0x44c   :  { %v2681_v19 = vadd.f32 %v7104_v31, %v2647_v55  ;;  %v2521_v55 = vmax.f32 %v2489_v63, 0.0 }
 0x44e   :  { %2609 = vmatmul.f32.gmra.mxu2 %v2517_v32  ;;  %2773 = vmatmul.f32.gmra.mxu3 %v2681_v19  ;;  %v2274_v19 = vadd.f32 %v2273_v40, %v2160_v8  ;;  %v2490_v32 = vadd.f32 %v6841_v54, %v2456_v0  ;;  %v2163_v51 = vpop.f32.mrf.mxu3  ;;  %v3551_v40 = vld [vmem:[#allocation7 + $0x6a0] sm:$0xff] }
 0x44f   :  { %v3571_v0 = vld [vmem:[#allocation7 + $0x740] sm:$0xff] }
 0x450   :  { %v2387_v5 = vadd.f32 %v2386_v47, %v2274_v19  ;;  %v5210_v19 = vld [vmem:[#allocation8 + $0x3] ss:$0 sm:$0xff] }
 0x451   :  { %v2562_v61 = vpop.f32.mrf.mxu2 }
 0x452   :  { %v2648_v25 = vmul.f32 %v7101_v49, %v2562_v61  ;;  %v2276_v28 = vpop.f32.mrf.mxu0  ;;  %v2389_v17 = vpop.f32.mrf.mxu1  ;;  %v2424_v22 = vadd.f32 %v2387_v5, %v7074_v23  ;;  %v3556_v23 = vld [vmem:[#allocation7 + $0x6c8] sm:$0xff]  ;;  %v3567_v5 = vld [vmem:[#allocation7 + $0x720] sm:$0xff] }
 0x454   :  { %v2682_v1 = vadd.f32 %v7104_v31, %v2648_v25  ;;  %v2522_v25 = vmax.f32 %v2490_v32, 0.0  ;;  %v2458_v29 = vmul.f32 %v6832_v10, %v2424_v22 }
 0x456   :  { %2612 = vmatmul.f32.gmra.mxu2 %v2518_v62  ;;  %2776 = vmatmul.f32.gmra.mxu3 %v2682_v1  ;;  %v2277_v1 = vadd.f32 %v2276_v28, %v2163_v51  ;;  %v2491_v62 = vadd.f32 %v6841_v54, %v2457_v38  ;;  %v2166_v37 = vpop.f32.mrf.mxu3  ;;  %v2492_v53 = vadd.f32 %v6841_v54, %v2458_v29  ;;  %v3568_v51 = vld [vmem:[#allocation7 + $0x728] sm:$0xff]  ;;  %v3531_v38 = vld [vmem:[#allocation7 + $0x600] sm:$0xff]  ;;  %v3485_v29 = vld [vmem:[#allocation7 + $0x4f8] sm:$0xff] }
 0x457   :  { %3918 = vmatpush.msra.mxu3 %v3485_v29 }
 0x458   :  { %v2390_v41 = vadd.f32 %v2389_v17, %v2277_v1  ;;  %v2523_v43 = vmax.f32 %v2491_v62, 0.0  ;;  %v3565_v17 = vld [vmem:[#allocation7 + $0x710] sm:$0xff]  ;;  %v3564_v1 = vld [vmem:[#allocation7 + $0x708] sm:$0xff] }
 0x459   :  { %v2565_v13 = vpop.f32.mrf.mxu2 }
 0x45a   :  { %v2649_v2 = vmul.f32 %v7101_v49, %v2565_v13  ;;  %v3532_v13 = vld [vmem:[#allocation7 + $0x608] sm:$0xff]  ;;  %v2279_v46 = vpop.f32.mrf.mxu0  ;;  %v2392_v44 = vpop.f32.mrf.mxu1 }
 0x45b   :  { %3593 = vmatpush.msrb.mxu0 %v3532_v13  ;;  %v2280_v6 = vadd.f32 %v2279_v46, %v2166_v37  ;;  %v3501_v13 = vld [vmem:[#allocation7 + $0x578] sm:$0xff]  ;;  %v7182_v37 = vld [vmem:[#allocation8 + $0x9] ss:$0 sm:$0xff] }
 0x45c   :  { %v2683_v59 = vadd.f32 %v7104_v31, %v2649_v2  ;;  %v3557_v2 = vld [vmem:[#allocation7 + $0x6d0] sm:$0xff] }
 0x45d   :  { %3697 = vmatpush.msrb.mxu1 %v3557_v2  ;;  %3594 = vmatpush.msrb.mxu0 %v3531_v38  ;;  %v7180_v2 = vld [vmem:[#allocation8 + $0x8] ss:$0 sm:$0xff] }
 0x45e   :  { %2615 = vmatmul.f32.gmra.mxu2 %v2519_v57  ;;  %2779 = vmatmul.f32.gmra.mxu3 %v2683_v59  ;;  %v3577_v59 = vld [vmem:[#allocation7 + $0x770] sm:$0xff]  ;;  %v2425_v57 = vadd.f32 %v2390_v41, %v7087_v35 }
 0x45f   :  { %3698 = vmatpush.msrb.mxu1 %v3556_v23  ;;  %3806 = vmatpush.msra.mxu2 %v3577_v59 }
 0x460   :  { %v2459_v12 = vmul.f32 %v6832_v10, %v2425_v57  ;;  %4031 = vmatpush.msra.mxu0 %v3501_v13 }
 0x461   :  { %v2568_v26 = vpop.f32.mrf.mxu2  ;;  %3699 = vmatpush.msrb.mxu1 %v3555_v15  ;;  %3807 = vmatpush.msra.mxu2 %v3576_v39 }
 0x462   :  { %v2650_v18 = vmul.f32 %v7101_v49, %v2568_v26  ;;  %v2493_v63 = vadd.f32 %v6841_v54, %v2459_v12  ;;  %v3570_v54 = vld [vmem:[#allocation7 + $0x738] sm:$0xff] }
 0x463   :  { %3808 = vmatpush.msra.mxu2 %v3575_v24 }
 0x464   :  { %v2684_v45 = vadd.f32 %v7104_v31, %v2650_v18  ;;  %v3554_v18 = vld [vmem:[#allocation7 + $0x6b8] sm:$0xff]  ;;  %v2525_v47 = vmax.f32 %v2493_v63, 0.0 }
 0x465   :  { %3700 = vmatpush.msrb.mxu1 %v3554_v18  ;;  %3809 = vmatpush.msra.mxu2 %v3574_v16 }
 0x466   :  { %2618 = vmatmul.f32.gmra.mxu2 %v2520_v52  ;;  %2782 = vmatmul.f32.gmra.mxu3 %v2684_v45  ;;  %v2393_v45 = vadd.f32 %v2392_v44, %v2280_v6  ;;  %v2524_v52 = vmax.f32 %v2492_v53, 0.0  ;;  %v3484_v53 = vld [vmem:[#allocation7 + $0x4f0] sm:$0xff] }
 0x467   :  { %3701 = vmatpush.msrb.mxu1 %v3553_v48  ;;  %3810 = vmatpush.msra.mxu2 %v3573_v30  ;;  %v3500_v48 = vld [vmem:[#allocation7 + $0x570] sm:$0xff] }
 0x468   :  { %v2426_v8 = vadd.f32 %v2393_v45, %v7097_v9  ;;  %v3548_v9 = vld [vmem:[#allocation7 + $0x688] sm:$0xff]  ;;  %3919 = vmatpush.msra.mxu3 %v3484_v53  ;;  %4032 = vmatpush.msra.mxu0 %v3500_v48 }
 0x469   :  { %v2571_v21 = vpop.f32.mrf.mxu2  ;;  %3702 = vmatpush.msrb.mxu1 %v3552_v56 }
 0x46a   :  { %v2651_v58 = vmul.f32 %v7101_v49, %v2571_v21  ;;  %v3572_v21 = vld [vmem:[#allocation7 + $0x748] sm:$0xff] }
 0x46b   :  { %3703 = vmatpush.msrb.mxu1 %v3551_v40  ;;  %3811 = vmatpush.msra.mxu2 %v3572_v21 }
 0x46c   :  { %v2685_v20 = vadd.f32 %v7104_v31, %v2651_v58 }
 0x46d   :  { %3704 = vmatpush.msrb.mxu1 %v3550_v33  ;;  %3812 = vmatpush.msra.mxu2 %v3571_v0 }
 0x46e   :  { %2621 = vmatmul.f32.gmra.mxu2 %v2521_v55  ;;  %2785 = vmatmul.f32.gmra.mxu3 %v2685_v20  ;;  %v5209_v20 = vld [vmem:[#allocation8 + $0x2] ss:$0 sm:$0xff] }
 0x46f   :  { %v2460_v55 = vmul.f32 %v5209_v20, %v2426_v8  ;;  %3705 = vmatpush.msrb.mxu1 %v3549_v14  ;;  %3813 = vmatpush.msra.mxu2 %v3570_v54 }
 0x471   :  { %v2574_v4 = vpop.f32.mrf.mxu2  ;;  %3706 = vmatpush.msrb.mxu1 %v3548_v9  ;;  %v2494_v32 = vadd.f32 %v5210_v19, %v2460_v55  ;;  %3814 = vmatpush.msra.mxu2 %v3569_v3 }
 0x472   :  { %v2652_v42 = vmul.f32 %v7101_v49, %v2574_v4  ;;  %v3547_v4 = vld [vmem:[#allocation7 + $0x680] sm:$0xff] }
 0x473   :  { %3707 = vmatpush.msrb.mxu1 %v3547_v4  ;;  %3815 = vmatpush.msra.mxu2 %v3568_v51 }
 0x474   :  { %v2686_v61 = vadd.f32 %v7104_v31, %v2652_v42 }
 0x475   :  { %3816 = vmatpush.msra.mxu2 %v3567_v5 }
 0x476   :  { %2624 = vmatmul.f32.gmra.mxu2 %v2522_v25  ;;  %2788 = vmatmul.f32.gmra.mxu3 %v2686_v61  ;;  %v2526_v25 = vmax.f32 %v2494_v32, 0.0 }
 0x477   :  { %3817 = vmatpush.msra.mxu2 %v3566_v60 }
 0x479   :  { %v2577_v11 = vpop.f32.mrf.mxu2  ;;  %3818 = vmatpush.msra.mxu2 %v3565_v17 }
 0x47a   :  { %v2653_v27 = vmul.f32 %v7101_v49, %v2577_v11  ;;  %v3563_v11 = vld [vmem:[#allocation7 + $0x700] sm:$0xff] }
 0x47b   :  { %3819 = vmatpush.msra.mxu2 %v3564_v1 }
 0x47c   :  { %v2687_v50 = vadd.f32 %v7104_v31, %v2653_v27 }
 0x47d   :  { %3820 = vmatpush.msra.mxu2 %v3563_v11 }
 0x47e   :  { %2627 = vmatmul.f32.gmra.mxu2 %v2523_v43  ;;  %2791 = vmatmul.f32.gmra.mxu3 %v2687_v50 }
 0x481   :  { %v2580_v7 = vpop.f32.mrf.mxu2 }
 0x482   :  { %v2654_v26 = vmul.f32 %v7101_v49, %v2580_v7 }
 0x484   :  { %v2688_v35 = vadd.f32 %v7104_v31, %v2654_v26 }
 0x486   :  { %2630 = vmatmul.f32.gmra.mxu2 %v2524_v52  ;;  %2794 = vmatmul.f32.gmra.mxu3 %v2688_v35 }
 0x489   :  { %v2583_v10 = vpop.f32.mrf.mxu2 }
 0x48a   :  { %v2655_v58 = vmul.f32 %v7101_v49, %v2583_v10 }
 0x48c   :  { %v2689_v36 = vadd.f32 %v7104_v31, %v2655_v58 }
 0x48e   :  { %2633 = vmatmul.f32.gmra.mxu2 %v2525_v47  ;;  %2797 = vmatmul.f32.gmra.mxu3 %v2689_v36  ;;  %v3483_v47 = vld [vmem:[#allocation7 + $0x4e8] sm:$0xff] }
 0x48f   :  { %3920 = vmatpush.msra.mxu3 %v3483_v47 }
 0x491   :  { %v2586_v42 = vpop.f32.mrf.mxu2 }
 0x492   :  { %v2656_v28 = vmul.f32 %v7101_v49, %v2586_v42 }
 0x494   :  { %v2690_v61 = vadd.f32 %v7104_v31, %v2656_v28 }
 0x496   :  { %2636 = vmatmul.f32.gmra.mxu2 %v2526_v25  ;;  %2800 = vmatmul.f32.gmra.mxu3 %v2690_v61  ;;  %v3499_v25 = vld [vmem:[#allocation7 + $0x568] sm:$0xff] }
 0x497   :  { %4033 = vmatpush.msra.mxu0 %v3499_v25 }
 0x499   :  { %v2589_v22 = vpop.f32.mrf.mxu2 }
 0x49a   :  { %v2657_v62 = vmul.f32 %v7101_v49, %v2589_v22 }
 0x49c   :  { %v2691_v27 = vadd.f32 %v7104_v31, %v2657_v62 }
 0x49e   :  { %2803 = vmatmul.f32.gmra.mxu3 %v2691_v27 }
 0x4a1   :  { %v2592_v41 = vpop.f32.mrf.mxu2 }
 0x4a2   :  { %v2658_v50 = vmul.f32 %v7101_v49, %v2592_v41 }
 0x4a4   :  { %v2692_v43 = vadd.f32 %v7104_v31, %v2658_v50 }
 0x4a6   :  { %2806 = vmatmul.f32.gmra.mxu3 %v2692_v43 }
 0x4a9   :  { %v2595_v46 = vpop.f32.mrf.mxu2  ;;  %v2759_v34 = vpop.f32.mrf.mxu3 }
 0x4aa   :  { %v2659_v23 = vmul.f32 %v7101_v49, %v2595_v46  ;;  %v2857_v59 = vmul.f32 %v7180_v2, %v2759_v34  ;;  %v3482_v34 = vld [vmem:[#allocation7 + $0x4e0] sm:$0xff] }
 0x4ab   :  { %3921 = vmatpush.msra.mxu3 %v3482_v34  ;;  %v3480_v34 = vld [vmem:[#allocation7 + $0x4d0] sm:$0xff] }
 0x4ac   :  { %v2693_v57 = vadd.f32 %v7104_v31, %v2659_v23  ;;  %v2891_v6 = vadd.f32 %v7182_v37, %v2857_v59 }
 0x4ae   :  { %v2923_v15 = vmax.f32 %v2891_v6, 0.0  ;;  %2809 = vmatmul.f32.gmra.mxu3 %v2693_v57 }
 0x4b0   :  { %v3019_v44 = vrot.slane %v2923_v15, 6  ;;  %3148 = vst [vmem:[#allocation2 + $0x308] sm:$0xff] %v2923_v15  ;;  %v3180_v39 = vsel %vm5562_vm1, %v2923_v15, 0.0  ;;  %3708 = vmatmul.f32.vlgmr.msrb.gmra.mxu1 %v2923_v15  ;;  %vm8701_vm1 = vmmov %vm8448_vm3 }
 0x4b1   :  { %v3244_v26 = vrot.slane %v3180_v39, 2  ;;  %v2598_v18 = vpop.f32.mrf.mxu2  ;;  %v2762_v24 = vpop.f32.mrf.mxu3  ;;  %vm8711_vm3 = vmmov %vm8701_vm1 }
 0x4b2   :  { %3115 = vst [vmem:[#allocation2 + $0x60] sm:$0xfc] %v3019_v44  ;;  %v2660_v12 = vmul.f32 %v7101_v49, %v2598_v18  ;;  %v2858_v45 = vmul.f32 %v7180_v2, %v2762_v24 }
 0x4b3   :  { %3340 = vst [vmem:[#allocation2 + $0x3d8] sm:$0xc0] %v3244_v26 }
 0x4b4   :  { %v2694_v35 = vadd.f32 %v7104_v31, %v2660_v12  ;;  %v2892_v52 = vadd.f32 %v7182_v37, %v2858_v45  ;;  %v3498_v45 = vld [vmem:[#allocation7 + $0x560] sm:$0xff] }
 0x4b5   :  { %4034 = vmatpush.msra.mxu0 %v3498_v45 }
 0x4b6   :  { %v2924_v16 = vmax.f32 %v2892_v52, 0.0  ;;  %2812 = vmatmul.f32.gmra.mxu3 %v2694_v35  ;;  %v3479_v52 = vld [vmem:[#allocation7 + $0x4c8] sm:$0xff] }
 0x4b8   :  { %v2956_v30 = vsel %vm5576_vm2, %v2924_v16, 0.0  ;;  %3149 = vst [vmem:[#allocation2 + $0x8] sm:$0xff] %v2924_v16  ;;  %v3245_v8 = vrot.slane %v2924_v16, 2  ;;  %3711 = vmatmul.f32.gmra.mxu1 %v2924_v16  ;;  %vm8704_vm2 = vmmov %vm8458_vm8 }
 0x4b9   :  { %v3020_v63 = vrot.slane %v2956_v30, 6  ;;  %v2601_v40 = vpop.f32.mrf.mxu2  ;;  %v2765_v10 = vpop.f32.mrf.mxu3  ;;  %v7196_v21 = vld [vmem:[#allocation2 + $0x60] sm:$0xff]  ;;  %vm8705_vm8 = vmmov %vm8701_vm1 }
 0x4ba   :  { %v3246_v58 = vsel %vm8701_vm1, %v3244_v26, %v3245_v8  ;;  %v2661_v33 = vmul.f32 %v7101_v49, %v2601_v40  ;;  %v2859_v0 = vmul.f32 %v7180_v2, %v2765_v10  ;;  %3595 = vmatmul.f32.vlgmr.msrb.gmra.mxu0 %v7196_v21  ;;  %vm8708_vm6 = vmmov %vm8704_vm2 }
 0x4bb   :  { %v7203_v20 = vsel %vm8702_vm12, %v3019_v44, %v3020_v63  ;;  %3341 = vst [vmem:[#allocation2 + $0x238] sm:$0xff] %v3246_v58  ;;  %3821 = vmatmul.f32.vlgmr.msra.gmra.mxu2 %v3246_v58  ;;  %vm8717_vm12 = vmmov %vm8711_vm3 }
 0x4bc   :  { %v2695_v55 = vadd.f32 %v7104_v31, %v2661_v33  ;;  %v2893_v36 = vadd.f32 %v7182_v37, %v2859_v0 }
 0x4be   :  { %v2925_v14 = vmax.f32 %v2893_v36, 0.0  ;;  %2815 = vmatmul.f32.gmra.mxu3 %v2695_v55  ;;  %v3481_v55 = vld [vmem:[#allocation7 + $0x4d8] sm:$0xff] }
 0x4bf   :  { %3922 = vmatpush.msra.mxu3 %v3481_v55 }
 0x4c0   :  { %v3022_v54 = vrot.slane %v2925_v14, 6  ;;  %3150 = vst [vmem:[#allocation2 + $0x338] sm:$0xff] %v2925_v14  ;;  %v3182_v3 = vsel %vm5594_vm4, %v2925_v14, 0.0  ;;  %3714 = vmatmul.f32.gmra.mxu1 %v2925_v14  ;;  %vm8707_vm4 = vmmov %vm8701_vm1 }
 0x4c1   :  { %v3247_v19 = vrot.slane %v3182_v3, 2  ;;  %v2604_v32 = vpop.f32.mrf.mxu2  ;;  %v2768_v4 = vpop.f32.mrf.mxu3  ;;  %3923 = vmatpush.msra.mxu3 %v3480_v34  ;;  %v3470_v34 = vld [vmem:[#allocation7 + $0x480] sm:$0xff] }
 0x4c2   :  { %v7210_v42 = vsel %vm8704_vm2, %v3020_v63, %v3022_v54  ;;  %v2662_v51 = vmul.f32 %v7101_v49, %v2604_v32  ;;  %v2860_v28 = vmul.f32 %v7180_v2, %v2768_v4  ;;  %3598 = vmatmul.f32.gmra.mxu0 %v7203_v20 }
 0x4c3   :  { %v3248_v38 = vsel %vm8705_vm8, %v3245_v8, %v3247_v19  ;;  %vm8723_vm8 = vmmov %vm8711_vm3  ;;  %3924 = vmatpush.msra.mxu3 %v3479_v52 }
 0x4c4   :  { %3342 = vst [vmem:[#allocation2 + $0x88] sm:$0xff] %v3248_v38  ;;  %v2696_v5 = vadd.f32 %v7104_v31, %v2662_v51  ;;  %v2894_v61 = vadd.f32 %v7182_v37, %v2860_v28  ;;  %3824 = vmatmul.f32.gmra.mxu2 %v3248_v38 }
 0x4c6   :  { %v2926_v60 = vmax.f32 %v2894_v61, 0.0  ;;  %2818 = vmatmul.f32.gmra.mxu3 %v2696_v5  ;;  %v3497_v61 = vld [vmem:[#allocation7 + $0x558] sm:$0xff] }
 0x4c7   :  { %4035 = vmatpush.msra.mxu0 %v3497_v61 }
 0x4c8   :  { %v2958_v22 = vsel %vm5627_vm7, %v2926_v60, 0.0  ;;  %3151 = vst [vmem:[#allocation2 + $0x3b8] sm:$0xff] %v2926_v60  ;;  %v3249_v1 = vrot.slane %v2926_v60, 2  ;;  %3717 = vmatmul.f32.gmra.mxu1 %v2926_v60  ;;  %vm8710_vm7 = vmmov %vm8704_vm2  ;;  %v7306_v60 = vld [vmem:[#allocation8 + $0x4] ss:$0 sm:$0xff] }
 0x4c9   :  { %v3024_v62 = vrot.slane %v2958_v22, 6  ;;  %v2607_v11 = vpop.f32.mrf.mxu2  ;;  %v2771_v27 = vpop.f32.mrf.mxu3 }
 0x4ca   :  { %v3250_v29 = vsel %vm8707_vm4, %v3247_v19, %v3249_v1  ;;  %v2663_v41 = vmul.f32 %v7101_v49, %v2607_v11  ;;  %v2861_v50 = vmul.f32 %v7180_v2, %v2771_v27  ;;  %3601 = vmatmul.f32.gmra.mxu0 %v7210_v42 }
 0x4cb   :  { %v7225_v43 = vsel %vm8708_vm6, %v3022_v54, %v3024_v62  ;;  %3343 = vst [vmem:[#allocation2 + $0x40] sm:$0xff] %v3250_v29 }
 0x4cc   :  { %v2697_v13 = vadd.f32 %v7104_v31, %v2663_v41  ;;  %v2895_v46 = vadd.f32 %v7182_v37, %v2861_v50  ;;  %3827 = vmatmul.f32.gmra.mxu2 %v3250_v29 }
 0x4ce   :  { %v2927_v23 = vmax.f32 %v2895_v46, 0.0  ;;  %2821 = vmatmul.f32.gmra.mxu3 %v2697_v13 }
 0x4d0   :  { %v3026_v59 = vrot.slane %v2927_v23, 6  ;;  %3152 = vst [vmem:[#allocation2 + $0x388] sm:$0xff] %v2927_v23  ;;  %v3184_v6 = vsel %vm5664_vm9, %v2927_v23, 0.0  ;;  %3720 = vmatmul.f32.gmra.mxu1 %v2927_v23  ;;  %vm8713_vm9 = vmmov %vm8701_vm1 }
 0x4d1   :  { %v3251_v53 = vrot.slane %v3184_v6, 2  ;;  %v2610_v15 = vpop.f32.mrf.mxu2  ;;  %v2774_v44 = vpop.f32.mrf.mxu3  ;;  %vm8714_vm1 = vmmov %vm8704_vm2 }
 0x4d2   :  { %v7232_v7 = vsel %vm8710_vm7, %v3024_v62, %v3026_v59  ;;  %v2664_v39 = vmul.f32 %v7101_v49, %v2610_v15  ;;  %v2862_v26 = vmul.f32 %v7180_v2, %v2774_v44  ;;  %3604 = vmatmul.f32.gmra.mxu0 %v7225_v43  ;;  %vm8720_vm2 = vmmov %vm8714_vm1 }
 0x4d3   :  { %3119 = vst [vmem:[#allocation2 + $0x20] sm:$0xff] %v7232_v7  ;;  %v3252_v18 = vsel %vm8711_vm3, %v3249_v1, %v3251_v53  ;;  %vm8726_vm4 = vmmov %vm8714_vm1 }
 0x4d4   :  { %3344 = vst [vmem:[#allocation2 + $0x1e0] sm:$0xff] %v3252_v18  ;;  %v2698_v24 = vadd.f32 %v7104_v31, %v2664_v39  ;;  %v2896_v12 = vadd.f32 %v7182_v37, %v2862_v26  ;;  %3830 = vmatmul.f32.gmra.mxu2 %v3252_v18  ;;  %vm8732_vm7 = vmmov %vm8714_vm1 }
 0x4d6   :  { %v2928_v35 = vmax.f32 %v2896_v12, 0.0  ;;  %2824 = vmatmul.f32.gmra.mxu3 %v2698_v24 }
 0x4d8   :  { %v2960_v48 = vsel %vm5705_vm11, %v2928_v35, 0.0  ;;  %3153 = vst [vmem:[#allocation2 + $0xe8] sm:$0xff] %v2928_v35  ;;  %v3253_v16 = vrot.slane %v2928_v35, 2  ;;  %3723 = vmatmul.f32.gmra.mxu1 %v2928_v35  ;;  %vm8716_vm11 = vmmov %vm8714_vm1  ;;  %v3496_v35 = vld [vmem:[#allocation7 + $0x550] sm:$0xff] }
 0x4d9   :  { %v3028_v56 = vrot.slane %v2960_v48, 6  ;;  %v2613_v30 = vpop.f32.mrf.mxu2  ;;  %v2777_v8 = vpop.f32.mrf.mxu3  ;;  %4036 = vmatpush.msra.mxu0 %v3496_v35 }
 0x4da   :  { %v3254_v63 = vsel %vm8713_vm9, %v3251_v53, %v3253_v16  ;;  %v2665_v40 = vmul.f32 %v7101_v49, %v2613_v30  ;;  %v2863_v10 = vmul.f32 %v7180_v2, %v2777_v8  ;;  %3607 = vmatmul.f32.gmra.mxu0 %v7232_v7 }
 0x4db   :  { %v7248_v58 = vsel %vm8714_vm1, %v3026_v59, %v3028_v56  ;;  %3345 = vst [vmem:[#allocation2 + $0x1f8] sm:$0xff] %v3254_v63 }
 0x4dc   :  { %3120 = vst [vmem:[#allocation2 + $0x2d8] sm:$0xff] %v7248_v58  ;;  %v2699_v33 = vadd.f32 %v7104_v31, %v2665_v40  ;;  %v2897_v0 = vadd.f32 %v7182_v37, %v2863_v10  ;;  %3833 = vmatmul.f32.gmra.mxu2 %v3254_v63  ;;  %v3477_v63 = vld [vmem:[#allocation7 + $0x4b8] sm:$0xff] }
 0x4de   :  { %v2929_v36 = vmax.f32 %v2897_v0, 0.0  ;;  %2827 = vmatmul.f32.gmra.mxu3 %v2699_v33 }
 0x4e0   :  { %v3030_v47 = vrot.slane %v2929_v36, 6  ;;  %3154 = vst [vmem:[#allocation2 + $0x158] sm:$0xff] %v2929_v36  ;;  %v3186_v54 = vsel %vm5737_vm13, %v2929_v36, 0.0  ;;  %3726 = vmatmul.f32.gmra.mxu1 %v2929_v36  ;;  %vm8719_vm13 = vmmov %vm8711_vm3 }
 0x4e1   :  { %v3255_v9 = vrot.slane %v3186_v54, 2  ;;  %v2616_v3 = vpop.f32.mrf.mxu2  ;;  %v2780_v19 = vpop.f32.mrf.mxu3 }
 0x4e2   :  { %v7256_v32 = vsel %vm8716_vm11, %v3028_v56, %v3030_v47  ;;  %v2666_v4 = vmul.f32 %v7101_v49, %v2616_v3  ;;  %v2864_v51 = vmul.f32 %v7180_v2, %v2780_v19  ;;  %3610 = vmatmul.f32.gmra.mxu0 %v7248_v58  ;;  %v3475_v3 = vld [vmem:[#allocation7 + $0x4a8] sm:$0xff]  ;;  %v3474_v19 = vld [vmem:[#allocation7 + $0x4a0] sm:$0xff] }
 0x4e3   :  { %3121 = vst [vmem:[#allocation2] sm:$0xff] %v7256_v32  ;;  %v3256_v28 = vsel %vm8717_vm12, %v3253_v16, %v3255_v9  ;;  %v3478_v16 = vld [vmem:[#allocation7 + $0x4c0] sm:$0xff]  ;;  %vm8740_vm12 = vmmov %vm8720_vm2 }
 0x4e4   :  { %3346 = vst [vmem:[#allocation2 + $0x140] sm:$0xff] %v3256_v28  ;;  %v2700_v38 = vadd.f32 %v7104_v31, %v2666_v4  ;;  %v2898_v5 = vadd.f32 %v7182_v37, %v2864_v51  ;;  %3836 = vmatmul.f32.gmra.mxu2 %v3256_v28  ;;  %3925 = vmatpush.msra.mxu3 %v3478_v16 }
 0x4e6   :  { %v2930_v25 = vmax.f32 %v2898_v5, 0.0  ;;  %2830 = vmatmul.f32.gmra.mxu3 %v2700_v38  ;;  %v3473_v38 = vld [vmem:[#allocation7 + $0x498] sm:$0xff] }
 0x4e7   :  { %3926 = vmatpush.msra.mxu3 %v3477_v63 }
 0x4e8   :  { %v2962_v17 = vsel %vm5768_vm15, %v2930_v25, 0.0  ;;  %3155 = vst [vmem:[#allocation2 + $0xa8] sm:$0xff] %v2930_v25  ;;  %v3257_v22 = vrot.slane %v2930_v25, 2  ;;  %3729 = vmatmul.f32.gmra.mxu1 %v2930_v25  ;;  %vm8722_vm15 = vmmov %vm8714_vm1 }
 0x4e9   :  { %v3032_v1 = vrot.slane %v2962_v17, 6  ;;  %v2619_v62 = vpop.f32.mrf.mxu2  ;;  %v2783_v11 = vpop.f32.mrf.mxu3 }
 0x4ea   :  { %v3258_v27 = vsel %vm8719_vm13, %v3255_v9, %v3257_v22  ;;  %v2667_v29 = vmul.f32 %v7101_v49, %v2619_v62  ;;  %v2865_v41 = vmul.f32 %v7180_v2, %v2783_v11  ;;  %3613 = vmatmul.f32.gmra.mxu0 %v7256_v32  ;;  %v7313_v11 = vld [vmem:[#allocation8 + $0x5] ss:$0 sm:$0xff] }
 0x4eb   :  { %v7272_v50 = vsel %vm8720_vm2, %v3030_v47, %v3032_v1  ;;  %3347 = vst [vmem:[#allocation2 + $0x2c0] sm:$0xff] %v3258_v27  ;;  %v3476_v47 = vld [vmem:[#allocation7 + $0x4b0] sm:$0xff] }
 0x4ec   :  { %3122 = vst [vmem:[#allocation2 + $0x378] sm:$0xff] %v7272_v50  ;;  %v2701_v13 = vadd.f32 %v7104_v31, %v2667_v29  ;;  %v2899_v46 = vadd.f32 %v7182_v37, %v2865_v41  ;;  %3839 = vmatmul.f32.gmra.mxu2 %v3258_v27  ;;  %3927 = vmatpush.msra.mxu3 %v3476_v47  ;;  %v3495_v41 = vld [vmem:[#allocation7 + $0x548] sm:$0xff] }
 0x4ed   :  { %4037 = vmatpush.msra.mxu0 %v3495_v41 }
 0x4ee   :  { %v2931_v23 = vmax.f32 %v2899_v46, 0.0  ;;  %2833 = vmatmul.f32.gmra.mxu3 %v2701_v13  ;;  %v3471_v13 = vld [vmem:[#allocation7 + $0x488] sm:$0xff] }
 0x4ef   :  { %3928 = vmatpush.msra.mxu3 %v3475_v3 }
 0x4f0   :  { %v3034_v59 = vrot.slane %v2931_v23, 6  ;;  %3156 = vst [vmem:[#allocation2 + $0x260] sm:$0xff] %v2931_v23  ;;  %v3188_v6 = vsel %vm5803_vm0, %v2931_v23, 0.0  ;;  %3732 = vmatmul.f32.gmra.mxu1 %v2931_v23  ;;  %vm8725_vm0 = vmmov %vm8711_vm3  ;;  %v7363_v23 = vld [vmem:[#allocation2 + $0x278] sm:$0xff] }
 0x4f1   :  { %v3259_v53 = vrot.slane %v3188_v6, 2  ;;  %v2622_v15 = vpop.f32.mrf.mxu2  ;;  %v2786_v44 = vpop.f32.mrf.mxu3  ;;  %3929 = vmatpush.msra.mxu3 %v3474_v19  ;;  %vm8731_vm6 = vmmov %vm8725_vm0 }
 0x4f2   :  { %v7280_v39 = vsel %vm8722_vm15, %v3032_v1, %v3034_v59  ;;  %v2668_v26 = vmul.f32 %v7101_v49, %v2622_v15  ;;  %v2866_v18 = vmul.f32 %v7180_v2, %v2786_v44  ;;  %3616 = vmatmul.f32.gmra.mxu0 %v7272_v50  ;;  %v3472_v1 = vld [vmem:[#allocation7 + $0x490] sm:$0xff]  ;;  %vm8735_vm3 = vmmov %vm8714_vm1 }
 0x4f3   :  { %3123 = vst [vmem:[#allocation2 + $0x2a0] sm:$0xff] %v7280_v39  ;;  %v3260_v24 = vsel %vm8723_vm8, %v3257_v22, %v3259_v53  ;;  %3930 = vmatpush.msra.mxu3 %v3473_v38  ;;  %vm8736_vm9 = vmmov %vm8725_vm0 }
 0x4f4   :  { %3348 = vst [vmem:[#allocation2 + $0x240] sm:$0xff] %v3260_v24  ;;  %v2702_v12 = vadd.f32 %v7104_v31, %v2668_v26  ;;  %v2900_v45 = vadd.f32 %v7182_v37, %v2866_v18  ;;  %3842 = vmatmul.f32.gmra.mxu2 %v3260_v24  ;;  %vm8739_vm11 = vmmov %vm8725_vm0 }
 0x4f5   :  { %3931 = vmatpush.msra.mxu3 %v3472_v1  ;;  %vm8743_vm15 = vmmov %vm8725_vm0 }
 0x4f6   :  { %v2932_v48 = vmax.f32 %v2900_v45, 0.0  ;;  %2836 = vmatmul.f32.gmra.mxu3 %v2702_v12 }
 0x4f7   :  { %3932 = vmatpush.msra.mxu3 %v3471_v13 }
 0x4f8   :  { %v2964_v30 = vsel %vm5836_vm5, %v2932_v48, 0.0  ;;  %3157 = vst [vmem:[#allocation2 + $0x110] sm:$0xff] %v2932_v48  ;;  %v3261_v8 = vrot.slane %v2932_v48, 2  ;;  %3735 = vmatmul.f32.gmra.mxu1 %v2932_v48  ;;  %vm8728_vm5 = vmmov %vm8714_vm1  ;;  %v8733_v48 = vld [vmem:[#allocation35_spill] sm:$0xff] }
 0x4f9   :  { %v3036_v40 = vrot.slane %v2964_v30, 6  ;;  %v2625_v10 = vpop.f32.mrf.mxu2  ;;  %v2789_v33 = vpop.f32.mrf.mxu3  ;;  %3933 = vmatpush.msra.mxu3 %v3470_v34 }
 0x4fa   :  { %v3262_v0 = vsel %vm8725_vm0, %v3259_v53, %v3261_v8  ;;  %v2669_v55 = vmul.f32 %v7101_v49, %v2625_v10  ;;  %v2867_v36 = vmul.f32 %v7180_v2, %v2789_v33  ;;  %3619 = vmatmul.f32.gmra.mxu0 %v7280_v39 }
 0x4fb   :  { %v7296_v14 = vsel %vm8726_vm4, %v3034_v59, %v3036_v40  ;;  %3349 = vst [vmem:[#allocation2 + $0x180] sm:$0xff] %v3262_v0  ;;  %vm8746_vm4 = vmmov %vm8720_vm2 }
 0x4fc   :  { %3124 = vst [vmem:[#allocation2 + $0x2d0] sm:$0xff] %v7296_v14  ;;  %v2703_v54 = vadd.f32 %v7104_v31, %v2669_v55  ;;  %v2901_v9 = vadd.f32 %v7182_v37, %v2867_v36  ;;  %3845 = vmatmul.f32.gmra.mxu2 %v3262_v0  ;;  %v3494_v36 = vld [vmem:[#allocation7 + $0x540] sm:$0xff] }
 0x4fd   :  { %4038 = vmatpush.msra.mxu0 %v3494_v36 }
 0x4fe   :  { %v2933_v49 = vmax.f32 %v2901_v9, 0.0  ;;  %2839 = vmatmul.f32.gmra.mxu3 %v2703_v54  ;;  %v8737_v54 = vld [vmem:[#allocation37_spill] sm:$0xff] }
 0x4ff   :  { %vm8738_vm1 = vnez %v8737_v54  ;;  %v8751_v54 = vld [vmem:[#allocation44_spill] sm:$0xff] }
 0x500   :  { %v3038_v4 = vrot.slane %v2933_v49, 6  ;;  %3158 = vst [vmem:[#allocation2 + $0x1f0] sm:$0xff] %v2933_v49  ;;  %v3190_v28 = vsel %vm5883_vm14, %v2933_v49, 0.0  ;;  %3738 = vmatmul.f32.gmra.mxu1 %v2933_v49  ;;  %vm8729_vm14 = vmmov %vm8725_vm0 }
 0x501   :  { %v3263_v5 = vrot.slane %v3190_v28, 2  ;;  %v2628_v61 = vpop.f32.mrf.mxu2  ;;  %v2792_v25 = vpop.f32.mrf.mxu3 }
 0x502   :  { %v7304_v31 = vsel %vm8728_vm5, %v3036_v40, %v3038_v4  ;;  %v2670_v17 = vmul.f32 %v7306_v60, %v2628_v61  ;;  %v2868_v22 = vmul.f32 %v7180_v2, %v2792_v25  ;;  %3622 = vmatmul.f32.gmra.mxu0 %v7296_v14 }
 0x503   :  { %3125 = vst [vmem:[#allocation2 + $0x1a8] sm:$0xff] %v7304_v31  ;;  %v3264_v62 = vsel %vm8729_vm14, %v3261_v8, %v3263_v5  ;;  %vm8749_vm14 = vmmov %vm8720_vm2 }
 0x504   :  { %3350 = vst [vmem:[#allocation2 + $0x150] sm:$0xff] %v3264_v62  ;;  %v2704_v27 = vadd.f32 %v7313_v11, %v2670_v17  ;;  %v2902_v29 = vadd.f32 %v7182_v37, %v2868_v22  ;;  %3848 = vmatmul.f32.gmra.mxu2 %v3264_v62 }
 0x506   :  { %v2934_v46 = vmax.f32 %v2902_v29, 0.0  ;;  %2842 = vmatmul.f32.gmra.mxu3 %v2704_v27 }
 0x508   :  { %v2966_v59 = vsel %vm5927_vm10, %v2934_v46, 0.0  ;;  %3159 = vst [vmem:[#allocation2 + $0x310] sm:$0xff] %v2934_v46  ;;  %v3265_v57 = vrot.slane %v2934_v46, 2  ;;  %3741 = vmatmul.f32.gmra.mxu1 %v2934_v46  ;;  %vm8734_vm10 = vnez %v8733_v48  ;;  %v3493_v46 = vld [vmem:[#allocation7 + $0x538] sm:$0xff]  ;;  %v8747_v48 = vld [vmem:[#allocation43_spill] sm:$0xff] }
 0x509   :  { %v3040_v6 = vrot.slane %v2966_v59, 6  ;;  %v2631_v53 = vpop.f32.mrf.mxu2  ;;  %v2795_v15 = vpop.f32.mrf.mxu3  ;;  %4039 = vmatpush.msra.mxu0 %v3493_v46  ;;  %v8744_v59 = vld [vmem:[#allocation42_spill] sm:$0xff]  ;;  %vm8748_vm5 = vnez %v8747_v48 }
 0x50a   :  { %v3266_v44 = vsel %vm8731_vm6, %v3263_v5, %v3265_v57  ;;  %v2671_v26 = vmul.f32 %v7306_v60, %v2631_v53  ;;  %v2869_v18 = vmul.f32 %v7180_v2, %v2795_v15  ;;  %3625 = vmatmul.f32.gmra.mxu0 %v7304_v31  ;;  %vm8745_vm8 = vnez %v8744_v59  ;;  %vm8750_vm6 = vmmov %vm8725_vm0 }
 0x50b   :  { %v7324_v24 = vsel %vm8732_vm7, %v3038_v4, %v3040_v6  ;;  %3351 = vst [vmem:[#allocation2 + $0x70] sm:$0xff] %v3266_v44  ;;  %vm8752_vm7 = vnez %v8751_v54 }
 0x50c   :  { %3126 = vst [vmem:[#allocation2 + $0xc8] sm:$0xff] %v7324_v24  ;;  %v2705_v12 = vadd.f32 %v7313_v11, %v2671_v26  ;;  %v2903_v45 = vadd.f32 %v7182_v37, %v2869_v18  ;;  %3851 = vmatmul.f32.gmra.mxu2 %v3266_v44 }
 0x50e   :  { %v2935_v35 = vmax.f32 %v2903_v45, 0.0  ;;  %2845 = vmatmul.f32.gmra.mxu3 %v2705_v12 }
 0x510   :  { %v3042_v52 = vrot.slane %v2935_v35, 6  ;;  %3160 = vst [vmem:[#allocation2 + $0x328] sm:$0xff] %v2935_v35  ;;  %v3192_v16 = vsel %vm8734_vm10, %v2935_v35, 0.0  ;;  %3744 = vmatmul.f32.gmra.mxu1 %v2935_v35  ;;  %vm8753_vm10 = vmmov %vm8725_vm0 }
 0x511   :  { %v3267_v56 = vrot.slane %v3192_v16, 2  ;;  %v2634_v30 = vpop.f32.mrf.mxu2  ;;  %v2798_v8 = vpop.f32.mrf.mxu3 }
 0x512   :  { %v7332_v63 = vsel %vm8735_vm3, %v3040_v6, %v3042_v52  ;;  %v2672_v40 = vmul.f32 %v7306_v60, %v2634_v30  ;;  %v2870_v10 = vmul.f32 %v7180_v2, %v2798_v8  ;;  %3628 = vmatmul.f32.gmra.mxu0 %v7324_v24  ;;  %vm8754_vm3 = vmmov %vm8720_vm2 }
 0x513   :  { %3127 = vst [vmem:[#allocation2 + $0xf8] sm:$0xff] %v7332_v63  ;;  %v3268_v33 = vsel %vm8736_vm9, %v3265_v57, %v3267_v56 }
 0x514   :  { %3352 = vst [vmem:[#allocation2 + $0x128] sm:$0xff] %v3268_v33  ;;  %v2706_v0 = vadd.f32 %v7313_v11, %v2672_v40  ;;  %v2904_v55 = vadd.f32 %v7182_v37, %v2870_v10  ;;  %3854 = vmatmul.f32.gmra.mxu2 %v3268_v33 }
 0x516   :  { %v2936_v47 = vmax.f32 %v2904_v55, 0.0  ;;  %2848 = vmatmul.f32.gmra.mxu3 %v2706_v0  ;;  %v3492_v0 = vld [vmem:[#allocation7 + $0x530] sm:$0xff] }
 0x517   :  { %4040 = vmatpush.msra.mxu0 %v3492_v0  ;;  %v3516_v0 = vld [vmem:[#allocation7 + $0x5f0] sm:$0xff] }
 0x518   :  { %v2968_v9 = vsel %vm8738_vm1, %v2936_v47, 0.0  ;;  %3161 = vst [vmem:[#allocation2 + $0x1d0] sm:$0xff] %v2936_v47  ;;  %v3269_v3 = vrot.slane %v2936_v47, 2  ;;  %3747 = vmatmul.f32.gmra.mxu1 %v2936_v47  ;;  %vm8757_vm1 = vmmov %vm8720_vm2 }
 0x519   :  { %v3044_v49 = vrot.slane %v2968_v9, 6  ;;  %v2637_v19 = vpop.f32.mrf.mxu2  ;;  %v2801_v4 = vpop.f32.mrf.mxu3 }
 0x51a   :  { %v3270_v51 = vsel %vm8739_vm11, %v3267_v56, %v3269_v3  ;;  %v2673_v28 = vmul.f32 %v7306_v60, %v2637_v19  ;;  %v2871_v38 = vmul.f32 %v7180_v2, %v2801_v4  ;;  %3631 = vmatmul.f32.gmra.mxu0 %v7332_v63  ;;  %v8741_v60 = vld [vmem:[#allocation39_spill] sm:$0xff]  ;;  %vm8758_vm11 = vmmov %vm8725_vm0 }
 0x51b   :  { %v7348_v5 = vsel %vm8740_vm12, %v3042_v52, %v3044_v49  ;;  %3353 = vst [vmem:[#allocation2 + $0x10] sm:$0xff] %v3270_v51  ;;  %vm8742_vm13 = vnez %v8741_v60 }
 0x51c   :  { %3128 = vst [vmem:[#allocation2 + $0x118] sm:$0xff] %v7348_v5  ;;  %v2707_v61 = vadd.f32 %v7313_v11, %v2673_v28  ;;  %v2905_v25 = vadd.f32 %v7182_v37, %v2871_v38  ;;  %3857 = vmatmul.f32.gmra.mxu2 %v3270_v51 }
 0x51e   :  { %v2937_v17 = vmax.f32 %v2905_v25, 0.0  ;;  %2851 = vmatmul.f32.gmra.mxu3 %v2707_v61  ;;  %v3517_v61 = vld [vmem:[#allocation7 + $0x5f8] sm:$0xff] }
 0x51f   :  { %4144 = vmatpush.msra.mxu1 %v3517_v61 }
 0x520   :  { %v3046_v22 = vrot.slane %v2937_v17, 6  ;;  %3162 = vst [vmem:[#allocation2 + $0x268] sm:$0xff] %v2937_v17  ;;  %v3194_v1 = vsel %vm8742_vm13, %v2937_v17, 0.0  ;;  %3750 = vmatmul.f32.gmra.mxu1 %v2937_v17  ;;  %vm8761_vm13 = vmmov %vm8725_vm0 }
 0x521   :  { %v3271_v62 = vrot.slane %v3194_v1, 2  ;;  %v2804_v27 = vpop.f32.mrf.mxu3  ;;  %4145 = vmatpush.msra.mxu1 %v3516_v0 }
 0x522   :  { %v7356_v29 = vsel %vm8720_vm2, %v3044_v49, %v3046_v22  ;;  %v2872_v41 = vmul.f32 %v7180_v2, %v2804_v27  ;;  %3634 = vmatmul.f32.gmra.mxu0 %v7348_v5  ;;  %vm8762_vm2 = vmmov %vm8757_vm1 }
 0x523   :  { %3129 = vst [vmem:[#allocation2 + $0x250] sm:$0xff] %v7356_v29  ;;  %v3272_v11 = vsel %vm8743_vm15, %v3269_v3, %v3271_v62 }
 0x524   :  { %3354 = vst [vmem:[#allocation2 + $0x38] sm:$0xff] %v3272_v11  ;;  %v2906_v13 = vadd.f32 %v7182_v37, %v2872_v41  ;;  %3860 = vmatmul.f32.gmra.mxu2 %v3272_v11  ;;  %v8755_v41 = vld [vmem:[#allocation16_spill] sm:$0xff] }
 0x525   :  { %vm8756_vm9 = vnez %v8755_v41 }
 0x526   :  { %v2938_v34 = vmax.f32 %v2906_v13, 0.0  ;;  %3934 = vmatmul.f32.vlgmr.msra.gmra.mxu3 %v7363_v23 }
 0x528   :  { %v2970_v57 = vsel %vm8745_vm8, %v2938_v34, 0.0  ;;  %3163 = vst [vmem:[#allocation2 + $0x2c8] sm:$0xff] %v2938_v34  ;;  %v3273_v6 = vrot.slane %v2938_v34, 2  ;;  %3753 = vmatmul.f32.gmra.mxu1 %v2938_v34  ;;  %vm8765_vm8 = vmmov %vm8757_vm1 }
 0x529   :  { %v3048_v53 = vrot.slane %v2970_v57, 6  ;;  %v2807_v15 = vpop.f32.mrf.mxu3 }
 0x52a   :  { %v3274_v44 = vsel %vm8725_vm0, %v3271_v62, %v3273_v6  ;;  %v2873_v26 = vmul.f32 %v7180_v2, %v2807_v15  ;;  %3637 = vmatmul.f32.gmra.mxu0 %v7356_v29 }
 0x52b   :  { %v7372_v18 = vsel %vm8746_vm4, %v3046_v22, %v3048_v53  ;;  %3355 = vst [vmem:[#allocation2 + $0x108] sm:$0xff] %v3274_v44 }
 0x52c   :  { %3130 = vst [vmem:[#allocation2 + $0x318] sm:$0xff] %v7372_v18  ;;  %v2907_v12 = vadd.f32 %v7182_v37, %v2873_v26  ;;  %3863 = vmatmul.f32.gmra.mxu2 %v3274_v44 }
 0x52d   :  { %v3709_v45 = vpop.f32.mrf.mxu1 }
 0x52e   :  { %v2939_v35 = vmax.f32 %v2907_v12, 0.0  ;;  %3937 = vmatmul.f32.gmra.mxu3 %v7363_v23 }
 0x530   :  { %v3050_v52 = vrot.slane %v2939_v35, 6  ;;  %3164 = vst [vmem:[#allocation2 + $0x68] sm:$0xff] %v2939_v35  ;;  %v3196_v16 = vsel %vm8748_vm5, %v2939_v35, 0.0  ;;  %3756 = vmatmul.f32.gmra.mxu1 %v2939_v35  ;;  %v8759_v35 = vld [vmem:[#allocation18_spill] sm:$0xff]  ;;  %vm8768_vm5 = vmmov %vm8725_vm0 }
 0x531   :  { %v3275_v56 = vrot.slane %v3196_v16, 2  ;;  %v2810_v30 = vpop.f32.mrf.mxu3  ;;  %vm8760_vm12 = vnez %v8759_v35 }
 0x532   :  { %v7380_v8 = vsel %vm8749_vm14, %v3048_v53, %v3050_v52  ;;  %v2874_v40 = vmul.f32 %v7180_v2, %v2810_v30  ;;  %3640 = vmatmul.f32.gmra.mxu0 %v7372_v18  ;;  %v3491_v53 = vld [vmem:[#allocation7 + $0x528] sm:$0xff]  ;;  %vm8769_vm14 = vmmov %vm8757_vm1 }
 0x533   :  { %3131 = vst [vmem:[#allocation2 + $0x3c8] sm:$0xff] %v7380_v8  ;;  %v3276_v10 = vsel %vm8750_vm6, %v3273_v6, %v3275_v56  ;;  %4041 = vmatpush.msra.mxu0 %v3491_v53 }
 0x534   :  { %3356 = vst [vmem:[#allocation2 + $0xd0] sm:$0xff] %v3276_v10  ;;  %v2908_v33 = vadd.f32 %v7182_v37, %v2874_v40  ;;  %3866 = vmatmul.f32.gmra.mxu2 %v3276_v10 }
 0x535   :  { %v3712_v55 = vpop.f32.mrf.mxu1 }
 0x536   :  { %v2940_v36 = vmax.f32 %v2908_v33, 0.0  ;;  %3940 = vmatmul.f32.gmra.mxu3 %v7363_v23 }
 0x537   :  { %v3596_v47 = vpop.f32.mrf.mxu0 }
 0x538   :  { %v2972_v9 = vsel %vm8752_vm7, %v2940_v36, 0.0  ;;  %3165 = vst [vmem:[#allocation2 + $0x290] sm:$0xff] %v2940_v36  ;;  %v3277_v3 = vrot.slane %v2940_v36, 2  ;;  %3759 = vmatmul.f32.gmra.mxu1 %v2940_v36  ;;  %v3710_v25 = vadd.f32 %v3709_v45, %v3596_v47  ;;  %vm8772_vm7 = vmmov %vm8757_vm1 }
 0x539   :  { %v3052_v49 = vrot.slane %v2972_v9, 6  ;;  %v2813_v19 = vpop.f32.mrf.mxu3 }
 0x53a   :  { %v3278_v4 = vsel %vm8753_vm10, %v3275_v56, %v3277_v3  ;;  %v2875_v51 = vmul.f32 %v7180_v2, %v2813_v19  ;;  %3643 = vmatmul.f32.gmra.mxu0 %v7380_v8  ;;  %vm8773_vm10 = vmmov %vm8725_vm0 }
 0x53b   :  { %v7394_v28 = vsel %vm8754_vm3, %v3050_v52, %v3052_v49  ;;  %3357 = vst [vmem:[#allocation2 + $0x398] sm:$0xff] %v3278_v4 }
 0x53c   :  { %3132 = vst [vmem:[#allocation2 + $0x208] sm:$0xff] %v7394_v28  ;;  %v2909_v38 = vadd.f32 %v7182_v37, %v2875_v51  ;;  %3869 = vmatmul.f32.gmra.mxu2 %v3278_v4 }
 0x53d   :  { %v3715_v17 = vpop.f32.mrf.mxu1 }
 0x53e   :  { %v2941_v22 = vmax.f32 %v2909_v38, 0.0  ;;  %3943 = vmatmul.f32.gmra.mxu3 %v7363_v23  ;;  %v3822_v60 = vpop.f32.mrf.mxu2 }
 0x53f   :  { %v3599_v1 = vpop.f32.mrf.mxu0  ;;  %v7399_v62 = vadd.f32 %v3822_v60, %v3710_v25 }
 0x540   :  { %v3054_v27 = vrot.slane %v2941_v22, 6  ;;  %3166 = vst [vmem:[#allocation2 + $0x330] sm:$0xff] %v2941_v22  ;;  %v3198_v11 = vsel %vm8756_vm9, %v2941_v22, 0.0  ;;  %3762 = vmatmul.f32.gmra.mxu1 %v2941_v22  ;;  %v3713_v26 = vadd.f32 %v3712_v55, %v3599_v1  ;;  %v3490_v22 = vld [vmem:[#allocation7 + $0x520] sm:$0xff]  ;;  %vm8776_vm9 = vmmov %vm8725_vm0 }
 0x541   :  { %v3279_v13 = vrot.slane %v3198_v11, 2  ;;  %v2816_v46 = vpop.f32.mrf.mxu3  ;;  %4042 = vmatpush.msra.mxu0 %v3490_v22 }
 0x542   :  { %v7404_v34 = vsel %vm8757_vm1, %v3052_v49, %v3054_v27  ;;  %v2876_v59 = vmul.f32 %v7180_v2, %v2816_v46  ;;  %3646 = vmatmul.f32.gmra.mxu0 %v7394_v28  ;;  %v8763_v49 = vld [vmem:[#allocation20_spill] sm:$0xff] }
 0x543   :  { %3133 = vst [vmem:[#allocation2 + $0x370] sm:$0xff] %v7404_v34  ;;  %v3280_v57 = vsel %vm8758_vm11, %v3277_v3, %v3279_v13  ;;  %vm8764_vm15 = vnez %v8763_v49 }
 0x544   :  { %3358 = vst [vmem:[#allocation2 + $0x1c0] sm:$0xff] %v3280_v57  ;;  %v2910_v6 = vadd.f32 %v7182_v37, %v2876_v59  ;;  %3872 = vmatmul.f32.gmra.mxu2 %v3280_v57 }
 0x545   :  { %v3718_v15 = vpop.f32.mrf.mxu1 }
 0x546   :  { %v2942_v44 = vmax.f32 %v2910_v6, 0.0  ;;  %3946 = vmatmul.f32.gmra.mxu3 %v7196_v21 }
 0x547   :  { %v3602_v12 = vpop.f32.mrf.mxu0  ;;  %v3825_v45 = vpop.f32.mrf.mxu2 }
 0x548   :  { %v2974_v52 = vsel %vm8760_vm12, %v2942_v44, 0.0  ;;  %3167 = vst [vmem:[#allocation2 + $0x2f8] sm:$0xff] %v2942_v44  ;;  %v3281_v48 = vrot.slane %v2942_v44, 2  ;;  %v7414_v16 = vadd.f32 %v3825_v45, %v3713_v26  ;;  %3765 = vmatmul.f32.gmra.mxu1 %v2942_v44  ;;  %v3716_v47 = vadd.f32 %v3715_v17, %v3602_v12  ;;  %v3515_v12 = vld [vmem:[#allocation7 + $0x5e8] sm:$0xff]  ;;  %vm8779_vm12 = vmmov %vm8757_vm1 }
 0x549   :  { %v3056_v56 = vrot.slane %v2974_v52, 6  ;;  %v2819_v30 = vpop.f32.mrf.mxu3  ;;  %4146 = vmatpush.msra.mxu1 %v3515_v12 }
 0x54a   :  { %v3282_v40 = vsel %vm8761_vm13, %v3279_v13, %v3281_v48  ;;  %v2877_v10 = vmul.f32 %v7180_v2, %v2819_v30  ;;  %3649 = vmatmul.f32.gmra.mxu0 %v7404_v34  ;;  %v8766_v13 = vld [vmem:[#allocation22_spill] sm:$0xff]  ;;  %vm8780_vm13 = vmmov %vm8725_vm0 }
 0x54b   :  { %v7420_v21 = vsel %vm8762_vm2, %v3054_v27, %v3056_v56  ;;  %3359 = vst [vmem:[#allocation2 + $0x320] sm:$0xff] %v3282_v40  ;;  %vm8767_vm4 = vnez %v8766_v13  ;;  %v3514_v13 = vld [vmem:[#allocation7 + $0x5e0] sm:$0xff] }
 0x54c   :  { %3134 = vst [vmem:[#allocation2 + $0x178] sm:$0xff] %v7420_v21  ;;  %v2911_v33 = vadd.f32 %v7182_v37, %v2877_v10  ;;  %3875 = vmatmul.f32.gmra.mxu2 %v3282_v40  ;;  %v8770_v40 = vld [vmem:[#allocation24_spill] sm:$0xff]  ;;  %4147 = vmatpush.msra.mxu1 %v3514_v13  ;;  %v4369_v13 = vld [vmem:[#allocation7 + $0x7f8] sm:$0xff] }
 0x54d   :  { %v3721_v55 = vpop.f32.mrf.mxu1  ;;  %vm8771_vm6 = vnez %v8770_v40  ;;  %v3488_v40 = vld [vmem:[#allocation7 + $0x510] sm:$0xff]  ;;  %4402 = vmatpush.msrb.mxu2 %v4369_v13 }
 0x54e   :  { %v2943_v36 = vmax.f32 %v2911_v33, 0.0  ;;  %3949 = vmatmul.f32.gmra.mxu3 %v7203_v20 }
 0x54f   :  { %v3605_v54 = vpop.f32.mrf.mxu0  ;;  %v3828_v9 = vpop.f32.mrf.mxu2 }
 0x550   :  { %v3058_v3 = vrot.slane %v2943_v36, 6  ;;  %3168 = vst [vmem:[#allocation2 + $0x2b8] sm:$0xff] %v2943_v36  ;;  %v3200_v19 = vsel %vm8764_vm15, %v2943_v36, 0.0  ;;  %v7427_v4 = vadd.f32 %v3828_v9, %v3716_v47  ;;  %3768 = vmatmul.f32.gmra.mxu1 %v2943_v36  ;;  %v3719_v27 = vadd.f32 %v3718_v15, %v3605_v54  ;;  %v3489_v9 = vld [vmem:[#allocation7 + $0x518] sm:$0xff]  ;;  %vm8783_vm15 = vmmov %vm8725_vm0 }
 0x551   :  { %v3283_v51 = vrot.slane %v3200_v19, 2  ;;  %v2822_v38 = vpop.f32.mrf.mxu3  ;;  %4043 = vmatpush.msra.mxu0 %v3489_v9 }
 0x552   :  { %v7430_v61 = vsel %vm8765_vm8, %v3056_v56, %v3058_v3  ;;  %v2878_v25 = vmul.f32 %v7180_v2, %v2822_v38  ;;  %3652 = vmatmul.f32.gmra.mxu0 %v7420_v21  ;;  %vm8784_vm8 = vmmov %vm8757_vm1 }
 0x553   :  { %3135 = vst [vmem:[#allocation2 + $0x170] sm:$0xff] %v7430_v61  ;;  %v3284_v20 = vsel %vm8725_vm0, %v3281_v48, %v3283_v51  ;;  %4044 = vmatpush.msra.mxu0 %v3488_v40 }
 0x554   :  { %3360 = vst [vmem:[#allocation2 + $0x1a0] sm:$0xff] %v3284_v20  ;;  %v2912_v17 = vadd.f32 %v7182_v37, %v2878_v25  ;;  %3878 = vmatmul.f32.gmra.mxu2 %v3284_v20 }
 0x555   :  { %v3724_v60 = vpop.f32.mrf.mxu1 }
 0x556   :  { %v2944_v1 = vmax.f32 %v2912_v17, 0.0  ;;  %3952 = vmatmul.f32.gmra.mxu3 %v7210_v42 }
 0x557   :  { %v3608_v41 = vpop.f32.mrf.mxu0  ;;  %v3831_v11 = vpop.f32.mrf.mxu2 }
 0x558   :  { %v2976_v46 = vsel %vm8767_vm4, %v2944_v1, 0.0  ;;  %3169 = vst [vmem:[#allocation2 + $0x210] sm:$0xff] %v2944_v1  ;;  %v3285_v59 = vrot.slane %v2944_v1, 2  ;;  %v7440_v57 = vadd.f32 %v3831_v11, %v3719_v27  ;;  %3771 = vmatmul.f32.gmra.mxu1 %v2944_v1  ;;  %v3722_v52 = vadd.f32 %v3721_v55, %v3608_v41  ;;  %v7469_v27 = vld [vmem:[#allocation8 + $0x8] ss:$0 sm:$0xff]  ;;  %vm8787_vm4 = vmmov %vm8757_vm1 }
 0x559   :  { %v3060_v6 = vrot.slane %v2976_v46, 6  ;;  %v2825_v53 = vpop.f32.mrf.mxu3  ;;  %v7477_v41 = vld [vmem:[#allocation8 + $0x9] ss:$0 sm:$0xff] }
 0x55a   :  { %v3286_v44 = vsel %vm8768_vm5, %v3283_v51, %v3285_v59  ;;  %v2879_v26 = vmul.f32 %v7180_v2, %v2825_v53  ;;  %3655 = vmatmul.f32.gmra.mxu0 %v7430_v61 }
 0x55b   :  { %v7446_v42 = vsel %vm8769_vm14, %v3058_v3, %v3060_v6  ;;  %3361 = vst [vmem:[#allocation2 + $0x190] sm:$0xff] %v3286_v44 }
 0x55c   :  { %3136 = vst [vmem:[#allocation2 + $0x58] sm:$0xff] %v7446_v42  ;;  %v2913_v15 = vadd.f32 %v7182_v37, %v2879_v26  ;;  %3881 = vmatmul.f32.gmra.mxu2 %v3286_v44 }
 0x55d   :  { %v3727_v45 = vpop.f32.mrf.mxu1 }
 0x55e   :  { %v2945_v35 = vmax.f32 %v2913_v15, 0.0  ;;  %3955 = vmatmul.f32.gmra.mxu3 %v7225_v43  ;;  %v8777_v15 = vld [vmem:[#allocation28_spill] sm:$0xff] }
 0x55f   :  { %v3611_v48 = vpop.f32.mrf.mxu0  ;;  %v3834_v56 = vpop.f32.mrf.mxu2  ;;  %vm8778_vm11 = vnez %v8777_v15 }
 0x560   :  { %v3062_v30 = vrot.slane %v2945_v35, 6  ;;  %3170 = vst [vmem:[#allocation2 + $0x380] sm:$0xff] %v2945_v35  ;;  %v3202_v10 = vsel %vm8771_vm6, %v2945_v35, 0.0  ;;  %v7453_v33 = vadd.f32 %v3834_v56, %v3722_v52  ;;  %3774 = vmatmul.f32.gmra.mxu1 %v2945_v35  ;;  %v3725_v19 = vadd.f32 %v3724_v60, %v3611_v48  ;;  %vm8790_vm6 = vmmov %vm8768_vm5 }
 0x561   :  { %v3287_v0 = vrot.slane %v3202_v10, 2  ;;  %v2828_v36 = vpop.f32.mrf.mxu3 }
 0x562   :  { %v7456_v47 = vsel %vm8772_vm7, %v3060_v6, %v3062_v30  ;;  %v2880_v54 = vmul.f32 %v7180_v2, %v2828_v36  ;;  %3658 = vmatmul.f32.gmra.mxu0 %v7446_v42  ;;  %v8774_v2 = vld [vmem:[#allocation26_spill] sm:$0xff]  ;;  %vm8791_vm7 = vmmov %vm8757_vm1 }
 0x563   :  { %3137 = vst [vmem:[#allocation2 + $0x198] sm:$0xff] %v7456_v47  ;;  %v3288_v43 = vsel %vm8773_vm10, %v3285_v59, %v3287_v0  ;;  %vm8775_vm3 = vnez %v8774_v2 }
 0x564   :  { %3362 = vst [vmem:[#allocation2 + $0x90] sm:$0xff] %v3288_v43  ;;  %v2914_v55 = vadd.f32 %v7182_v37, %v2880_v54  ;;  %3884 = vmatmul.f32.gmra.mxu2 %v3288_v43 }
 0x565   :  { %v3730_v3 = vpop.f32.mrf.mxu1 }
 0x566   :  { %v2946_v49 = vmax.f32 %v2914_v55, 0.0  ;;  %3958 = vmatmul.f32.gmra.mxu3 %v7232_v7  ;;  %v8781_v55 = vld [vmem:[#allocation30_spill] sm:$0xff] }
 0x567   :  { %v3614_v51 = vpop.f32.mrf.mxu0  ;;  %v3837_v38 = vpop.f32.mrf.mxu2  ;;  %vm8782_vm2 = vnez %v8781_v55 }
 0x568   :  { %v2978_v25 = vsel %vm8775_vm3, %v2946_v49, 0.0  ;;  %3171 = vst [vmem:[#allocation2 + $0x2a8] sm:$0xff] %v2946_v49  ;;  %v3289_v20 = vrot.slane %v2946_v49, 2  ;;  %v7466_v17 = vadd.f32 %v3837_v38, %v3725_v19  ;;  %3777 = vmatmul.f32.gmra.mxu1 %v2946_v49  ;;  %v3728_v6 = vadd.f32 %v3727_v45, %v3614_v51  ;;  %vm8794_vm3 = vmmov %vm8757_vm1 }
 0x569   :  { %v3064_v22 = vrot.slane %v2978_v25, 6  ;;  %v2831_v37 = vpop.f32.mrf.mxu3 }
 0x56a   :  { %v3290_v1 = vsel %vm8776_vm9, %v3287_v0, %v3289_v20  ;;  %v2881_v60 = vmul.f32 %v7469_v27, %v2831_v37  ;;  %3661 = vmatmul.f32.gmra.mxu0 %v7456_v47  ;;  %vm8795_vm9 = vmmov %vm8768_vm5 }
 0x56b   :  { %v7474_v7 = vsel %vm8757_vm1, %v3062_v30, %v3064_v22  ;;  %3363 = vst [vmem:[#allocation2 + $0x360] sm:$0xff] %v3290_v1 }
 0x56c   :  { %3138 = vst [vmem:[#allocation2 + $0x288] sm:$0xff] %v7474_v7  ;;  %v2915_v11 = vadd.f32 %v7477_v41, %v2881_v60  ;;  %3887 = vmatmul.f32.gmra.mxu2 %v3290_v1 }
 0x56d   :  { %v3733_v46 = vpop.f32.mrf.mxu1 }
 0x56e   :  { %v2947_v59 = vmax.f32 %v2915_v11, 0.0  ;;  %3961 = vmatmul.f32.gmra.mxu3 %v7248_v58  ;;  %v3511_v11 = vld [vmem:[#allocation7 + $0x5c8] sm:$0xff] }
 0x56f   :  { %v3617_v53 = vpop.f32.mrf.mxu0  ;;  %v3840_v44 = vpop.f32.mrf.mxu2 }
 0x570   :  { %v3066_v26 = vrot.slane %v2947_v59, 6  ;;  %3172 = vst [vmem:[#allocation2 + $0x3c0] sm:$0xff] %v2947_v59  ;;  %v3204_v12 = vsel %vm8778_vm11, %v2947_v59, 0.0  ;;  %v7483_v35 = vadd.f32 %v3840_v44, %v3728_v6  ;;  %3780 = vmatmul.f32.gmra.mxu1 %v2947_v59  ;;  %v3731_v36 = vadd.f32 %v3730_v3, %v3617_v53  ;;  %v3513_v3 = vld [vmem:[#allocation7 + $0x5d8] sm:$0xff]  ;;  %v8785_v44 = vld [vmem:[#allocation32_spill] sm:$0xff]  ;;  %vm8798_vm11 = vmmov %vm8768_vm5 }
 0x571   :  { %v3291_v52 = vrot.slane %v3204_v12, 2  ;;  %v2834_v48 = vpop.f32.mrf.mxu3  ;;  %4148 = vmatpush.msra.mxu1 %v3513_v3  ;;  %vm8786_vm0 = vnez %v8785_v44  ;;  %v8788_v3 = vld [vmem:[#allocation34_spill] sm:$0xff]  ;;  %v4363_v44 = vld [vmem:[#allocation7 + $0x7c8] sm:$0xff] }
 0x572   :  { %v7486_v56 = vsel %vm8779_vm12, %v3064_v22, %v3066_v26  ;;  %v2882_v30 = vmul.f32 %v7469_v27, %v2834_v48  ;;  %3664 = vmatmul.f32.gmra.mxu0 %v7474_v7  ;;  %v3512_v22 = vld [vmem:[#allocation7 + $0x5d0] sm:$0xff]  ;;  %vm8789_vm14 = vnez %v8788_v3  ;;  %v4385_v3 = vld [vmem:[#allocation7 + $0x878] sm:$0xff]  ;;  %vm8799_vm12 = vmmov %vm8794_vm3 }
 0x573   :  { %3139 = vst [vmem:[#allocation2 + $0x78] sm:$0xff] %v7486_v56  ;;  %v3292_v58 = vsel %vm8780_vm13, %v3289_v20, %v3291_v52  ;;  %4149 = vmatpush.msra.mxu1 %v3512_v22  ;;  %4515 = vmatpush.msrb.mxu3 %v4385_v3 }
 0x574   :  { %3364 = vst [vmem:[#allocation2 + $0x3b0] sm:$0xff] %v3292_v58  ;;  %v2916_v45 = vadd.f32 %v7477_v41, %v2882_v30  ;;  %3890 = vmatmul.f32.gmra.mxu2 %v3292_v58  ;;  %v3509_v58 = vld [vmem:[#allocation7 + $0x5b8] sm:$0xff] }
 0x575   :  { %v7493_v10 = vpop.f32.mrf.mxu1  ;;  %4150 = vmatpush.msra.mxu1 %v3511_v11 }
 0x576   :  { %v2948_v0 = vmax.f32 %v2916_v45, 0.0  ;;  %3964 = vmatmul.f32.gmra.mxu3 %v7256_v32  ;;  %v4367_v45 = vld [vmem:[#allocation7 + $0x7e8] sm:$0xff] }
 0x577   :  { %v3620_v54 = vpop.f32.mrf.mxu0  ;;  %v3843_v43 = vpop.f32.mrf.mxu2 }
 0x578   :  { %v2980_v9 = vsel %vm8782_vm2, %v2948_v0, 0.0  ;;  %3173 = vst [vmem:[#allocation2 + $0x30] sm:$0xff] %v2948_v0  ;;  %v3293_v49 = vrot.slane %v2948_v0, 2  ;;  %v7498_v19 = vadd.f32 %v3843_v43, %v3731_v36  ;;  %3783 = vmatmul.f32.gmra.mxu1 %v2948_v0  ;;  %v3734_v60 = vadd.f32 %v3733_v46, %v3620_v54  ;;  %v3510_v46 = vld [vmem:[#allocation7 + $0x5c0] sm:$0xff]  ;;  %v3487_v36 = vld [vmem:[#allocation7 + $0x508] sm:$0xff]  ;;  %v3508_v54 = vld [vmem:[#allocation7 + $0x5b0] sm:$0xff] }
 0x579   :  { %v3068_v51 = vrot.slane %v2980_v9, 6  ;;  %v2837_v38 = vpop.f32.mrf.mxu3  ;;  %4151 = vmatpush.msra.mxu1 %v3510_v46  ;;  %v4366_v43 = vld [vmem:[#allocation7 + $0x7e0] sm:$0xff]  ;;  %4045 = vmatpush.msra.mxu0 %v3487_v36  ;;  %vm8802_vm2 = vmmov %vm8794_vm3 }
 0x57a   :  { %v3294_v2 = vsel %vm8783_vm15, %v3291_v52, %v3293_v49  ;;  %v2883_v25 = vmul.f32 %v7469_v27, %v2837_v38  ;;  %3667 = vmatmul.f32.gmra.mxu0 %v7486_v56  ;;  %v4365_v38 = vld [vmem:[#allocation7 + $0x7d8] sm:$0xff]  ;;  %vm8803_vm15 = vmmov %vm8768_vm5 }
 0x57b   :  { %v7504_v32 = vsel %vm8784_vm8, %v3066_v26, %v3068_v51  ;;  %3365 = vst [vmem:[#allocation2 + $0x1b8] sm:$0xff] %v3294_v2  ;;  %4152 = vmatpush.msra.mxu1 %v3509_v58 }
 0x57c   :  { %3140 = vst [vmem:[#allocation2 + $0xc0] sm:$0xff] %v7504_v32  ;;  %v2917_v20 = vadd.f32 %v7477_v41, %v2883_v25  ;;  %3893 = vmatmul.f32.gmra.mxu2 %v3294_v2 }
 0x57d   :  { %v7508_v37 = vpop.f32.mrf.mxu1  ;;  %4153 = vmatpush.msra.mxu1 %v3508_v54 }
 0x57e   :  { %v7510_v1 = vmax.f32 %v2917_v20, 0.0  ;;  %3967 = vmatmul.f32.gmra.mxu3 %v7272_v50  ;;  %v4368_v50 = vld [vmem:[#allocation7 + $0x7f0] sm:$0xff] }
 0x57f   :  { %v3623_v59 = vpop.f32.mrf.mxu0  ;;  %v3846_v6 = vpop.f32.mrf.mxu2  ;;  %4403 = vmatpush.msrb.mxu2 %v4368_v50  ;;  %v3504_v50 = vld [vmem:[#allocation7 + $0x590] sm:$0xff] }
 0x580   :  { %v3070_v53 = vrot.slane %v7510_v1, 6  ;;  %3174 = vst [vmem:[#allocation2 + $0x348] sm:$0xff] %v7510_v1  ;;  %v3206_v26 = vsel %vm8786_vm0, %v7510_v1, 0.0  ;;  %v7518_v15 = vadd.f32 %v3846_v6, %v3734_v60  ;;  %3786 = vmatmul.f32.gmra.mxu1 %v7510_v1  ;;  %v3505_v6 = vld [vmem:[#allocation7 + $0x598] sm:$0xff]  ;;  %vm8806_vm0 = vmmov %vm8768_vm5 }
 0x581   :  { %v3295_v12 = vrot.slane %v3206_v26, 2  ;;  %v2840_v52 = vpop.f32.mrf.mxu3  ;;  %4404 = vmatpush.msrb.mxu2 %v4367_v45 }
 0x582   :  { %v7522_v48 = vsel %vm8787_vm4, %v3068_v51, %v3070_v53  ;;  %v2884_v30 = vmul.f32 %v7469_v27, %v2840_v52  ;;  %3670 = vmatmul.f32.gmra.mxu0 %v7504_v32  ;;  %v3737_v51 = vadd.f32 %v7493_v10, %v3623_v59  ;;  %v4364_v10 = vld [vmem:[#allocation7 + $0x7d0] sm:$0xff]  ;;  %v4362_v52 = vld [vmem:[#allocation7 + $0x7c0] sm:$0xff]  ;;  %vm8807_vm4 = vmmov %vm8802_vm2 }
 0x583   :  { %3141 = vst [vmem:[#allocation2 + $0x230] sm:$0xff] %v7522_v48  ;;  %v3296_v40 = vsel %vm8768_vm5, %v3293_v49, %v3295_v12  ;;  %4405 = vmatpush.msrb.mxu2 %v4366_v43  ;;  %v3507_v49 = vld [vmem:[#allocation7 + $0x5a8] sm:$0xff] }
 0x584   :  { %3366 = vst [vmem:[#allocation2 + $0xf0] sm:$0xff] %v3296_v40  ;;  %v2918_v0 = vadd.f32 %v7477_v41, %v2884_v30  ;;  %3896 = vmatmul.f32.gmra.mxu2 %v3296_v40  ;;  %4154 = vmatpush.msra.mxu1 %v3507_v49  ;;  %v3486_v30 = vld [vmem:[#allocation7 + $0x500] sm:$0xff]  ;;  %v4361_v40 = vld [vmem:[#allocation7 + $0x7b8] sm:$0xff]  ;;  %v8792_v43 = vld [vmem:[#allocation36_spill] sm:$0xff] }
 0x585   :  { %v7529_v55 = vpop.f32.mrf.mxu1  ;;  %4406 = vmatpush.msrb.mxu2 %v4365_v38  ;;  %4046 = vmatpush.msra.mxu0 %v3486_v30  ;;  %vm8793_vm10 = vnez %v8792_v43  ;;  %v3502_v49 = vld [vmem:[#allocation7 + $0x580] sm:$0xff]  ;;  %v4360_v38 = vld [vmem:[#allocation7 + $0x7b0] sm:$0xff] }
 0x586   :  { %v7531_v9 = vmax.f32 %v2918_v0, 0.0  ;;  %3970 = vmatmul.f32.gmra.mxu3 %v7280_v39  ;;  %v3506_v39 = vld [vmem:[#allocation7 + $0x5a0] sm:$0xff] }
 0x587   :  { %v3626_v2 = vpop.f32.mrf.mxu0  ;;  %v3849_v25 = vpop.f32.mrf.mxu2  ;;  %4155 = vmatpush.msra.mxu1 %v3506_v39  ;;  %4407 = vmatpush.msrb.mxu2 %v4364_v10 }
 0x588   :  { %v2982_v20 = vsel %vm8789_vm14, %v7531_v9, 0.0  ;;  %3175 = vst [vmem:[#allocation2 + $0x1c8] sm:$0xff] %v7531_v9  ;;  %v3297_v22 = vrot.slane %v7531_v9, 2  ;;  %v7540_v1 = vadd.f32 %v3849_v25, %v3737_v51  ;;  %3789 = vmatmul.f32.gmra.mxu1 %v7531_v9  ;;  %v3740_v45 = vadd.f32 %v7508_v37, %v3626_v2 }
 0x589   :  { %v3072_v60 = vrot.slane %v2982_v20, 6  ;;  %v2843_v11 = vpop.f32.mrf.mxu3  ;;  %4156 = vmatpush.msra.mxu1 %v3505_v6  ;;  %4408 = vmatpush.msrb.mxu2 %v4363_v44  ;;  %v4359_v20 = vld [vmem:[#allocation7 + $0x7a8] sm:$0xff]  ;;  %v4357_v6 = vld [vmem:[#allocation7 + $0x798] sm:$0xff] }
 0x58a   :  { %v3298_v13 = vsel %vm8790_vm6, %v3295_v12, %v3297_v22  ;;  %v2885_v59 = vmul.f32 %v7469_v27, %v2843_v11  ;;  %3673 = vmatmul.f32.gmra.mxu0 %v7522_v48  ;;  %v4358_v11 = vld [vmem:[#allocation7 + $0x7a0] sm:$0xff] }
 0x58b   :  { %v7547_v26 = vsel %vm8791_vm7, %v3070_v53, %v3072_v60  ;;  %3367 = vst [vmem:[#allocation2 + $0x248] sm:$0xff] %v3298_v13  ;;  %4157 = vmatpush.msra.mxu1 %v3504_v50  ;;  %v3503_v53 = vld [vmem:[#allocation7 + $0x588] sm:$0xff]  ;;  %4409 = vmatpush.msrb.mxu2 %v4362_v52  ;;  %v8796_v50 = vld [vmem:[#allocation38_spill] sm:$0xff] }
 0x58c   :  { %3142 = vst [vmem:[#allocation2 + $0x280] sm:$0xff] %v7547_v26  ;;  %v2919_v46 = vadd.f32 %v7477_v41, %v2885_v59  ;;  %3899 = vmatmul.f32.gmra.mxu2 %v3298_v13  ;;  %vm8797_vm1 = vnez %v8796_v50 }
 0x58d   :  { %v7551_v12 = vpop.f32.mrf.mxu1  ;;  %4158 = vmatpush.msra.mxu1 %v3503_v53  ;;  %4410 = vmatpush.msrb.mxu2 %v4361_v40  ;;  %v4401_v40 = vld [vmem:[#allocation7 + $0x8f8] sm:$0xff] }
 0x58e   :  { %v2951_v58 = vmax.f32 %v2919_v46, 0.0  ;;  %3973 = vmatmul.f32.gmra.mxu3 %v7296_v14  ;;  %4628 = vmatpush.msrb.mxu0 %v4401_v40 }
 0x58f   :  { %v3629_v0 = vpop.f32.mrf.mxu0  ;;  %v3852_v36 = vpop.f32.mrf.mxu2  ;;  %4159 = vmatpush.msra.mxu1 %v3502_v49  ;;  %4411 = vmatpush.msrb.mxu2 %v4360_v38 }
 0x590   :  { %v3074_v54 = vrot.slane %v2951_v58, 6  ;;  %3176 = vst [vmem:[#allocation2 + $0x2f0] sm:$0xff] %v2951_v58  ;;  %v3208_v9 = vsel %vm8793_vm10, %v2951_v58, 0.0  ;;  %v7557_v51 = vadd.f32 %v3852_v36, %v3740_v45  ;;  %3792 = vmatmul.f32.gmra.mxu1 %v2951_v58  ;;  %v4356_v58 = vld [vmem:[#allocation7 + $0x790] sm:$0xff] }
 0x591   :  { %v3299_v37 = vrot.slane %v3208_v9, 2  ;;  %v2846_v2 = vpop.f32.mrf.mxu3  ;;  %4412 = vmatpush.msrb.mxu2 %v4359_v20  ;;  %v4354_v9 = vld [vmem:[#allocation7 + $0x780] sm:$0xff] }
 0x592   :  { %v3075_v14 = vsel %vm8794_vm3, %v3072_v60, %v3074_v54  ;;  %v2886_v25 = vmul.f32 %v7469_v27, %v2846_v2  ;;  %3676 = vmatmul.f32.gmra.mxu0 %v7547_v26  ;;  %v3743_v60 = vadd.f32 %v7529_v55, %v3629_v0  ;;  %v4355_v0 = vld [vmem:[#allocation7 + $0x788] sm:$0xff] }
 0x593   :  { %3143 = vst [vmem:[#allocation2 + $0x300] sm:$0xff] %v3075_v14  ;;  %v3300_v39 = vsel %vm8795_vm9, %v3297_v22, %v3299_v37  ;;  %4413 = vmatpush.msrb.mxu2 %v4358_v11 }
 0x594   :  { %3368 = vst [vmem:[#allocation2 + $0x200] sm:$0xff] %v3300_v39  ;;  %v2920_v10 = vadd.f32 %v7477_v41, %v2886_v25  ;;  %3902 = vmatmul.f32.gmra.mxu2 %v3300_v39 }
 0x595   :  { %v3748_v13 = vpop.f32.mrf.mxu1  ;;  %4414 = vmatpush.msrb.mxu2 %v4357_v6 }
 0x596   :  { %v2952_v59 = vmax.f32 %v2920_v10, 0.0  ;;  %3976 = vmatmul.f32.gmra.mxu3 %v7304_v31 }
 0x597   :  { %v3632_v44 = vpop.f32.mrf.mxu0  ;;  %v3855_v46 = vpop.f32.mrf.mxu2  ;;  %4415 = vmatpush.msrb.mxu2 %v4356_v58  ;;  %v8804_v58 = vld [vmem:[#allocation41_spill] sm:$0xff] }
 0x598   :  { %v2984_v22 = vsel %vm8797_vm1, %v2952_v59, 0.0  ;;  %3177 = vst [vmem:[#allocation2 + $0x2e8] sm:$0xff] %v2952_v59  ;;  %v3301_v52 = vrot.slane %v2952_v59, 2  ;;  %v7568_v30 = vadd.f32 %v3855_v46, %v3743_v60  ;;  %3795 = vmatmul.f32.gmra.mxu1 %v2952_v59  ;;  %vm8805_vm8 = vnez %v8804_v58  ;;  %v3384_v58 = vld [vmem:[#allocation2 + $0x3d8] sm:$0xff] }
 0x599   :  { %v3076_v45 = vrot.slane %v2984_v22, 6  ;;  %v2849_v53 = vpop.f32.mrf.mxu3  ;;  %4416 = vmatpush.msrb.mxu2 %v4355_v0 }
 0x59a   :  { %v3302_v55 = vsel %vm8798_vm11, %v3299_v37, %v3301_v52  ;;  %v2887_v31 = vmul.f32 %v7469_v27, %v2849_v53  ;;  %3679 = vmatmul.f32.gmra.mxu0 %v3075_v14  ;;  %v3746_v37 = vadd.f32 %v7551_v12, %v3632_v44  ;;  %v4384_v12 = vld [vmem:[#allocation7 + $0x870] sm:$0xff] }
 0x59b   :  { %v3077_v36 = vsel %vm8799_vm12, %v3074_v54, %v3076_v45  ;;  %3369 = vst [vmem:[#allocation2 + $0x188] sm:$0xff] %v3302_v55  ;;  %4417 = vmatpush.msrb.mxu2 %v4354_v9  ;;  %v8800_v54 = vld [vmem:[#allocation40_spill] sm:$0xff]  ;;  %4516 = vmatpush.msrb.mxu3 %v4384_v12 }
 0x59c   :  { %3144 = vst [vmem:[#allocation2 + $0xb8] sm:$0xff] %v3077_v36  ;;  %v2921_v43 = vadd.f32 %v7477_v41, %v2887_v31  ;;  %3905 = vmatmul.f32.gmra.mxu2 %v3302_v55  ;;  %vm8801_vm13 = vnez %v8800_v54 }
 0x59d   :  { %v3751_v49 = vpop.f32.mrf.mxu1 }
 0x59e   :  { %v2953_v38 = vmax.f32 %v2921_v43, 0.0  ;;  %3979 = vmatmul.f32.gmra.mxu3 %v7324_v24 }
 0x59f   :  { %v3635_v2 = vpop.f32.mrf.mxu0  ;;  %v3858_v14 = vpop.f32.mrf.mxu2 }
 0x5a0   :  { %v3078_v25 = vrot.slane %v2953_v38, 6  ;;  %3178 = vst [vmem:[#allocation2 + $0xe0] sm:$0xff] %v2953_v38  ;;  %v3210_v3 = vsel %vm8801_vm13, %v2953_v38, 0.0  ;;  %v7578_v20 = vadd.f32 %v3858_v14, %v3746_v37  ;;  %3798 = vmatmul.f32.gmra.mxu1 %v2953_v38  ;;  %v3749_v46 = vadd.f32 %v3748_v13, %v3635_v2  ;;  %v4383_v37 = vld [vmem:[#allocation7 + $0x868] sm:$0xff] }
 0x5a1   :  { %v3303_v39 = vrot.slane %v3210_v3, 2  ;;  %v2852_v10 = vpop.f32.mrf.mxu3  ;;  %4517 = vmatpush.msrb.mxu3 %v4383_v37 }
 0x5a2   :  { %v3079_v11 = vsel %vm8802_vm2, %v3076_v45, %v3078_v25  ;;  %v2888_v59 = vmul.f32 %v7469_v27, %v2852_v10  ;;  %3682 = vmatmul.f32.gmra.mxu0 %v3077_v36  ;;  %v4257_v10 = vld [vmem:[#allocation2 + $0x20] sm:$0xff] }
 0x5a3   :  { %3145 = vst [vmem:[#allocation2 + $0x98] sm:$0xff] %v3079_v11  ;;  %v3304_v24 = vsel %vm8803_vm15, %v3301_v52, %v3303_v39 }
 0x5a4   :  { %3370 = vst [vmem:[#allocation2 + $0xa0] sm:$0xff] %v3304_v24  ;;  %v2922_v60 = vadd.f32 %v7477_v41, %v2888_v59  ;;  %3908 = vmatmul.f32.gmra.mxu2 %v3304_v24 }
 0x5a5   :  { %v3754_v6 = vpop.f32.mrf.mxu1 }
 0x5a6   :  { %v2954_v44 = vmax.f32 %v2922_v60, 0.0  ;;  %3982 = vmatmul.f32.gmra.mxu3 %v7332_v63  ;;  %v4400_v63 = vld [vmem:[#allocation7 + $0x8f0] sm:$0xff] }
 0x5a7   :  { %v3638_v50 = vpop.f32.mrf.mxu0  ;;  %v3861_v22 = vpop.f32.mrf.mxu2  ;;  %4629 = vmatpush.msrb.mxu0 %v4400_v63 }
 0x5a8   :  { %v2986_v27 = vsel %vm8805_vm8, %v2954_v44, 0.0  ;;  %3179 = vst [vmem:[#allocation2 + $0x160] sm:$0xff] %v2954_v44  ;;  %v3305_v45 = vrot.slane %v2954_v44, 2  ;;  %v7587_v53 = vadd.f32 %v3861_v22, %v3749_v46  ;;  %3801 = vmatmul.f32.gmra.mxu1 %v2954_v44  ;;  %v3752_v0 = vadd.f32 %v3751_v49, %v3638_v50  ;;  %v4260_v44 = vld [vmem:[#allocation2 + $0x2d8] sm:$0xff] }
 0x5a9   :  { %v3080_v52 = vrot.slane %v2986_v27, 6  ;;  %v3935_v55 = vpop.f32.mrf.mxu3 }
 0x5aa   :  { %v3306_v41 = vsel %vm8806_vm0, %v3303_v39, %v3305_v45  ;;  %3372 = vst [vmem:[#allocation2 + $0x80] sm:$0x3f] %v3305_v45  ;;  %v7591_v31 = vadd.f32 %v3935_v55, %v7399_v62  ;;  %3685 = vmatmul.f32.gmra.mxu0 %v3079_v11  ;;  %v4263_v55 = vld [vmem:[#allocation2] sm:$0xff] }
 0x5ab   :  { %v3081_v13 = vsel %vm8807_vm4, %v3078_v25, %v3080_v52  ;;  %3147 = vst [vmem:[#allocation2 + $0x228] sm:$0x3] %v3080_v52  ;;  %v4398_v52 = vld [vmem:[#allocation7 + $0x8e0] sm:$0xff] }
 0x5ac   :  { %3146 = vst [vmem:[#allocation2 + $0x148] sm:$0xff] %v3081_v13  ;;  %3911 = vmatmul.f32.gmra.mxu2 %v3306_v41 }
 0x5ad   :  { %3371 = vst [vmem:[#allocation2 + $0x1b0] sm:$0xff] %v3306_v41  ;;  %v3757_v40 = vpop.f32.mrf.mxu1 }
 0x5ae   :  { %3985 = vmatmul.f32.gmra.mxu3 %v7348_v5 }
 0x5af   :  { %v3641_v36 = vpop.f32.mrf.mxu0  ;;  %v3864_v43 = vpop.f32.mrf.mxu2 }
 0x5b0   :  { %v7595_v9 = vadd.f32 %v3864_v43, %v3752_v0  ;;  %4160 = vmatmul.f32.vlgmr.msra.gmra.mxu1 %v7363_v23  ;;  %v3755_v25 = vadd.f32 %v3754_v6, %v3641_v36  ;;  %v4382_v6 = vld [vmem:[#allocation7 + $0x860] sm:$0xff]  ;;  %v5216_v0 = vld [vmem:[#allocation2 + $0x238] sm:$0xff] }
 0x5b1   :  { %v3938_v62 = vpop.f32.mrf.mxu3  ;;  %v3529_v2 = vld [vmem:[#allocation2 + $0x80] sm:$0xff]  ;;  %4518 = vmatpush.msrb.mxu3 %v4382_v6  ;;  %v4381_v43 = vld [vmem:[#allocation7 + $0x858] sm:$0xff]  ;;  %v5220_v6 = vld [vmem:[#allocation2 + $0x8] sm:$0xff] }
 0x5b2   :  { %v7599_v38 = vadd.f32 %v3938_v62, %v7414_v16  ;;  %3688 = vmatmul.f32.gmra.mxu0 %v3081_v13  ;;  %v4399_v16 = vld [vmem:[#allocation7 + $0x8e8] sm:$0xff]  ;;  %v4266_v62 = vld [vmem:[#allocation2 + $0x378] sm:$0xff] }
 0x5b3   :  { %4630 = vmatpush.msrb.mxu0 %v4399_v16  ;;  %4519 = vmatpush.msrb.mxu3 %v4381_v43  ;;  %v4269_v16 = vld [vmem:[#allocation2 + $0x2a0] sm:$0xff]  ;;  %v5223_v43 = vld [vmem:[#allocation2 + $0x1f8] sm:$0xff] }
 0x5b4   :  { %3914 = vmatmul.f32.gmra.mxu2 %v3529_v2 }
 0x5b5   :  { %v3760_v14 = vpop.f32.mrf.mxu1  ;;  %4631 = vmatpush.msrb.mxu0 %v4398_v52 }
 0x5b6   :  { %3988 = vmatmul.f32.gmra.mxu3 %v7356_v29 }
 0x5b7   :  { %v3644_v5 = vpop.f32.mrf.mxu0  ;;  %v3867_v49 = vpop.f32.mrf.mxu2 }
 0x5b8   :  { %v7602_v54 = vadd.f32 %v3867_v49, %v3755_v25  ;;  %4163 = vmatmul.f32.gmra.mxu1 %v7363_v23  ;;  %v3758_v59 = vadd.f32 %v3757_v40, %v3644_v5  ;;  %v5217_v5 = vld [vmem:[#allocation2 + $0x88] sm:$0xff] }
 0x5b9   :  { %v3941_v3 = vpop.f32.mrf.mxu3 }
 0x5ba   :  { %v7606_v39 = vadd.f32 %v3941_v3, %v7427_v4  ;;  %4047 = vmatmul.f32.vlgmr.msra.gmra.mxu0 %v7363_v23  ;;  %v5218_v3 = vld [vmem:[#allocation2 + $0x308] sm:$0xff] }
 0x5bc   :  { %4418 = vmatmul.f32.vlgmr.msrb.gmra.mxu2 %v4257_v10 }
 0x5bd   :  { %v3763_v11 = vpop.f32.mrf.mxu1 }
 0x5be   :  { %3991 = vmatmul.f32.gmra.mxu3 %v7372_v18 }
 0x5bf   :  { %v3647_v29 = vpop.f32.mrf.mxu0  ;;  %v3870_v12 = vpop.f32.mrf.mxu2 }
 0x5c0   :  { %v7610_v24 = vadd.f32 %v3870_v12, %v3758_v59  ;;  %4166 = vmatmul.f32.gmra.mxu1 %v7363_v23  ;;  %v3761_v50 = vadd.f32 %v3760_v14, %v3647_v29  ;;  %v5219_v12 = vld [vmem:[#allocation2 + $0x40] sm:$0xff] }
 0x5c1   :  { %v3944_v60 = vpop.f32.mrf.mxu3 }
 0x5c2   :  { %v7614_v4 = vadd.f32 %v3944_v60, %v7440_v57  ;;  %4050 = vmatmul.f32.gmra.mxu0 %v7363_v23 }
 0x5c4   :  { %4421 = vmatmul.f32.gmra.mxu2 %v4260_v44  ;;  %v4380_v44 = vld [vmem:[#allocation7 + $0x850] sm:$0xff] }
 0x5c5   :  { %v3766_v46 = vpop.f32.mrf.mxu1  ;;  %4520 = vmatpush.msrb.mxu3 %v4380_v44 }
 0x5c6   :  { %3994 = vmatmul.f32.gmra.mxu3 %v7380_v8 }
 0x5c7   :  { %v3650_v18 = vpop.f32.mrf.mxu0  ;;  %v3873_v22 = vpop.f32.mrf.mxu2 }
 0x5c8   :  { %v7618_v27 = vadd.f32 %v3873_v22, %v3761_v50  ;;  %4169 = vmatmul.f32.gmra.mxu1 %v3384_v58  ;;  %v3764_v63 = vadd.f32 %v3763_v11, %v3650_v18 }
 0x5c9   :  { %v3947_v45 = vpop.f32.mrf.mxu3 }
 0x5ca   :  { %v7621_v57 = vadd.f32 %v3947_v45, %v7453_v33  ;;  %4053 = vmatmul.f32.gmra.mxu0 %v7363_v23  ;;  %v5221_v45 = vld [vmem:[#allocation2 + $0x1e0] sm:$0xff] }
 0x5cc   :  { %4424 = vmatmul.f32.gmra.mxu2 %v4263_v55  ;;  %v5222_v55 = vld [vmem:[#allocation2 + $0x338] sm:$0xff] }
 0x5cd   :  { %v3769_v41 = vpop.f32.mrf.mxu1 }
 0x5ce   :  { %3997 = vmatmul.f32.gmra.mxu3 %v7394_v28 }
 0x5cf   :  { %v3653_v8 = vpop.f32.mrf.mxu0  ;;  %v3876_v13 = vpop.f32.mrf.mxu2 }
 0x5d0   :  { %v7625_v40 = vadd.f32 %v3876_v13, %v3764_v63  ;;  %4172 = vmatmul.f32.gmra.mxu1 %v5216_v0  ;;  %v3767_v2 = vadd.f32 %v3766_v46, %v3653_v8  ;;  %v4272_v46 = vld [vmem:[#allocation2 + $0x2d0] sm:$0xff]  ;;  %v4275_v63 = vld [vmem:[#allocation2 + $0x1a8] sm:$0xff] }
 0x5d1   :  { %v3950_v36 = vpop.f32.mrf.mxu3 }
 0x5d2   :  { %v7628_v33 = vadd.f32 %v3950_v36, %v7466_v17  ;;  %4056 = vmatmul.f32.gmra.mxu0 %v7363_v23  ;;  %v4397_v23 = vld [vmem:[#allocation7 + $0x8d8] sm:$0xff] }
 0x5d3   :  { %4632 = vmatpush.msrb.mxu0 %v4397_v23 }
 0x5d4   :  { %4427 = vmatmul.f32.gmra.mxu2 %v4266_v62 }
 0x5d5   :  { %v3772_v37 = vpop.f32.mrf.mxu1 }
 0x5d6   :  { %4000 = vmatmul.f32.gmra.mxu3 %v7404_v34 }
 0x5d7   :  { %v3656_v28 = vpop.f32.mrf.mxu0  ;;  %v3879_v14 = vpop.f32.mrf.mxu2 }
 0x5d8   :  { %v7632_v25 = vadd.f32 %v3879_v14, %v3767_v2  ;;  %4175 = vmatmul.f32.gmra.mxu1 %v5217_v5  ;;  %v3770_v11 = vadd.f32 %v3769_v41, %v3656_v28  ;;  %v4396_v41 = vld [vmem:[#allocation7 + $0x8d0] sm:$0xff]  ;;  %v4379_v2 = vld [vmem:[#allocation7 + $0x848] sm:$0xff]  ;;  %v4378_v28 = vld [vmem:[#allocation7 + $0x840] sm:$0xff] }
 0x5d9   :  { %v3953_v49 = vpop.f32.mrf.mxu3  ;;  %4633 = vmatpush.msrb.mxu0 %v4396_v41  ;;  %v4278_v14 = vld [vmem:[#allocation2 + $0xc8] sm:$0xff]  ;;  %4521 = vmatpush.msrb.mxu3 %v4379_v2  ;;  %v4372_v41 = vld [vmem:[#allocation7 + $0x810] sm:$0xff] }
 0x5da   :  { %v7635_v17 = vadd.f32 %v3953_v49, %v7483_v35  ;;  %4059 = vmatmul.f32.gmra.mxu0 %v5218_v3  ;;  %v4377_v49 = vld [vmem:[#allocation7 + $0x838] sm:$0xff] }
 0x5db   :  { %4522 = vmatpush.msrb.mxu3 %v4378_v28  ;;  %v5230_v28 = vld [vmem:[#allocation2 + $0x158] sm:$0xff] }
 0x5dc   :  { %4430 = vmatmul.f32.gmra.mxu2 %v4269_v16 }
 0x5dd   :  { %v3775_v10 = vpop.f32.mrf.mxu1  ;;  %4523 = vmatpush.msrb.mxu3 %v4377_v49 }
 0x5de   :  { %4003 = vmatmul.f32.gmra.mxu3 %v7420_v21 }
 0x5df   :  { %v3659_v34 = vpop.f32.mrf.mxu0  ;;  %v3882_v59 = vpop.f32.mrf.mxu2 }
 0x5e0   :  { %v7638_v29 = vadd.f32 %v3882_v59, %v3770_v11  ;;  %4178 = vmatmul.f32.gmra.mxu1 %v5219_v12  ;;  %v3773_v18 = vadd.f32 %v3772_v37, %v3659_v34  ;;  %v5224_v37 = vld [vmem:[#allocation2 + $0x3b8] sm:$0xff]  ;;  %v5226_v34 = vld [vmem:[#allocation2 + $0x388] sm:$0xff]  ;;  %v4376_v59 = vld [vmem:[#allocation7 + $0x830] sm:$0xff] }
 0x5e1   :  { %v3956_v60 = vpop.f32.mrf.mxu3  ;;  %v4375_v12 = vld [vmem:[#allocation7 + $0x828] sm:$0xff]  ;;  %4524 = vmatpush.msrb.mxu3 %v4376_v59  ;;  %v4290_v59 = vld [vmem:[#allocation2 + $0x318] sm:$0xff] }
 0x5e2   :  { %v7641_v35 = vadd.f32 %v3956_v60, %v7498_v19  ;;  %4062 = vmatmul.f32.gmra.mxu0 %v5220_v6  ;;  %v4395_v60 = vld [vmem:[#allocation7 + $0x8c8] sm:$0xff]  ;;  %v4281_v6 = vld [vmem:[#allocation2 + $0xf8] sm:$0xff] }
 0x5e3   :  { %4634 = vmatpush.msrb.mxu0 %v4395_v60  ;;  %4525 = vmatpush.msrb.mxu3 %v4375_v12 }
 0x5e4   :  { %4433 = vmatmul.f32.gmra.mxu2 %v4272_v46 }
 0x5e5   :  { %v3778_v50 = vpop.f32.mrf.mxu1 }
 0x5e6   :  { %4006 = vmatmul.f32.gmra.mxu3 %v7430_v61 }
 0x5e7   :  { %v3662_v21 = vpop.f32.mrf.mxu0  ;;  %v3885_v22 = vpop.f32.mrf.mxu2 }
 0x5e8   :  { %v7644_v58 = vadd.f32 %v3885_v22, %v3773_v18  ;;  %4181 = vmatmul.f32.gmra.mxu1 %v5221_v45  ;;  %v3776_v13 = vadd.f32 %v3775_v10, %v3662_v21  ;;  %v5227_v22 = vld [vmem:[#allocation2 + $0x2c0] sm:$0xff] }
 0x5e9   :  { %v3959_v52 = vpop.f32.mrf.mxu3 }
 0x5ea   :  { %v7647_v19 = vadd.f32 %v3959_v52, %v7518_v15  ;;  %4065 = vmatmul.f32.gmra.mxu0 %v5222_v55  ;;  %v5228_v55 = vld [vmem:[#allocation2 + $0xe8] sm:$0xff] }
 0x5ec   :  { %4436 = vmatmul.f32.gmra.mxu2 %v4275_v63  ;;  %v4371_v63 = vld [vmem:[#allocation7 + $0x808] sm:$0xff] }
 0x5ed   :  { %v3781_v8 = vpop.f32.mrf.mxu1 }
 0x5ee   :  { %4009 = vmatmul.f32.gmra.mxu3 %v7446_v42 }
 0x5ef   :  { %v3665_v61 = vpop.f32.mrf.mxu0  ;;  %v3888_v0 = vpop.f32.mrf.mxu2 }
 0x5f0   :  { %v7650_v36 = vadd.f32 %v3888_v0, %v3776_v13  ;;  %4184 = vmatmul.f32.gmra.mxu1 %v5223_v43  ;;  %v3779_v42 = vadd.f32 %v3778_v50, %v3665_v61  ;;  %v4373_v50 = vld [vmem:[#allocation7 + $0x818] sm:$0xff] }
 0x5f1   :  { %v3962_v62 = vpop.f32.mrf.mxu3 }
 0x5f2   :  { %v7653_v15 = vadd.f32 %v3962_v62, %v7540_v1  ;;  %4068 = vmatmul.f32.gmra.mxu0 %v5224_v37  ;;  %v5225_v1 = vld [vmem:[#allocation2 + $0x140] sm:$0xff] }
 0x5f4   :  { %4439 = vmatmul.f32.gmra.mxu2 %v4278_v14  ;;  %v4394_v14 = vld [vmem:[#allocation7 + $0x8c0] sm:$0xff] }
 0x5f5   :  { %v3784_v5 = vpop.f32.mrf.mxu1  ;;  %4635 = vmatpush.msrb.mxu0 %v4394_v14 }
 0x5f6   :  { %4012 = vmatmul.f32.gmra.mxu3 %v7456_v47  ;;  %v4374_v47 = vld [vmem:[#allocation7 + $0x820] sm:$0xff] }
 0x5f7   :  { %v3668_v3 = vpop.f32.mrf.mxu0  ;;  %v3891_v23 = vpop.f32.mrf.mxu2  ;;  %4526 = vmatpush.msrb.mxu3 %v4374_v47 }
 0x5f8   :  { %v7656_v16 = vadd.f32 %v3891_v23, %v3779_v42  ;;  %4187 = vmatmul.f32.gmra.mxu1 %v5225_v1  ;;  %v3782_v46 = vadd.f32 %v3781_v8, %v3668_v3  ;;  %v4284_v8 = vld [vmem:[#allocation2 + $0x118] sm:$0xff]  ;;  %v4287_v42 = vld [vmem:[#allocation2 + $0x250] sm:$0xff]  ;;  %v5231_v1 = vld [vmem:[#allocation2 + $0x180] sm:$0xff] }
 0x5f9   :  { %v3965_v10 = vpop.f32.mrf.mxu3  ;;  %4527 = vmatpush.msrb.mxu3 %v4373_v50 }
 0x5fa   :  { %v7659_v11 = vadd.f32 %v3965_v10, %v7557_v51  ;;  %4071 = vmatmul.f32.gmra.mxu0 %v5226_v34  ;;  %v5232_v34 = vld [vmem:[#allocation2 + $0xa8] sm:$0xff] }
 0x5fb   :  { %4528 = vmatpush.msrb.mxu3 %v4372_v41 }
 0x5fc   :  { %4442 = vmatmul.f32.gmra.mxu2 %v4281_v6 }
 0x5fd   :  { %v3787_v44 = vpop.f32.mrf.mxu1  ;;  %4529 = vmatpush.msrb.mxu3 %v4371_v63  ;;  %v5235_v63 = vld [vmem:[#allocation2 + $0x70] sm:$0xff] }
 0x5fe   :  { %4015 = vmatmul.f32.gmra.mxu3 %v7474_v7  ;;  %v4370_v7 = vld [vmem:[#allocation7 + $0x800] sm:$0xff] }
 0x5ff   :  { %v3671_v18 = vpop.f32.mrf.mxu0  ;;  %v3894_v21 = vpop.f32.mrf.mxu2  ;;  %4530 = vmatpush.msrb.mxu3 %v4370_v7  ;;  %v5236_v7 = vld [vmem:[#allocation2 + $0x110] sm:$0xff] }
 0x600   :  { %v7662_v51 = vadd.f32 %v3894_v21, %v3782_v46  ;;  %4190 = vmatmul.f32.gmra.mxu1 %v5227_v22  ;;  %v3785_v61 = vadd.f32 %v3784_v5, %v3671_v18  ;;  %v4393_v18 = vld [vmem:[#allocation7 + $0x8b8] sm:$0xff]  ;;  %v4293_v21 = vld [vmem:[#allocation2 + $0x3c8] sm:$0xff] }
 0x601   :  { %v3968_v45 = vpop.f32.mrf.mxu3  ;;  %4636 = vmatpush.msrb.mxu0 %v4393_v18 }
 0x602   :  { %v7665_v52 = vadd.f32 %v3968_v45, %v7568_v30  ;;  %4074 = vmatmul.f32.gmra.mxu0 %v5228_v55  ;;  %v5229_v30 = vld [vmem:[#allocation2 + $0x240] sm:$0xff] }
 0x604   :  { %4445 = vmatmul.f32.gmra.mxu2 %v4284_v8 }
 0x605   :  { %v3790_v13 = vpop.f32.mrf.mxu1 }
 0x606   :  { %4018 = vmatmul.f32.gmra.mxu3 %v7486_v56 }
 0x607   :  { %v3674_v0 = vpop.f32.mrf.mxu0  ;;  %v3897_v43 = vpop.f32.mrf.mxu2 }
 0x608   :  { %v7668_v62 = vadd.f32 %v3897_v43, %v3785_v61  ;;  %4193 = vmatmul.f32.gmra.mxu1 %v5229_v30  ;;  %v3788_v49 = vadd.f32 %v3787_v44, %v3674_v0  ;;  %v5233_v44 = vld [vmem:[#allocation2 + $0x150] sm:$0xff]  ;;  %v4258_v61 = vld [vmem:[#allocation2 + $0x388] sm:$0xff] }
 0x609   :  { %v3971_v37 = vpop.f32.mrf.mxu3 }
 0x60a   :  { %v7671_v2 = vadd.f32 %v3971_v37, %v7578_v20  ;;  %4077 = vmatmul.f32.gmra.mxu0 %v5230_v28  ;;  %v5237_v28 = vld [vmem:[#allocation2 + $0x128] sm:$0xff] }
 0x60c   :  { %4448 = vmatmul.f32.gmra.mxu2 %v4287_v42 }
 0x60d   :  { %v3793_v5 = vpop.f32.mrf.mxu1 }
 0x60e   :  { %4021 = vmatmul.f32.gmra.mxu3 %v7504_v32 }
 0x60f   :  { %v3677_v56 = vpop.f32.mrf.mxu0  ;;  %v3900_v3 = vpop.f32.mrf.mxu2 }
 0x610   :  { %v7674_v23 = vadd.f32 %v3900_v3, %v3788_v49  ;;  %4196 = vmatmul.f32.gmra.mxu1 %v5231_v1  ;;  %v3791_v60 = vadd.f32 %v3790_v13, %v3677_v56  ;;  %v4296_v13 = vld [vmem:[#allocation2 + $0x208] sm:$0xff]  ;;  %v4299_v49 = vld [vmem:[#allocation2 + $0x370] sm:$0xff] }
 0x611   :  { %v3974_v10 = vpop.f32.mrf.mxu3  ;;  %v4261_v56 = vld [vmem:[#allocation2 + $0xe8] sm:$0xff] }
 0x612   :  { %v7677_v20 = vadd.f32 %v3974_v10, %v7587_v53  ;;  %4080 = vmatmul.f32.gmra.mxu0 %v5232_v34  ;;  %v5234_v53 = vld [vmem:[#allocation2 + $0x260] sm:$0xff] }
 0x614   :  { %4451 = vmatmul.f32.gmra.mxu2 %v4290_v59 }
 0x615   :  { %v3796_v12 = vpop.f32.mrf.mxu1 }
 0x616   :  { %4024 = vmatmul.f32.gmra.mxu3 %v7522_v48 }
 0x617   :  { %v3680_v6 = vpop.f32.mrf.mxu0  ;;  %v3903_v32 = vpop.f32.mrf.mxu2 }
 0x618   :  { %v7680_v47 = vadd.f32 %v3903_v32, %v3791_v60  ;;  %4199 = vmatmul.f32.gmra.mxu1 %v5233_v44  ;;  %v3794_v45 = vadd.f32 %v3793_v5, %v3680_v6  ;;  %v4392_v5 = vld [vmem:[#allocation7 + $0x8b0] sm:$0xff]  ;;  %v2741_v32 = vld [vmem:[#allocation5 + $0x178] sm:$0xff] }
 0x619   :  { %v3977_v46 = vpop.f32.mrf.mxu3  ;;  %4637 = vmatpush.msrb.mxu0 %v4392_v5  ;;  %v5240_v6 = vld [vmem:[#allocation2 + $0x310] sm:$0xff]  ;;  %v4302_v44 = vld [vmem:[#allocation2 + $0x178] sm:$0xff]  ;;  %4873 = vmatpush.msrb.mxu1 %v2741_v32 }
 0x61a   :  { %v7683_v50 = vadd.f32 %v3977_v46, %v7595_v9  ;;  %4083 = vmatmul.f32.gmra.mxu0 %v5234_v53  ;;  %5143 = vmatpush.msra.mxu3 %v2741_v32  ;;  %v4264_v46 = vld [vmem:[#allocation2 + $0x158] sm:$0xff]  ;;  %v2740_v5 = vld [vmem:[#allocation5 + $0x170] sm:$0xff] }
 0x61b   :  { %4874 = vmatpush.msrb.mxu1 %v2740_v5  ;;  %v4311_v32 = vld [vmem:[#allocation2 + $0x198] sm:$0xff] }
 0x61c   :  { %4454 = vmatmul.f32.gmra.mxu2 %v4293_v21  ;;  %5144 = vmatpush.msra.mxu3 %v2740_v5 }
 0x61d   :  { %v3799_v22 = vpop.f32.mrf.mxu1 }
 0x61e   :  { %4027 = vmatmul.f32.gmra.mxu3 %v7547_v26 }
 0x61f   :  { %v3683_v48 = vpop.f32.mrf.mxu0  ;;  %v3906_v55 = vpop.f32.mrf.mxu2 }
 0x620   :  { %v7686_v41 = vadd.f32 %v3906_v55, %v3794_v45  ;;  %4202 = vmatmul.f32.gmra.mxu1 %v5235_v63  ;;  %v3797_v43 = vadd.f32 %v3796_v12, %v3683_v48  ;;  %v5239_v12 = vld [vmem:[#allocation2 + $0x10] sm:$0xff]  ;;  %v5241_v55 = vld [vmem:[#allocation2 + $0x38] sm:$0xff] }
 0x621   :  { %v3980_v8 = vpop.f32.mrf.mxu3 }
 0x622   :  { %v7689_v9 = vadd.f32 %v3980_v8, %v7602_v54  ;;  %4086 = vmatmul.f32.gmra.mxu0 %v5236_v7  ;;  %v5238_v54 = vld [vmem:[#allocation2 + $0x1f0] sm:$0xff]  ;;  %v5242_v7 = vld [vmem:[#allocation2 + $0x328] sm:$0xff] }
 0x624   :  { %4457 = vmatmul.f32.gmra.mxu2 %v4296_v13  ;;  %v4391_v13 = vld [vmem:[#allocation7 + $0x8a8] sm:$0xff] }
 0x625   :  { %v3802_v0 = vpop.f32.mrf.mxu1  ;;  %4638 = vmatpush.msrb.mxu0 %v4391_v13 }
 0x626   :  { %4531 = vmatmul.f32.vlgmr.msrb.gmra.mxu3 %v4258_v61  ;;  %v4305_v61 = vld [vmem:[#allocation2 + $0x170] sm:$0xff] }
 0x627   :  { %v3686_v30 = vpop.f32.mrf.mxu0  ;;  %v3909_v26 = vpop.f32.mrf.mxu2 }
 0x628   :  { %v7691_v37 = vadd.f32 %v3909_v26, %v3797_v43  ;;  %4205 = vmatmul.f32.gmra.mxu1 %v5237_v28  ;;  %v3800_v1 = vadd.f32 %v3799_v22, %v3686_v30  ;;  %v5243_v26 = vld [vmem:[#allocation2 + $0x108] sm:$0xff] }
 0x629   :  { %v3983_v14 = vpop.f32.mrf.mxu3 }
 0x62a   :  { %v7694_v42 = vadd.f32 %v3983_v14, %v7610_v24  ;;  %4089 = vmatmul.f32.gmra.mxu0 %v5238_v54  ;;  %v5244_v54 = vld [vmem:[#allocation2 + $0x1d0] sm:$0xff] }
 0x62c   :  { %4460 = vmatmul.f32.gmra.mxu2 %v4299_v49  ;;  %v4308_v49 = vld [vmem:[#allocation2 + $0x58] sm:$0xff] }
 0x62d   :  { %v4161_v3 = vpop.f32.mrf.mxu1 }
 0x62e   :  { %4534 = vmatmul.f32.gmra.mxu3 %v4261_v56  ;;  %v4270_v56 = vld [vmem:[#allocation2 + $0x260] sm:$0xff] }
 0x62f   :  { %v3689_v10 = vpop.f32.mrf.mxu0  ;;  %v3912_v34 = vpop.f32.mrf.mxu2 }
 0x630   :  { %v7696_v59 = vadd.f32 %v3912_v34, %v3800_v1  ;;  %4208 = vmatmul.f32.gmra.mxu1 %v5239_v12  ;;  %v3803_v18 = vadd.f32 %v3802_v0, %v3689_v10  ;;  %v4267_v0 = vld [vmem:[#allocation2 + $0xa8] sm:$0xff]  ;;  %v5245_v1 = vld [vmem:[#allocation2 + $0xd0] sm:$0xff] }
 0x631   :  { %v3986_v60 = vpop.f32.mrf.mxu3 }
 0x632   :  { %v7699_v24 = vadd.f32 %v3986_v60, %v7618_v27  ;;  %4092 = vmatmul.f32.gmra.mxu0 %v5240_v6  ;;  %v5246_v60 = vld [vmem:[#allocation2 + $0x268] sm:$0xff]  ;;  %v4390_v6 = vld [vmem:[#allocation7 + $0x8a0] sm:$0xff] }
 0x633   :  { %4639 = vmatpush.msrb.mxu0 %v4390_v6 }
 0x634   :  { %8808 = vst [vmem:[#allocation46_spill] sm:$0xff] %v7699_v24  ;;  %4463 = vmatmul.f32.gmra.mxu2 %v4302_v44  ;;  %v4273_v44 = vld [vmem:[#allocation2 + $0x110] sm:$0xff]  ;;  %v7885_v24 = vld [vmem:[#allocation8 + $0xb] ss:$0 sm:$0xff] }
 0x635   :  { %v4164_v53 = vpop.f32.mrf.mxu1 }
 0x636   :  { %4537 = vmatmul.f32.gmra.mxu3 %v4264_v46 }
 0x637   :  { %v4048_v21 = vpop.f32.mrf.mxu0  ;;  %v3915_v22 = vpop.f32.mrf.mxu2 }
 0x638   :  { %v4049_v45 = vadd.f32 %v4048_v21, %v7591_v31  ;;  %v7702_v48 = vadd.f32 %v3915_v22, %v3803_v18  ;;  %4211 = vmatmul.f32.gmra.mxu1 %v5241_v55  ;;  %v5248_v22 = vld [vmem:[#allocation2 + $0x2c8] sm:$0xff] }
 0x639   :  { %v3989_v27 = vpop.f32.mrf.mxu3 }
 0x63a   :  { %v7705_v63 = vadd.f32 %v3989_v27, %v7625_v40  ;;  %v7707_v8 = vadd.f32 %v4161_v3, %v4049_v45  ;;  %4095 = vmatmul.f32.gmra.mxu0 %v5242_v7  ;;  %v2739_v45 = vld [vmem:[#allocation5 + $0x168] sm:$0xff]  ;;  %v4276_v7 = vld [vmem:[#allocation2 + $0x1f0] sm:$0xff] }
 0x63b   :  { %v4314_v27 = vld [vmem:[#allocation2 + $0x288] sm:$0xff]  ;;  %4875 = vmatpush.msrb.mxu1 %v2739_v45  ;;  %5145 = vmatpush.msra.mxu3 %v2739_v45 }
 0x63c   :  { %8809 = vst [vmem:[#allocation45_spill] sm:$0xff] %v7705_v63  ;;  %4466 = vmatmul.f32.gmra.mxu2 %v4305_v61  ;;  %v5249_v61 = vld [vmem:[#allocation2 + $0x1c0] sm:$0xff] }
 0x63d   :  { %v4167_v31 = vpop.f32.mrf.mxu1 }
 0x63e   :  { %4540 = vmatmul.f32.gmra.mxu3 %v4267_v0 }
 0x63f   :  { %v4051_v43 = vpop.f32.mrf.mxu0  ;;  %v7745_v45 = vpop.f32.mrf.mxu2 }
 0x640   :  { %v4052_v30 = vadd.f32 %v4051_v43, %v7599_v38  ;;  %4214 = vmatmul.f32.gmra.mxu1 %v5243_v26  ;;  %v4317_v26 = vld [vmem:[#allocation2 + $0x78] sm:$0xff] }
 0x641   :  { %v3992_v28 = vpop.f32.mrf.mxu3 }
 0x642   :  { %v7711_v40 = vadd.f32 %v3992_v28, %v7632_v25  ;;  %v7713_v14 = vadd.f32 %v4164_v53, %v4052_v30  ;;  %4098 = vmatmul.f32.gmra.mxu0 %v5244_v54  ;;  %v5247_v53 = vld [vmem:[#allocation2 + $0x398] sm:$0xff]  ;;  %v4279_v54 = vld [vmem:[#allocation2 + $0x310] sm:$0xff] }
 0x643   :  { %v4389_v30 = vld [vmem:[#allocation7 + $0x898] sm:$0xff] }
 0x644   :  { %8810 = vst [vmem:[#allocation49_spill] sm:$0xff] %v7711_v40  ;;  %4469 = vmatmul.f32.gmra.mxu2 %v4308_v49  ;;  %4640 = vmatpush.msrb.mxu0 %v4389_v30  ;;  %v5251_v49 = vld [vmem:[#allocation2 + $0x320] sm:$0xff]  ;;  %v4288_v30 = vld [vmem:[#allocation2 + $0x268] sm:$0xff] }
 0x645   :  { %v4170_v34 = vpop.f32.mrf.mxu1  ;;  %v4304_v40 = vld [vmem:[#allocation2 + $0x1a0] sm:$0xff] }
 0x646   :  { %4543 = vmatmul.f32.gmra.mxu3 %v4270_v56 }
 0x647   :  { %v4054_v3 = vpop.f32.mrf.mxu0 }
 0x648   :  { %v4055_v38 = vadd.f32 %v4054_v3, %v7606_v39  ;;  %4217 = vmatmul.f32.gmra.mxu1 %v5245_v1  ;;  %v2738_v1 = vld [vmem:[#allocation5 + $0x160] sm:$0xff] }
 0x649   :  { %v3995_v10 = vpop.f32.mrf.mxu3  ;;  %4876 = vmatpush.msrb.mxu1 %v2738_v1  ;;  %5146 = vmatpush.msra.mxu3 %v2738_v1  ;;  %v5259_v1 = vld [vmem:[#allocation2 + $0x360] sm:$0xff] }
 0x64a   :  { %v7717_v25 = vadd.f32 %v3995_v10, %v7638_v29  ;;  %v7719_v12 = vadd.f32 %v4167_v31, %v4055_v38  ;;  %4101 = vmatmul.f32.gmra.mxu0 %v5246_v60  ;;  %v5250_v31 = vld [vmem:[#allocation2 + $0x68] sm:$0xff]  ;;  %v5252_v38 = vld [vmem:[#allocation2 + $0x290] sm:$0xff]  ;;  %v4320_v10 = vld [vmem:[#allocation2 + $0xc0] sm:$0xff] }
 0x64c   :  { %8811 = vst [vmem:[#allocation48_spill] sm:$0xff] %v7717_v25  ;;  %4472 = vmatmul.f32.gmra.mxu2 %v4311_v32  ;;  %v5253_v32 = vld [vmem:[#allocation2 + $0x1a0] sm:$0xff] }
 0x64d   :  { %v4173_v55 = vpop.f32.mrf.mxu1 }
 0x64e   :  { %4546 = vmatmul.f32.gmra.mxu3 %v4273_v44 }
 0x64f   :  { %v4057_v46 = vpop.f32.mrf.mxu0 }
 0x650   :  { %v4058_v39 = vadd.f32 %v4057_v46, %v7614_v4  ;;  %4220 = vmatmul.f32.gmra.mxu1 %v5247_v53  ;;  %v4388_v53 = vld [vmem:[#allocation7 + $0x890] sm:$0xff] }
 0x651   :  { %v3998_v18 = vpop.f32.mrf.mxu3  ;;  %4641 = vmatpush.msrb.mxu0 %v4388_v53 }
 0x652   :  { %v7723_v21 = vadd.f32 %v3998_v18, %v7644_v58  ;;  %v7725_v29 = vadd.f32 %v4170_v34, %v4058_v39  ;;  %4104 = vmatmul.f32.gmra.mxu0 %v5248_v22  ;;  %v4282_v34 = vld [vmem:[#allocation2 + $0x328] sm:$0xff]  ;;  %v5254_v39 = vld [vmem:[#allocation2 + $0x330] sm:$0xff] }
 0x653   :  { %v4323_v18 = vld [vmem:[#allocation2 + $0x230] sm:$0xff] }
 0x654   :  { %8812 = vst [vmem:[#allocation47_spill] sm:$0xff] %v7723_v21  ;;  %4475 = vmatmul.f32.gmra.mxu2 %v4314_v27  ;;  %v4285_v22 = vld [vmem:[#allocation2 + $0x1d0] sm:$0xff] }
 0x655   :  { %v4176_v28 = vpop.f32.mrf.mxu1  ;;  %v5255_v27 = vld [vmem:[#allocation2 + $0x190] sm:$0xff] }
 0x656   :  { %4549 = vmatmul.f32.gmra.mxu3 %v4276_v7 }
 0x657   :  { %v4060_v13 = vpop.f32.mrf.mxu0 }
 0x658   :  { %v4061_v4 = vadd.f32 %v4060_v13, %v7621_v57  ;;  %4223 = vmatmul.f32.gmra.mxu1 %v5249_v61  ;;  %v5256_v61 = vld [vmem:[#allocation2 + $0x2f8] sm:$0xff] }
 0x659   :  { %v4001_v0 = vpop.f32.mrf.mxu3 }
 0x65a   :  { %v7729_v58 = vadd.f32 %v4001_v0, %v7650_v36  ;;  %v7731_v43 = vadd.f32 %v4173_v55, %v4061_v4  ;;  %4107 = vmatmul.f32.gmra.mxu0 %v5250_v31  ;;  %v2737_v0 = vld [vmem:[#allocation5 + $0x158] sm:$0xff]  ;;  %v4326_v31 = vld [vmem:[#allocation2 + $0x280] sm:$0xff] }
 0x65b   :  { %4877 = vmatpush.msrb.mxu1 %v2737_v0  ;;  %5147 = vmatpush.msra.mxu3 %v2737_v0 }
 0x65c   :  { %8813 = vst [vmem:[#allocation52_spill] sm:$0xff] %v7729_v58  ;;  %4478 = vmatmul.f32.gmra.mxu2 %v4317_v26 }
 0x65d   :  { %v4179_v60 = vpop.f32.mrf.mxu1 }
 0x65e   :  { %4552 = vmatmul.f32.gmra.mxu3 %v4279_v54 }
 0x65f   :  { %v4063_v5 = vpop.f32.mrf.mxu0 }
 0x660   :  { %v4064_v57 = vadd.f32 %v4063_v5, %v7628_v33  ;;  %4226 = vmatmul.f32.gmra.mxu1 %v5251_v49  ;;  %v5258_v5 = vld [vmem:[#allocation2 + $0x2b8] sm:$0xff]  ;;  %v4329_v49 = vld [vmem:[#allocation2 + $0x300] sm:$0xff] }
 0x661   :  { %v4004_v56 = vpop.f32.mrf.mxu3 }
 0x662   :  { %v7735_v36 = vadd.f32 %v4004_v56, %v7656_v16  ;;  %v7737_v3 = vadd.f32 %v4176_v28, %v4064_v57  ;;  %4110 = vmatmul.f32.gmra.mxu0 %v5252_v38  ;;  %v5257_v28 = vld [vmem:[#allocation2 + $0x90] sm:$0xff]  ;;  %v4387_v57 = vld [vmem:[#allocation7 + $0x888] sm:$0xff] }
 0x663   :  { %4642 = vmatpush.msrb.mxu0 %v4387_v57  ;;  %v4291_v56 = vld [vmem:[#allocation2 + $0x2c8] sm:$0xff]  ;;  %v5265_v57 = vld [vmem:[#allocation2 + $0xf0] sm:$0xff] }
 0x664   :  { %8814 = vst [vmem:[#allocation51_spill] sm:$0xff] %v7735_v36  ;;  %4481 = vmatmul.f32.gmra.mxu2 %v4320_v10 }
 0x665   :  { %v4182_v7 = vpop.f32.mrf.mxu1 }
 0x666   :  { %4555 = vmatmul.f32.gmra.mxu3 %v4282_v34 }
 0x667   :  { %v4066_v6 = vpop.f32.mrf.mxu0 }
 0x668   :  { %v4067_v33 = vadd.f32 %v4066_v6, %v7635_v17  ;;  %4229 = vmatmul.f32.gmra.mxu1 %v5253_v32  ;;  %v2736_v6 = vld [vmem:[#allocation5 + $0x150] sm:$0xff]  ;;  %v4294_v32 = vld [vmem:[#allocation2 + $0x68] sm:$0xff] }
 0x669   :  { %v4007_v44 = vpop.f32.mrf.mxu3  ;;  %4878 = vmatpush.msrb.mxu1 %v2736_v6  ;;  %5148 = vmatpush.msra.mxu3 %v2736_v6 }
 0x66a   :  { %v7741_v16 = vadd.f32 %v4007_v44, %v7662_v51  ;;  %v7743_v46 = vadd.f32 %v4179_v60, %v4067_v33  ;;  %4113 = vmatmul.f32.gmra.mxu0 %v5254_v39  ;;  %v4332_v33 = vld [vmem:[#allocation2 + $0xb8] sm:$0xff]  ;;  %v5261_v39 = vld [vmem:[#allocation2 + $0x3b0] sm:$0xff] }
 0x66c   :  { %8815 = vst [vmem:[#allocation50_spill] sm:$0xff] %v7741_v16  ;;  %4484 = vmatmul.f32.gmra.mxu2 %v4323_v18  ;;  %v4283_v16 = vld [vmem:[#allocation2 + $0x10] sm:$0xff] }
 0x66e   :  { %4558 = vmatmul.f32.gmra.mxu3 %v4285_v22  ;;  %v5262_v22 = vld [vmem:[#allocation2 + $0x380] sm:$0xff] }
 0x66f   :  { %v4069_v55 = vpop.f32.mrf.mxu0 }
 0x670   :  { %v4070_v17 = vadd.f32 %v4069_v55, %v7641_v35  ;;  %4232 = vmatmul.f32.gmra.mxu1 %v5255_v27  ;;  %v7755_v35 = vpop.f32.mrf.mxu2  ;;  %v4335_v55 = vld [vmem:[#allocation2 + $0x98] sm:$0xff]  ;;  %v4297_v27 = vld [vmem:[#allocation2 + $0x290] sm:$0xff] }
 0x671   :  { %v4010_v51 = vpop.f32.mrf.mxu3 }
 0x672   :  { %v7749_v13 = vadd.f32 %v4010_v51, %v7668_v62  ;;  %v7751_v4 = vadd.f32 %v4182_v7, %v4070_v17  ;;  %4116 = vmatmul.f32.gmra.mxu0 %v5256_v61  ;;  %v5263_v51 = vld [vmem:[#allocation2 + $0x1b8] sm:$0xff] }
 0x674   :  { %8816 = vst [vmem:[#allocation98_spill] sm:$0xff] %v7749_v13  ;;  %4487 = vmatmul.f32.gmra.mxu2 %v4326_v31  ;;  %v2735_v31 = vld [vmem:[#allocation5 + $0x148] sm:$0xff] }
 0x675   :  { %4879 = vmatpush.msrb.mxu1 %v2735_v31  ;;  %5149 = vmatpush.msra.mxu3 %v2735_v31  ;;  %v5272_v31 = vld [vmem:[#allocation2 + $0x1c8] sm:$0xff] }
 0x676   :  { %4561 = vmatmul.f32.gmra.mxu3 %v4288_v30  ;;  %v4338_v30 = vld [vmem:[#allocation2 + $0x148] sm:$0xff] }
 0x677   :  { %v7753_v26 = vpop.f32.mrf.mxu0 }
 0x678   :  { %4235 = vmatmul.f32.gmra.mxu1 %v5257_v28  ;;  %v7762_v34 = vpop.f32.mrf.mxu2  ;;  %v4300_v28 = vld [vmem:[#allocation2 + $0x330] sm:$0xff] }
 0x679   :  { %v4013_v54 = vpop.f32.mrf.mxu3 }
 0x67a   :  { %v7758_v62 = vadd.f32 %v4013_v54, %v7674_v23  ;;  %4119 = vmatmul.f32.gmra.mxu0 %v5258_v5  ;;  %v5260_v23 = vld [vmem:[#allocation2 + $0x210] sm:$0xff] }
 0x67c   :  { %8817 = vst [vmem:[#allocation54_spill] sm:$0xff] %v7758_v62  ;;  %4490 = vmatmul.f32.gmra.mxu2 %v4329_v49  ;;  %v2729_v62 = vld [vmem:[#allocation5 + $0x118] sm:$0xff] }
 0x67e   :  { %4564 = vmatmul.f32.gmra.mxu3 %v4291_v56 }
 0x67f   :  { %v7760_v38 = vpop.f32.mrf.mxu0 }
 0x680   :  { %4238 = vmatmul.f32.gmra.mxu1 %v5259_v1  ;;  %v7772_v17 = vpop.f32.mrf.mxu2  ;;  %v4341_v1 = vld [vmem:[#allocation2 + $0x228] sm:$0xff] }
 0x681   :  { %v4016_v10 = vpop.f32.mrf.mxu3 }
 0x682   :  { %v7765_v60 = vadd.f32 %v4016_v10, %v7680_v47  ;;  %4122 = vmatmul.f32.gmra.mxu0 %v5260_v23  ;;  %v4386_v47 = vld [vmem:[#allocation7 + $0x880] sm:$0xff]  ;;  %v4303_v10 = vld [vmem:[#allocation2 + $0x2f8] sm:$0xff] }
 0x683   :  { %4643 = vmatpush.msrb.mxu0 %v4386_v47  ;;  %v4306_v47 = vld [vmem:[#allocation2 + $0x2b8] sm:$0xff] }
 0x684   :  { %8818 = vst [vmem:[#allocation134_spill] sm:$0xff] %v7765_v60  ;;  %4493 = vmatmul.f32.gmra.mxu2 %v4332_v33  ;;  %v5267_v33 = vld [vmem:[#allocation2 + $0x248] sm:$0xff] }
 0x686   :  { %4567 = vmatmul.f32.gmra.mxu3 %v4294_v32 }
 0x687   :  { %v7767_v44 = vpop.f32.mrf.mxu0 }
 0x688   :  { %4241 = vmatmul.f32.gmra.mxu1 %v5261_v39  ;;  %v7779_v54 = vpop.f32.mrf.mxu2 }
 0x689   :  { %v4019_v53 = vpop.f32.mrf.mxu3 }
 0x68a   :  { %v7770_v18 = vadd.f32 %v4019_v53, %v7686_v41  ;;  %4125 = vmatmul.f32.gmra.mxu0 %v5262_v22  ;;  %v5264_v41 = vld [vmem:[#allocation2 + $0x2a8] sm:$0xff]  ;;  %v5268_v53 = vld [vmem:[#allocation2 + $0x30] sm:$0xff]  ;;  %v7793_v22 = vld [vmem:[#allocation2 + $0x278] sm:$0xff] }
 0x68c   :  { %8819 = vst [vmem:[#allocation53_spill] sm:$0xff] %v7770_v18  ;;  %4496 = vmatmul.f32.gmra.mxu2 %v4335_v55 }
 0x68e   :  { %4570 = vmatmul.f32.gmra.mxu3 %v4297_v27  ;;  %v5270_v27 = vld [vmem:[#allocation2 + $0x200] sm:$0xff] }
 0x68f   :  { %v7774_v7 = vpop.f32.mrf.mxu0 }
 0x690   :  { %4244 = vmatmul.f32.gmra.mxu1 %v5263_v51  ;;  %v7788_v6 = vpop.f32.mrf.mxu2 }
 0x691   :  { %v4022_v61 = vpop.f32.mrf.mxu3 }
 0x692   :  { %v7777_v0 = vadd.f32 %v4022_v61, %v7691_v37  ;;  %4128 = vmatmul.f32.gmra.mxu0 %v5264_v41  ;;  %v5266_v37 = vld [vmem:[#allocation2 + $0x3c0] sm:$0xff]  ;;  %v5271_v61 = vld [vmem:[#allocation2 + $0x348] sm:$0xff] }
 0x694   :  { %8820 = vst [vmem:[#allocation57_spill] sm:$0xff] %v7777_v0  ;;  %4499 = vmatmul.f32.gmra.mxu2 %v4338_v30  ;;  %v2733_v30 = vld [vmem:[#allocation5 + $0x138] sm:$0xff] }
 0x696   :  { %4573 = vmatmul.f32.gmra.mxu3 %v4300_v28 }
 0x697   :  { %v7781_v5 = vpop.f32.mrf.mxu0 }
 0x698   :  { %4247 = vmatmul.f32.gmra.mxu1 %v5265_v57  ;;  %v7798_v51 = vpop.f32.mrf.mxu2  ;;  %v4312_v57 = vld [vmem:[#allocation2 + $0x380] sm:$0xff] }
 0x699   :  { %v4025_v49 = vpop.f32.mrf.mxu3 }
 0x69a   :  { %v7784_v56 = vadd.f32 %v4025_v49, %v7696_v59  ;;  %4131 = vmatmul.f32.gmra.mxu0 %v5266_v37  ;;  %v2734_v59 = vld [vmem:[#allocation5 + $0x140] sm:$0xff]  ;;  %v4259_v37 = vld [vmem:[#allocation2 + $0x1f8] sm:$0xff] }
 0x69b   :  { %4880 = vmatpush.msrb.mxu1 %v2734_v59  ;;  %5150 = vmatpush.msra.mxu3 %v2734_v59 }
 0x69c   :  { %8821 = vst [vmem:[#allocation102_spill] sm:$0xff] %v7784_v56  ;;  %4502 = vmatmul.f32.gmra.mxu2 %v4341_v1  ;;  %v4315_v1 = vld [vmem:[#allocation2 + $0x2a8] sm:$0xff] }
 0x69d   :  { %4881 = vmatpush.msrb.mxu1 %v2733_v30  ;;  %5151 = vmatpush.msra.mxu3 %v2733_v30  ;;  %v2731_v30 = vld [vmem:[#allocation5 + $0x128] sm:$0xff] }
 0x69e   :  { %4576 = vmatmul.f32.gmra.mxu3 %v4303_v10 }
 0x69f   :  { %v7786_v23 = vpop.f32.mrf.mxu0 }
 0x6a0   :  { %4250 = vmatmul.f32.gmra.mxu1 %v5267_v33  ;;  %v7803_v28 = vpop.f32.mrf.mxu2  ;;  %v4262_v33 = vld [vmem:[#allocation2 + $0x140] sm:$0xff] }
 0x6a1   :  { %v4028_v32 = vpop.f32.mrf.mxu3 }
 0x6a2   :  { %v7791_v39 = vadd.f32 %v4028_v32, %v7702_v48  ;;  %4134 = vmatmul.f32.gmra.mxu0 %v5268_v53  ;;  %v4309_v48 = vld [vmem:[#allocation2 + $0x210] sm:$0xff]  ;;  %v4318_v53 = vld [vmem:[#allocation2 + $0x3c0] sm:$0xff] }
 0x6a3   :  { %v2732_v32 = vld [vmem:[#allocation5 + $0x130] sm:$0xff] }
 0x6a4   :  { %8822 = vst [vmem:[#allocation56_spill] sm:$0xff] %v7791_v39  ;;  %4505 = vmatmul.f32.gmra.mxu2 %v7793_v22  ;;  %4882 = vmatpush.msrb.mxu1 %v2732_v32 }
 0x6a5   :  { %5152 = vmatpush.msra.mxu3 %v2732_v32 }
 0x6a6   :  { %4579 = vmatmul.f32.gmra.mxu3 %v4306_v47  ;;  %v4265_v47 = vld [vmem:[#allocation2 + $0x2c0] sm:$0xff]  ;;  %4883 = vmatpush.msrb.mxu1 %v2731_v30 }
 0x6a7   :  { %v7796_v55 = vpop.f32.mrf.mxu0  ;;  %5153 = vmatpush.msra.mxu3 %v2731_v30 }
 0x6a8   :  { %4253 = vmatmul.f32.gmra.mxu1 %v5270_v27  ;;  %v4321_v27 = vld [vmem:[#allocation2 + $0x30] sm:$0xff] }
 0x6aa   :  { %4137 = vmatmul.f32.gmra.mxu0 %v5271_v61 }
 0x6ac   :  { %4508 = vmatmul.f32.gmra.mxu2 %v7793_v22 }
 0x6ae   :  { %4582 = vmatmul.f32.gmra.mxu3 %v4309_v48  ;;  %v7814_v48 = vpop.f32.mrf.mxu1 }
 0x6af   :  { %v7801_v41 = vpop.f32.mrf.mxu0 }
 0x6b2   :  { %4140 = vmatmul.f32.gmra.mxu0 %v5272_v31  ;;  %v4268_v31 = vld [vmem:[#allocation2 + $0x240] sm:$0xff] }
 0x6b4   :  { %4511 = vmatmul.f32.gmra.mxu2 %v7793_v22 }
 0x6b6   :  { %4585 = vmatmul.f32.gmra.mxu3 %v4312_v57  ;;  %v4324_v57 = vld [vmem:[#allocation2 + $0x348] sm:$0xff]  ;;  %v7820_v32 = vpop.f32.mrf.mxu1 }
 0x6b7   :  { %v7806_v49 = vpop.f32.mrf.mxu0 }
 0x6ba   :  { %4644 = vmatmul.f32.vlgmr.msrb.gmra.mxu0 %v4259_v37 }
 0x6be   :  { %4588 = vmatmul.f32.gmra.mxu3 %v4315_v1  ;;  %v7818_v1 = vpop.f32.mrf.mxu3  ;;  %v7826_v30 = vpop.f32.mrf.mxu1 }
 0x6bf   :  { %v7808_v10 = vpop.f32.mrf.mxu0 }
 0x6c0   :  { %8823 = vst [vmem:[#allocation136_spill] sm:$0xff] %v7808_v10  ;;  %v7882_v10 = vld [vmem:[#allocation8 + $0xa] ss:$0 sm:$0xff] }
 0x6c2   :  { %4647 = vmatmul.f32.gmra.mxu0 %v4262_v33  ;;  %v4271_v33 = vld [vmem:[#allocation2 + $0x180] sm:$0xff] }
 0x6c6   :  { %4591 = vmatmul.f32.gmra.mxu3 %v4318_v53  ;;  %v4327_v53 = vld [vmem:[#allocation2 + $0x1c8] sm:$0xff]  ;;  %v7824_v39 = vpop.f32.mrf.mxu3  ;;  %v7832_v18 = vpop.f32.mrf.mxu1 }
 0x6c7   :  { %v7810_v59 = vpop.f32.mrf.mxu0 }
 0x6c8   :  { %8824 = vst [vmem:[#allocation55_spill] sm:$0xff] %v7810_v59 }
 0x6ca   :  { %4650 = vmatmul.f32.gmra.mxu0 %v4265_v47 }
 0x6ce   :  { %4594 = vmatmul.f32.gmra.mxu3 %v4321_v27  ;;  %v4274_v27 = vld [vmem:[#allocation2 + $0x150] sm:$0xff]  ;;  %v7830_v0 = vpop.f32.mrf.mxu3 }
 0x6cf   :  { %v7812_v61 = vpop.f32.mrf.mxu0 }
 0x6d0   :  { %8825 = vst [vmem:[#allocation60_spill] sm:$0xff] %v7812_v61  ;;  %v4301_v61 = vld [vmem:[#allocation2 + $0x320] sm:$0xff] }
 0x6d2   :  { %4653 = vmatmul.f32.gmra.mxu0 %v4268_v31  ;;  %v2730_v31 = vld [vmem:[#allocation5 + $0x120] sm:$0xff] }
 0x6d3   :  { %4884 = vmatpush.msrb.mxu1 %v2730_v31  ;;  %5154 = vmatpush.msra.mxu3 %v2730_v31  ;;  %v4336_v31 = vld [vmem:[#allocation2 + $0xe0] sm:$0xff] }
 0x6d5   :  { %4885 = vmatpush.msrb.mxu1 %v2729_v62  ;;  %5155 = vmatpush.msra.mxu3 %v2729_v62 }
 0x6d6   :  { %4597 = vmatmul.f32.gmra.mxu3 %v4324_v57  ;;  %v4330_v57 = vld [vmem:[#allocation2 + $0x2f0] sm:$0xff]  ;;  %v7836_v13 = vpop.f32.mrf.mxu3 }
 0x6d7   :  { %v7816_v37 = vpop.f32.mrf.mxu0 }
 0x6d8   :  { %8826 = vst [vmem:[#allocation107_spill] sm:$0xff] %v7816_v37  ;;  %v4298_v37 = vld [vmem:[#allocation2 + $0x1c0] sm:$0xff] }
 0x6da   :  { %4656 = vmatmul.f32.gmra.mxu0 %v4271_v33  ;;  %v4277_v33 = vld [vmem:[#allocation2 + $0x70] sm:$0xff] }
 0x6de   :  { %4600 = vmatmul.f32.gmra.mxu3 %v4327_v53  ;;  %v4333_v53 = vld [vmem:[#allocation2 + $0x2e8] sm:$0xff] }
 0x6df   :  { %v7822_v47 = vpop.f32.mrf.mxu0 }
 0x6e0   :  { %8827 = vst [vmem:[#allocation59_spill] sm:$0xff] %v7822_v47 }
 0x6e2   :  { %4659 = vmatmul.f32.gmra.mxu0 %v4274_v27  ;;  %v4280_v27 = vld [vmem:[#allocation2 + $0x128] sm:$0xff] }
 0x6e6   :  { %4603 = vmatmul.f32.gmra.mxu3 %v4330_v57 }
 0x6e7   :  { %v7828_v56 = vpop.f32.mrf.mxu0 }
 0x6e8   :  { %8828 = vst [vmem:[#allocation58_spill] sm:$0xff] %v7828_v56  ;;  %v2728_v56 = vld [vmem:[#allocation5 + $0x110] sm:$0xff] }
 0x6e9   :  { %4886 = vmatpush.msrb.mxu1 %v2728_v56  ;;  %5156 = vmatpush.msra.mxu3 %v2728_v56 }
 0x6ea   :  { %4662 = vmatmul.f32.gmra.mxu0 %v4277_v33  ;;  %v7840_v33 = vpop.f32.mrf.mxu1 }
 0x6ee   :  { %4606 = vmatmul.f32.gmra.mxu3 %v4333_v53  ;;  %v4339_v53 = vld [vmem:[#allocation2 + $0x160] sm:$0xff] }
 0x6ef   :  { %v7834_v60 = vpop.f32.mrf.mxu0 }
 0x6f0   :  { %8829 = vst [vmem:[#allocation63_spill] sm:$0xff] %v7834_v60  ;;  %v7844_v60 = vpop.f32.mrf.mxu3 }
 0x6f2   :  { %4665 = vmatmul.f32.gmra.mxu0 %v4280_v27  ;;  %v4286_v27 = vld [vmem:[#allocation2 + $0x38] sm:$0xff]  ;;  %v7846_v62 = vpop.f32.mrf.mxu1 }
 0x6f6   :  { %4609 = vmatmul.f32.gmra.mxu3 %v4336_v31 }
 0x6f7   :  { %v7838_v57 = vpop.f32.mrf.mxu0 }
 0x6f8   :  { %8830 = vst [vmem:[#allocation113_spill] sm:$0xff] %v7838_v57  ;;  %v4289_v57 = vld [vmem:[#allocation2 + $0x108] sm:$0xff]  ;;  %v7851_v58 = vpop.f32.mrf.mxu3 }
 0x6fa   :  { %4668 = vmatmul.f32.gmra.mxu0 %v4283_v16  ;;  %v7853_v16 = vpop.f32.mrf.mxu1 }
 0x6fe   :  { %4612 = vmatmul.f32.gmra.mxu3 %v4339_v53 }
 0x6ff   :  { %v7842_v36 = vpop.f32.mrf.mxu0 }
 0x700   :  { %8831 = vst [vmem:[#allocation62_spill] sm:$0xff] %v7842_v36  ;;  %v2727_v36 = vld [vmem:[#allocation5 + $0x108] sm:$0xff]  ;;  %v7858_v56 = vpop.f32.mrf.mxu3 }
 0x701   :  { %4887 = vmatpush.msrb.mxu1 %v2727_v36  ;;  %5157 = vmatpush.msra.mxu3 %v2727_v36  ;;  %v2726_v36 = vld [vmem:[#allocation5 + $0x100] sm:$0xff] }
 0x702   :  { %4671 = vmatmul.f32.gmra.mxu0 %v4286_v27  ;;  %v4292_v27 = vld [vmem:[#allocation2 + $0xd0] sm:$0xff] }
 0x703   :  { %4888 = vmatpush.msrb.mxu1 %v2726_v36  ;;  %5158 = vmatpush.msra.mxu3 %v2726_v36  ;;  %v4307_v36 = vld [vmem:[#allocation2 + $0x190] sm:$0xff] }
 0x706   :  { %4615 = vmatmul.f32.gmra.mxu3 %v7793_v22 }
 0x707   :  { %v7849_v31 = vpop.f32.mrf.mxu0 }
 0x708   :  { %8832 = vst [vmem:[#allocation139_spill] sm:$0xff] %v7849_v31  ;;  %v7861_v31 = vpop.f32.mrf.mxu1  ;;  %v7865_v21 = vpop.f32.mrf.mxu3 }
 0x70a   :  { %4674 = vmatmul.f32.gmra.mxu0 %v4289_v57  ;;  %v4295_v57 = vld [vmem:[#allocation2 + $0x398] sm:$0xff] }
 0x70e   :  { %4618 = vmatmul.f32.gmra.mxu3 %v7793_v22 }
 0x70f   :  { %v7856_v53 = vpop.f32.mrf.mxu0 }
 0x710   :  { %8833 = vst [vmem:[#allocation61_spill] sm:$0xff] %v7856_v53 }
 0x712   :  { %4677 = vmatmul.f32.gmra.mxu0 %v4292_v27  ;;  %v7870_v27 = vpop.f32.mrf.mxu1 }
 0x716   :  { %4621 = vmatmul.f32.gmra.mxu3 %v7793_v22 }
 0x717   :  { %v7863_v47 = vpop.f32.mrf.mxu0 }
 0x718   :  { %8834 = vst [vmem:[#allocation66_spill] sm:$0xff] %v7863_v47 }
 0x71a   :  { %4680 = vmatmul.f32.gmra.mxu0 %v4295_v57  ;;  %v7874_v47 = vpop.f32.mrf.mxu1 }
 0x71b   :  { %8837 = vst [vmem:[#allocation141_spill] sm:$0xff] %v7874_v47 }
 0x71e   :  { %4624 = vmatmul.f32.gmra.mxu3 %v7793_v22 }
 0x71f   :  { %v7868_v53 = vpop.f32.mrf.mxu0 }
 0x720   :  { %8835 = vst [vmem:[#allocation117_spill] sm:$0xff] %v7868_v53  ;;  %v4533_v53 = vadd.f32 %v7818_v1, %v7745_v45 }
 0x722   :  { %4683 = vmatmul.f32.gmra.mxu0 %v4298_v37  ;;  %v7878_v59 = vpop.f32.mrf.mxu1 }
 0x723   :  { %8839 = vst [vmem:[#allocation69_spill] sm:$0xff] %v7878_v59 }
 0x727   :  { %v7872_v25 = vpop.f32.mrf.mxu0 }
 0x728   :  { %8836 = vst [vmem:[#allocation65_spill] sm:$0xff] %v7872_v25 }
 0x72a   :  { %4686 = vmatmul.f32.gmra.mxu0 %v4301_v61  ;;  %v7891_v59 = vpop.f32.mrf.mxu1 }
 0x72f   :  { %v7876_v57 = vpop.f32.mrf.mxu0 }
 0x730   :  { %8838 = vst [vmem:[#allocation64_spill] sm:$0xff] %v7876_v57 }
 0x732   :  { %4689 = vmatmul.f32.gmra.mxu0 %v4304_v40  ;;  %v4536_v40 = vadd.f32 %v7824_v39, %v7755_v35  ;;  %v4539_v35 = vadd.f32 %v7830_v0, %v7762_v34 }
 0x737   :  { %v4645_v63 = vpop.f32.mrf.mxu0 }
 0x738   :  { %v4646_v37 = vadd.f32 %v4645_v63, %v4533_v53  ;;  %v4310_v53 = vld [vmem:[#allocation2 + $0x90] sm:$0xff] }
 0x73a   :  { %v4741_v25 = vadd.f32 %v4646_v37, %v7707_v8  ;;  %4692 = vmatmul.f32.gmra.mxu0 %v4307_v36  ;;  %v7894_v8 = vpop.f32.mrf.mxu2  ;;  %v7896_v37 = vpop.f32.mrf.mxu3 }
 0x73c   :  { %v4775_v61 = vmul.f32 %v7882_v10, %v4741_v25 }
 0x73e   :  { %v4809_v57 = vadd.f32 %v7885_v24, %v4775_v61 }
 0x73f   :  { %v4648_v45 = vpop.f32.mrf.mxu0 }
 0x740   :  { %v4841_v1 = vmax.f32 %v4809_v57, 0.0  ;;  %v4649_v63 = vadd.f32 %v4648_v45, %v4536_v40  ;;  %v7902_v40 = vpop.f32.mrf.mxu1  ;;  %v4313_v45 = vld [vmem:[#allocation2 + $0x360] sm:$0xff] }
 0x742   :  { %v4742_v47 = vadd.f32 %v4649_v63, %v7713_v14  ;;  %4695 = vmatmul.f32.gmra.mxu0 %v4310_v53  ;;  %4889 = vmatmul.f32.vlgmr.msrb.gmra.mxu1 %v4841_v1  ;;  %v7906_v63 = vpop.f32.mrf.mxu2  ;;  %v7910_v34 = vpop.f32.mrf.mxu3 }
 0x744   :  { %v4776_v25 = vmul.f32 %v7882_v10, %v4742_v47  ;;  %v4542_v47 = vadd.f32 %v7836_v13, %v7772_v17 }
 0x746   :  { %v4810_v39 = vadd.f32 %v7885_v24, %v4776_v25 }
 0x747   :  { %v4651_v36 = vpop.f32.mrf.mxu0 }
 0x748   :  { %v4652_v61 = vadd.f32 %v4651_v36, %v4539_v35  ;;  %v4842_v57 = vmax.f32 %v4810_v39, 0.0  ;;  %v4316_v39 = vld [vmem:[#allocation2 + $0x3b0] sm:$0xff] }
 0x74a   :  { %v4743_v14 = vadd.f32 %v4652_v61, %v7719_v12  ;;  %4698 = vmatmul.f32.gmra.mxu0 %v4313_v45  ;;  %4892 = vmatmul.f32.gmra.mxu1 %v4842_v57  ;;  %v7914_v12 = vpop.f32.mrf.mxu1  ;;  %v4545_v57 = vadd.f32 %v7844_v60, %v7779_v54  ;;  %v7920_v45 = vpop.f32.mrf.mxu2  ;;  %v4548_v60 = vadd.f32 %v7851_v58, %v7788_v6 }
 0x74c   :  { %v4777_v1 = vmul.f32 %v7882_v10, %v4743_v14  ;;  %v7922_v14 = vpop.f32.mrf.mxu3 }
 0x74e   :  { %v4811_v0 = vadd.f32 %v7885_v24, %v4777_v1 }
 0x74f   :  { %v4654_v53 = vpop.f32.mrf.mxu0 }
 0x750   :  { %v4655_v25 = vadd.f32 %v4654_v53, %v4542_v47  ;;  %v4843_v35 = vmax.f32 %v4811_v0, 0.0  ;;  %v4319_v0 = vld [vmem:[#allocation2 + $0x1b8] sm:$0xff] }
 0x752   :  { %v4744_v36 = vadd.f32 %v4655_v25, %v7725_v29  ;;  %4701 = vmatmul.f32.gmra.mxu0 %v4316_v39  ;;  %4895 = vmatmul.f32.gmra.mxu1 %v4843_v35  ;;  %v7926_v25 = vpop.f32.mrf.mxu1 }
 0x754   :  { %v4778_v61 = vmul.f32 %v7882_v10, %v4744_v36 }
 0x756   :  { %v4812_v13 = vadd.f32 %v7885_v24, %v4778_v61  ;;  %v4322_v61 = vld [vmem:[#allocation2 + $0xf0] sm:$0xff] }
 0x757   :  { %v4657_v17 = vpop.f32.mrf.mxu0 }
 0x758   :  { %v4658_v1 = vadd.f32 %v4657_v17, %v4545_v57  ;;  %v4844_v47 = vmax.f32 %v4812_v13, 0.0  ;;  %v7931_v57 = vpop.f32.mrf.mxu2  ;;  %v7933_v13 = vpop.f32.mrf.mxu3 }
 0x75a   :  { %v4745_v29 = vadd.f32 %v4658_v1, %v7731_v43  ;;  %4704 = vmatmul.f32.gmra.mxu0 %v4319_v0  ;;  %4898 = vmatmul.f32.gmra.mxu1 %v4844_v47  ;;  %v4551_v1 = vadd.f32 %v7858_v56, %v7798_v51  ;;  %v7940_v6 = vpop.f32.mrf.mxu1  ;;  %v4554_v51 = vadd.f32 %v7865_v21, %v7803_v28 }
 0x75b   :  { %v4557_v21 = vadd.f32 %v7896_v37, %v7894_v8  ;;  %v4560_v37 = vadd.f32 %v7910_v34, %v7906_v63 }
 0x75c   :  { %v4779_v53 = vmul.f32 %v7882_v10, %v4745_v29 }
 0x75e   :  { %v4813_v54 = vadd.f32 %v7885_v24, %v4779_v53  ;;  %v4325_v53 = vld [vmem:[#allocation2 + $0x248] sm:$0xff] }
 0x75f   :  { %v4660_v35 = vpop.f32.mrf.mxu0 }
 0x760   :  { %v4661_v39 = vadd.f32 %v4660_v35, %v4548_v60  ;;  %v4845_v36 = vmax.f32 %v4813_v54, 0.0  ;;  %v7945_v54 = vpop.f32.mrf.mxu3 }
 0x762   :  { %v4746_v43 = vadd.f32 %v4661_v39, %v7737_v3  ;;  %4707 = vmatmul.f32.gmra.mxu0 %v4322_v61  ;;  %4901 = vmatmul.f32.gmra.mxu1 %v4845_v36  ;;  %v7943_v3 = vpop.f32.mrf.mxu2 }
 0x764   :  { %v4780_v17 = vmul.f32 %v7882_v10, %v4746_v43  ;;  %v7951_v43 = vpop.f32.mrf.mxu1 }
 0x766   :  { %v4814_v58 = vadd.f32 %v7885_v24, %v4780_v17  ;;  %v4328_v17 = vld [vmem:[#allocation2 + $0x200] sm:$0xff] }
 0x767   :  { %v4663_v47 = vpop.f32.mrf.mxu0 }
 0x768   :  { %v4664_v0 = vadd.f32 %v4663_v47, %v4551_v1  ;;  %v4846_v29 = vmax.f32 %v4814_v58, 0.0  ;;  %v4073_v1 = vadd.f32 %v7753_v26, %v7647_v19  ;;  %v7961_v28 = vpop.f32.mrf.mxu3  ;;  %v4076_v26 = vadd.f32 %v7760_v38, %v7653_v15 }
 0x769   :  { %v4079_v15 = vadd.f32 %v7767_v44, %v7659_v11  ;;  %v4082_v11 = vadd.f32 %v7774_v7, %v7665_v52  ;;  %v4085_v52 = vadd.f32 %v7781_v5, %v7671_v2  ;;  %v4088_v2 = vadd.f32 %v7786_v23, %v7677_v20 }
 0x76a   :  { %v4747_v60 = vadd.f32 %v4664_v0, %v7743_v46  ;;  %4710 = vmatmul.f32.gmra.mxu0 %v4325_v53  ;;  %4904 = vmatmul.f32.gmra.mxu1 %v4846_v29  ;;  %v7957_v47 = vpop.f32.mrf.mxu2  ;;  %v4186_v53 = vadd.f32 %v7814_v48, %v4073_v1  ;;  %v4189_v48 = vadd.f32 %v7820_v32, %v4076_v26  ;;  %v4334_v1 = vld [vmem:[#allocation2 + $0xa0] sm:$0xff] }
 0x76b   :  { %v4563_v32 = vadd.f32 %v7922_v14, %v7920_v45  ;;  %v4566_v45 = vadd.f32 %v7933_v13, %v7931_v57  ;;  %v4569_v13 = vadd.f32 %v7945_v54, %v7943_v3  ;;  %v4572_v3 = vadd.f32 %v7961_v28, %v7957_v47 }
 0x76c   :  { %v4781_v35 = vmul.f32 %v7882_v10, %v4747_v60  ;;  %v7965_v19 = vpop.f32.mrf.mxu1  ;;  %v4091_v20 = vadd.f32 %v7796_v55, %v7683_v50  ;;  %v4094_v50 = vadd.f32 %v7801_v41, %v7689_v9  ;;  %v4097_v9 = vadd.f32 %v7806_v49, %v7694_v42  ;;  %v8042_v49 = vld [vmem:[#allocation8 + $0xc] ss:$0 sm:$0xff] }
 0x76e   :  { %v4815_v56 = vadd.f32 %v7885_v24, %v4781_v35  ;;  %v4331_v35 = vld [vmem:[#allocation2 + $0x188] sm:$0xff] }
 0x76f   :  { %v4666_v39 = vpop.f32.mrf.mxu0 }
 0x770   :  { %v4667_v36 = vadd.f32 %v4666_v39, %v4554_v51  ;;  %v4847_v61 = vmax.f32 %v4815_v56, 0.0 }
 0x772   :  { %v4748_v46 = vadd.f32 %v4667_v36, %v7751_v4  ;;  %4713 = vmatmul.f32.gmra.mxu0 %v4328_v17  ;;  %4907 = vmatmul.f32.gmra.mxu1 %v4847_v61  ;;  %v7974_v36 = vpop.f32.mrf.mxu2  ;;  %v7976_v61 = vpop.f32.mrf.mxu3 }
 0x773   :  { %v4575_v47 = vadd.f32 %v7976_v61, %v7974_v36 }
 0x774   :  { %v4782_v58 = vmul.f32 %v7882_v10, %v4748_v46  ;;  %v7981_v63 = vpop.f32.mrf.mxu1 }
 0x776   :  { %v4816_v0 = vadd.f32 %v7885_v24, %v4782_v58 }
 0x777   :  { %v4669_v29 = vpop.f32.mrf.mxu0 }
 0x778   :  { %v4670_v4 = vadd.f32 %v4669_v29, %v4557_v21  ;;  %v4848_v60 = vmax.f32 %v4816_v0, 0.0  ;;  %v4192_v0 = vadd.f32 %v7826_v30, %v4079_v15 }
 0x77a   :  { %v4749_v51 = vadd.f32 %v4670_v4, %v4186_v53  ;;  %4716 = vmatmul.f32.gmra.mxu0 %v4331_v35  ;;  %4910 = vmatmul.f32.gmra.mxu1 %v4848_v60  ;;  %v4337_v4 = vld [vmem:[#allocation2 + $0x1b0] sm:$0xff]  ;;  %v4464_v60 = vpop.f32.mrf.mxu2  ;;  %v4577_v35 = vpop.f32.mrf.mxu3 }
 0x77b   :  { %v4578_v36 = vadd.f32 %v4577_v35, %v4464_v60 }
 0x77c   :  { %v4783_v8 = vmul.f32 %v7882_v10, %v4749_v51  ;;  %v7993_v26 = vpop.f32.mrf.mxu1 }
 0x77e   :  { %v4817_v56 = vadd.f32 %v7885_v24, %v4783_v8  ;;  %v4195_v8 = vadd.f32 %v7832_v18, %v4082_v11  ;;  %v4198_v18 = vadd.f32 %v7840_v33, %v4085_v52 }
 0x77f   :  { %v4672_v39 = vpop.f32.mrf.mxu0 }
 0x780   :  { %v4673_v17 = vadd.f32 %v4672_v39, %v4560_v37  ;;  %v4849_v46 = vmax.f32 %v4817_v56, 0.0  ;;  %v4340_v39 = vld [vmem:[#allocation2 + $0x80] sm:$0xff] }
 0x782   :  { %v4750_v58 = vadd.f32 %v4673_v17, %v4189_v48  ;;  %4719 = vmatmul.f32.gmra.mxu0 %v4334_v1  ;;  %4913 = vmatmul.f32.gmra.mxu1 %v4849_v46  ;;  %v4467_v7 = vpop.f32.mrf.mxu2  ;;  %v4580_v17 = vpop.f32.mrf.mxu3 }
 0x784   :  { %v4784_v38 = vmul.f32 %v7882_v10, %v4750_v58 }
 0x786   :  { %v4818_v34 = vadd.f32 %v7885_v24, %v4784_v38  ;;  %v8003_v38 = vpop.f32.mrf.mxu1 }
 0x787   :  { %v4675_v21 = vpop.f32.mrf.mxu0 }
 0x788   :  { %v4676_v29 = vadd.f32 %v4675_v21, %v4563_v32  ;;  %v4850_v53 = vmax.f32 %v4818_v34, 0.0 }
 0x78a   :  { %v4751_v51 = vadd.f32 %v4676_v29, %v4192_v0  ;;  %4722 = vmatmul.f32.gmra.mxu0 %v4337_v4  ;;  %4916 = vmatmul.f32.gmra.mxu1 %v4850_v53  ;;  %v4470_v34 = vpop.f32.mrf.mxu2  ;;  %v4583_v54 = vpop.f32.mrf.mxu3  ;;  %v4201_v0 = vadd.f32 %v7846_v62, %v4088_v2  ;;  %v4204_v62 = vadd.f32 %v7853_v16, %v4091_v20 }
 0x78b   :  { %v4207_v16 = vadd.f32 %v7861_v31, %v4094_v50  ;;  %v4210_v31 = vadd.f32 %v7870_v27, %v4097_v9  ;;  %v8846_v9 = vld [vmem:[#allocation49_spill] sm:$0xff] }
 0x78c   :  { %v4785_v44 = vmul.f32 %v7882_v10, %v4751_v51 }
 0x78e   :  { %v4819_v14 = vadd.f32 %v7885_v24, %v4785_v44  ;;  %v8014_v51 = vpop.f32.mrf.mxu1 }
 0x78f   :  { %v4678_v30 = vpop.f32.mrf.mxu0 }
 0x790   :  { %v4679_v37 = vadd.f32 %v4678_v30, %v4566_v45  ;;  %v4851_v56 = vmax.f32 %v4819_v14, 0.0 }
 0x792   :  { %v4752_v48 = vadd.f32 %v4679_v37, %v4195_v8  ;;  %4725 = vmatmul.f32.gmra.mxu0 %v4340_v39  ;;  %4919 = vmatmul.f32.gmra.mxu1 %v4851_v56  ;;  %v4473_v44 = vpop.f32.mrf.mxu2  ;;  %v4586_v45 = vpop.f32.mrf.mxu3 }
 0x794   :  { %v4786_v57 = vmul.f32 %v7882_v10, %v4752_v48 }
 0x796   :  { %v4820_v46 = vadd.f32 %v7885_v24, %v4786_v57  ;;  %v8027_v37 = vpop.f32.mrf.mxu1 }
 0x797   :  { %v4681_v1 = vpop.f32.mrf.mxu0 }
 0x798   :  { %v4682_v58 = vadd.f32 %v4681_v1, %v4569_v13  ;;  %v4852_v15 = vmax.f32 %v4820_v46, 0.0  ;;  %v4581_v46 = vadd.f32 %v4580_v17, %v4467_v7  ;;  %v4584_v7 = vadd.f32 %v4583_v54, %v4470_v34  ;;  %v8044_v17 = vld [vmem:[#allocation8 + $0xd] ss:$0 sm:$0xff] }
 0x79a   :  { %v4753_v32 = vadd.f32 %v4682_v58, %v4198_v18  ;;  %4728 = vmatmul.f32.gmra.mxu0 %v7793_v22  ;;  %4922 = vmatmul.f32.gmra.mxu1 %v4852_v15  ;;  %v4476_v52 = vpop.f32.mrf.mxu2  ;;  %v4589_v57 = vpop.f32.mrf.mxu3 }
 0x79c   :  { %v4787_v5 = vmul.f32 %v7882_v10, %v4753_v32  ;;  %v8840_v32 = vld [vmem:[#allocation46_spill] sm:$0xff] }
 0x79e   :  { %v4821_v33 = vadd.f32 %v7885_v24, %v4787_v5  ;;  %v8036_v35 = vpop.f32.mrf.mxu1 }
 0x79f   :  { %v4684_v21 = vpop.f32.mrf.mxu0 }
 0x7a0   :  { %v4685_v29 = vadd.f32 %v4684_v21, %v4572_v3  ;;  %v4853_v53 = vmax.f32 %v4821_v33, 0.0 }
 0x7a2   :  { %v4754_v4 = vadd.f32 %v4685_v29, %v4201_v0  ;;  %4731 = vmatmul.f32.gmra.mxu0 %v7793_v22  ;;  %4925 = vmatmul.f32.gmra.mxu1 %v4853_v53  ;;  %v4479_v5 = vpop.f32.mrf.mxu2  ;;  %v4592_v3 = vpop.f32.mrf.mxu3  ;;  %v8842_v0 = vld [vmem:[#allocation141_spill] sm:$0xff] }
 0x7a4   :  { %v4788_v23 = vmul.f32 %v7882_v10, %v4754_v4 }
 0x7a6   :  { %v4822_v28 = vadd.f32 %v7885_v24, %v4788_v23 }
 0x7a7   :  { %v4687_v11 = vpop.f32.mrf.mxu0 }
 0x7a8   :  { %v4688_v14 = vadd.f32 %v4687_v11, %v4575_v47  ;;  %v4854_v30 = vmax.f32 %v4822_v28, 0.0  ;;  %v8843_v28 = vld [vmem:[#allocation45_spill] sm:$0xff]  ;;  %v8844_v11 = vld [vmem:[#allocation55_spill] sm:$0xff] }
 0x7aa   :  { %v4755_v8 = vadd.f32 %v4688_v14, %v4204_v62  ;;  %4734 = vmatmul.f32.gmra.mxu0 %v7793_v22  ;;  %4928 = vmatmul.f32.gmra.mxu1 %v4854_v30  ;;  %v4103_v62 = vadd.f32 %v8844_v11, %v8843_v28  ;;  %v4482_v54 = vpop.f32.mrf.mxu2  ;;  %v4587_v14 = vadd.f32 %v4586_v45, %v4473_v44  ;;  %v4595_v30 = vpop.f32.mrf.mxu3 }
 0x7ab   :  { %v4590_v45 = vadd.f32 %v4589_v57, %v4476_v52 }
 0x7ac   :  { %v4789_v55 = vmul.f32 %v7882_v10, %v4755_v8 }
 0x7ae   :  { %v4823_v61 = vadd.f32 %v7885_v24, %v4789_v55 }
 0x7af   :  { %v4690_v56 = vpop.f32.mrf.mxu0 }
 0x7b0   :  { %v4691_v39 = vadd.f32 %v4690_v56, %v4578_v36  ;;  %v4855_v48 = vmax.f32 %v4823_v61, 0.0  ;;  %v8845_v36 = vld [vmem:[#allocation69_spill] sm:$0xff] }
 0x7b1   :  { %v4216_v61 = vadd.f32 %v8845_v36, %v4103_v62 }
 0x7b2   :  { %v4756_v13 = vadd.f32 %v4691_v39, %v4207_v16  ;;  %4737 = vmatmul.f32.gmra.mxu0 %v7793_v22  ;;  %4931 = vmatmul.f32.gmra.mxu1 %v4855_v48  ;;  %v8841_v22 = vld [vmem:[#allocation136_spill] sm:$0xff] }
 0x7b3   :  { %v4100_v2 = vadd.f32 %v8841_v22, %v8840_v32 }
 0x7b4   :  { %v4790_v41 = vmul.f32 %v7882_v10, %v4756_v13 }
 0x7b5   :  { %v4213_v29 = vadd.f32 %v8842_v0, %v4100_v2 }
 0x7b6   :  { %v4824_v60 = vadd.f32 %v7885_v24, %v4790_v41  ;;  %v8847_v41 = vld [vmem:[#allocation60_spill] sm:$0xff] }
 0x7b7   :  { %v4693_v1 = vpop.f32.mrf.mxu0 }
 0x7b8   :  { %v4694_v18 = vadd.f32 %v4693_v1, %v4581_v46  ;;  %v4856_v58 = vmax.f32 %v4824_v60, 0.0  ;;  %v4106_v46 = vadd.f32 %v8847_v41, %v8846_v9  ;;  %v8853_v9 = vld [vmem:[#allocation58_spill] sm:$0xff] }
 0x7ba   :  { %v4757_v15 = vadd.f32 %v4694_v18, %v4210_v31  ;;  %4934 = vmatmul.f32.gmra.mxu1 %v4856_v58  ;;  %v4219_v18 = vadd.f32 %v7891_v59, %v4106_v46  ;;  %v4485_v58 = vpop.f32.mrf.mxu2  ;;  %v4593_v59 = vadd.f32 %v4592_v3, %v4479_v5 }
 0x7bc   :  { %v4791_v42 = vmul.f32 %v7882_v10, %v4757_v15  ;;  %v4598_v15 = vpop.f32.mrf.mxu3 }
 0x7be   :  { %v4825_v33 = vadd.f32 %v7885_v24, %v4791_v42 }
 0x7bf   :  { %v4696_v21 = vpop.f32.mrf.mxu0  ;;  %v4890_v27 = vpop.f32.mrf.mxu1 }
 0x7c0   :  { %v4697_v53 = vadd.f32 %v4696_v21, %v4584_v7  ;;  %v4988_v4 = vmul.f32 %v8042_v49, %v4890_v27  ;;  %v4857_v20 = vmax.f32 %v4825_v33, 0.0  ;;  %v8848_v33 = vld [vmem:[#allocation48_spill] sm:$0xff]  ;;  %v8849_v21 = vld [vmem:[#allocation107_spill] sm:$0xff] }
 0x7c1   :  { %v4109_v27 = vadd.f32 %v8849_v21, %v8848_v33 }
 0x7c2   :  { %v4758_v23 = vadd.f32 %v4697_v53, %v4213_v29  ;;  %v5022_v47 = vadd.f32 %v8044_v17, %v4988_v4  ;;  %4937 = vmatmul.f32.gmra.mxu1 %v4857_v20 }
 0x7c3   :  { %v4222_v53 = vadd.f32 %v7902_v40, %v4109_v27  ;;  %v4596_v40 = vadd.f32 %v4595_v30, %v4482_v54 }
 0x7c4   :  { %v4792_v34 = vmul.f32 %v7882_v10, %v4758_v23  ;;  %5054 = vst [vmem:[%s8285_s5] sm:$0xff] %v5022_v47  ;;  %v4488_v47 = vpop.f32.mrf.mxu2  ;;  %v4601_v28 = vpop.f32.mrf.mxu3 }
 0x7c6   :  { %v4826_v8 = vadd.f32 %v7885_v24, %v4792_v34  ;;  %v8850_v34 = vld [vmem:[#allocation47_spill] sm:$0xff] }
 0x7c7   :  { %v4699_v50 = vpop.f32.mrf.mxu0  ;;  %v4893_v55 = vpop.f32.mrf.mxu1 }
 0x7c8   :  { %v4700_v56 = vadd.f32 %v4699_v50, %v4587_v14  ;;  %v4989_v16 = vmul.f32 %v8042_v49, %v4893_v55  ;;  %v4858_v39 = vmax.f32 %v4826_v8, 0.0  ;;  %v8851_v14 = vld [vmem:[#allocation59_spill] sm:$0xff] }
 0x7c9   :  { %v4112_v8 = vadd.f32 %v8851_v14, %v8850_v34 }
 0x7ca   :  { %v4759_v48 = vadd.f32 %v4700_v56, %v4216_v61  ;;  %v5023_v13 = vadd.f32 %v8044_v17, %v4989_v16  ;;  %4940 = vmatmul.f32.gmra.mxu1 %v4858_v39 }
 0x7cb   :  { %v4225_v36 = vadd.f32 %v7914_v12, %v4112_v8  ;;  %v4599_v12 = vadd.f32 %v4598_v15, %v4485_v58  ;;  %v4602_v15 = vadd.f32 %v4601_v28, %v4488_v47 }
 0x7cc   :  { %v4793_v44 = vmul.f32 %v7882_v10, %v4759_v48  ;;  %5055 = vst [vmem:[%s8285_s5 + $0x8] sm:$0xff] %v5023_v13  ;;  %v8852_v13 = vld [vmem:[#allocation52_spill] sm:$0xff]  ;;  %v4491_v46 = vpop.f32.mrf.mxu2 }
 0x7cd   :  { %v4115_v41 = vadd.f32 %v8853_v9, %v8852_v13 }
 0x7ce   :  { %v4827_v60 = vadd.f32 %v7885_v24, %v4793_v44  ;;  %v4604_v44 = vpop.f32.mrf.mxu3 }
 0x7cf   :  { %v4702_v1 = vpop.f32.mrf.mxu0  ;;  %v4896_v31 = vpop.f32.mrf.mxu1  ;;  %v4605_v28 = vadd.f32 %v4604_v44, %v4491_v46 }
 0x7d0   :  { %v4703_v32 = vadd.f32 %v4702_v1, %v4590_v45  ;;  %v4990_v22 = vmul.f32 %v8042_v49, %v4896_v31  ;;  %v4859_v2 = vmax.f32 %v4827_v60, 0.0  ;;  %v4228_v1 = vadd.f32 %v7926_v25, %v4115_v41 }
 0x7d2   :  { %v4760_v42 = vadd.f32 %v4703_v32, %v4219_v18  ;;  %v5024_v7 = vadd.f32 %v8044_v17, %v4990_v22  ;;  %4943 = vmatmul.f32.gmra.mxu1 %v4859_v2 }
 0x7d4   :  { %v4794_v52 = vmul.f32 %v7882_v10, %v4760_v42  ;;  %5056 = vst [vmem:[%s8285_s5 + $0x10] sm:$0xff] %v5024_v7  ;;  %v8854_v42 = vld [vmem:[#allocation51_spill] sm:$0xff]  ;;  %v4494_v58 = vpop.f32.mrf.mxu2 }
 0x7d5   :  { %v8855_v7 = vld [vmem:[#allocation63_spill] sm:$0xff] }
 0x7d6   :  { %v4828_v57 = vadd.f32 %v7885_v24, %v4794_v52  ;;  %v4118_v33 = vadd.f32 %v8855_v7, %v8854_v42  ;;  %v4607_v25 = vpop.f32.mrf.mxu3 }
 0x7d7   :  { %v4705_v0 = vpop.f32.mrf.mxu0  ;;  %v4899_v29 = vpop.f32.mrf.mxu1 }
 0x7d8   :  { %v4706_v4 = vadd.f32 %v4705_v0, %v4593_v59  ;;  %v4991_v20 = vmul.f32 %v8042_v49, %v4899_v29  ;;  %v4860_v23 = vmax.f32 %v4828_v57, 0.0  ;;  %v4231_v57 = vadd.f32 %v7940_v6, %v4118_v33 }
 0x7da   :  { %v4761_v11 = vadd.f32 %v4706_v4, %v4222_v53  ;;  %v5025_v62 = vadd.f32 %v8044_v17, %v4991_v20  ;;  %4946 = vmatmul.f32.gmra.mxu1 %v4860_v23  ;;  %v8856_v23 = vld [vmem:[#allocation50_spill] sm:$0xff] }
 0x7dc   :  { %v4795_v5 = vmul.f32 %v7882_v10, %v4761_v11  ;;  %5057 = vst [vmem:[%s8285_s5 + $0x18] sm:$0xff] %v5025_v62  ;;  %v8857_v11 = vld [vmem:[#allocation113_spill] sm:$0xff] }
 0x7dd   :  { %v4121_v62 = vadd.f32 %v8857_v11, %v8856_v23 }
 0x7de   :  { %v4829_v3 = vadd.f32 %v7885_v24, %v4795_v5  ;;  %v4497_v5 = vpop.f32.mrf.mxu2 }
 0x7df   :  { %v4708_v50 = vpop.f32.mrf.mxu0  ;;  %v4902_v55 = vpop.f32.mrf.mxu1  ;;  %v4234_v8 = vadd.f32 %v7951_v43, %v4121_v62  ;;  %v4608_v43 = vadd.f32 %v4607_v25, %v4494_v58 }
 0x7e0   :  { %v4709_v61 = vadd.f32 %v4708_v50, %v4596_v40  ;;  %v4992_v56 = vmul.f32 %v8042_v49, %v4902_v55  ;;  %v4861_v16 = vmax.f32 %v4829_v3, 0.0  ;;  %v4610_v40 = vpop.f32.mrf.mxu3 }
 0x7e2   :  { %v4762_v39 = vadd.f32 %v4709_v61, %v4225_v36  ;;  %v5026_v48 = vadd.f32 %v8044_v17, %v4992_v56  ;;  %4949 = vmatmul.f32.gmra.mxu1 %v4861_v16  ;;  %v8858_v56 = vld [vmem:[#allocation98_spill] sm:$0xff] }
 0x7e3   :  { %v8859_v16 = vld [vmem:[#allocation62_spill] sm:$0xff] }
 0x7e4   :  { %v4796_v54 = vmul.f32 %v7882_v10, %v4762_v39  ;;  %5058 = vst [vmem:[%s8285_s5 + $0x20] sm:$0xff] %v5026_v48  ;;  %v4124_v39 = vadd.f32 %v8859_v16, %v8858_v56 }
 0x7e6   :  { %v4830_v30 = vadd.f32 %v7885_v24, %v4796_v54  ;;  %v4237_v46 = vadd.f32 %v7965_v19, %v4124_v39  ;;  %v4611_v19 = vadd.f32 %v4610_v40, %v4497_v5 }
 0x7e7   :  { %v4711_v45 = vpop.f32.mrf.mxu0  ;;  %v4905_v60 = vpop.f32.mrf.mxu1 }
 0x7e8   :  { %v4712_v31 = vadd.f32 %v4711_v45, %v4599_v12  ;;  %v4993_v18 = vmul.f32 %v8042_v49, %v4905_v60  ;;  %v4862_v32 = vmax.f32 %v4830_v30, 0.0  ;;  %v4500_v30 = vpop.f32.mrf.mxu2  ;;  %v4613_v45 = vpop.f32.mrf.mxu3 }
 0x7ea   :  { %v4763_v22 = vadd.f32 %v4712_v31, %v4228_v1  ;;  %v5027_v2 = vadd.f32 %v8044_v17, %v4993_v18  ;;  %4952 = vmatmul.f32.gmra.mxu1 %v4862_v32  ;;  %v8860_v31 = vld [vmem:[#allocation54_spill] sm:$0xff]  ;;  %v8861_v18 = vld [vmem:[#allocation139_spill] sm:$0xff] }
 0x7eb   :  { %v4127_v32 = vadd.f32 %v8861_v18, %v8860_v31 }
 0x7ec   :  { %v4797_v21 = vmul.f32 %v7882_v10, %v4763_v22  ;;  %5059 = vst [vmem:[%s8285_s5 + $0x28] sm:$0xff] %v5027_v2 }
 0x7ed   :  { %v4240_v33 = vadd.f32 %v7981_v63, %v4127_v32  ;;  %v4614_v63 = vadd.f32 %v4613_v45, %v4500_v30 }
 0x7ee   :  { %v4831_v27 = vadd.f32 %v7885_v24, %v4797_v21 }
 0x7ef   :  { %v4714_v52 = vpop.f32.mrf.mxu0  ;;  %v4908_v59 = vpop.f32.mrf.mxu1 }
 0x7f0   :  { %v4715_v0 = vadd.f32 %v4714_v52, %v4602_v15  ;;  %v4994_v29 = vmul.f32 %v8042_v49, %v4908_v59  ;;  %v4863_v53 = vmax.f32 %v4831_v27, 0.0  ;;  %v8862_v52 = vld [vmem:[#allocation134_spill] sm:$0xff]  ;;  %v8863_v59 = vld [vmem:[#allocation61_spill] sm:$0xff] }
 0x7f2   :  { %v4764_v4 = vadd.f32 %v4715_v0, %v4231_v57  ;;  %v5028_v20 = vadd.f32 %v8044_v17, %v4994_v29  ;;  %4955 = vmatmul.f32.gmra.mxu1 %v4863_v53  ;;  %v4130_v57 = vadd.f32 %v8863_v59, %v8862_v52  ;;  %v4503_v0 = vpop.f32.mrf.mxu2  ;;  %v4616_v29 = vpop.f32.mrf.mxu3 }
 0x7f4   :  { %v4798_v47 = vmul.f32 %v7882_v10, %v4764_v4  ;;  %5060 = vst [vmem:[%s8285_s5 + $0x30] sm:$0xff] %v5028_v20  ;;  %v4243_v11 = vadd.f32 %v7993_v26, %v4130_v57  ;;  %v4617_v26 = vadd.f32 %v4616_v29, %v4503_v0 }
 0x7f6   :  { %v4832_v6 = vadd.f32 %v7885_v24, %v4798_v47 }
 0x7f7   :  { %v4717_v34 = vpop.f32.mrf.mxu0  ;;  %v4911_v14 = vpop.f32.mrf.mxu1 }
 0x7f8   :  { %v4718_v3 = vadd.f32 %v4717_v34, %v4605_v28  ;;  %v4995_v50 = vmul.f32 %v8042_v49, %v4911_v14  ;;  %v4864_v55 = vmax.f32 %v4832_v6, 0.0  ;;  %v8864_v14 = vld [vmem:[#allocation53_spill] sm:$0xff] }
 0x7fa   :  { %v4765_v36 = vadd.f32 %v4718_v3, %v4234_v8  ;;  %v5029_v61 = vadd.f32 %v8044_v17, %v4995_v50  ;;  %4958 = vmatmul.f32.gmra.mxu1 %v4864_v55  ;;  %v8865_v8 = vld [vmem:[#allocation66_spill] sm:$0xff]  ;;  %v4506_v3 = vpop.f32.mrf.mxu2  ;;  %v4619_v50 = vpop.f32.mrf.mxu3 }
 0x7fb   :  { %v4133_v5 = vadd.f32 %v8865_v8, %v8864_v14 }
 0x7fc   :  { %v4799_v48 = vmul.f32 %v7882_v10, %v4765_v36  ;;  %5061 = vst [vmem:[%s8285_s5 + $0x38] sm:$0xff] %v5029_v61 }
 0x7fd   :  { %v4246_v56 = vadd.f32 %v8003_v38, %v4133_v5 }
 0x7fe   :  { %v4833_v13 = vadd.f32 %v7885_v24, %v4799_v48 }
 0x7ff   :  { %v4720_v9 = vpop.f32.mrf.mxu0  ;;  %v4914_v41 = vpop.f32.mrf.mxu1 }
 0x800   :  { %v4721_v44 = vadd.f32 %v4720_v9, %v4608_v43  ;;  %v4996_v54 = vmul.f32 %v8042_v49, %v4914_v41  ;;  %v4865_v12 = vmax.f32 %v4833_v13, 0.0  ;;  %v8866_v9 = vld [vmem:[#allocation57_spill] sm:$0xff] }
 0x801   :  { %v8867_v41 = vld [vmem:[#allocation117_spill] sm:$0xff] }
 0x802   :  { %v4766_v60 = vadd.f32 %v4721_v44, %v4237_v46  ;;  %v5030_v1 = vadd.f32 %v8044_v17, %v4996_v54  ;;  %4961 = vmatmul.f32.gmra.mxu1 %v4865_v12  ;;  %v4136_v46 = vadd.f32 %v8867_v41, %v8866_v9  ;;  %v4620_v54 = vadd.f32 %v4619_v50, %v4506_v3  ;;  %v4509_v12 = vpop.f32.mrf.mxu2  ;;  %v4622_v30 = vpop.f32.mrf.mxu3 }
 0x804   :  { %v4800_v22 = vmul.f32 %v7882_v10, %v4766_v60  ;;  %5062 = vst [vmem:[%s8285_s5 + $0x40] sm:$0xff] %v5030_v1  ;;  %v4249_v1 = vadd.f32 %v8014_v51, %v4136_v46 }
 0x806   :  { %v4834_v2 = vadd.f32 %v7885_v24, %v4800_v22 }
 0x807   :  { %v4723_v42 = vpop.f32.mrf.mxu0  ;;  %v4917_v7 = vpop.f32.mrf.mxu1 }
 0x808   :  { %v4724_v21 = vadd.f32 %v4723_v42, %v4611_v19  ;;  %v4997_v58 = vmul.f32 %v8042_v49, %v4917_v7  ;;  %v4866_v15 = vmax.f32 %v4834_v2, 0.0  ;;  %v8868_v2 = vld [vmem:[#allocation102_spill] sm:$0xff]  ;;  %v8869_v42 = vld [vmem:[#allocation65_spill] sm:$0xff] }
 0x809   :  { %v4139_v7 = vadd.f32 %v8869_v42, %v8868_v2 }
 0x80a   :  { %v4767_v25 = vadd.f32 %v4724_v21, %v4240_v33  ;;  %v5031_v27 = vadd.f32 %v8044_v17, %v4997_v58  ;;  %4964 = vmatmul.f32.gmra.mxu1 %v4866_v15  ;;  %v4623_v21 = vadd.f32 %v4622_v30, %v4509_v12  ;;  %v4512_v57 = vpop.f32.mrf.mxu2  ;;  %v4625_v0 = vpop.f32.mrf.mxu3 }
 0x80c   :  { %v4801_v53 = vmul.f32 %v7882_v10, %v4767_v25  ;;  %5063 = vst [vmem:[%s8285_s5 + $0x48] sm:$0xff] %v5031_v27  ;;  %v4252_v25 = vadd.f32 %v8027_v37, %v4139_v7  ;;  %v4626_v37 = vadd.f32 %v4625_v0, %v4512_v57 }
 0x80e   :  { %v4835_v4 = vadd.f32 %v7885_v24, %v4801_v53 }
 0x80f   :  { %v4726_v20 = vpop.f32.mrf.mxu0  ;;  %v4920_v23 = vpop.f32.mrf.mxu1 }
 0x810   :  { %v4727_v62 = vadd.f32 %v4726_v20, %v4614_v63  ;;  %v4998_v47 = vmul.f32 %v8042_v49, %v4920_v23  ;;  %v4867_v28 = vmax.f32 %v4835_v4, 0.0  ;;  %v8870_v63 = vld [vmem:[#allocation56_spill] sm:$0xff] }
 0x811   :  { %v8871_v4 = vld [vmem:[#allocation64_spill] sm:$0xff] }
 0x812   :  { %v4768_v6 = vadd.f32 %v4727_v62, %v4243_v11  ;;  %v5032_v34 = vadd.f32 %v8044_v17, %v4998_v47  ;;  %4967 = vmatmul.f32.gmra.mxu1 %v4867_v28  ;;  %v4142_v20 = vadd.f32 %v8871_v4, %v8870_v63 }
 0x814   :  { %v4802_v40 = vmul.f32 %v7882_v10, %v4768_v6  ;;  %5064 = vst [vmem:[%s8285_s5 + $0x50] sm:$0xff] %v5032_v34  ;;  %v4255_v28 = vadd.f32 %v8036_v35, %v4142_v20 }
 0x816   :  { %v4836_v55 = vadd.f32 %v7885_v24, %v4802_v40 }
 0x817   :  { %v4729_v36 = vpop.f32.mrf.mxu0  ;;  %v4923_v61 = vpop.f32.mrf.mxu1 }
 0x818   :  { %v4730_v16 = vadd.f32 %v4729_v36, %v4617_v26  ;;  %v4999_v39 = vmul.f32 %v8042_v49, %v4923_v61  ;;  %v4868_v48 = vmax.f32 %v4836_v55, 0.0 }
 0x81a   :  { %v4769_v43 = vadd.f32 %v4730_v16, %v4246_v56  ;;  %v5033_v13 = vadd.f32 %v8044_v17, %v4999_v39  ;;  %4970 = vmatmul.f32.gmra.mxu1 %v4868_v48 }
 0x81c   :  { %v4803_v44 = vmul.f32 %v7882_v10, %v4769_v43  ;;  %5065 = vst [vmem:[%s8285_s5 + $0x58] sm:$0xff] %v5033_v13 }
 0x81e   :  { %v4837_v38 = vadd.f32 %v7885_v24, %v4803_v44 }
 0x81f   :  { %v4732_v45 = vpop.f32.mrf.mxu0  ;;  %v4926_v60 = vpop.f32.mrf.mxu1 }
 0x820   :  { %v4733_v31 = vadd.f32 %v4732_v45, %v4620_v54  ;;  %v5000_v18 = vmul.f32 %v8042_v49, %v4926_v60  ;;  %v4869_v32 = vmax.f32 %v4837_v38, 0.0 }
 0x822   :  { %v4770_v22 = vadd.f32 %v4733_v31, %v4249_v1  ;;  %v5034_v19 = vadd.f32 %v8044_v17, %v5000_v18  ;;  %4973 = vmatmul.f32.gmra.mxu1 %v4869_v32 }
 0x824   :  { %v4804_v33 = vmul.f32 %v7882_v10, %v4770_v22  ;;  %5066 = vst [vmem:[%s8285_s5 + $0x60] sm:$0xff] %v5034_v19 }
 0x826   :  { %v4838_v51 = vadd.f32 %v7885_v24, %v4804_v33 }
 0x827   :  { %v4735_v58 = vpop.f32.mrf.mxu0  ;;  %v4929_v15 = vpop.f32.mrf.mxu1 }
 0x828   :  { %v4736_v27 = vadd.f32 %v4735_v58, %v4623_v21  ;;  %v5001_v52 = vmul.f32 %v8042_v49, %v4929_v15  ;;  %v4870_v59 = vmax.f32 %v4838_v51, 0.0 }
 0x82a   :  { %v4771_v29 = vadd.f32 %v4736_v27, %v4252_v25  ;;  %v5035_v53 = vadd.f32 %v8044_v17, %v5001_v52  ;;  %4976 = vmatmul.f32.gmra.mxu1 %v4870_v59 }
 0x82c   :  { %v4805_v23 = vmul.f32 %v7882_v10, %v4771_v29  ;;  %5067 = vst [vmem:[%s8285_s5 + $0x68] sm:$0xff] %v5035_v53 }
 0x82e   :  { %v4839_v11 = vadd.f32 %v7885_v24, %v4805_v23 }
 0x82f   :  { %v4738_v62 = vpop.f32.mrf.mxu0  ;;  %v4932_v47 = vpop.f32.mrf.mxu1 }
 0x830   :  { %v4739_v6 = vadd.f32 %v4738_v62, %v4626_v37  ;;  %v5002_v34 = vmul.f32 %v8042_v49, %v4932_v47  ;;  %v4871_v14 = vmax.f32 %v4839_v11, 0.0 }
 0x832   :  { %v4772_v8 = vadd.f32 %v4739_v6, %v4255_v28  ;;  %v5036_v5 = vadd.f32 %v8044_v17, %v5002_v34  ;;  %4979 = vmatmul.f32.gmra.mxu1 %v4871_v14 }
 0x834   :  { %v4806_v40 = vmul.f32 %v7882_v10, %v4772_v8  ;;  %5068 = vst [vmem:[%s8285_s5 + $0x70] sm:$0xff] %v5036_v5 }
 0x836   :  { %v4840_v3 = vadd.f32 %v7885_v24, %v4806_v40 }
 0x837   :  { %v4935_v50 = vpop.f32.mrf.mxu1 }
 0x838   :  { %v4872_v26 = vmax.f32 %v4840_v3, 0.0  ;;  %v5003_v35 = vmul.f32 %v8042_v49, %v4935_v50 }
 0x83a   :  { %v5037_v55 = vadd.f32 %v8044_v17, %v5003_v35  ;;  %4982 = vmatmul.f32.vlgmr.msra.gmra.mxu3 %v4872_v26 }
 0x83c   :  { %5069 = vst [vmem:[%s8285_s5 + $0x78] sm:$0xff] %v5037_v55 }
 0x83f   :  { %v4938_v36 = vpop.f32.mrf.mxu1 }
 0x840   :  { %v5004_v10 = vmul.f32 %v8042_v49, %v4938_v36 }
 0x842   :  { %v5038_v61 = vadd.f32 %v8044_v17, %v5004_v10 }
 0x844   :  { %5070 = vst [vmem:[%s8285_s5 + $0x80] sm:$0xff] %v5038_v61 }
 0x847   :  { %v4941_v24 = vpop.f32.mrf.mxu1 }
 0x848   :  { %v5005_v56 = vmul.f32 %v8042_v49, %v4941_v24 }
 0x84a   :  { %v5039_v16 = vadd.f32 %v8044_v17, %v5005_v56 }
 0x84c   :  { %5071 = vst [vmem:[%s8285_s5 + $0x88] sm:$0xff] %v5039_v16 }
 0x84f   :  { %v4944_v39 = vpop.f32.mrf.mxu1 }
 0x850   :  { %v5006_v48 = vmul.f32 %v8042_v49, %v4944_v39 }
 0x852   :  { %v5040_v43 = vadd.f32 %v8044_v17, %v5006_v48 }
 0x854   :  { %5072 = vst [vmem:[%s8285_s5 + $0x90] sm:$0xff] %v5040_v43 }
 0x857   :  { %v4947_v13 = vpop.f32.mrf.mxu1 }
 0x858   :  { %v5007_v9 = vmul.f32 %v8042_v49, %v4947_v13 }
 0x85a   :  { %v5041_v41 = vadd.f32 %v8044_v17, %v5007_v9 }
 0x85c   :  { %5073 = vst [vmem:[%s8285_s5 + $0x98] sm:$0xff] %v5041_v41 }
 0x85f   :  { %v4950_v46 = vpop.f32.mrf.mxu1 }
 0x860   :  { %v5008_v44 = vmul.f32 %v8042_v49, %v4950_v46 }
 0x862   :  { %v5042_v54 = vadd.f32 %v8044_v17, %v5008_v44 }
 0x864   :  { %5074 = vst [vmem:[%s8285_s5 + $0xa0] sm:$0xff] %v5042_v54 }
 0x867   :  { %v4953_v38 = vpop.f32.mrf.mxu1 }
 0x868   :  { %v5009_v12 = vmul.f32 %v8042_v49, %v4953_v38 }
 0x86a   :  { %v5043_v30 = vadd.f32 %v8044_v17, %v5009_v12 }
 0x86c   :  { %5075 = vst [vmem:[%s8285_s5 + $0xa8] sm:$0xff] %v5043_v30 }
 0x86f   :  { %v4956_v45 = vpop.f32.mrf.mxu1 }
 0x870   :  { %v5010_v60 = vmul.f32 %v8042_v49, %v4956_v45 }
 0x872   :  { %v5044_v1 = vadd.f32 %v8044_v17, %v5010_v60 }
 0x874   :  { %5076 = vst [vmem:[%s8285_s5 + $0xb0] sm:$0xff] %v5044_v1 }
 0x877   :  { %v4959_v31 = vpop.f32.mrf.mxu1 }
 0x878   :  { %v5011_v18 = vmul.f32 %v8042_v49, %v4959_v31 }
 0x87a   :  { %v5045_v32 = vadd.f32 %v8044_v17, %v5011_v18 }
 0x87c   :  { %5077 = vst [vmem:[%s8285_s5 + $0xb8] sm:$0xff] %v5045_v32 }
 0x87f   :  { %v4962_v22 = vpop.f32.mrf.mxu1 }
 0x880   :  { %v5012_v19 = vmul.f32 %v8042_v49, %v4962_v22 }
 0x882   :  { %v5046_v2 = vadd.f32 %v8044_v17, %v5012_v19 }
 0x884   :  { %5078 = vst [vmem:[%s8285_s5 + $0xc0] sm:$0xff] %v5046_v2 }
 0x887   :  { %v4965_v42 = vpop.f32.mrf.mxu1 }
 0x888   :  { %v5013_v7 = vmul.f32 %v8042_v49, %v4965_v42 }
 0x88a   :  { %v5047_v33 = vadd.f32 %v8044_v17, %v5013_v7 }
 0x88c   :  { %5079 = vst [vmem:[%s8285_s5 + $0xc8] sm:$0xff] %v5047_v33 }
 0x88f   :  { %v4968_v21 = vpop.f32.mrf.mxu1 }
 0x890   :  { %v5014_v51 = vmul.f32 %v8042_v49, %v4968_v21 }
 0x892   :  { %v5048_v58 = vadd.f32 %v8044_v17, %v5014_v51 }
 0x894   :  { %5080 = vst [vmem:[%s8285_s5 + $0xd0] sm:$0xff] %v5048_v58 }
 0x897   :  { %v4971_v15 = vpop.f32.mrf.mxu1 }
 0x898   :  { %v5015_v25 = vmul.f32 %v8042_v49, %v4971_v15 }
 0x89a   :  { %v5049_v27 = vadd.f32 %v8044_v17, %v5015_v25 }
 0x89c   :  { %5081 = vst [vmem:[%s8285_s5 + $0xd8] sm:$0xff] %v5049_v27 }
 0x89f   :  { %v4974_v52 = vpop.f32.mrf.mxu1 }
 0x8a0   :  { %v5016_v59 = vmul.f32 %v8042_v49, %v4974_v52 }
 0x8a2   :  { %v5050_v57 = vadd.f32 %v8044_v17, %v5016_v59 }
 0x8a4   :  { %5082 = vst [vmem:[%s8285_s5 + $0xe0] sm:$0xff] %v5050_v57 }
 0x8a7   :  { %v4977_v0 = vpop.f32.mrf.mxu1 }
 0x8a8   :  { %v5017_v29 = vmul.f32 %v8042_v49, %v4977_v0 }
 0x8aa   :  { %v5051_v53 = vadd.f32 %v8044_v17, %v5017_v29 }
 0x8ac   :  { %5083 = vst [vmem:[%s8285_s5 + $0xe8] sm:$0xff] %v5051_v53 }
 0x8af   :  { %v4980_v63 = vpop.f32.mrf.mxu1 }
 0x8b0   :  { %v5018_v4 = vmul.f32 %v8042_v49, %v4980_v63 }
 0x8b2   :  { %v5052_v20 = vadd.f32 %v8044_v17, %v5018_v4 }
 0x8b4   :  { %5084 = vst [vmem:[%s8285_s5 + $0xf0] sm:$0xff] %v5052_v20 }
 0x8bd   :  { %v4983_v23 = vpop.f32.mrf.mxu3 }
 0x8be   :  { %v5019_v37 = vmul.f32 %v8042_v49, %v4983_v23 }
 0x8c0   :  { %v5053_v11 = vadd.f32 %v8044_v17, %v5019_v37 }
 0x8c2   :  { %5085 = vst [vmem:[%s8285_s5 + $0xf8] sm:$0xff] %v5053_v11 }
 0x8c3   :  { %5090 = vsyncpa [#allocation4], 1 }
 0x8c4   :  { %5091 = vsyncpa [#allocation6], 1 }
 0x8c5   :  { %5092 = vsyncpa [#allocation9], 1 }

</bundles_post_ra>
